<compile_context>
chip_gen: v7x
topology: tpu7x:2x2x1
jax: 0.10.0
libtpu: 0.0.40
codegen_flags: <defaults>
</compile_context>

<pallas_src>
import numpy as np
import jax
import jax.numpy as jnp
from jax.experimental import pallas as pl
from jax.experimental.pallas import tpu as pltpu

_EPS = 1e-5
_LANE = 128                       # pad Cout up to lane width for unmasked stores
_TM_MAX = 512                     # max rows (N*Ho*Wo) per grid step
_VMEM_WORKSET = 24 * 1024 * 1024  # budget for the double-buffered working set (v7x-safe)
_VMEM_LIMIT = 48 * 1024 * 1024


def _round_up(x, m):
    return (x + m - 1) // m * m


# ---------------------------------------------------------------------------
# Pallas kernel: sum_i (TM, K_i) @ (K_i, Cout_p) on the MXU
#                + BN affine (+ residual) + PReLU/LeakyReLU
#                [+ optional fused 1x1 "head" matmul + bias]
# ---------------------------------------------------------------------------
def _make_kernel(n_src: int, has_res: bool, apply_act: bool, has_head: bool):
    def kernel(*refs):
        it = iter(refs)
        p_refs = [next(it) for _ in range(n_src)]
        w_refs = [next(it) for _ in range(n_src)]
        scale_ref = next(it)
        shift_ref = next(it)
        alpha_ref = next(it)
        res_ref = next(it) if has_res else None
        hw_ref = next(it) if has_head else None
        hb_ref = next(it) if has_head else None
        o_ref = next(it)

        # bf16 x bf16 -> f32 accumulation on the MXU; split-Cin sources accumulate in-register.
        acc = jnp.dot(p_refs[0][...], w_refs[0][...], preferred_element_type=jnp.float32)
        for i in range(1, n_src):
            acc = acc + jnp.dot(p_refs[i][...], w_refs[i][...],
                                preferred_element_type=jnp.float32)

        y = acc * scale_ref[...] + shift_ref[...]
        if has_res:
            y = y + res_ref[...].astype(jnp.float32)
        if apply_act:  # PReLU / LeakyReLU with per-channel alpha vector
            y = jnp.where(y > 0, y, alpha_ref[...] * y)

        if has_head:   # fused final 1x1 conv + bias (f32 output)
            z = jnp.dot(y.astype(jnp.bfloat16), hw_ref[...],
                        preferred_element_type=jnp.float32) + hb_ref[...]
            o_ref[...] = z.astype(o_ref.dtype)
        else:
            o_ref[...] = y.astype(o_ref.dtype)

    return kernel


# ---------------------------------------------------------------------------
# Patch (im2col) builder -- bf16, with the nearest-x2 upsample folded into the gather
# ---------------------------------------------------------------------------
def _patches(x, kh, kw, stride, upsample2x):
    N, H, W, C = x.shape
    if upsample2x:
        # conv(pad=1) over nearest-x2-upsampled x, gathered directly from x:
        # padded_up row i maps to zero-padded-x row (i-1)//2 + 1.
        Ho, Wo = 2 * H, 2 * W
        xz = jnp.pad(x, ((0, 0), (1, 1), (1, 1), (0, 0)))
        pats = []
        for dy in range(kh):
            ri = ((np.arange(Ho) + dy - 1) // 2 + 1).astype(np.int32)
            rows = jnp.take(xz, ri, axis=1)
            for dx in range(kw):
                ci = ((np.arange(Wo) + dx - 1) // 2 + 1).astype(np.int32)
                pats.append(jnp.take(rows, ci, axis=2))
    else:
        pad = (kh - 1) // 2
        xp = jnp.pad(x, ((0, 0), (pad, pad), (pad, pad), (0, 0))) if pad else x
        Ho = (H + 2 * pad - kh) // stride + 1
        Wo = (W + 2 * pad - kw) // stride + 1
        pats = [xp[:, dy:dy + stride * (Ho - 1) + 1:stride,
                   dx:dx + stride * (Wo - 1) + 1:stride, :]
                for dy in range(kh) for dx in range(kw)]
    P = jnp.concatenate(pats, axis=-1).reshape(N * Ho * Wo, kh * kw * C)
    return P, Ho, Wo


def _vec(v, n, n_pad):
    v = jnp.asarray(v, jnp.float32) * jnp.ones((n,), jnp.float32)
    return jnp.pad(v, (0, n_pad - n)).reshape(1, n_pad)


def conv_bn_act(sources, scale, shift, *, stride=1, alpha=None, residual=None,
                upsample2x=False, head_w=None, head_b=None, out_dtype=jnp.bfloat16):
    """sources: list of (x NHWC, w HWIO) pairs sharing spatial dims (split-Cin conv).
    Computes act(BN(sum_i conv(x_i, w_i)) [+ residual]) [-> fused 1x1 head conv]."""
    kh, kw, _, Cout = sources[0][1].shape
    N = sources[0][0].shape[0]

    Ps, Ws, Ks = [], [], []
    for x_src, w_src in sources:
        P, Ho, Wo = _patches(x_src.astype(jnp.bfloat16), kh, kw, stride, upsample2x)
        Ps.append(P)
        Ws.append(w_src.reshape(-1, Cout).astype(jnp.bfloat16))
        Ks.append(P.shape[1])
    M = N * Ho * Wo

    Cout_p = _round_up(Cout, _LANE)
    apply_act = alpha is not None
    has_res = residual is not None
    has_head = head_w is not None
    if has_head:
        nhead = head_w.shape[-1]
        Nout_p = _round_up(nhead, _LANE)
    else:
        Nout_p = Cout_p
    out_bytes = jnp.dtype(out_dtype).itemsize

    # ---- tile size from the VMEM working-set budget (double-buffered streams) ----
    sumK = sum(Ks)
    weight_bytes = 2 * sumK * Cout_p * 2
    if has_head:
        weight_bytes += 2 * Cout_p * Nout_p * 2
    per_row = 2 * sumK * 2 + 2 * Nout_p * out_bytes
    if has_res:
        per_row += 2 * Cout_p * 2
    tm = max(8, ((_VMEM_WORKSET - weight_bytes) // max(per_row, 1)) // 8 * 8)
    tm = min(tm, _TM_MAX)
    # keep >= 2 grid steps when possible (megacore / v7x two-TensorCore sharding)
    tm = min(tm, max(8, _round_up(pl.cdiv(M, 2), 8)))
    M_p = _round_up(M, tm)
    grid_m = M_p // tm

    inputs, in_specs = [], []
    for P, K in zip(Ps, Ks):
        if M_p != M:
            P = jnp.pad(P, ((0, M_p - M), (0, 0)))
        inputs.append(P)
        in_specs.append(pl.BlockSpec((tm, K), lambda i: (i, 0)))
    for Wm, K in zip(Ws, Ks):
        if Cout_p != Cout:
            Wm = jnp.pad(Wm, ((0, 0), (0, Cout_p - Cout)))
        inputs.append(Wm)
        in_specs.append(pl.BlockSpec((K, Cout_p), lambda i: (0, 0)))

    inputs += [_vec(scale, Cout, Cout_p), _vec(shift, Cout, Cout_p),
               _vec(alpha if apply_act else 0.0, Cout, Cout_p)]
    in_specs += [pl.BlockSpec((1, Cout_p), lambda i: (0, 0))] * 3

    if has_res:
        r = residual.reshape(M, Cout).astype(jnp.bfloat16)
        r = jnp.pad(r, ((0, M_p - M), (0, Cout_p - Cout)))
        inputs.append(r)
        in_specs.append(pl.BlockSpec((tm, Cout_p), lambda i: (i, 0)))

    if has_head:
        hw = head_w.reshape(-1, nhead).astype(jnp.bfloat16)     # (Cout, nhead) for 1x1 conv
        hw = jnp.pad(hw, ((0, Cout_p - Cout), (0, Nout_p - nhead)))
        inputs += [hw, _vec(head_b, nhead, Nout_p)]
        in_specs += [pl.BlockSpec((Cout_p, Nout_p), lambda i: (0, 0)),
                     pl.BlockSpec((1, Nout_p), lambda i: (0, 0))]

    out = pl.pallas_call(
        _make_kernel(len(sources), has_res, apply_act, has_head),
        out_shape=jax.ShapeDtypeStruct((M_p, Nout_p), out_dtype),
        grid_spec=pltpu.PrefetchScalarGridSpec(
            num_scalar_prefetch=0,
            grid=(grid_m,),
            in_specs=in_specs,
            out_specs=pl.BlockSpec((tm, Nout_p), lambda i: (i, 0)),
        ),
        compiler_params=pltpu.CompilerParams(
            dimension_semantics=("parallel",),
            vmem_limit_bytes=_VMEM_LIMIT,
        ),
    )(*inputs)

    C_final = nhead if has_head else Cout
    return out[:M, :C_final].reshape(N, Ho, Wo, C_final)


# ---------------------------------------------------------------------------
# Parameter initialization (deterministic, in-script)
# ---------------------------------------------------------------------------
def _init_convbatch(key, cin, cout):
    kw_, kg, kb = jax.random.split(key, 3)
    w = jax.random.normal(kw_, (3, 3, cin, cout), jnp.float32) * 0.03
    gamma = jax.random.uniform(kg, (cout,), jnp.float32, 0.5, 1.5)
    beta = jax.random.normal(kb, (cout,), jnp.float32) * 0.1
    scale = gamma / jnp.sqrt(1.0 + _EPS)      # running_var = 1
    shift = beta                              # running_mean = 0
    alpha = jnp.asarray(0.25, jnp.float32)    # nn.PReLU() default init
    return dict(w=w, scale=scale, shift=shift, alpha=alpha)


def _init_residual(key, nin, nout):
    assert nin == nout  # bridge uses residualConv(nG*8, nG*8): identity skip branch
    k1, k2, k3, k4, k5 = jax.random.split(key, 5)
    cb = _init_convbatch(k1, nin, nout)
    w2 = jax.random.normal(k2, (3, 3, nout, nout), jnp.float32) * 0.03
    b2 = jax.random.normal(k3, (nout,), jnp.float32) * 0.05
    gamma = jax.random.uniform(k4, (nout,), jnp.float32, 0.5, 1.5)
    beta = jax.random.normal(k5, (nout,), jnp.float32) * 0.1
    scale2 = gamma / jnp.sqrt(1.0 + _EPS)
    shift2 = scale2 * b2 + beta               # conv bias folded through BN
    return dict(cb=cb, w2=w2, scale2=scale2, shift2=shift2)


def init_unet(key, nin, nout, nG):
    keys = iter(jax.random.split(key, 64))
    cb = lambda ci, co: _init_convbatch(next(keys), ci, co)
    p = {}
    p["conv0"] = [cb(nin, nG), cb(nG, nG)]
    p["conv1"] = [cb(nG, 2 * nG), cb(2 * nG, 2 * nG)]
    p["conv2"] = [cb(2 * nG, 4 * nG), cb(4 * nG, 4 * nG)]
    p["bridge_cb0"] = cb(4 * nG, 8 * nG)
    p["bridge_res"] = _init_residual(next(keys), 8 * nG, 8 * nG)
    p["bridge_cb1"] = cb(8 * nG, 8 * nG)
    p["deconv1"] = [cb(8 * nG, 8 * nG), cb(8 * nG, 8 * nG)]
    p["conv5"] = [cb(12 * nG, 4 * nG), cb(4 * nG, 4 * nG)]
    p["deconv2"] = [cb(4 * nG, 4 * nG), cb(4 * nG, 4 * nG)]
    p["conv6"] = [cb(6 * nG, 2 * nG), cb(2 * nG, 2 * nG)]
    p["deconv3"] = [cb(2 * nG, 2 * nG), cb(2 * nG, 2 * nG)]
    p["conv7"] = [cb(3 * nG, nG), cb(nG, nG)]
    kf1, kf2 = jax.random.split(next(keys))
    p["final_w"] = jax.random.normal(kf1, (1, 1, nG, nout), jnp.float32) * 0.05
    p["final_b"] = jax.random.normal(kf2, (nout,), jnp.float32) * 0.05
    return p


# ---------------------------------------------------------------------------
# Forward pass
# ---------------------------------------------------------------------------
def _convbatch(x, p, stride=1, upsample2x=False):
    return conv_bn_act([(x, p["w"])], p["scale"], p["shift"],
                       stride=stride, alpha=p["alpha"], upsample2x=upsample2x)


def _convbatch_skip(x_a, x_b, p):
    # conv over the channel-concat [x_a, x_b] without materializing the concat:
    # split the weight along Cin and accumulate two MXU dots in-register.
    ca = x_a.shape[-1]
    return conv_bn_act([(x_a, p["w"][:, :, :ca, :]), (x_b, p["w"][:, :, ca:, :])],
                       p["scale"], p["shift"], alpha=p["alpha"])


def _convbatch_head(x, p, head_w, head_b):
    # last convBatch with the final 1x1 conv + bias fused into the epilogue (f32 out)
    return conv_bn_act([(x, p["w"])], p["scale"], p["shift"], alpha=p["alpha"],
                       head_w=head_w, head_b=head_b, out_dtype=jnp.float32)


def _residual_conv(x, p):
    h = _convbatch(x, p["cb"])
    # second conv -> BN, identity residual add, LeakyReLU(0.2), all fused in one kernel
    return conv_bn_act([(h, p["w2"])], p["scale2"], p["shift2"], alpha=0.2, residual=x)


def _upsample_conv(x, ps):
    # nearest x2 upsample folded into the first conv's patch gather (no 4x HBM copy)
    x = _convbatch(x, ps[0], upsample2x=True)
    return _convbatch(x, ps[1])


def _seq_convbatch(x, ps, first_stride=1):
    x = _convbatch(x, ps[0], stride=first_stride)
    return _convbatch(x, ps[1])


@jax.jit
def unet_forward(params, x_nchw):
    x = jnp.transpose(x_nchw.astype(jnp.float32), (0, 2, 3, 1))  # NCHW -> NHWC
    x = x.astype(jnp.bfloat16)   # all intermediate activations flow in bf16

    x0 = _seq_convbatch(x, params["conv0"])
    x1 = _seq_convbatch(x0, params["conv1"], first_stride=2)
    x2 = _seq_convbatch(x1, params["conv2"], first_stride=2)

    b = _convbatch(x2, params["bridge_cb0"], stride=2)
    b = _residual_conv(b, params["bridge_res"])
    bridge = _convbatch(b, params["bridge_cb1"])

    y0 = _upsample_conv(bridge, params["deconv1"])
    y1 = _upsample_conv(
        _convbatch(_convbatch_skip(y0, x2, params["conv5"][0]), params["conv5"][1]),
        params["deconv2"])
    y2 = _upsample_conv(
        _convbatch(_convbatch_skip(y1, x1, params["conv6"][0]), params["conv6"][1]),
        params["deconv3"])

    h = _convbatch_skip(y2, x0, params["conv7"][0])
    out = _convbatch_head(h, params["conv7"][1], params["final_w"], params["final_b"])

    return jnp.transpose(out, (0, 3, 1, 2)).astype(jnp.float32)  # NHWC -> NCHW


if __name__ == "__main__":
    key = jax.random.PRNGKey(0)
    kp, kx = jax.random.split(key)

    NIN, NOUT, NG = 3, 2, 8        # small synthetic config: UNet(nin=3, nout=2, nG=8)
    N, H, W = 2, 16, 16

    params = init_unet(kp, NIN, NOUT, NG)
    x = jax.random.normal(kx, (N, NIN, H, W), jnp.float32)  # NCHW, like PyTorch

    y = unet_forward(params, x)
    jax.block_until_ready(y)

    assert y.shape == (N, NOUT, H, W), y.shape
    assert y.dtype == jnp.float32
    assert bool(jnp.all(jnp.isfinite(y)))
    print("KERNEL_OK")
</pallas_src>

<mosaic_0001>
module attributes {stable_mosaic.version = 11 : i64} {
  func.func @kernel(%arg0: i32, %arg1: memref<256x27xbf16, #tpu.memory_space<vmem>>, %arg2: memref<27x128xbf16, #tpu.memory_space<vmem>>, %arg3: memref<1x128xf32, #tpu.memory_space<vmem>>, %arg4: memref<1x128xf32, #tpu.memory_space<vmem>>, %arg5: memref<1x128xf32, #tpu.memory_space<vmem>>, %arg6: memref<256x128xbf16, #tpu.memory_space<vmem>>) attributes {dimension_semantics = [#tpu.dimension_semantics<parallel>], iteration_bounds = array<i64: 2>, scalar_prefetch = 0 : i64, scratch_operands = 0 : i64, tpu.core_type = #tpu.core_type<tc>, window_params = [{transform_indices = @transform_0, window_bounds = array<i64: 256, 27>}, {pipeline_mode = #tpu.pipeline_mode<synchronous>, transform_indices = @transform_1, window_bounds = array<i64: 27, 128>}, {pipeline_mode = #tpu.pipeline_mode<synchronous>, transform_indices = @transform_2, window_bounds = array<i64: 1, 128>}, {pipeline_mode = #tpu.pipeline_mode<synchronous>, transform_indices = @transform_3, window_bounds = array<i64: 1, 128>}, {pipeline_mode = #tpu.pipeline_mode<synchronous>, transform_indices = @transform_4, window_bounds = array<i64: 1, 128>}, {transform_indices = @transform_5, window_bounds = array<i64: 256, 128>}]} {
    %c0 = arith.constant 0 : index
    %c0_0 = arith.constant 0 : index
    %0 = vector.load %arg1[%c0, %c0_0] : memref<256x27xbf16, #tpu.memory_space<vmem>>, vector<256x27xbf16>
    %c0_1 = arith.constant 0 : index
    %c0_2 = arith.constant 0 : index
    %1 = vector.load %arg2[%c0_1, %c0_2] : memref<27x128xbf16, #tpu.memory_space<vmem>>, vector<27x128xbf16>
    %cst = arith.constant dense<0.000000e+00> : vector<256x128xf32>
    %2 = tpu.matmul %0, %1, %cst {dimension_numbers = #tpu.dot_dimension_numbers<[1], [0], [0], [1], [0, 0, 1, 1], [], []>} : vector<256x27xbf16>, vector<27x128xbf16>, vector<256x128xf32> -> vector<256x128xf32>
    %c0_3 = arith.constant 0 : index
    %c0_4 = arith.constant 0 : index
    %3 = vector.load %arg3[%c0_3, %c0_4] : memref<1x128xf32, #tpu.memory_space<vmem>>, vector<1x128xf32>
    %4 = vector.broadcast %3 : vector<1x128xf32> to vector<256x128xf32>
    %5 = arith.mulf %2, %4 : vector<256x128xf32>
    %c0_5 = arith.constant 0 : index
    %c0_6 = arith.constant 0 : index
    %6 = vector.load %arg4[%c0_5, %c0_6] : memref<1x128xf32, #tpu.memory_space<vmem>>, vector<1x128xf32>
    %7 = vector.broadcast %6 : vector<1x128xf32> to vector<256x128xf32>
    %8 = arith.addf %5, %7 : vector<256x128xf32>
    %cst_7 = arith.constant 0.000000e+00 : f32
    %9 = vector.broadcast %cst_7 : f32 to vector<256x128xf32>
    %10 = arith.cmpf ogt, %8, %9 : vector<256x128xf32>
    %c0_8 = arith.constant 0 : index
    %c0_9 = arith.constant 0 : index
    %11 = vector.load %arg5[%c0_8, %c0_9] : memref<1x128xf32, #tpu.memory_space<vmem>>, vector<1x128xf32>
    %12 = vector.broadcast %11 : vector<1x128xf32> to vector<256x128xf32>
    %13 = arith.mulf %12, %8 : vector<256x128xf32>
    %14 = arith.select %10, %8, %13 : vector<256x128xi1>, vector<256x128xf32>
    %15 = arith.truncf %14 : vector<256x128xf32> to vector<256x128xbf16>
    %c0_10 = arith.constant 0 : index
    %c0_11 = arith.constant 0 : index
    %16 = vector.load %arg6[%c0_10, %c0_11] : memref<256x128xbf16, #tpu.memory_space<vmem>>, vector<256x128xbf16>
    tpu.vector_store %arg6[%c0_10, %c0_11], %15 {strides = array<i32>} : memref<256x128xbf16, #tpu.memory_space<vmem>>, vector<256x128xbf16>,
    return
  }
  func.func @transform_0(%arg0: i32) -> (i32, i32) {
    %c0_i32 = arith.constant 0 : i32
    %c0_i32_0 = arith.constant 0 : i32
    return %arg0, %c0_i32 : i32, i32
  }
  func.func @transform_1(%arg0: i32) -> (i32, i32) {
    %c0_i32 = arith.constant 0 : i32
    %c0_i32_0 = arith.constant 0 : i32
    %c0_i32_1 = arith.constant 0 : i32
    return %c0_i32, %c0_i32_0 : i32, i32
  }
  func.func @transform_2(%arg0: i32) -> (i32, i32) {
    %c0_i32 = arith.constant 0 : i32
    %c0_i32_0 = arith.constant 0 : i32
    %c0_i32_1 = arith.constant 0 : i32
    return %c0_i32, %c0_i32_0 : i32, i32
  }
  func.func @transform_3(%arg0: i32) -> (i32, i32) {
    %c0_i32 = arith.constant 0 : i32
    %c0_i32_0 = arith.constant 0 : i32
    %c0_i32_1 = arith.constant 0 : i32
    return %c0_i32, %c0_i32_0 : i32, i32
  }
  func.func @transform_4(%arg0: i32) -> (i32, i32) {
    %c0_i32 = arith.constant 0 : i32
    %c0_i32_0 = arith.constant 0 : i32
    %c0_i32_1 = arith.constant 0 : i32
    return %c0_i32, %c0_i32_0 : i32, i32
  }
  func.func @transform_5(%arg0: i32) -> (i32, i32) {
    %c0_i32 = arith.constant 0 : i32
    %c0_i32_0 = arith.constant 0 : i32
    return %arg0, %c0_i32 : i32, i32
  }
}

module attributes {stable_mosaic.version = 11 : i64} {
  func.func @kernel(%arg0: i32, %arg1: memref<256x72xbf16, #tpu.memory_space<vmem>>, %arg2: memref<72x128xbf16, #tpu.memory_space<vmem>>, %arg3: memref<1x128xf32, #tpu.memory_space<vmem>>, %arg4: memref<1x128xf32, #tpu.memory_space<vmem>>, %arg5: memref<1x128xf32, #tpu.memory_space<vmem>>, %arg6: memref<256x128xbf16, #tpu.memory_space<vmem>>) attributes {dimension_semantics = [#tpu.dimension_semantics<parallel>], iteration_bounds = array<i64: 2>, scalar_prefetch = 0 : i64, scratch_operands = 0 : i64, tpu.core_type = #tpu.core_type<tc>, window_params = [{transform_indices = @transform_0, window_bounds = array<i64: 256, 72>}, {pipeline_mode = #tpu.pipeline_mode<synchronous>, transform_indices = @transform_1, window_bounds = array<i64: 72, 128>}, {pipeline_mode = #tpu.pipeline_mode<synchronous>, transform_indices = @transform_2, window_bounds = array<i64: 1, 128>}, {pipeline_mode = #tpu.pipeline_mode<synchronous>, transform_indices = @transform_3, window_bounds = array<i64: 1, 128>}, {pipeline_mode = #tpu.pipeline_mode<synchronous>, transform_indices = @transform_4, window_bounds = array<i64: 1, 128>}, {transform_indices = @transform_5, window_bounds = array<i64: 256, 128>}]} {
    %c0 = arith.constant 0 : index
    %c0_0 = arith.constant 0 : index
    %0 = vector.load %arg1[%c0, %c0_0] : memref<256x72xbf16, #tpu.memory_space<vmem>>, vector<256x72xbf16>
    %c0_1 = arith.constant 0 : index
    %c0_2 = arith.constant 0 : index
    %1 = vector.load %arg2[%c0_1, %c0_2] : memref<72x128xbf16, #tpu.memory_space<vmem>>, vector<72x128xbf16>
    %cst = arith.constant dense<0.000000e+00> : vector<256x128xf32>
    %2 = tpu.matmul %0, %1, %cst {dimension_numbers = #tpu.dot_dimension_numbers<[1], [0], [0], [1], [0, 0, 1, 1], [], []>} : vector<256x72xbf16>, vector<72x128xbf16>, vector<256x128xf32> -> vector<256x128xf32>
    %c0_3 = arith.constant 0 : index
    %c0_4 = arith.constant 0 : index
    %3 = vector.load %arg3[%c0_3, %c0_4] : memref<1x128xf32, #tpu.memory_space<vmem>>, vector<1x128xf32>
    %4 = vector.broadcast %3 : vector<1x128xf32> to vector<256x128xf32>
    %5 = arith.mulf %2, %4 : vector<256x128xf32>
    %c0_5 = arith.constant 0 : index
    %c0_6 = arith.constant 0 : index
    %6 = vector.load %arg4[%c0_5, %c0_6] : memref<1x128xf32, #tpu.memory_space<vmem>>, vector<1x128xf32>
    %7 = vector.broadcast %6 : vector<1x128xf32> to vector<256x128xf32>
    %8 = arith.addf %5, %7 : vector<256x128xf32>
    %cst_7 = arith.constant 0.000000e+00 : f32
    %9 = vector.broadcast %cst_7 : f32 to vector<256x128xf32>
    %10 = arith.cmpf ogt, %8, %9 : vector<256x128xf32>
    %c0_8 = arith.constant 0 : index
    %c0_9 = arith.constant 0 : index
    %11 = vector.load %arg5[%c0_8, %c0_9] : memref<1x128xf32, #tpu.memory_space<vmem>>, vector<1x128xf32>
    %12 = vector.broadcast %11 : vector<1x128xf32> to vector<256x128xf32>
    %13 = arith.mulf %12, %8 : vector<256x128xf32>
    %14 = arith.select %10, %8, %13 : vector<256x128xi1>, vector<256x128xf32>
    %15 = arith.truncf %14 : vector<256x128xf32> to vector<256x128xbf16>
    %c0_10 = arith.constant 0 : index
    %c0_11 = arith.constant 0 : index
    %16 = vector.load %arg6[%c0_10, %c0_11] : memref<256x128xbf16, #tpu.memory_space<vmem>>, vector<256x128xbf16>
    tpu.vector_store %arg6[%c0_10, %c0_11], %15 {strides = array<i32>} : memref<256x128xbf16, #tpu.memory_space<vmem>>, vector<256x128xbf16>,
    return
  }
  func.func @transform_0(%arg0: i32) -> (i32, i32) {
    %c0_i32 = arith.constant 0 : i32
    %c0_i32_0 = arith.constant 0 : i32
    return %arg0, %c0_i32 : i32, i32
  }
  func.func @transform_1(%arg0: i32) -> (i32, i32) {
    %c0_i32 = arith.constant 0 : i32
    %c0_i32_0 = arith.constant 0 : i32
    %c0_i32_1 = arith.constant 0 : i32
    return %c0_i32, %c0_i32_0 : i32, i32
  }
  func.func @transform_2(%arg0: i32) -> (i32, i32) {
    %c0_i32 = arith.constant 0 : i32
    %c0_i32_0 = arith.constant 0 : i32
    %c0_i32_1 = arith.constant 0 : i32
    return %c0_i32, %c0_i32_0 : i32, i32
  }
  func.func @transform_3(%arg0: i32) -> (i32, i32) {
    %c0_i32 = arith.constant 0 : i32
    %c0_i32_0 = arith.constant 0 : i32
    %c0_i32_1 = arith.constant 0 : i32
    return %c0_i32, %c0_i32_0 : i32, i32
  }
  func.func @transform_4(%arg0: i32) -> (i32, i32) {
    %c0_i32 = arith.constant 0 : i32
    %c0_i32_0 = arith.constant 0 : i32
    %c0_i32_1 = arith.constant 0 : i32
    return %c0_i32, %c0_i32_0 : i32, i32
  }
  func.func @transform_5(%arg0: i32) -> (i32, i32) {
    %c0_i32 = arith.constant 0 : i32
    %c0_i32_0 = arith.constant 0 : i32
    return %arg0, %c0_i32 : i32, i32
  }
}

module attributes {stable_mosaic.version = 11 : i64} {
  func.func @kernel(%arg0: i32, %arg1: memref<64x72xbf16, #tpu.memory_space<vmem>>, %arg2: memref<72x128xbf16, #tpu.memory_space<vmem>>, %arg3: memref<1x128xf32, #tpu.memory_space<vmem>>, %arg4: memref<1x128xf32, #tpu.memory_space<vmem>>, %arg5: memref<1x128xf32, #tpu.memory_space<vmem>>, %arg6: memref<64x128xbf16, #tpu.memory_space<vmem>>) attributes {dimension_semantics = [#tpu.dimension_semantics<parallel>], iteration_bounds = array<i64: 2>, scalar_prefetch = 0 : i64, scratch_operands = 0 : i64, tpu.core_type = #tpu.core_type<tc>, window_params = [{transform_indices = @transform_0, window_bounds = array<i64: 64, 72>}, {pipeline_mode = #tpu.pipeline_mode<synchronous>, transform_indices = @transform_1, window_bounds = array<i64: 72, 128>}, {pipeline_mode = #tpu.pipeline_mode<synchronous>, transform_indices = @transform_2, window_bounds = array<i64: 1, 128>}, {pipeline_mode = #tpu.pipeline_mode<synchronous>, transform_indices = @transform_3, window_bounds = array<i64: 1, 128>}, {pipeline_mode = #tpu.pipeline_mode<synchronous>, transform_indices = @transform_4, window_bounds = array<i64: 1, 128>}, {transform_indices = @transform_5, window_bounds = array<i64: 64, 128>}]} {
    %c0 = arith.constant 0 : index
    %c0_0 = arith.constant 0 : index
    %0 = vector.load %arg1[%c0, %c0_0] : memref<64x72xbf16, #tpu.memory_space<vmem>>, vector<64x72xbf16>
    %c0_1 = arith.constant 0 : index
    %c0_2 = arith.constant 0 : index
    %1 = vector.load %arg2[%c0_1, %c0_2] : memref<72x128xbf16, #tpu.memory_space<vmem>>, vector<72x128xbf16>
    %cst = arith.constant dense<0.000000e+00> : vector<64x128xf32>
    %2 = tpu.matmul %0, %1, %cst {dimension_numbers = #tpu.dot_dimension_numbers<[1], [0], [0], [1], [0, 0, 1, 1], [], []>} : vector<64x72xbf16>, vector<72x128xbf16>, vector<64x128xf32> -> vector<64x128xf32>
    %c0_3 = arith.constant 0 : index
    %c0_4 = arith.constant 0 : index
    %3 = vector.load %arg3[%c0_3, %c0_4] : memref<1x128xf32, #tpu.memory_space<vmem>>, vector<1x128xf32>
    %4 = vector.broadcast %3 : vector<1x128xf32> to vector<64x128xf32>
    %5 = arith.mulf %2, %4 : vector<64x128xf32>
    %c0_5 = arith.constant 0 : index
    %c0_6 = arith.constant 0 : index
    %6 = vector.load %arg4[%c0_5, %c0_6] : memref<1x128xf32, #tpu.memory_space<vmem>>, vector<1x128xf32>
    %7 = vector.broadcast %6 : vector<1x128xf32> to vector<64x128xf32>
    %8 = arith.addf %5, %7 : vector<64x128xf32>
    %cst_7 = arith.constant 0.000000e+00 : f32
    %9 = vector.broadcast %cst_7 : f32 to vector<64x128xf32>
    %10 = arith.cmpf ogt, %8, %9 : vector<64x128xf32>
    %c0_8 = arith.constant 0 : index
    %c0_9 = arith.constant 0 : index
    %11 = vector.load %arg5[%c0_8, %c0_9] : memref<1x128xf32, #tpu.memory_space<vmem>>, vector<1x128xf32>
    %12 = vector.broadcast %11 : vector<1x128xf32> to vector<64x128xf32>
    %13 = arith.mulf %12, %8 : vector<64x128xf32>
    %14 = arith.select %10, %8, %13 : vector<64x128xi1>, vector<64x128xf32>
    %15 = arith.truncf %14 : vector<64x128xf32> to vector<64x128xbf16>
    %c0_10 = arith.constant 0 : index
    %c0_11 = arith.constant 0 : index
    %16 = vector.load %arg6[%c0_10, %c0_11] : memref<64x128xbf16, #tpu.memory_space<vmem>>, vector<64x128xbf16>
    tpu.vector_store %arg6[%c0_10, %c0_11], %15 {strides = array<i32>} : memref<64x128xbf16, #tpu.memory_space<vmem>>, vector<64x128xbf16>,
    return
  }
  func.func @transform_0(%arg0: i32) -> (i32, i32) {
    %c0_i32 = arith.constant 0 : i32
    %c0_i32_0 = arith.constant 0 : i32
    return %arg0, %c0_i32 : i32, i32
  }
  func.func @transform_1(%arg0: i32) -> (i32, i32) {
    %c0_i32 = arith.constant 0 : i32
    %c0_i32_0 = arith.constant 0 : i32
    %c0_i32_1 = arith.constant 0 : i32
    return %c0_i32, %c0_i32_0 : i32, i32
  }
  func.func @transform_2(%arg0: i32) -> (i32, i32) {
    %c0_i32 = arith.constant 0 : i32
    %c0_i32_0 = arith.constant 0 : i32
    %c0_i32_1 = arith.constant 0 : i32
    return %c0_i32, %c0_i32_0 : i32, i32
  }
  func.func @transform_3(%arg0: i32) -> (i32, i32) {
    %c0_i32 = arith.constant 0 : i32
    %c0_i32_0 = arith.constant 0 : i32
    %c0_i32_1 = arith.constant 0 : i32
    return %c0_i32, %c0_i32_0 : i32, i32
  }
  func.func @transform_4(%arg0: i32) -> (i32, i32) {
    %c0_i32 = arith.constant 0 : i32
    %c0_i32_0 = arith.constant 0 : i32
    %c0_i32_1 = arith.constant 0 : i32
    return %c0_i32, %c0_i32_0 : i32, i32
  }
  func.func @transform_5(%arg0: i32) -> (i32, i32) {
    %c0_i32 = arith.constant 0 : i32
    %c0_i32_0 = arith.constant 0 : i32
    return %arg0, %c0_i32 : i32, i32
  }
}

module attributes {stable_mosaic.version = 11 : i64} {
  func.func @kernel(%arg0: i32, %arg1: memref<64x144xbf16, #tpu.memory_space<vmem>>, %arg2: memref<144x128xbf16, #tpu.memory_space<vmem>>, %arg3: memref<1x128xf32, #tpu.memory_space<vmem>>, %arg4: memref<1x128xf32, #tpu.memory_space<vmem>>, %arg5: memref<1x128xf32, #tpu.memory_space<vmem>>, %arg6: memref<64x128xbf16, #tpu.memory_space<vmem>>) attributes {dimension_semantics = [#tpu.dimension_semantics<parallel>], iteration_bounds = array<i64: 2>, scalar_prefetch = 0 : i64, scratch_operands = 0 : i64, tpu.core_type = #tpu.core_type<tc>, window_params = [{transform_indices = @transform_0, window_bounds = array<i64: 64, 144>}, {pipeline_mode = #tpu.pipeline_mode<synchronous>, transform_indices = @transform_1, window_bounds = array<i64: 144, 128>}, {pipeline_mode = #tpu.pipeline_mode<synchronous>, transform_indices = @transform_2, window_bounds = array<i64: 1, 128>}, {pipeline_mode = #tpu.pipeline_mode<synchronous>, transform_indices = @transform_3, window_bounds = array<i64: 1, 128>}, {pipeline_mode = #tpu.pipeline_mode<synchronous>, transform_indices = @transform_4, window_bounds = array<i64: 1, 128>}, {transform_indices = @transform_5, window_bounds = array<i64: 64, 128>}]} {
    %c0 = arith.constant 0 : index
    %c0_0 = arith.constant 0 : index
    %0 = vector.load %arg1[%c0, %c0_0] : memref<64x144xbf16, #tpu.memory_space<vmem>>, vector<64x144xbf16>
    %c0_1 = arith.constant 0 : index
    %c0_2 = arith.constant 0 : index
    %1 = vector.load %arg2[%c0_1, %c0_2] : memref<144x128xbf16, #tpu.memory_space<vmem>>, vector<144x128xbf16>
    %cst = arith.constant dense<0.000000e+00> : vector<64x128xf32>
    %2 = tpu.matmul %0, %1, %cst {dimension_numbers = #tpu.dot_dimension_numbers<[1], [0], [0], [1], [0, 0, 1, 1], [], []>} : vector<64x144xbf16>, vector<144x128xbf16>, vector<64x128xf32> -> vector<64x128xf32>
    %c0_3 = arith.constant 0 : index
    %c0_4 = arith.constant 0 : index
    %3 = vector.load %arg3[%c0_3, %c0_4] : memref<1x128xf32, #tpu.memory_space<vmem>>, vector<1x128xf32>
    %4 = vector.broadcast %3 : vector<1x128xf32> to vector<64x128xf32>
    %5 = arith.mulf %2, %4 : vector<64x128xf32>
    %c0_5 = arith.constant 0 : index
    %c0_6 = arith.constant 0 : index
    %6 = vector.load %arg4[%c0_5, %c0_6] : memref<1x128xf32, #tpu.memory_space<vmem>>, vector<1x128xf32>
    %7 = vector.broadcast %6 : vector<1x128xf32> to vector<64x128xf32>
    %8 = arith.addf %5, %7 : vector<64x128xf32>
    %cst_7 = arith.constant 0.000000e+00 : f32
    %9 = vector.broadcast %cst_7 : f32 to vector<64x128xf32>
    %10 = arith.cmpf ogt, %8, %9 : vector<64x128xf32>
    %c0_8 = arith.constant 0 : index
    %c0_9 = arith.constant 0 : index
    %11 = vector.load %arg5[%c0_8, %c0_9] : memref<1x128xf32, #tpu.memory_space<vmem>>, vector<1x128xf32>
    %12 = vector.broadcast %11 : vector<1x128xf32> to vector<64x128xf32>
    %13 = arith.mulf %12, %8 : vector<64x128xf32>
    %14 = arith.select %10, %8, %13 : vector<64x128xi1>, vector<64x128xf32>
    %15 = arith.truncf %14 : vector<64x128xf32> to vector<64x128xbf16>
    %c0_10 = arith.constant 0 : index
    %c0_11 = arith.constant 0 : index
    %16 = vector.load %arg6[%c0_10, %c0_11] : memref<64x128xbf16, #tpu.memory_space<vmem>>, vector<64x128xbf16>
    tpu.vector_store %arg6[%c0_10, %c0_11], %15 {strides = array<i32>} : memref<64x128xbf16, #tpu.memory_space<vmem>>, vector<64x128xbf16>,
    return
  }
  func.func @transform_0(%arg0: i32) -> (i32, i32) {
    %c0_i32 = arith.constant 0 : i32
    %c0_i32_0 = arith.constant 0 : i32
    return %arg0, %c0_i32 : i32, i32
  }
  func.func @transform_1(%arg0: i32) -> (i32, i32) {
    %c0_i32 = arith.constant 0 : i32
    %c0_i32_0 = arith.constant 0 : i32
    %c0_i32_1 = arith.constant 0 : i32
    return %c0_i32, %c0_i32_0 : i32, i32
  }
  func.func @transform_2(%arg0: i32) -> (i32, i32) {
    %c0_i32 = arith.constant 0 : i32
    %c0_i32_0 = arith.constant 0 : i32
    %c0_i32_1 = arith.constant 0 : i32
    return %c0_i32, %c0_i32_0 : i32, i32
  }
  func.func @transform_3(%arg0: i32) -> (i32, i32) {
    %c0_i32 = arith.constant 0 : i32
    %c0_i32_0 = arith.constant 0 : i32
    %c0_i32_1 = arith.constant 0 : i32
    return %c0_i32, %c0_i32_0 : i32, i32
  }
  func.func @transform_4(%arg0: i32) -> (i32, i32) {
    %c0_i32 = arith.constant 0 : i32
    %c0_i32_0 = arith.constant 0 : i32
    %c0_i32_1 = arith.constant 0 : i32
    return %c0_i32, %c0_i32_0 : i32, i32
  }
  func.func @transform_5(%arg0: i32) -> (i32, i32) {
    %c0_i32 = arith.constant 0 : i32
    %c0_i32_0 = arith.constant 0 : i32
    return %arg0, %c0_i32 : i32, i32
  }
}

module attributes {stable_mosaic.version = 11 : i64} {
  func.func @kernel(%arg0: i32, %arg1: memref<16x144xbf16, #tpu.memory_space<vmem>>, %arg2: memref<144x128xbf16, #tpu.memory_space<vmem>>, %arg3: memref<1x128xf32, #tpu.memory_space<vmem>>, %arg4: memref<1x128xf32, #tpu.memory_space<vmem>>, %arg5: memref<1x128xf32, #tpu.memory_space<vmem>>, %arg6: memref<16x128xbf16, #tpu.memory_space<vmem>>) attributes {dimension_semantics = [#tpu.dimension_semantics<parallel>], iteration_bounds = array<i64: 2>, scalar_prefetch = 0 : i64, scratch_operands = 0 : i64, tpu.core_type = #tpu.core_type<tc>, window_params = [{transform_indices = @transform_0, window_bounds = array<i64: 16, 144>}, {pipeline_mode = #tpu.pipeline_mode<synchronous>, transform_indices = @transform_1, window_bounds = array<i64: 144, 128>}, {pipeline_mode = #tpu.pipeline_mode<synchronous>, transform_indices = @transform_2, window_bounds = array<i64: 1, 128>}, {pipeline_mode = #tpu.pipeline_mode<synchronous>, transform_indices = @transform_3, window_bounds = array<i64: 1, 128>}, {pipeline_mode = #tpu.pipeline_mode<synchronous>, transform_indices = @transform_4, window_bounds = array<i64: 1, 128>}, {transform_indices = @transform_5, window_bounds = array<i64: 16, 128>}]} {
    %c0 = arith.constant 0 : index
    %c0_0 = arith.constant 0 : index
    %0 = vector.load %arg1[%c0, %c0_0] : memref<16x144xbf16, #tpu.memory_space<vmem>>, vector<16x144xbf16>
    %c0_1 = arith.constant 0 : index
    %c0_2 = arith.constant 0 : index
    %1 = vector.load %arg2[%c0_1, %c0_2] : memref<144x128xbf16, #tpu.memory_space<vmem>>, vector<144x128xbf16>
    %cst = arith.constant dense<0.000000e+00> : vector<16x128xf32>
    %2 = tpu.matmul %0, %1, %cst {dimension_numbers = #tpu.dot_dimension_numbers<[1], [0], [0], [1], [0, 0, 1, 1], [], []>} : vector<16x144xbf16>, vector<144x128xbf16>, vector<16x128xf32> -> vector<16x128xf32>
    %c0_3 = arith.constant 0 : index
    %c0_4 = arith.constant 0 : index
    %3 = vector.load %arg3[%c0_3, %c0_4] : memref<1x128xf32, #tpu.memory_space<vmem>>, vector<1x128xf32>
    %4 = vector.broadcast %3 : vector<1x128xf32> to vector<16x128xf32>
    %5 = arith.mulf %2, %4 : vector<16x128xf32>
    %c0_5 = arith.constant 0 : index
    %c0_6 = arith.constant 0 : index
    %6 = vector.load %arg4[%c0_5, %c0_6] : memref<1x128xf32, #tpu.memory_space<vmem>>, vector<1x128xf32>
    %7 = vector.broadcast %6 : vector<1x128xf32> to vector<16x128xf32>
    %8 = arith.addf %5, %7 : vector<16x128xf32>
    %cst_7 = arith.constant 0.000000e+00 : f32
    %9 = vector.broadcast %cst_7 : f32 to vector<16x128xf32>
    %10 = arith.cmpf ogt, %8, %9 : vector<16x128xf32>
    %c0_8 = arith.constant 0 : index
    %c0_9 = arith.constant 0 : index
    %11 = vector.load %arg5[%c0_8, %c0_9] : memref<1x128xf32, #tpu.memory_space<vmem>>, vector<1x128xf32>
    %12 = vector.broadcast %11 : vector<1x128xf32> to vector<16x128xf32>
    %13 = arith.mulf %12, %8 : vector<16x128xf32>
    %14 = arith.select %10, %8, %13 : vector<16x128xi1>, vector<16x128xf32>
    %15 = arith.truncf %14 : vector<16x128xf32> to vector<16x128xbf16>
    %c0_10 = arith.constant 0 : index
    %c0_11 = arith.constant 0 : index
    %16 = vector.load %arg6[%c0_10, %c0_11] : memref<16x128xbf16, #tpu.memory_space<vmem>>, vector<16x128xbf16>
    tpu.vector_store %arg6[%c0_10, %c0_11], %15 {strides = array<i32>} : memref<16x128xbf16, #tpu.memory_space<vmem>>, vector<16x128xbf16>,
    return
  }
  func.func @transform_0(%arg0: i32) -> (i32, i32) {
    %c0_i32 = arith.constant 0 : i32
    %c0_i32_0 = arith.constant 0 : i32
    return %arg0, %c0_i32 : i32, i32
  }
  func.func @transform_1(%arg0: i32) -> (i32, i32) {
    %c0_i32 = arith.constant 0 : i32
    %c0_i32_0 = arith.constant 0 : i32
    %c0_i32_1 = arith.constant 0 : i32
    return %c0_i32, %c0_i32_0 : i32, i32
  }
  func.func @transform_2(%arg0: i32) -> (i32, i32) {
    %c0_i32 = arith.constant 0 : i32
    %c0_i32_0 = arith.constant 0 : i32
    %c0_i32_1 = arith.constant 0 : i32
    return %c0_i32, %c0_i32_0 : i32, i32
  }
  func.func @transform_3(%arg0: i32) -> (i32, i32) {
    %c0_i32 = arith.constant 0 : i32
    %c0_i32_0 = arith.constant 0 : i32
    %c0_i32_1 = arith.constant 0 : i32
    return %c0_i32, %c0_i32_0 : i32, i32
  }
  func.func @transform_4(%arg0: i32) -> (i32, i32) {
    %c0_i32 = arith.constant 0 : i32
    %c0_i32_0 = arith.constant 0 : i32
    %c0_i32_1 = arith.constant 0 : i32
    return %c0_i32, %c0_i32_0 : i32, i32
  }
  func.func @transform_5(%arg0: i32) -> (i32, i32) {
    %c0_i32 = arith.constant 0 : i32
    %c0_i32_0 = arith.constant 0 : i32
    return %arg0, %c0_i32 : i32, i32
  }
}

module attributes {stable_mosaic.version = 11 : i64} {
  func.func @kernel(%arg0: i32, %arg1: memref<16x288xbf16, #tpu.memory_space<vmem>>, %arg2: memref<288x128xbf16, #tpu.memory_space<vmem>>, %arg3: memref<1x128xf32, #tpu.memory_space<vmem>>, %arg4: memref<1x128xf32, #tpu.memory_space<vmem>>, %arg5: memref<1x128xf32, #tpu.memory_space<vmem>>, %arg6: memref<16x128xbf16, #tpu.memory_space<vmem>>) attributes {dimension_semantics = [#tpu.dimension_semantics<parallel>], iteration_bounds = array<i64: 2>, scalar_prefetch = 0 : i64, scratch_operands = 0 : i64, tpu.core_type = #tpu.core_type<tc>, window_params = [{transform_indices = @transform_0, window_bounds = array<i64: 16, 288>}, {pipeline_mode = #tpu.pipeline_mode<synchronous>, transform_indices = @transform_1, window_bounds = array<i64: 288, 128>}, {pipeline_mode = #tpu.pipeline_mode<synchronous>, transform_indices = @transform_2, window_bounds = array<i64: 1, 128>}, {pipeline_mode = #tpu.pipeline_mode<synchronous>, transform_indices = @transform_3, window_bounds = array<i64: 1, 128>}, {pipeline_mode = #tpu.pipeline_mode<synchronous>, transform_indices = @transform_4, window_bounds = array<i64: 1, 128>}, {transform_indices = @transform_5, window_bounds = array<i64: 16, 128>}]} {
    %c0 = arith.constant 0 : index
    %c0_0 = arith.constant 0 : index
    %0 = vector.load %arg1[%c0, %c0_0] : memref<16x288xbf16, #tpu.memory_space<vmem>>, vector<16x288xbf16>
    %c0_1 = arith.constant 0 : index
    %c0_2 = arith.constant 0 : index
    %1 = vector.load %arg2[%c0_1, %c0_2] : memref<288x128xbf16, #tpu.memory_space<vmem>>, vector<288x128xbf16>
    %cst = arith.constant dense<0.000000e+00> : vector<16x128xf32>
    %2 = tpu.matmul %0, %1, %cst {dimension_numbers = #tpu.dot_dimension_numbers<[1], [0], [0], [1], [0, 0, 1, 1], [], []>} : vector<16x288xbf16>, vector<288x128xbf16>, vector<16x128xf32> -> vector<16x128xf32>
    %c0_3 = arith.constant 0 : index
    %c0_4 = arith.constant 0 : index
    %3 = vector.load %arg3[%c0_3, %c0_4] : memref<1x128xf32, #tpu.memory_space<vmem>>, vector<1x128xf32>
    %4 = vector.broadcast %3 : vector<1x128xf32> to vector<16x128xf32>
    %5 = arith.mulf %2, %4 : vector<16x128xf32>
    %c0_5 = arith.constant 0 : index
    %c0_6 = arith.constant 0 : index
    %6 = vector.load %arg4[%c0_5, %c0_6] : memref<1x128xf32, #tpu.memory_space<vmem>>, vector<1x128xf32>
    %7 = vector.broadcast %6 : vector<1x128xf32> to vector<16x128xf32>
    %8 = arith.addf %5, %7 : vector<16x128xf32>
    %cst_7 = arith.constant 0.000000e+00 : f32
    %9 = vector.broadcast %cst_7 : f32 to vector<16x128xf32>
    %10 = arith.cmpf ogt, %8, %9 : vector<16x128xf32>
    %c0_8 = arith.constant 0 : index
    %c0_9 = arith.constant 0 : index
    %11 = vector.load %arg5[%c0_8, %c0_9] : memref<1x128xf32, #tpu.memory_space<vmem>>, vector<1x128xf32>
    %12 = vector.broadcast %11 : vector<1x128xf32> to vector<16x128xf32>
    %13 = arith.mulf %12, %8 : vector<16x128xf32>
    %14 = arith.select %10, %8, %13 : vector<16x128xi1>, vector<16x128xf32>
    %15 = arith.truncf %14 : vector<16x128xf32> to vector<16x128xbf16>
    %c0_10 = arith.constant 0 : index
    %c0_11 = arith.constant 0 : index
    %16 = vector.load %arg6[%c0_10, %c0_11] : memref<16x128xbf16, #tpu.memory_space<vmem>>, vector<16x128xbf16>
    tpu.vector_store %arg6[%c0_10, %c0_11], %15 {strides = array<i32>} : memref<16x128xbf16, #tpu.memory_space<vmem>>, vector<16x128xbf16>,
    return
  }
  func.func @transform_0(%arg0: i32) -> (i32, i32) {
    %c0_i32 = arith.constant 0 : i32
    %c0_i32_0 = arith.constant 0 : i32
    return %arg0, %c0_i32 : i32, i32
  }
  func.func @transform_1(%arg0: i32) -> (i32, i32) {
    %c0_i32 = arith.constant 0 : i32
    %c0_i32_0 = arith.constant 0 : i32
    %c0_i32_1 = arith.constant 0 : i32
    return %c0_i32, %c0_i32_0 : i32, i32
  }
  func.func @transform_2(%arg0: i32) -> (i32, i32) {
    %c0_i32 = arith.constant 0 : i32
    %c0_i32_0 = arith.constant 0 : i32
    %c0_i32_1 = arith.constant 0 : i32
    return %c0_i32, %c0_i32_0 : i32, i32
  }
  func.func @transform_3(%arg0: i32) -> (i32, i32) {
    %c0_i32 = arith.constant 0 : i32
    %c0_i32_0 = arith.constant 0 : i32
    %c0_i32_1 = arith.constant 0 : i32
    return %c0_i32, %c0_i32_0 : i32, i32
  }
  func.func @transform_4(%arg0: i32) -> (i32, i32) {
    %c0_i32 = arith.constant 0 : i32
    %c0_i32_0 = arith.constant 0 : i32
    %c0_i32_1 = arith.constant 0 : i32
    return %c0_i32, %c0_i32_0 : i32, i32
  }
  func.func @transform_5(%arg0: i32) -> (i32, i32) {
    %c0_i32 = arith.constant 0 : i32
    %c0_i32_0 = arith.constant 0 : i32
    return %arg0, %c0_i32 : i32, i32
  }
}

module attributes {stable_mosaic.version = 11 : i64} {
  func.func @kernel(%arg0: i32, %arg1: memref<8x288xbf16, #tpu.memory_space<vmem>>, %arg2: memref<288x128xbf16, #tpu.memory_space<vmem>>, %arg3: memref<1x128xf32, #tpu.memory_space<vmem>>, %arg4: memref<1x128xf32, #tpu.memory_space<vmem>>, %arg5: memref<1x128xf32, #tpu.memory_space<vmem>>, %arg6: memref<8x128xbf16, #tpu.memory_space<vmem>>) attributes {dimension_semantics = [#tpu.dimension_semantics<parallel>], iteration_bounds = array<i64: 1>, scalar_prefetch = 0 : i64, scratch_operands = 0 : i64, tpu.core_type = #tpu.core_type<tc>, window_params = [{transform_indices = @transform_0, window_bounds = array<i64: 8, 288>}, {pipeline_mode = #tpu.pipeline_mode<synchronous>, transform_indices = @transform_1, window_bounds = array<i64: 288, 128>}, {pipeline_mode = #tpu.pipeline_mode<synchronous>, transform_indices = @transform_2, window_bounds = array<i64: 1, 128>}, {pipeline_mode = #tpu.pipeline_mode<synchronous>, transform_indices = @transform_3, window_bounds = array<i64: 1, 128>}, {pipeline_mode = #tpu.pipeline_mode<synchronous>, transform_indices = @transform_4, window_bounds = array<i64: 1, 128>}, {transform_indices = @transform_5, window_bounds = array<i64: 8, 128>}]} {
    %c0 = arith.constant 0 : index
    %c0_0 = arith.constant 0 : index
    %0 = vector.load %arg1[%c0, %c0_0] : memref<8x288xbf16, #tpu.memory_space<vmem>>, vector<8x288xbf16>
    %c0_1 = arith.constant 0 : index
    %c0_2 = arith.constant 0 : index
    %1 = vector.load %arg2[%c0_1, %c0_2] : memref<288x128xbf16, #tpu.memory_space<vmem>>, vector<288x128xbf16>
    %cst = arith.constant dense<0.000000e+00> : vector<8x128xf32>
    %2 = tpu.matmul %0, %1, %cst {dimension_numbers = #tpu.dot_dimension_numbers<[1], [0], [0], [1], [0, 0, 1, 1], [], []>} : vector<8x288xbf16>, vector<288x128xbf16>, vector<8x128xf32> -> vector<8x128xf32>
    %c0_3 = arith.constant 0 : index
    %c0_4 = arith.constant 0 : index
    %3 = vector.load %arg3[%c0_3, %c0_4] : memref<1x128xf32, #tpu.memory_space<vmem>>, vector<1x128xf32>
    %4 = vector.broadcast %3 : vector<1x128xf32> to vector<8x128xf32>
    %5 = arith.mulf %2, %4 : vector<8x128xf32>
    %c0_5 = arith.constant 0 : index
    %c0_6 = arith.constant 0 : index
    %6 = vector.load %arg4[%c0_5, %c0_6] : memref<1x128xf32, #tpu.memory_space<vmem>>, vector<1x128xf32>
    %7 = vector.broadcast %6 : vector<1x128xf32> to vector<8x128xf32>
    %8 = arith.addf %5, %7 : vector<8x128xf32>
    %cst_7 = arith.constant 0.000000e+00 : f32
    %9 = vector.broadcast %cst_7 : f32 to vector<8x128xf32>
    %10 = arith.cmpf ogt, %8, %9 : vector<8x128xf32>
    %c0_8 = arith.constant 0 : index
    %c0_9 = arith.constant 0 : index
    %11 = vector.load %arg5[%c0_8, %c0_9] : memref<1x128xf32, #tpu.memory_space<vmem>>, vector<1x128xf32>
    %12 = vector.broadcast %11 : vector<1x128xf32> to vector<8x128xf32>
    %13 = arith.mulf %12, %8 : vector<8x128xf32>
    %14 = arith.select %10, %8, %13 : vector<8x128xi1>, vector<8x128xf32>
    %15 = arith.truncf %14 : vector<8x128xf32> to vector<8x128xbf16>
    %c0_10 = arith.constant 0 : index
    %c0_11 = arith.constant 0 : index
    %16 = vector.load %arg6[%c0_10, %c0_11] : memref<8x128xbf16, #tpu.memory_space<vmem>>, vector<8x128xbf16>
    tpu.vector_store %arg6[%c0_10, %c0_11], %15 {strides = array<i32>} : memref<8x128xbf16, #tpu.memory_space<vmem>>, vector<8x128xbf16>,
    return
  }
  func.func @transform_0(%arg0: i32) -> (i32, i32) {
    %c0_i32 = arith.constant 0 : i32
    %c0_i32_0 = arith.constant 0 : i32
    return %arg0, %c0_i32 : i32, i32
  }
  func.func @transform_1(%arg0: i32) -> (i32, i32) {
    %c0_i32 = arith.constant 0 : i32
    %c0_i32_0 = arith.constant 0 : i32
    %c0_i32_1 = arith.constant 0 : i32
    return %c0_i32, %c0_i32_0 : i32, i32
  }
  func.func @transform_2(%arg0: i32) -> (i32, i32) {
    %c0_i32 = arith.constant 0 : i32
    %c0_i32_0 = arith.constant 0 : i32
    %c0_i32_1 = arith.constant 0 : i32
    return %c0_i32, %c0_i32_0 : i32, i32
  }
  func.func @transform_3(%arg0: i32) -> (i32, i32) {
    %c0_i32 = arith.constant 0 : i32
    %c0_i32_0 = arith.constant 0 : i32
    %c0_i32_1 = arith.constant 0 : i32
    return %c0_i32, %c0_i32_0 : i32, i32
  }
  func.func @transform_4(%arg0: i32) -> (i32, i32) {
    %c0_i32 = arith.constant 0 : i32
    %c0_i32_0 = arith.constant 0 : i32
    %c0_i32_1 = arith.constant 0 : i32
    return %c0_i32, %c0_i32_0 : i32, i32
  }
  func.func @transform_5(%arg0: i32) -> (i32, i32) {
    %c0_i32 = arith.constant 0 : i32
    %c0_i32_0 = arith.constant 0 : i32
    return %arg0, %c0_i32 : i32, i32
  }
}

module attributes {stable_mosaic.version = 11 : i64} {
  func.func @kernel(%arg0: i32, %arg1: memref<8x576xbf16, #tpu.memory_space<vmem>>, %arg2: memref<576x128xbf16, #tpu.memory_space<vmem>>, %arg3: memref<1x128xf32, #tpu.memory_space<vmem>>, %arg4: memref<1x128xf32, #tpu.memory_space<vmem>>, %arg5: memref<1x128xf32, #tpu.memory_space<vmem>>, %arg6: memref<8x128xbf16, #tpu.memory_space<vmem>>) attributes {dimension_semantics = [#tpu.dimension_semantics<parallel>], iteration_bounds = array<i64: 1>, scalar_prefetch = 0 : i64, scratch_operands = 0 : i64, tpu.core_type = #tpu.core_type<tc>, window_params = [{transform_indices = @transform_0, window_bounds = array<i64: 8, 576>}, {pipeline_mode = #tpu.pipeline_mode<synchronous>, transform_indices = @transform_1, window_bounds = array<i64: 576, 128>}, {pipeline_mode = #tpu.pipeline_mode<synchronous>, transform_indices = @transform_2, window_bounds = array<i64: 1, 128>}, {pipeline_mode = #tpu.pipeline_mode<synchronous>, transform_indices = @transform_3, window_bounds = array<i64: 1, 128>}, {pipeline_mode = #tpu.pipeline_mode<synchronous>, transform_indices = @transform_4, window_bounds = array<i64: 1, 128>}, {transform_indices = @transform_5, window_bounds = array<i64: 8, 128>}]} {
    %c0 = arith.constant 0 : index
    %c0_0 = arith.constant 0 : index
    %0 = vector.load %arg1[%c0, %c0_0] : memref<8x576xbf16, #tpu.memory_space<vmem>>, vector<8x576xbf16>
    %c0_1 = arith.constant 0 : index
    %c0_2 = arith.constant 0 : index
    %1 = vector.load %arg2[%c0_1, %c0_2] : memref<576x128xbf16, #tpu.memory_space<vmem>>, vector<576x128xbf16>
    %cst = arith.constant dense<0.000000e+00> : vector<8x128xf32>
    %2 = tpu.matmul %0, %1, %cst {dimension_numbers = #tpu.dot_dimension_numbers<[1], [0], [0], [1], [0, 0, 1, 1], [], []>} : vector<8x576xbf16>, vector<576x128xbf16>, vector<8x128xf32> -> vector<8x128xf32>
    %c0_3 = arith.constant 0 : index
    %c0_4 = arith.constant 0 : index
    %3 = vector.load %arg3[%c0_3, %c0_4] : memref<1x128xf32, #tpu.memory_space<vmem>>, vector<1x128xf32>
    %4 = vector.broadcast %3 : vector<1x128xf32> to vector<8x128xf32>
    %5 = arith.mulf %2, %4 : vector<8x128xf32>
    %c0_5 = arith.constant 0 : index
    %c0_6 = arith.constant 0 : index
    %6 = vector.load %arg4[%c0_5, %c0_6] : memref<1x128xf32, #tpu.memory_space<vmem>>, vector<1x128xf32>
    %7 = vector.broadcast %6 : vector<1x128xf32> to vector<8x128xf32>
    %8 = arith.addf %5, %7 : vector<8x128xf32>
    %cst_7 = arith.constant 0.000000e+00 : f32
    %9 = vector.broadcast %cst_7 : f32 to vector<8x128xf32>
    %10 = arith.cmpf ogt, %8, %9 : vector<8x128xf32>
    %c0_8 = arith.constant 0 : index
    %c0_9 = arith.constant 0 : index
    %11 = vector.load %arg5[%c0_8, %c0_9] : memref<1x128xf32, #tpu.memory_space<vmem>>, vector<1x128xf32>
    %12 = vector.broadcast %11 : vector<1x128xf32> to vector<8x128xf32>
    %13 = arith.mulf %12, %8 : vector<8x128xf32>
    %14 = arith.select %10, %8, %13 : vector<8x128xi1>, vector<8x128xf32>
    %15 = arith.truncf %14 : vector<8x128xf32> to vector<8x128xbf16>
    %c0_10 = arith.constant 0 : index
    %c0_11 = arith.constant 0 : index
    %16 = vector.load %arg6[%c0_10, %c0_11] : memref<8x128xbf16, #tpu.memory_space<vmem>>, vector<8x128xbf16>
    tpu.vector_store %arg6[%c0_10, %c0_11], %15 {strides = array<i32>} : memref<8x128xbf16, #tpu.memory_space<vmem>>, vector<8x128xbf16>,
    return
  }
  func.func @transform_0(%arg0: i32) -> (i32, i32) {
    %c0_i32 = arith.constant 0 : i32
    %c0_i32_0 = arith.constant 0 : i32
    return %arg0, %c0_i32 : i32, i32
  }
  func.func @transform_1(%arg0: i32) -> (i32, i32) {
    %c0_i32 = arith.constant 0 : i32
    %c0_i32_0 = arith.constant 0 : i32
    %c0_i32_1 = arith.constant 0 : i32
    return %c0_i32, %c0_i32_0 : i32, i32
  }
  func.func @transform_2(%arg0: i32) -> (i32, i32) {
    %c0_i32 = arith.constant 0 : i32
    %c0_i32_0 = arith.constant 0 : i32
    %c0_i32_1 = arith.constant 0 : i32
    return %c0_i32, %c0_i32_0 : i32, i32
  }
  func.func @transform_3(%arg0: i32) -> (i32, i32) {
    %c0_i32 = arith.constant 0 : i32
    %c0_i32_0 = arith.constant 0 : i32
    %c0_i32_1 = arith.constant 0 : i32
    return %c0_i32, %c0_i32_0 : i32, i32
  }
  func.func @transform_4(%arg0: i32) -> (i32, i32) {
    %c0_i32 = arith.constant 0 : i32
    %c0_i32_0 = arith.constant 0 : i32
    %c0_i32_1 = arith.constant 0 : i32
    return %c0_i32, %c0_i32_0 : i32, i32
  }
  func.func @transform_5(%arg0: i32) -> (i32, i32) {
    %c0_i32 = arith.constant 0 : i32
    %c0_i32_0 = arith.constant 0 : i32
    return %arg0, %c0_i32 : i32, i32
  }
}

module attributes {stable_mosaic.version = 11 : i64} {
  func.func @kernel(%arg0: i32, %arg1: memref<8x576xbf16, #tpu.memory_space<vmem>>, %arg2: memref<576x128xbf16, #tpu.memory_space<vmem>>, %arg3: memref<1x128xf32, #tpu.memory_space<vmem>>, %arg4: memref<1x128xf32, #tpu.memory_space<vmem>>, %arg5: memref<1x128xf32, #tpu.memory_space<vmem>>, %arg6: memref<8x128xbf16, #tpu.memory_space<vmem>>, %arg7: memref<8x128xbf16, #tpu.memory_space<vmem>>) attributes {dimension_semantics = [#tpu.dimension_semantics<parallel>], iteration_bounds = array<i64: 1>, scalar_prefetch = 0 : i64, scratch_operands = 0 : i64, tpu.core_type = #tpu.core_type<tc>, window_params = [{transform_indices = @transform_0, window_bounds = array<i64: 8, 576>}, {pipeline_mode = #tpu.pipeline_mode<synchronous>, transform_indices = @transform_1, window_bounds = array<i64: 576, 128>}, {pipeline_mode = #tpu.pipeline_mode<synchronous>, transform_indices = @transform_2, window_bounds = array<i64: 1, 128>}, {pipeline_mode = #tpu.pipeline_mode<synchronous>, transform_indices = @transform_3, window_bounds = array<i64: 1, 128>}, {pipeline_mode = #tpu.pipeline_mode<synchronous>, transform_indices = @transform_4, window_bounds = array<i64: 1, 128>}, {transform_indices = @transform_5, window_bounds = array<i64: 8, 128>}, {transform_indices = @transform_6, window_bounds = array<i64: 8, 128>}]} {
    %c0 = arith.constant 0 : index
    %c0_0 = arith.constant 0 : index
    %0 = vector.load %arg1[%c0, %c0_0] : memref<8x576xbf16, #tpu.memory_space<vmem>>, vector<8x576xbf16>
    %c0_1 = arith.constant 0 : index
    %c0_2 = arith.constant 0 : index
    %1 = vector.load %arg2[%c0_1, %c0_2] : memref<576x128xbf16, #tpu.memory_space<vmem>>, vector<576x128xbf16>
    %cst = arith.constant dense<0.000000e+00> : vector<8x128xf32>
    %2 = tpu.matmul %0, %1, %cst {dimension_numbers = #tpu.dot_dimension_numbers<[1], [0], [0], [1], [0, 0, 1, 1], [], []>} : vector<8x576xbf16>, vector<576x128xbf16>, vector<8x128xf32> -> vector<8x128xf32>
    %c0_3 = arith.constant 0 : index
    %c0_4 = arith.constant 0 : index
    %3 = vector.load %arg3[%c0_3, %c0_4] : memref<1x128xf32, #tpu.memory_space<vmem>>, vector<1x128xf32>
    %4 = vector.broadcast %3 : vector<1x128xf32> to vector<8x128xf32>
    %5 = arith.mulf %2, %4 : vector<8x128xf32>
    %c0_5 = arith.constant 0 : index
    %c0_6 = arith.constant 0 : index
    %6 = vector.load %arg4[%c0_5, %c0_6] : memref<1x128xf32, #tpu.memory_space<vmem>>, vector<1x128xf32>
    %7 = vector.broadcast %6 : vector<1x128xf32> to vector<8x128xf32>
    %8 = arith.addf %5, %7 : vector<8x128xf32>
    %c0_7 = arith.constant 0 : index
    %c0_8 = arith.constant 0 : index
    %9 = vector.load %arg6[%c0_7, %c0_8] : memref<8x128xbf16, #tpu.memory_space<vmem>>, vector<8x128xbf16>
    %10 = arith.extf %9 : vector<8x128xbf16> to vector<8x128xf32>
    %11 = arith.addf %8, %10 : vector<8x128xf32>
    %cst_9 = arith.constant 0.000000e+00 : f32
    %12 = vector.broadcast %cst_9 : f32 to vector<8x128xf32>
    %13 = arith.cmpf ogt, %11, %12 : vector<8x128xf32>
    %c0_10 = arith.constant 0 : index
    %c0_11 = arith.constant 0 : index
    %14 = vector.load %arg5[%c0_10, %c0_11] : memref<1x128xf32, #tpu.memory_space<vmem>>, vector<1x128xf32>
    %15 = vector.broadcast %14 : vector<1x128xf32> to vector<8x128xf32>
    %16 = arith.mulf %15, %11 : vector<8x128xf32>
    %17 = arith.select %13, %11, %16 : vector<8x128xi1>, vector<8x128xf32>
    %18 = arith.truncf %17 : vector<8x128xf32> to vector<8x128xbf16>
    %c0_12 = arith.constant 0 : index
    %c0_13 = arith.constant 0 : index
    %19 = vector.load %arg7[%c0_12, %c0_13] : memref<8x128xbf16, #tpu.memory_space<vmem>>, vector<8x128xbf16>
    tpu.vector_store %arg7[%c0_12, %c0_13], %18 {strides = array<i32>} : memref<8x128xbf16, #tpu.memory_space<vmem>>, vector<8x128xbf16>,
    return
  }
  func.func @transform_0(%arg0: i32) -> (i32, i32) {
    %c0_i32 = arith.constant 0 : i32
    %c0_i32_0 = arith.constant 0 : i32
    return %arg0, %c0_i32 : i32, i32
  }
  func.func @transform_1(%arg0: i32) -> (i32, i32) {
    %c0_i32 = arith.constant 0 : i32
    %c0_i32_0 = arith.constant 0 : i32
    %c0_i32_1 = arith.constant 0 : i32
    return %c0_i32, %c0_i32_0 : i32, i32
  }
  func.func @transform_2(%arg0: i32) -> (i32, i32) {
    %c0_i32 = arith.constant 0 : i32
    %c0_i32_0 = arith.constant 0 : i32
    %c0_i32_1 = arith.constant 0 : i32
    return %c0_i32, %c0_i32_0 : i32, i32
  }
  func.func @transform_3(%arg0: i32) -> (i32, i32) {
    %c0_i32 = arith.constant 0 : i32
    %c0_i32_0 = arith.constant 0 : i32
    %c0_i32_1 = arith.constant 0 : i32
    return %c0_i32, %c0_i32_0 : i32, i32
  }
  func.func @transform_4(%arg0: i32) -> (i32, i32) {
    %c0_i32 = arith.constant 0 : i32
    %c0_i32_0 = arith.constant 0 : i32
    %c0_i32_1 = arith.constant 0 : i32
    return %c0_i32, %c0_i32_0 : i32, i32
  }
  func.func @transform_5(%arg0: i32) -> (i32, i32) {
    %c0_i32 = arith.constant 0 : i32
    %c0_i32_0 = arith.constant 0 : i32
    return %arg0, %c0_i32 : i32, i32
  }
  func.func @transform_6(%arg0: i32) -> (i32, i32) {
    %c0_i32 = arith.constant 0 : i32
    %c0_i32_0 = arith.constant 0 : i32
    return %arg0, %c0_i32 : i32, i32
  }
}

module attributes {stable_mosaic.version = 11 : i64} {
  func.func @kernel(%arg0: i32, %arg1: memref<16x576xbf16, #tpu.memory_space<vmem>>, %arg2: memref<576x128xbf16, #tpu.memory_space<vmem>>, %arg3: memref<1x128xf32, #tpu.memory_space<vmem>>, %arg4: memref<1x128xf32, #tpu.memory_space<vmem>>, %arg5: memref<1x128xf32, #tpu.memory_space<vmem>>, %arg6: memref<16x128xbf16, #tpu.memory_space<vmem>>) attributes {dimension_semantics = [#tpu.dimension_semantics<parallel>], iteration_bounds = array<i64: 2>, scalar_prefetch = 0 : i64, scratch_operands = 0 : i64, tpu.core_type = #tpu.core_type<tc>, window_params = [{transform_indices = @transform_0, window_bounds = array<i64: 16, 576>}, {pipeline_mode = #tpu.pipeline_mode<synchronous>, transform_indices = @transform_1, window_bounds = array<i64: 576, 128>}, {pipeline_mode = #tpu.pipeline_mode<synchronous>, transform_indices = @transform_2, window_bounds = array<i64: 1, 128>}, {pipeline_mode = #tpu.pipeline_mode<synchronous>, transform_indices = @transform_3, window_bounds = array<i64: 1, 128>}, {pipeline_mode = #tpu.pipeline_mode<synchronous>, transform_indices = @transform_4, window_bounds = array<i64: 1, 128>}, {transform_indices = @transform_5, window_bounds = array<i64: 16, 128>}]} {
    %c0 = arith.constant 0 : index
    %c0_0 = arith.constant 0 : index
    %0 = vector.load %arg1[%c0, %c0_0] : memref<16x576xbf16, #tpu.memory_space<vmem>>, vector<16x576xbf16>
    %c0_1 = arith.constant 0 : index
    %c0_2 = arith.constant 0 : index
    %1 = vector.load %arg2[%c0_1, %c0_2] : memref<576x128xbf16, #tpu.memory_space<vmem>>, vector<576x128xbf16>
    %cst = arith.constant dense<0.000000e+00> : vector<16x128xf32>
    %2 = tpu.matmul %0, %1, %cst {dimension_numbers = #tpu.dot_dimension_numbers<[1], [0], [0], [1], [0, 0, 1, 1], [], []>} : vector<16x576xbf16>, vector<576x128xbf16>, vector<16x128xf32> -> vector<16x128xf32>
    %c0_3 = arith.constant 0 : index
    %c0_4 = arith.constant 0 : index
    %3 = vector.load %arg3[%c0_3, %c0_4] : memref<1x128xf32, #tpu.memory_space<vmem>>, vector<1x128xf32>
    %4 = vector.broadcast %3 : vector<1x128xf32> to vector<16x128xf32>
    %5 = arith.mulf %2, %4 : vector<16x128xf32>
    %c0_5 = arith.constant 0 : index
    %c0_6 = arith.constant 0 : index
    %6 = vector.load %arg4[%c0_5, %c0_6] : memref<1x128xf32, #tpu.memory_space<vmem>>, vector<1x128xf32>
    %7 = vector.broadcast %6 : vector<1x128xf32> to vector<16x128xf32>
    %8 = arith.addf %5, %7 : vector<16x128xf32>
    %cst_7 = arith.constant 0.000000e+00 : f32
    %9 = vector.broadcast %cst_7 : f32 to vector<16x128xf32>
    %10 = arith.cmpf ogt, %8, %9 : vector<16x128xf32>
    %c0_8 = arith.constant 0 : index
    %c0_9 = arith.constant 0 : index
    %11 = vector.load %arg5[%c0_8, %c0_9] : memref<1x128xf32, #tpu.memory_space<vmem>>, vector<1x128xf32>
    %12 = vector.broadcast %11 : vector<1x128xf32> to vector<16x128xf32>
    %13 = arith.mulf %12, %8 : vector<16x128xf32>
    %14 = arith.select %10, %8, %13 : vector<16x128xi1>, vector<16x128xf32>
    %15 = arith.truncf %14 : vector<16x128xf32> to vector<16x128xbf16>
    %c0_10 = arith.constant 0 : index
    %c0_11 = arith.constant 0 : index
    %16 = vector.load %arg6[%c0_10, %c0_11] : memref<16x128xbf16, #tpu.memory_space<vmem>>, vector<16x128xbf16>
    tpu.vector_store %arg6[%c0_10, %c0_11], %15 {strides = array<i32>} : memref<16x128xbf16, #tpu.memory_space<vmem>>, vector<16x128xbf16>,
    return
  }
  func.func @transform_0(%arg0: i32) -> (i32, i32) {
    %c0_i32 = arith.constant 0 : i32
    %c0_i32_0 = arith.constant 0 : i32
    return %arg0, %c0_i32 : i32, i32
  }
  func.func @transform_1(%arg0: i32) -> (i32, i32) {
    %c0_i32 = arith.constant 0 : i32
    %c0_i32_0 = arith.constant 0 : i32
    %c0_i32_1 = arith.constant 0 : i32
    return %c0_i32, %c0_i32_0 : i32, i32
  }
  func.func @transform_2(%arg0: i32) -> (i32, i32) {
    %c0_i32 = arith.constant 0 : i32
    %c0_i32_0 = arith.constant 0 : i32
    %c0_i32_1 = arith.constant 0 : i32
    return %c0_i32, %c0_i32_0 : i32, i32
  }
  func.func @transform_3(%arg0: i32) -> (i32, i32) {
    %c0_i32 = arith.constant 0 : i32
    %c0_i32_0 = arith.constant 0 : i32
    %c0_i32_1 = arith.constant 0 : i32
    return %c0_i32, %c0_i32_0 : i32, i32
  }
  func.func @transform_4(%arg0: i32) -> (i32, i32) {
    %c0_i32 = arith.constant 0 : i32
    %c0_i32_0 = arith.constant 0 : i32
    %c0_i32_1 = arith.constant 0 : i32
    return %c0_i32, %c0_i32_0 : i32, i32
  }
  func.func @transform_5(%arg0: i32) -> (i32, i32) {
    %c0_i32 = arith.constant 0 : i32
    %c0_i32_0 = arith.constant 0 : i32
    return %arg0, %c0_i32 : i32, i32
  }
}

module attributes {stable_mosaic.version = 11 : i64} {
  func.func @kernel(%arg0: i32, %arg1: memref<16x576xbf16, #tpu.memory_space<vmem>>, %arg2: memref<16x288xbf16, #tpu.memory_space<vmem>>, %arg3: memref<576x128xbf16, #tpu.memory_space<vmem>>, %arg4: memref<288x128xbf16, #tpu.memory_space<vmem>>, %arg5: memref<1x128xf32, #tpu.memory_space<vmem>>, %arg6: memref<1x128xf32, #tpu.memory_space<vmem>>, %arg7: memref<1x128xf32, #tpu.memory_space<vmem>>, %arg8: memref<16x128xbf16, #tpu.memory_space<vmem>>) attributes {dimension_semantics = [#tpu.dimension_semantics<parallel>], iteration_bounds = array<i64: 2>, scalar_prefetch = 0 : i64, scratch_operands = 0 : i64, tpu.core_type = #tpu.core_type<tc>, window_params = [{transform_indices = @transform_0, window_bounds = array<i64: 16, 576>}, {transform_indices = @transform_1, window_bounds = array<i64: 16, 288>}, {pipeline_mode = #tpu.pipeline_mode<synchronous>, transform_indices = @transform_2, window_bounds = array<i64: 576, 128>}, {pipeline_mode = #tpu.pipeline_mode<synchronous>, transform_indices = @transform_3, window_bounds = array<i64: 288, 128>}, {pipeline_mode = #tpu.pipeline_mode<synchronous>, transform_indices = @transform_4, window_bounds = array<i64: 1, 128>}, {pipeline_mode = #tpu.pipeline_mode<synchronous>, transform_indices = @transform_5, window_bounds = array<i64: 1, 128>}, {pipeline_mode = #tpu.pipeline_mode<synchronous>, transform_indices = @transform_6, window_bounds = array<i64: 1, 128>}, {transform_indices = @transform_7, window_bounds = array<i64: 16, 128>}]} {
    %c0 = arith.constant 0 : index
    %c0_0 = arith.constant 0 : index
    %0 = vector.load %arg1[%c0, %c0_0] : memref<16x576xbf16, #tpu.memory_space<vmem>>, vector<16x576xbf16>
    %c0_1 = arith.constant 0 : index
    %c0_2 = arith.constant 0 : index
    %1 = vector.load %arg3[%c0_1, %c0_2] : memref<576x128xbf16, #tpu.memory_space<vmem>>, vector<576x128xbf16>
    %cst = arith.constant dense<0.000000e+00> : vector<16x128xf32>
    %2 = tpu.matmul %0, %1, %cst {dimension_numbers = #tpu.dot_dimension_numbers<[1], [0], [0], [1], [0, 0, 1, 1], [], []>} : vector<16x576xbf16>, vector<576x128xbf16>, vector<16x128xf32> -> vector<16x128xf32>
    %c0_3 = arith.constant 0 : index
    %c0_4 = arith.constant 0 : index
    %3 = vector.load %arg2[%c0_3, %c0_4] : memref<16x288xbf16, #tpu.memory_space<vmem>>, vector<16x288xbf16>
    %c0_5 = arith.constant 0 : index
    %c0_6 = arith.constant 0 : index
    %4 = vector.load %arg4[%c0_5, %c0_6] : memref<288x128xbf16, #tpu.memory_space<vmem>>, vector<288x128xbf16>
    %cst_7 = arith.constant dense<0.000000e+00> : vector<16x128xf32>
    %5 = tpu.matmul %3, %4, %cst_7 {dimension_numbers = #tpu.dot_dimension_numbers<[1], [0], [0], [1], [0, 0, 1, 1], [], []>} : vector<16x288xbf16>, vector<288x128xbf16>, vector<16x128xf32> -> vector<16x128xf32>
    %6 = arith.addf %2, %5 : vector<16x128xf32>
    %c0_8 = arith.constant 0 : index
    %c0_9 = arith.constant 0 : index
    %7 = vector.load %arg5[%c0_8, %c0_9] : memref<1x128xf32, #tpu.memory_space<vmem>>, vector<1x128xf32>
    %8 = vector.broadcast %7 : vector<1x128xf32> to vector<16x128xf32>
    %9 = arith.mulf %6, %8 : vector<16x128xf32>
    %c0_10 = arith.constant 0 : index
    %c0_11 = arith.constant 0 : index
    %10 = vector.load %arg6[%c0_10, %c0_11] : memref<1x128xf32, #tpu.memory_space<vmem>>, vector<1x128xf32>
    %11 = vector.broadcast %10 : vector<1x128xf32> to vector<16x128xf32>
    %12 = arith.addf %9, %11 : vector<16x128xf32>
    %cst_12 = arith.constant 0.000000e+00 : f32
    %13 = vector.broadcast %cst_12 : f32 to vector<16x128xf32>
    %14 = arith.cmpf ogt, %12, %13 : vector<16x128xf32>
    %c0_13 = arith.constant 0 : index
    %c0_14 = arith.constant 0 : index
    %15 = vector.load %arg7[%c0_13, %c0_14] : memref<1x128xf32, #tpu.memory_space<vmem>>, vector<1x128xf32>
    %16 = vector.broadcast %15 : vector<1x128xf32> to vector<16x128xf32>
    %17 = arith.mulf %16, %12 : vector<16x128xf32>
    %18 = arith.select %14, %12, %17 : vector<16x128xi1>, vector<16x128xf32>
    %19 = arith.truncf %18 : vector<16x128xf32> to vector<16x128xbf16>
    %c0_15 = arith.constant 0 : index
    %c0_16 = arith.constant 0 : index
    %20 = vector.load %arg8[%c0_15, %c0_16] : memref<16x128xbf16, #tpu.memory_space<vmem>>, vector<16x128xbf16>
    tpu.vector_store %arg8[%c0_15, %c0_16], %19 {strides = array<i32>} : memref<16x128xbf16, #tpu.memory_space<vmem>>, vector<16x128xbf16>,
    return
  }
  func.func @transform_0(%arg0: i32) -> (i32, i32) {
    %c0_i32 = arith.constant 0 : i32
    %c0_i32_0 = arith.constant 0 : i32
    return %arg0, %c0_i32 : i32, i32
  }
  func.func @transform_1(%arg0: i32) -> (i32, i32) {
    %c0_i32 = arith.constant 0 : i32
    %c0_i32_0 = arith.constant 0 : i32
    return %arg0, %c0_i32 : i32, i32
  }
  func.func @transform_2(%arg0: i32) -> (i32, i32) {
    %c0_i32 = arith.constant 0 : i32
    %c0_i32_0 = arith.constant 0 : i32
    %c0_i32_1 = arith.constant 0 : i32
    return %c0_i32, %c0_i32_0 : i32, i32
  }
  func.func @transform_3(%arg0: i32) -> (i32, i32) {
    %c0_i32 = arith.constant 0 : i32
    %c0_i32_0 = arith.constant 0 : i32
    %c0_i32_1 = arith.constant 0 : i32
    return %c0_i32, %c0_i32_0 : i32, i32
  }
  func.func @transform_4(%arg0: i32) -> (i32, i32) {
    %c0_i32 = arith.constant 0 : i32
    %c0_i32_0 = arith.constant 0 : i32
    %c0_i32_1 = arith.constant 0 : i32
    return %c0_i32, %c0_i32_0 : i32, i32
  }
  func.func @transform_5(%arg0: i32) -> (i32, i32) {
    %c0_i32 = arith.constant 0 : i32
    %c0_i32_0 = arith.constant 0 : i32
    %c0_i32_1 = arith.constant 0 : i32
    return %c0_i32, %c0_i32_0 : i32, i32
  }
  func.func @transform_6(%arg0: i32) -> (i32, i32) {
    %c0_i32 = arith.constant 0 : i32
    %c0_i32_0 = arith.constant 0 : i32
    %c0_i32_1 = arith.constant 0 : i32
    return %c0_i32, %c0_i32_0 : i32, i32
  }
  func.func @transform_7(%arg0: i32) -> (i32, i32) {
    %c0_i32 = arith.constant 0 : i32
    %c0_i32_0 = arith.constant 0 : i32
    return %arg0, %c0_i32 : i32, i32
  }
}

module attributes {stable_mosaic.version = 11 : i64} {
  func.func @kernel(%arg0: i32, %arg1: memref<64x288xbf16, #tpu.memory_space<vmem>>, %arg2: memref<288x128xbf16, #tpu.memory_space<vmem>>, %arg3: memref<1x128xf32, #tpu.memory_space<vmem>>, %arg4: memref<1x128xf32, #tpu.memory_space<vmem>>, %arg5: memref<1x128xf32, #tpu.memory_space<vmem>>, %arg6: memref<64x128xbf16, #tpu.memory_space<vmem>>) attributes {dimension_semantics = [#tpu.dimension_semantics<parallel>], iteration_bounds = array<i64: 2>, scalar_prefetch = 0 : i64, scratch_operands = 0 : i64, tpu.core_type = #tpu.core_type<tc>, window_params = [{transform_indices = @transform_0, window_bounds = array<i64: 64, 288>}, {pipeline_mode = #tpu.pipeline_mode<synchronous>, transform_indices = @transform_1, window_bounds = array<i64: 288, 128>}, {pipeline_mode = #tpu.pipeline_mode<synchronous>, transform_indices = @transform_2, window_bounds = array<i64: 1, 128>}, {pipeline_mode = #tpu.pipeline_mode<synchronous>, transform_indices = @transform_3, window_bounds = array<i64: 1, 128>}, {pipeline_mode = #tpu.pipeline_mode<synchronous>, transform_indices = @transform_4, window_bounds = array<i64: 1, 128>}, {transform_indices = @transform_5, window_bounds = array<i64: 64, 128>}]} {
    %c0 = arith.constant 0 : index
    %c0_0 = arith.constant 0 : index
    %0 = vector.load %arg1[%c0, %c0_0] : memref<64x288xbf16, #tpu.memory_space<vmem>>, vector<64x288xbf16>
    %c0_1 = arith.constant 0 : index
    %c0_2 = arith.constant 0 : index
    %1 = vector.load %arg2[%c0_1, %c0_2] : memref<288x128xbf16, #tpu.memory_space<vmem>>, vector<288x128xbf16>
    %cst = arith.constant dense<0.000000e+00> : vector<64x128xf32>
    %2 = tpu.matmul %0, %1, %cst {dimension_numbers = #tpu.dot_dimension_numbers<[1], [0], [0], [1], [0, 0, 1, 1], [], []>} : vector<64x288xbf16>, vector<288x128xbf16>, vector<64x128xf32> -> vector<64x128xf32>
    %c0_3 = arith.constant 0 : index
    %c0_4 = arith.constant 0 : index
    %3 = vector.load %arg3[%c0_3, %c0_4] : memref<1x128xf32, #tpu.memory_space<vmem>>, vector<1x128xf32>
    %4 = vector.broadcast %3 : vector<1x128xf32> to vector<64x128xf32>
    %5 = arith.mulf %2, %4 : vector<64x128xf32>
    %c0_5 = arith.constant 0 : index
    %c0_6 = arith.constant 0 : index
    %6 = vector.load %arg4[%c0_5, %c0_6] : memref<1x128xf32, #tpu.memory_space<vmem>>, vector<1x128xf32>
    %7 = vector.broadcast %6 : vector<1x128xf32> to vector<64x128xf32>
    %8 = arith.addf %5, %7 : vector<64x128xf32>
    %cst_7 = arith.constant 0.000000e+00 : f32
    %9 = vector.broadcast %cst_7 : f32 to vector<64x128xf32>
    %10 = arith.cmpf ogt, %8, %9 : vector<64x128xf32>
    %c0_8 = arith.constant 0 : index
    %c0_9 = arith.constant 0 : index
    %11 = vector.load %arg5[%c0_8, %c0_9] : memref<1x128xf32, #tpu.memory_space<vmem>>, vector<1x128xf32>
    %12 = vector.broadcast %11 : vector<1x128xf32> to vector<64x128xf32>
    %13 = arith.mulf %12, %8 : vector<64x128xf32>
    %14 = arith.select %10, %8, %13 : vector<64x128xi1>, vector<64x128xf32>
    %15 = arith.truncf %14 : vector<64x128xf32> to vector<64x128xbf16>
    %c0_10 = arith.constant 0 : index
    %c0_11 = arith.constant 0 : index
    %16 = vector.load %arg6[%c0_10, %c0_11] : memref<64x128xbf16, #tpu.memory_space<vmem>>, vector<64x128xbf16>
    tpu.vector_store %arg6[%c0_10, %c0_11], %15 {strides = array<i32>} : memref<64x128xbf16, #tpu.memory_space<vmem>>, vector<64x128xbf16>,
    return
  }
  func.func @transform_0(%arg0: i32) -> (i32, i32) {
    %c0_i32 = arith.constant 0 : i32
    %c0_i32_0 = arith.constant 0 : i32
    return %arg0, %c0_i32 : i32, i32
  }
  func.func @transform_1(%arg0: i32) -> (i32, i32) {
    %c0_i32 = arith.constant 0 : i32
    %c0_i32_0 = arith.constant 0 : i32
    %c0_i32_1 = arith.constant 0 : i32
    return %c0_i32, %c0_i32_0 : i32, i32
  }
  func.func @transform_2(%arg0: i32) -> (i32, i32) {
    %c0_i32 = arith.constant 0 : i32
    %c0_i32_0 = arith.constant 0 : i32
    %c0_i32_1 = arith.constant 0 : i32
    return %c0_i32, %c0_i32_0 : i32, i32
  }
  func.func @transform_3(%arg0: i32) -> (i32, i32) {
    %c0_i32 = arith.constant 0 : i32
    %c0_i32_0 = arith.constant 0 : i32
    %c0_i32_1 = arith.constant 0 : i32
    return %c0_i32, %c0_i32_0 : i32, i32
  }
  func.func @transform_4(%arg0: i32) -> (i32, i32) {
    %c0_i32 = arith.constant 0 : i32
    %c0_i32_0 = arith.constant 0 : i32
    %c0_i32_1 = arith.constant 0 : i32
    return %c0_i32, %c0_i32_0 : i32, i32
  }
  func.func @transform_5(%arg0: i32) -> (i32, i32) {
    %c0_i32 = arith.constant 0 : i32
    %c0_i32_0 = arith.constant 0 : i32
    return %arg0, %c0_i32 : i32, i32
  }
}

module attributes {stable_mosaic.version = 11 : i64} {
  func.func @kernel(%arg0: i32, %arg1: memref<64x288xbf16, #tpu.memory_space<vmem>>, %arg2: memref<64x144xbf16, #tpu.memory_space<vmem>>, %arg3: memref<288x128xbf16, #tpu.memory_space<vmem>>, %arg4: memref<144x128xbf16, #tpu.memory_space<vmem>>, %arg5: memref<1x128xf32, #tpu.memory_space<vmem>>, %arg6: memref<1x128xf32, #tpu.memory_space<vmem>>, %arg7: memref<1x128xf32, #tpu.memory_space<vmem>>, %arg8: memref<64x128xbf16, #tpu.memory_space<vmem>>) attributes {dimension_semantics = [#tpu.dimension_semantics<parallel>], iteration_bounds = array<i64: 2>, scalar_prefetch = 0 : i64, scratch_operands = 0 : i64, tpu.core_type = #tpu.core_type<tc>, window_params = [{transform_indices = @transform_0, window_bounds = array<i64: 64, 288>}, {transform_indices = @transform_1, window_bounds = array<i64: 64, 144>}, {pipeline_mode = #tpu.pipeline_mode<synchronous>, transform_indices = @transform_2, window_bounds = array<i64: 288, 128>}, {pipeline_mode = #tpu.pipeline_mode<synchronous>, transform_indices = @transform_3, window_bounds = array<i64: 144, 128>}, {pipeline_mode = #tpu.pipeline_mode<synchronous>, transform_indices = @transform_4, window_bounds = array<i64: 1, 128>}, {pipeline_mode = #tpu.pipeline_mode<synchronous>, transform_indices = @transform_5, window_bounds = array<i64: 1, 128>}, {pipeline_mode = #tpu.pipeline_mode<synchronous>, transform_indices = @transform_6, window_bounds = array<i64: 1, 128>}, {transform_indices = @transform_7, window_bounds = array<i64: 64, 128>}]} {
    %c0 = arith.constant 0 : index
    %c0_0 = arith.constant 0 : index
    %0 = vector.load %arg1[%c0, %c0_0] : memref<64x288xbf16, #tpu.memory_space<vmem>>, vector<64x288xbf16>
    %c0_1 = arith.constant 0 : index
    %c0_2 = arith.constant 0 : index
    %1 = vector.load %arg3[%c0_1, %c0_2] : memref<288x128xbf16, #tpu.memory_space<vmem>>, vector<288x128xbf16>
    %cst = arith.constant dense<0.000000e+00> : vector<64x128xf32>
    %2 = tpu.matmul %0, %1, %cst {dimension_numbers = #tpu.dot_dimension_numbers<[1], [0], [0], [1], [0, 0, 1, 1], [], []>} : vector<64x288xbf16>, vector<288x128xbf16>, vector<64x128xf32> -> vector<64x128xf32>
    %c0_3 = arith.constant 0 : index
    %c0_4 = arith.constant 0 : index
    %3 = vector.load %arg2[%c0_3, %c0_4] : memref<64x144xbf16, #tpu.memory_space<vmem>>, vector<64x144xbf16>
    %c0_5 = arith.constant 0 : index
    %c0_6 = arith.constant 0 : index
    %4 = vector.load %arg4[%c0_5, %c0_6] : memref<144x128xbf16, #tpu.memory_space<vmem>>, vector<144x128xbf16>
    %cst_7 = arith.constant dense<0.000000e+00> : vector<64x128xf32>
    %5 = tpu.matmul %3, %4, %cst_7 {dimension_numbers = #tpu.dot_dimension_numbers<[1], [0], [0], [1], [0, 0, 1, 1], [], []>} : vector<64x144xbf16>, vector<144x128xbf16>, vector<64x128xf32> -> vector<64x128xf32>
    %6 = arith.addf %2, %5 : vector<64x128xf32>
    %c0_8 = arith.constant 0 : index
    %c0_9 = arith.constant 0 : index
    %7 = vector.load %arg5[%c0_8, %c0_9] : memref<1x128xf32, #tpu.memory_space<vmem>>, vector<1x128xf32>
    %8 = vector.broadcast %7 : vector<1x128xf32> to vector<64x128xf32>
    %9 = arith.mulf %6, %8 : vector<64x128xf32>
    %c0_10 = arith.constant 0 : index
    %c0_11 = arith.constant 0 : index
    %10 = vector.load %arg6[%c0_10, %c0_11] : memref<1x128xf32, #tpu.memory_space<vmem>>, vector<1x128xf32>
    %11 = vector.broadcast %10 : vector<1x128xf32> to vector<64x128xf32>
    %12 = arith.addf %9, %11 : vector<64x128xf32>
    %cst_12 = arith.constant 0.000000e+00 : f32
    %13 = vector.broadcast %cst_12 : f32 to vector<64x128xf32>
    %14 = arith.cmpf ogt, %12, %13 : vector<64x128xf32>
    %c0_13 = arith.constant 0 : index
    %c0_14 = arith.constant 0 : index
    %15 = vector.load %arg7[%c0_13, %c0_14] : memref<1x128xf32, #tpu.memory_space<vmem>>, vector<1x128xf32>
    %16 = vector.broadcast %15 : vector<1x128xf32> to vector<64x128xf32>
    %17 = arith.mulf %16, %12 : vector<64x128xf32>
    %18 = arith.select %14, %12, %17 : vector<64x128xi1>, vector<64x128xf32>
    %19 = arith.truncf %18 : vector<64x128xf32> to vector<64x128xbf16>
    %c0_15 = arith.constant 0 : index
    %c0_16 = arith.constant 0 : index
    %20 = vector.load %arg8[%c0_15, %c0_16] : memref<64x128xbf16, #tpu.memory_space<vmem>>, vector<64x128xbf16>
    tpu.vector_store %arg8[%c0_15, %c0_16], %19 {strides = array<i32>} : memref<64x128xbf16, #tpu.memory_space<vmem>>, vector<64x128xbf16>,
    return
  }
  func.func @transform_0(%arg0: i32) -> (i32, i32) {
    %c0_i32 = arith.constant 0 : i32
    %c0_i32_0 = arith.constant 0 : i32
    return %arg0, %c0_i32 : i32, i32
  }
  func.func @transform_1(%arg0: i32) -> (i32, i32) {
    %c0_i32 = arith.constant 0 : i32
    %c0_i32_0 = arith.constant 0 : i32
    return %arg0, %c0_i32 : i32, i32
  }
  func.func @transform_2(%arg0: i32) -> (i32, i32) {
    %c0_i32 = arith.constant 0 : i32
    %c0_i32_0 = arith.constant 0 : i32
    %c0_i32_1 = arith.constant 0 : i32
    return %c0_i32, %c0_i32_0 : i32, i32
  }
  func.func @transform_3(%arg0: i32) -> (i32, i32) {
    %c0_i32 = arith.constant 0 : i32
    %c0_i32_0 = arith.constant 0 : i32
    %c0_i32_1 = arith.constant 0 : i32
    return %c0_i32, %c0_i32_0 : i32, i32
  }
  func.func @transform_4(%arg0: i32) -> (i32, i32) {
    %c0_i32 = arith.constant 0 : i32
    %c0_i32_0 = arith.constant 0 : i32
    %c0_i32_1 = arith.constant 0 : i32
    return %c0_i32, %c0_i32_0 : i32, i32
  }
  func.func @transform_5(%arg0: i32) -> (i32, i32) {
    %c0_i32 = arith.constant 0 : i32
    %c0_i32_0 = arith.constant 0 : i32
    %c0_i32_1 = arith.constant 0 : i32
    return %c0_i32, %c0_i32_0 : i32, i32
  }
  func.func @transform_6(%arg0: i32) -> (i32, i32) {
    %c0_i32 = arith.constant 0 : i32
    %c0_i32_0 = arith.constant 0 : i32
    %c0_i32_1 = arith.constant 0 : i32
    return %c0_i32, %c0_i32_0 : i32, i32
  }
  func.func @transform_7(%arg0: i32) -> (i32, i32) {
    %c0_i32 = arith.constant 0 : i32
    %c0_i32_0 = arith.constant 0 : i32
    return %arg0, %c0_i32 : i32, i32
  }
}

module attributes {stable_mosaic.version = 11 : i64} {
  func.func @kernel(%arg0: i32, %arg1: memref<256x144xbf16, #tpu.memory_space<vmem>>, %arg2: memref<144x128xbf16, #tpu.memory_space<vmem>>, %arg3: memref<1x128xf32, #tpu.memory_space<vmem>>, %arg4: memref<1x128xf32, #tpu.memory_space<vmem>>, %arg5: memref<1x128xf32, #tpu.memory_space<vmem>>, %arg6: memref<256x128xbf16, #tpu.memory_space<vmem>>) attributes {dimension_semantics = [#tpu.dimension_semantics<parallel>], iteration_bounds = array<i64: 2>, scalar_prefetch = 0 : i64, scratch_operands = 0 : i64, tpu.core_type = #tpu.core_type<tc>, window_params = [{transform_indices = @transform_0, window_bounds = array<i64: 256, 144>}, {pipeline_mode = #tpu.pipeline_mode<synchronous>, transform_indices = @transform_1, window_bounds = array<i64: 144, 128>}, {pipeline_mode = #tpu.pipeline_mode<synchronous>, transform_indices = @transform_2, window_bounds = array<i64: 1, 128>}, {pipeline_mode = #tpu.pipeline_mode<synchronous>, transform_indices = @transform_3, window_bounds = array<i64: 1, 128>}, {pipeline_mode = #tpu.pipeline_mode<synchronous>, transform_indices = @transform_4, window_bounds = array<i64: 1, 128>}, {transform_indices = @transform_5, window_bounds = array<i64: 256, 128>}]} {
    %c0 = arith.constant 0 : index
    %c0_0 = arith.constant 0 : index
    %0 = vector.load %arg1[%c0, %c0_0] : memref<256x144xbf16, #tpu.memory_space<vmem>>, vector<256x144xbf16>
    %c0_1 = arith.constant 0 : index
    %c0_2 = arith.constant 0 : index
    %1 = vector.load %arg2[%c0_1, %c0_2] : memref<144x128xbf16, #tpu.memory_space<vmem>>, vector<144x128xbf16>
    %cst = arith.constant dense<0.000000e+00> : vector<256x128xf32>
    %2 = tpu.matmul %0, %1, %cst {dimension_numbers = #tpu.dot_dimension_numbers<[1], [0], [0], [1], [0, 0, 1, 1], [], []>} : vector<256x144xbf16>, vector<144x128xbf16>, vector<256x128xf32> -> vector<256x128xf32>
    %c0_3 = arith.constant 0 : index
    %c0_4 = arith.constant 0 : index
    %3 = vector.load %arg3[%c0_3, %c0_4] : memref<1x128xf32, #tpu.memory_space<vmem>>, vector<1x128xf32>
    %4 = vector.broadcast %3 : vector<1x128xf32> to vector<256x128xf32>
    %5 = arith.mulf %2, %4 : vector<256x128xf32>
    %c0_5 = arith.constant 0 : index
    %c0_6 = arith.constant 0 : index
    %6 = vector.load %arg4[%c0_5, %c0_6] : memref<1x128xf32, #tpu.memory_space<vmem>>, vector<1x128xf32>
    %7 = vector.broadcast %6 : vector<1x128xf32> to vector<256x128xf32>
    %8 = arith.addf %5, %7 : vector<256x128xf32>
    %cst_7 = arith.constant 0.000000e+00 : f32
    %9 = vector.broadcast %cst_7 : f32 to vector<256x128xf32>
    %10 = arith.cmpf ogt, %8, %9 : vector<256x128xf32>
    %c0_8 = arith.constant 0 : index
    %c0_9 = arith.constant 0 : index
    %11 = vector.load %arg5[%c0_8, %c0_9] : memref<1x128xf32, #tpu.memory_space<vmem>>, vector<1x128xf32>
    %12 = vector.broadcast %11 : vector<1x128xf32> to vector<256x128xf32>
    %13 = arith.mulf %12, %8 : vector<256x128xf32>
    %14 = arith.select %10, %8, %13 : vector<256x128xi1>, vector<256x128xf32>
    %15 = arith.truncf %14 : vector<256x128xf32> to vector<256x128xbf16>
    %c0_10 = arith.constant 0 : index
    %c0_11 = arith.constant 0 : index
    %16 = vector.load %arg6[%c0_10, %c0_11] : memref<256x128xbf16, #tpu.memory_space<vmem>>, vector<256x128xbf16>
    tpu.vector_store %arg6[%c0_10, %c0_11], %15 {strides = array<i32>} : memref<256x128xbf16, #tpu.memory_space<vmem>>, vector<256x128xbf16>,
    return
  }
  func.func @transform_0(%arg0: i32) -> (i32, i32) {
    %c0_i32 = arith.constant 0 : i32
    %c0_i32_0 = arith.constant 0 : i32
    return %arg0, %c0_i32 : i32, i32
  }
  func.func @transform_1(%arg0: i32) -> (i32, i32) {
    %c0_i32 = arith.constant 0 : i32
    %c0_i32_0 = arith.constant 0 : i32
    %c0_i32_1 = arith.constant 0 : i32
    return %c0_i32, %c0_i32_0 : i32, i32
  }
  func.func @transform_2(%arg0: i32) -> (i32, i32) {
    %c0_i32 = arith.constant 0 : i32
    %c0_i32_0 = arith.constant 0 : i32
    %c0_i32_1 = arith.constant 0 : i32
    return %c0_i32, %c0_i32_0 : i32, i32
  }
  func.func @transform_3(%arg0: i32) -> (i32, i32) {
    %c0_i32 = arith.constant 0 : i32
    %c0_i32_0 = arith.constant 0 : i32
    %c0_i32_1 = arith.constant 0 : i32
    return %c0_i32, %c0_i32_0 : i32, i32
  }
  func.func @transform_4(%arg0: i32) -> (i32, i32) {
    %c0_i32 = arith.constant 0 : i32
    %c0_i32_0 = arith.constant 0 : i32
    %c0_i32_1 = arith.constant 0 : i32
    return %c0_i32, %c0_i32_0 : i32, i32
  }
  func.func @transform_5(%arg0: i32) -> (i32, i32) {
    %c0_i32 = arith.constant 0 : i32
    %c0_i32_0 = arith.constant 0 : i32
    return %arg0, %c0_i32 : i32, i32
  }
}

module attributes {stable_mosaic.version = 11 : i64} {
  func.func @kernel(%arg0: i32, %arg1: memref<256x144xbf16, #tpu.memory_space<vmem>>, %arg2: memref<256x72xbf16, #tpu.memory_space<vmem>>, %arg3: memref<144x128xbf16, #tpu.memory_space<vmem>>, %arg4: memref<72x128xbf16, #tpu.memory_space<vmem>>, %arg5: memref<1x128xf32, #tpu.memory_space<vmem>>, %arg6: memref<1x128xf32, #tpu.memory_space<vmem>>, %arg7: memref<1x128xf32, #tpu.memory_space<vmem>>, %arg8: memref<256x128xbf16, #tpu.memory_space<vmem>>) attributes {dimension_semantics = [#tpu.dimension_semantics<parallel>], iteration_bounds = array<i64: 2>, scalar_prefetch = 0 : i64, scratch_operands = 0 : i64, tpu.core_type = #tpu.core_type<tc>, window_params = [{transform_indices = @transform_0, window_bounds = array<i64: 256, 144>}, {transform_indices = @transform_1, window_bounds = array<i64: 256, 72>}, {pipeline_mode = #tpu.pipeline_mode<synchronous>, transform_indices = @transform_2, window_bounds = array<i64: 144, 128>}, {pipeline_mode = #tpu.pipeline_mode<synchronous>, transform_indices = @transform_3, window_bounds = array<i64: 72, 128>}, {pipeline_mode = #tpu.pipeline_mode<synchronous>, transform_indices = @transform_4, window_bounds = array<i64: 1, 128>}, {pipeline_mode = #tpu.pipeline_mode<synchronous>, transform_indices = @transform_5, window_bounds = array<i64: 1, 128>}, {pipeline_mode = #tpu.pipeline_mode<synchronous>, transform_indices = @transform_6, window_bounds = array<i64: 1, 128>}, {transform_indices = @transform_7, window_bounds = array<i64: 256, 128>}]} {
    %c0 = arith.constant 0 : index
    %c0_0 = arith.constant 0 : index
    %0 = vector.load %arg1[%c0, %c0_0] : memref<256x144xbf16, #tpu.memory_space<vmem>>, vector<256x144xbf16>
    %c0_1 = arith.constant 0 : index
    %c0_2 = arith.constant 0 : index
    %1 = vector.load %arg3[%c0_1, %c0_2] : memref<144x128xbf16, #tpu.memory_space<vmem>>, vector<144x128xbf16>
    %cst = arith.constant dense<0.000000e+00> : vector<256x128xf32>
    %2 = tpu.matmul %0, %1, %cst {dimension_numbers = #tpu.dot_dimension_numbers<[1], [0], [0], [1], [0, 0, 1, 1], [], []>} : vector<256x144xbf16>, vector<144x128xbf16>, vector<256x128xf32> -> vector<256x128xf32>
    %c0_3 = arith.constant 0 : index
    %c0_4 = arith.constant 0 : index
    %3 = vector.load %arg2[%c0_3, %c0_4] : memref<256x72xbf16, #tpu.memory_space<vmem>>, vector<256x72xbf16>
    %c0_5 = arith.constant 0 : index
    %c0_6 = arith.constant 0 : index
    %4 = vector.load %arg4[%c0_5, %c0_6] : memref<72x128xbf16, #tpu.memory_space<vmem>>, vector<72x128xbf16>
    %cst_7 = arith.constant dense<0.000000e+00> : vector<256x128xf32>
    %5 = tpu.matmul %3, %4, %cst_7 {dimension_numbers = #tpu.dot_dimension_numbers<[1], [0], [0], [1], [0, 0, 1, 1], [], []>} : vector<256x72xbf16>, vector<72x128xbf16>, vector<256x128xf32> -> vector<256x128xf32>
    %6 = arith.addf %2, %5 : vector<256x128xf32>
    %c0_8 = arith.constant 0 : index
    %c0_9 = arith.constant 0 : index
    %7 = vector.load %arg5[%c0_8, %c0_9] : memref<1x128xf32, #tpu.memory_space<vmem>>, vector<1x128xf32>
    %8 = vector.broadcast %7 : vector<1x128xf32> to vector<256x128xf32>
    %9 = arith.mulf %6, %8 : vector<256x128xf32>
    %c0_10 = arith.constant 0 : index
    %c0_11 = arith.constant 0 : index
    %10 = vector.load %arg6[%c0_10, %c0_11] : memref<1x128xf32, #tpu.memory_space<vmem>>, vector<1x128xf32>
    %11 = vector.broadcast %10 : vector<1x128xf32> to vector<256x128xf32>
    %12 = arith.addf %9, %11 : vector<256x128xf32>
    %cst_12 = arith.constant 0.000000e+00 : f32
    %13 = vector.broadcast %cst_12 : f32 to vector<256x128xf32>
    %14 = arith.cmpf ogt, %12, %13 : vector<256x128xf32>
    %c0_13 = arith.constant 0 : index
    %c0_14 = arith.constant 0 : index
    %15 = vector.load %arg7[%c0_13, %c0_14] : memref<1x128xf32, #tpu.memory_space<vmem>>, vector<1x128xf32>
    %16 = vector.broadcast %15 : vector<1x128xf32> to vector<256x128xf32>
    %17 = arith.mulf %16, %12 : vector<256x128xf32>
    %18 = arith.select %14, %12, %17 : vector<256x128xi1>, vector<256x128xf32>
    %19 = arith.truncf %18 : vector<256x128xf32> to vector<256x128xbf16>
    %c0_15 = arith.constant 0 : index
    %c0_16 = arith.constant 0 : index
    %20 = vector.load %arg8[%c0_15, %c0_16] : memref<256x128xbf16, #tpu.memory_space<vmem>>, vector<256x128xbf16>
    tpu.vector_store %arg8[%c0_15, %c0_16], %19 {strides = array<i32>} : memref<256x128xbf16, #tpu.memory_space<vmem>>, vector<256x128xbf16>,
    return
  }
  func.func @transform_0(%arg0: i32) -> (i32, i32) {
    %c0_i32 = arith.constant 0 : i32
    %c0_i32_0 = arith.constant 0 : i32
    return %arg0, %c0_i32 : i32, i32
  }
  func.func @transform_1(%arg0: i32) -> (i32, i32) {
    %c0_i32 = arith.constant 0 : i32
    %c0_i32_0 = arith.constant 0 : i32
    return %arg0, %c0_i32 : i32, i32
  }
  func.func @transform_2(%arg0: i32) -> (i32, i32) {
    %c0_i32 = arith.constant 0 : i32
    %c0_i32_0 = arith.constant 0 : i32
    %c0_i32_1 = arith.constant 0 : i32
    return %c0_i32, %c0_i32_0 : i32, i32
  }
  func.func @transform_3(%arg0: i32) -> (i32, i32) {
    %c0_i32 = arith.constant 0 : i32
    %c0_i32_0 = arith.constant 0 : i32
    %c0_i32_1 = arith.constant 0 : i32
    return %c0_i32, %c0_i32_0 : i32, i32
  }
  func.func @transform_4(%arg0: i32) -> (i32, i32) {
    %c0_i32 = arith.constant 0 : i32
    %c0_i32_0 = arith.constant 0 : i32
    %c0_i32_1 = arith.constant 0 : i32
    return %c0_i32, %c0_i32_0 : i32, i32
  }
  func.func @transform_5(%arg0: i32) -> (i32, i32) {
    %c0_i32 = arith.constant 0 : i32
    %c0_i32_0 = arith.constant 0 : i32
    %c0_i32_1 = arith.constant 0 : i32
    return %c0_i32, %c0_i32_0 : i32, i32
  }
  func.func @transform_6(%arg0: i32) -> (i32, i32) {
    %c0_i32 = arith.constant 0 : i32
    %c0_i32_0 = arith.constant 0 : i32
    %c0_i32_1 = arith.constant 0 : i32
    return %c0_i32, %c0_i32_0 : i32, i32
  }
  func.func @transform_7(%arg0: i32) -> (i32, i32) {
    %c0_i32 = arith.constant 0 : i32
    %c0_i32_0 = arith.constant 0 : i32
    return %arg0, %c0_i32 : i32, i32
  }
}

module attributes {stable_mosaic.version = 11 : i64} {
  func.func @kernel(%arg0: i32, %arg1: memref<256x72xbf16, #tpu.memory_space<vmem>>, %arg2: memref<72x128xbf16, #tpu.memory_space<vmem>>, %arg3: memref<1x128xf32, #tpu.memory_space<vmem>>, %arg4: memref<1x128xf32, #tpu.memory_space<vmem>>, %arg5: memref<1x128xf32, #tpu.memory_space<vmem>>, %arg6: memref<128x128xbf16, #tpu.memory_space<vmem>>, %arg7: memref<1x128xf32, #tpu.memory_space<vmem>>, %arg8: memref<256x128xf32, #tpu.memory_space<vmem>>) attributes {dimension_semantics = [#tpu.dimension_semantics<parallel>], iteration_bounds = array<i64: 2>, scalar_prefetch = 0 : i64, scratch_operands = 0 : i64, tpu.core_type = #tpu.core_type<tc>, window_params = [{transform_indices = @transform_0, window_bounds = array<i64: 256, 72>}, {pipeline_mode = #tpu.pipeline_mode<synchronous>, transform_indices = @transform_1, window_bounds = array<i64: 72, 128>}, {pipeline_mode = #tpu.pipeline_mode<synchronous>, transform_indices = @transform_2, window_bounds = array<i64: 1, 128>}, {pipeline_mode = #tpu.pipeline_mode<synchronous>, transform_indices = @transform_3, window_bounds = array<i64: 1, 128>}, {pipeline_mode = #tpu.pipeline_mode<synchronous>, transform_indices = @transform_4, window_bounds = array<i64: 1, 128>}, {pipeline_mode = #tpu.pipeline_mode<synchronous>, transform_indices = @transform_5, window_bounds = array<i64: 128, 128>}, {pipeline_mode = #tpu.pipeline_mode<synchronous>, transform_indices = @transform_6, window_bounds = array<i64: 1, 128>}, {transform_indices = @transform_7, window_bounds = array<i64: 256, 128>}]} {
    %c0 = arith.constant 0 : index
    %c0_0 = arith.constant 0 : index
    %0 = vector.load %arg1[%c0, %c0_0] : memref<256x72xbf16, #tpu.memory_space<vmem>>, vector<256x72xbf16>
    %c0_1 = arith.constant 0 : index
    %c0_2 = arith.constant 0 : index
    %1 = vector.load %arg2[%c0_1, %c0_2] : memref<72x128xbf16, #tpu.memory_space<vmem>>, vector<72x128xbf16>
    %cst = arith.constant dense<0.000000e+00> : vector<256x128xf32>
    %2 = tpu.matmul %0, %1, %cst {dimension_numbers = #tpu.dot_dimension_numbers<[1], [0], [0], [1], [0, 0, 1, 1], [], []>} : vector<256x72xbf16>, vector<72x128xbf16>, vector<256x128xf32> -> vector<256x128xf32>
    %c0_3 = arith.constant 0 : index
    %c0_4 = arith.constant 0 : index
    %3 = vector.load %arg3[%c0_3, %c0_4] : memref<1x128xf32, #tpu.memory_space<vmem>>, vector<1x128xf32>
    %4 = vector.broadcast %3 : vector<1x128xf32> to vector<256x128xf32>
    %5 = arith.mulf %2, %4 : vector<256x128xf32>
    %c0_5 = arith.constant 0 : index
    %c0_6 = arith.constant 0 : index
    %6 = vector.load %arg4[%c0_5, %c0_6] : memref<1x128xf32, #tpu.memory_space<vmem>>, vector<1x128xf32>
    %7 = vector.broadcast %6 : vector<1x128xf32> to vector<256x128xf32>
    %8 = arith.addf %5, %7 : vector<256x128xf32>
    %cst_7 = arith.constant 0.000000e+00 : f32
    %9 = vector.broadcast %cst_7 : f32 to vector<256x128xf32>
    %10 = arith.cmpf ogt, %8, %9 : vector<256x128xf32>
    %c0_8 = arith.constant 0 : index
    %c0_9 = arith.constant 0 : index
    %11 = vector.load %arg5[%c0_8, %c0_9] : memref<1x128xf32, #tpu.memory_space<vmem>>, vector<1x128xf32>
    %12 = vector.broadcast %11 : vector<1x128xf32> to vector<256x128xf32>
    %13 = arith.mulf %12, %8 : vector<256x128xf32>
    %14 = arith.select %10, %8, %13 : vector<256x128xi1>, vector<256x128xf32>
    %15 = arith.truncf %14 : vector<256x128xf32> to vector<256x128xbf16>
    %c0_10 = arith.constant 0 : index
    %c0_11 = arith.constant 0 : index
    %16 = vector.load %arg6[%c0_10, %c0_11] : memref<128x128xbf16, #tpu.memory_space<vmem>>, vector<128x128xbf16>
    %cst_12 = arith.constant dense<0.000000e+00> : vector<256x128xf32>
    %17 = tpu.matmul %15, %16, %cst_12 {dimension_numbers = #tpu.dot_dimension_numbers<[1], [0], [0], [1], [0, 0, 1, 1], [], []>} : vector<256x128xbf16>, vector<128x128xbf16>, vector<256x128xf32> -> vector<256x128xf32>
    %c0_13 = arith.constant 0 : index
    %c0_14 = arith.constant 0 : index
    %18 = vector.load %arg7[%c0_13, %c0_14] : memref<1x128xf32, #tpu.memory_space<vmem>>, vector<1x128xf32>
    %19 = vector.broadcast %18 : vector<1x128xf32> to vector<256x128xf32>
    %20 = arith.addf %17, %19 : vector<256x128xf32>
    %c0_15 = arith.constant 0 : index
    %c0_16 = arith.constant 0 : index
    %21 = vector.load %arg8[%c0_15, %c0_16] : memref<256x128xf32, #tpu.memory_space<vmem>>, vector<256x128xf32>
    tpu.vector_store %arg8[%c0_15, %c0_16], %20 {strides = array<i32>} : memref<256x128xf32, #tpu.memory_space<vmem>>, vector<256x128xf32>,
    return
  }
  func.func @transform_0(%arg0: i32) -> (i32, i32) {
    %c0_i32 = arith.constant 0 : i32
    %c0_i32_0 = arith.constant 0 : i32
    return %arg0, %c0_i32 : i32, i32
  }
  func.func @transform_1(%arg0: i32) -> (i32, i32) {
    %c0_i32 = arith.constant 0 : i32
    %c0_i32_0 = arith.constant 0 : i32
    %c0_i32_1 = arith.constant 0 : i32
    return %c0_i32, %c0_i32_0 : i32, i32
  }
  func.func @transform_2(%arg0: i32) -> (i32, i32) {
    %c0_i32 = arith.constant 0 : i32
    %c0_i32_0 = arith.constant 0 : i32
    %c0_i32_1 = arith.constant 0 : i32
    return %c0_i32, %c0_i32_0 : i32, i32
  }
  func.func @transform_3(%arg0: i32) -> (i32, i32) {
    %c0_i32 = arith.constant 0 : i32
    %c0_i32_0 = arith.constant 0 : i32
    %c0_i32_1 = arith.constant 0 : i32
    return %c0_i32, %c0_i32_0 : i32, i32
  }
  func.func @transform_4(%arg0: i32) -> (i32, i32) {
    %c0_i32 = arith.constant 0 : i32
    %c0_i32_0 = arith.constant 0 : i32
    %c0_i32_1 = arith.constant 0 : i32
    return %c0_i32, %c0_i32_0 : i32, i32
  }
  func.func @transform_5(%arg0: i32) -> (i32, i32) {
    %c0_i32 = arith.constant 0 : i32
    %c0_i32_0 = arith.constant 0 : i32
    %c0_i32_1 = arith.constant 0 : i32
    return %c0_i32, %c0_i32_0 : i32, i32
  }
  func.func @transform_6(%arg0: i32) -> (i32, i32) {
    %c0_i32 = arith.constant 0 : i32
    %c0_i32_0 = arith.constant 0 : i32
    %c0_i32_1 = arith.constant 0 : i32
    return %c0_i32, %c0_i32_0 : i32, i32
  }
  func.func @transform_7(%arg0: i32) -> (i32, i32) {
    %c0_i32 = arith.constant 0 : i32
    %c0_i32_0 = arith.constant 0 : i32
    return %arg0, %c0_i32 : i32, i32
  }
}

</mosaic_0001>

<bundles_post_ra>
// kernel: mul.23
= control target key start
LH: loop header
LB: loop body
LE: loop exit
PB: predicated region body
PF: predicated region fallthrough
CT: control target
= control target key end

     0   :  { %s20_s0 = inlined_call_operand.<no memory space> [shape: f32[], index: 0, kind: input, shape index: {}]   ;;  %s21_s1 = inlined_call_operand.vmem [shape: f32[8], index: 1, kind: output, shape index: {}]  }
   0x1   :  { %v2_v0 = vstv %s20_s0 }
   0x2   :  { %3 = vst [vmem:[%s21_s1] sm:$0x1] %v2_v0 }

// kernel: unet_forward.22
= control target key start
LH: loop header
LB: loop body
LE: loop exit
PB: predicated region body
PF: predicated region fallthrough
CT: control target
= control target key end

     0   :  { %s1301_s18 = smov 0   ;;  %s1499_s0 = inlined_call_operand.vmem [shape: bf16[512,27], index: 0, kind: input, shape index: {}]   ;;  %s1500_s1 = inlined_call_operand.vmem [shape: bf16[27,128], index: 1, kind: input, shape index: {}]   ;;  %s1501_s2 = inlined_call_operand.vmem [shape: f32[1,128], index: 2, kind: input, shape index: {}]   ;;  %s1502_s3 = inlined_call_operand.vmem [shape: f32[1,128], index: 3, kind: input, shape index: {}]   ;;  %s1503_s4 = inlined_call_operand.vmem [shape: f32[1,128], index: 4, kind: input, shape index: {}]   ;;  %s1504_s5 = inlined_call_operand.vmem [shape: bf16[512,128], index: 5, kind: output, shape index: {}]  }
   0x1 LB: > { %s970_s19 = sadd.s32 4294967295, %s1268_s18   ;;  %p974_p0 = scmp.ge.s32.totalorder %s1268_s18, 1  ;;  %s1268_s18 = sphi %s1301_s18, %s15_s18  }
   0x2   : > { %p188_p1 = scmp.lt.s32.totalorder %s1268_s18, 3 }
   0x4   : > { %p189_p2 = pnand %p974_p0, %p188_p1 }
   0x5   : > { %v1244_v0 = vld [vmem:[%s1500_s1] sm:$0xff] (!%p189_p2)   ;;  %vm405_vm0 = vcmask (!%p189_p2), 1044480   ;;  %v1245_v1 = vld [vmem:[%s1500_s1 + $0x8] sm:$0x3f] (!%p189_p2)   ;;  %vm406_vm1 = vcmask (!%p189_p2), 1045504   ;;  %s975_s24 = sshll.u32 (!%p189_p2), %s970_s19, 5 }
   0x6   : > { %192 = sbr.rel (%p189_p2) target bundleno = 279 (0x117), region = 40  ;;  %1195 = vmatprep.subr.bf16.mxu0 (!%p189_p2), %v1244_v0  ;;  %1231 = vmatprep.subr.bf16.mxu1 (!%p189_p2), %v1244_v0  ;;  %v1270_v2 = vmov (!%p189_p2), 65535   ;;  %p217_p3 = scmp.lt.s32.totalorder (!%p189_p2), %s975_s24, 63  ;;  %vm356_vm2 = vcmask (!%p189_p2), 220160   ;;  %v1360_v22 = vld [vmem:[%s1501_s2] ss:$0 sm:$0xff] (!%p189_p2) }
   0x7   : > { %1196 = vmatpush3.bf16.msra.mxu0 (!%p189_p2), %v1244_v0  ;;  %1233 = vmatpush3.bf16.msra.mxu1 (!%p189_p2), %v1244_v0  ;;  %v407_v3 = vsel (!%p189_p2), %vm405_vm0, 4294967295, %v1270_v2  ;;  %v1365_v24 = vld [vmem:[%s1502_s3] ss:$0 sm:$0xff] (!%p189_p2) }
   0x8   : > { %v408_v4 = vsel (!%p189_p2), %vm406_vm1, %v407_v3, 0  ;;  %v1371_v28 = vld [vmem:[%s1503_s4] ss:$0 sm:$0xff] (!%p189_p2) }
   0x9   : > { %v410_v5 = vand.u32 (!%p189_p2), %v1245_v1, %v408_v4 }
   0xb   : > { %1197 = vmatprep.subr.bf16.mxu0 (!%p189_p2), %v410_v5  ;;  %1232 = vmatprep.subr.bf16.mxu1 (!%p189_p2), %v410_v5 }
   0xc   : > { %1198 = vmatpush3.bf16.msra.mxu0 (!%p189_p2), %v410_v5  ;;  %1234 = vmatpush3.bf16.msra.mxu1 (!%p189_p2), %v410_v5 }
   0xd   : > { %s1506_s24 = smov (!%p217_p3, %s975_s24), 63 }
   0xe   : > { %s976_s25 = sshll.u32 %s1506_s24, 2 }
   0xf   : > { %s1323_s28 = scalar_lea.vmem %s1499_s0, %s976_s25  ;;  %s1398_s12 = scalar_lea.vmem %s1504_s5, %s976_s25 }
  0x10   : > { %v1246_v6 = vld [vmem:[%s1323_s28] sm:$0xff]   ;;  %v1248_v8 = vld [vmem:[%s1323_s28 + $0x8] sm:$0xff]   ;;  %v1250_v10 = vld [vmem:[%s1323_s28 + $0x10] sm:$0xff]  }
  0x11   : > { %v1247_v7 = vld [vmem:[%s1323_s28 + $0x40] sm:$0xff]   ;;  %1199 = vmatprep.mubr.msk.bf16.mxu0 %vm356_vm2, %v1246_v6  ;;  %v1249_v9 = vld [vmem:[%s1323_s28 + $0x48] sm:$0xff]   ;;  %v1251_v11 = vld [vmem:[%s1323_s28 + $0x50] sm:$0xff]  }
  0x12   : > { %1215 = vmatprep.mubr.msk.bf16.mxu1 %vm356_vm2, %v1247_v7  ;;  %1200 = vmatmul.mubr.msk.bf16.vlgmr.msra.gmra.mrb[0].mxu0 %vm356_vm2, %v1248_v8  ;;  %v1252_v12 = vld [vmem:[%s1323_s28 + $0x18] sm:$0xff]   ;;  %v1254_v14 = vld [vmem:[%s1323_s28 + $0x20] sm:$0xff]   ;;  %v1256_v16 = vld [vmem:[%s1323_s28 + $0x28] sm:$0xff]  }
  0x13   : > { %1216 = vmatmul.mubr.msk.bf16.vlgmr.msra.gmra.mrb[0].mxu1 %vm356_vm2, %v1249_v9  ;;  %1203 = vmatprep.mubr.msk.bf16.mxu0 %vm356_vm2, %v1250_v10  ;;  %v1253_v13 = vld [vmem:[%s1323_s28 + $0x58] sm:$0xff]   ;;  %v1255_v15 = vld [vmem:[%s1323_s28 + $0x60] sm:$0xff]   ;;  %v1257_v17 = vld [vmem:[%s1323_s28 + $0x68] sm:$0xff]  }
  0x14   : > { %1219 = vmatprep.mubr.msk.bf16.mxu1 %vm356_vm2, %v1251_v11  ;;  %v1258_v18 = vld [vmem:[%s1323_s28 + $0x30] sm:$0xff]   ;;  %v1260_v20 = vld [vmem:[%s1323_s28 + $0x38] sm:$0xff]  }
  0x15   : > { %v1259_v19 = vld [vmem:[%s1323_s28 + $0x70] sm:$0xff]   ;;  %v1261_v21 = vld [vmem:[%s1323_s28 + $0x78] sm:$0xff]  }
  0x1a   : > { %1204 = vmatmul.mubr.msk.bf16.gmra.mrb[4].mxu0 %vm356_vm2, %v1252_v12 }
  0x1b   : > { %1220 = vmatmul.mubr.msk.bf16.gmra.mrb[4].mxu1 %vm356_vm2, %v1253_v13  ;;  %1207 = vmatprep.mubr.msk.bf16.mxu0 %vm356_vm2, %v1254_v14 }
  0x1c   : > { %1223 = vmatprep.mubr.msk.bf16.mxu1 %vm356_vm2, %v1255_v15 }
  0x22   : > { %1208 = vmatmul.mubr.msk.bf16.gmra.mrb[8].mxu0 %vm356_vm2, %v1256_v16 }
  0x23   : > { %1224 = vmatmul.mubr.msk.bf16.gmra.mrb[8].mxu1 %vm356_vm2, %v1257_v17  ;;  %1211 = vmatprep.mubr.msk.bf16.mxu0 %vm356_vm2, %v1258_v18 }
  0x24   : > { %1227 = vmatprep.mubr.msk.bf16.mxu1 %vm356_vm2, %v1259_v19 }
  0x2a   : > { %1212 = vmatmul.mubr.msk.bf16.gmra.mrb[12].mxu0 %vm356_vm2, %v1260_v20 }
  0x2b   : > { %1228 = vmatmul.mubr.msk.bf16.gmra.mrb[12].mxu1 %vm356_vm2, %v1261_v21 }
  0xe5   : > { %v1201_v23 = vpop.f32.mrb[0].mxu0 }
  0xe6   : > { %v582_v25 = vmul.f32 %v1201_v23, %v1360_v22  ;;  %v1217_v26 = vpop.f32.mrb[0].mxu1  ;;  %v446_v27 = vpop.f32.mrb[1].mxu0 }
  0xe7   : > { %v598_v29 = vmul.f32 %v1217_v26, %v1360_v22  ;;  %v580_v30 = vmul.f32 %v1360_v22, %v446_v27  ;;  %v510_v31 = vpop.f32.mrb[1].mxu1  ;;  %v1202_v32 = vpop.f32.mrb[2].mxu0 }
  0xe8   : > { %v621_v33 = vadd.f32 %v1365_v24, %v582_v25  ;;  %v596_v34 = vmul.f32 %v1360_v22, %v510_v31  ;;  %v583_v35 = vmul.f32 %v1202_v32, %v1360_v22  ;;  %v1218_v36 = vpop.f32.mrb[2].mxu1  ;;  %v449_v37 = vpop.f32.mrb[3].mxu0 }
  0xe9   : > { %v637_v38 = vadd.f32 %v1365_v24, %v598_v29  ;;  %v619_v39 = vadd.f32 %v1365_v24, %v580_v30  ;;  %v599_v40 = vmul.f32 %v1218_v36, %v1360_v22  ;;  %v581_v41 = vmul.f32 %v1360_v22, %v449_v37  ;;  %v513_v42 = vpop.f32.mrb[3].mxu1 }
  0xea   : > { %vm653_vm3 = vcmp.gt.f32.partialorder %v621_v33, 0.0  ;;  %v692_v43 = vmul.f32 %v1371_v28, %v621_v33  ;;  %v635_v44 = vadd.f32 %v1365_v24, %v596_v34  ;;  %v622_v45 = vadd.f32 %v1365_v24, %v583_v35 }
  0xeb   : > { %vm669_vm4 = vcmp.gt.f32.partialorder %v637_v38, 0.0  ;;  %v708_v46 = vmul.f32 %v1371_v28, %v637_v38  ;;  %vm651_vm5 = vcmp.gt.f32.partialorder %v619_v39, 0.0  ;;  %v690_v47 = vmul.f32 %v1371_v28, %v619_v39 }
  0xec   : > { %v724_v48 = vsel %vm653_vm3, %v621_v33, %v692_v43  ;;  %vm667_vm6 = vcmp.gt.f32.partialorder %v635_v44, 0.0  ;;  %vm654_vm7 = vcmp.gt.f32.partialorder %v622_v45, 0.0  ;;  %v706_v50 = vmul.f32 %v1371_v28, %v635_v44 }
  0xed   : > { %v740_v49 = vsel %vm669_vm4, %v637_v38, %v708_v46  ;;  %v693_v51 = vmul.f32 %v1371_v28, %v622_v45  ;;  %v638_v52 = vadd.f32 %v1365_v24, %v599_v40  ;;  %v1205_v53 = vpop.f32.mrb[4].mxu0  ;;  %v722_v54 = vsel %vm651_vm5, %v619_v39, %v690_v47 }
  0xee   : > { %v620_v55 = vadd.f32 %v1365_v24, %v581_v41  ;;  %v597_v56 = vmul.f32 %v1360_v22, %v513_v42  ;;  %v586_v57 = vmul.f32 %v1205_v53, %v1360_v22  ;;  %v1221_v58 = vpop.f32.mrb[4].mxu1  ;;  %v462_v59 = vpop.f32.mrb[5].mxu0  ;;  %v738_v14 = vsel %vm667_vm6, %v635_v44, %v706_v50 }
  0xef   : > { %v725_v60 = vsel %vm654_vm7, %v622_v45, %v693_v51  ;;  %vm670_vm8 = vcmp.gt.f32.partialorder %v638_v52, 0.0  ;;  %v709_v61 = vmul.f32 %v1371_v28, %v638_v52  ;;  %v602_v62 = vmul.f32 %v1221_v58, %v1360_v22  ;;  %v526_v63 = vpop.f32.mrb[5].mxu1  ;;  %v1206_v0 = vpop.f32.mrb[6].mxu0 }
  0xf0   : > { %v1090_v1 = vpack.c.bf16 %v725_v60, %v724_v48  ;;  %vm652_vm9 = vcmp.gt.f32.partialorder %v620_v55, 0.0  ;;  %v691_v2 = vmul.f32 %v1371_v28, %v620_v55  ;;  %v636_v3 = vadd.f32 %v1365_v24, %v597_v56  ;;  %v1222_v4 = vpop.f32.mrb[6].mxu1  ;;  %v465_v5 = vpop.f32.mrb[7].mxu0 }
  0xf1   : > { %v741_v6 = vsel %vm670_vm8, %v638_v52, %v709_v61  ;;  %v625_v7 = vadd.f32 %v1365_v24, %v586_v57  ;;  %v641_v8 = vadd.f32 %v1365_v24, %v602_v62  ;;  %v584_v9 = vmul.f32 %v1360_v22, %v462_v59  ;;  %v529_v10 = vpop.f32.mrb[7].mxu1 }
  0xf2   : > { %1162 = vst [vmem:[%s1398_s12 + $0x8] sm:$0xff] %v1090_v1   ;;  %v1130_v11 = vpack.c.bf16 %v741_v6, %v740_v49  ;;  %v723_v12 = vsel %vm652_vm9, %v620_v55, %v691_v2  ;;  %vm668_vm10 = vcmp.gt.f32.partialorder %v636_v3, 0.0  ;;  %v707_v13 = vmul.f32 %v1371_v28, %v636_v3 }
  0xf3   : > { %v1085_v15 = vpack.c.bf16 %v723_v12, %v722_v54  ;;  %vm657_vm11 = vcmp.gt.f32.partialorder %v625_v7, 0.0  ;;  %v696_v16 = vmul.f32 %v1371_v28, %v625_v7  ;;  %v712_v18 = vmul.f32 %v1371_v28, %v641_v8 }
  0xf4   : > { %1170 = vst [vmem:[%s1398_s12 + $0x48] sm:$0xff] %v1130_v11   ;;  %v739_v17 = vsel %vm668_vm10, %v636_v3, %v707_v13  ;;  %v623_v19 = vadd.f32 %v1365_v24, %v584_v9  ;;  %v600_v20 = vmul.f32 %v1360_v22, %v526_v63  ;;  %vm673_vm12 = vcmp.gt.f32.partialorder %v641_v8, 0.0 }
  0xf5   : > { %1086 = vst [vmem:[%s1398_s12] sm:$0xff] %v1085_v15   ;;  %v1125_v21 = vpack.c.bf16 %v739_v17, %v738_v14  ;;  %v587_v23 = vmul.f32 %v1206_v0, %v1360_v22  ;;  %v603_v25 = vmul.f32 %v1222_v4, %v1360_v22  ;;  %v1209_v26 = vpop.f32.mrb[8].mxu0  ;;  %v728_v27 = vsel %vm657_vm11, %v625_v7, %v696_v16 }
  0xf6   : > { %vm655_vm13 = vcmp.gt.f32.partialorder %v623_v19, 0.0  ;;  %v694_v29 = vmul.f32 %v1371_v28, %v623_v19  ;;  %v639_v30 = vadd.f32 %v1365_v24, %v600_v20  ;;  %v1225_v31 = vpop.f32.mrb[8].mxu1  ;;  %v478_v32 = vpop.f32.mrb[9].mxu0  ;;  %v585_v35 = vmul.f32 %v1360_v22, %v465_v5 }
  0xf7   : > { %1169 = vst [vmem:[%s1398_s12 + $0x40] sm:$0xff] %v1125_v21   ;;  %v626_v33 = vadd.f32 %v1365_v24, %v587_v23  ;;  %v642_v34 = vadd.f32 %v1365_v24, %v603_v25  ;;  %v601_v36 = vmul.f32 %v1360_v22, %v529_v10  ;;  %v542_v37 = vpop.f32.mrb[9].mxu1  ;;  %v1210_v38 = vpop.f32.mrb[10].mxu0  ;;  %v744_v39 = vsel %vm673_vm12, %v641_v8, %v712_v18 }
  0xf8   : > { %v726_v40 = vsel %vm655_vm13, %v623_v19, %v694_v29  ;;  %vm671_vm14 = vcmp.gt.f32.partialorder %v639_v30, 0.0  ;;  %v590_v41 = vmul.f32 %v1209_v26, %v1360_v22  ;;  %v1226_v42 = vpop.f32.mrb[10].mxu1  ;;  %v481_v43 = vpop.f32.mrb[11].mxu0  ;;  %v710_v47 = vmul.f32 %v1371_v28, %v639_v30 }
  0xf9   : > { %vm658_vm15 = vcmp.gt.f32.partialorder %v626_v33, 0.0  ;;  %v697_v44 = vmul.f32 %v1371_v28, %v626_v33  ;;  %vm674_vm0 = vcmp.gt.f32.partialorder %v642_v34, 0.0  ;;  %v713_v45 = vmul.f32 %v1371_v28, %v642_v34  ;;  %v545_v46 = vpop.f32.mrb[11].mxu1 }
  0xfa   : > { %v624_v48 = vadd.f32 %v1365_v24, %v585_v35  ;;  %v640_v49 = vadd.f32 %v1365_v24, %v601_v36  ;;  %v629_v50 = vadd.f32 %v1365_v24, %v590_v41  ;;  %v606_v53 = vmul.f32 %v1225_v31, %v1360_v22 }
  0xfb   : > { %v729_v51 = vsel %vm658_vm15, %v626_v33, %v697_v44  ;;  %v745_v52 = vsel %vm674_vm0, %v642_v34, %v713_v45  ;;  %v588_v54 = vmul.f32 %v1360_v22, %v478_v32  ;;  %v604_v0 = vmul.f32 %v1360_v22, %v542_v37 }
  0xfc   : > { %v1100_v55 = vpack.c.bf16 %v729_v51, %v728_v27  ;;  %v1140_v56 = vpack.c.bf16 %v745_v52, %v744_v39  ;;  %vm656_vm1 = vcmp.gt.f32.partialorder %v624_v48, 0.0  ;;  %v695_v57 = vmul.f32 %v1371_v28, %v624_v48 }
  0xfd   : > { %vm672_vm2 = vcmp.gt.f32.partialorder %v640_v49, 0.0  ;;  %v711_v58 = vmul.f32 %v1371_v28, %v640_v49  ;;  %vm661_vm3 = vcmp.gt.f32.partialorder %v629_v50, 0.0  ;;  %v700_v59 = vmul.f32 %v1371_v28, %v629_v50  ;;  %v1213_v60 = vpop.f32.mrb[12].mxu0 }
  0xfe   : > { %1164 = vst [vmem:[%s1398_s12 + $0x18] sm:$0xff] %v1100_v55   ;;  %1172 = vst [vmem:[%s1398_s12 + $0x58] sm:$0xff] %v1140_v56   ;;  %v727_v61 = vsel %vm656_vm1, %v624_v48, %v695_v57  ;;  %v645_v62 = vadd.f32 %v1365_v24, %v606_v53  ;;  %v627_v63 = vadd.f32 %v1365_v24, %v588_v54  ;;  %v1229_v1 = vpop.f32.mrb[12].mxu1  ;;  %v494_v2 = vpop.f32.mrb[13].mxu0 }
  0xff   : > { %v742_v3 = vsel %vm671_vm14, %v639_v30, %v710_v47  ;;  %v1095_v4 = vpack.c.bf16 %v727_v61, %v726_v40  ;;  %v743_v5 = vsel %vm672_vm2, %v640_v49, %v711_v58  ;;  %v591_v6 = vmul.f32 %v1210_v38, %v1360_v22  ;;  %v558_v7 = vpop.f32.mrb[13].mxu1  ;;  %v1214_v8 = vpop.f32.mrb[14].mxu0 }
 0x100   : > { %v1135_v9 = vpack.c.bf16 %v743_v5, %v742_v3  ;;  %vm677_vm4 = vcmp.gt.f32.partialorder %v645_v62, 0.0  ;;  %v716_v10 = vmul.f32 %v1371_v28, %v645_v62  ;;  %v1230_v11 = vpop.f32.mrb[14].mxu1  ;;  %v497_v12 = vpop.f32.mrb[15].mxu0  ;;  %v732_v13 = vsel %vm661_vm3, %v629_v50, %v700_v59 }
 0x101   : > { %1163 = vst [vmem:[%s1398_s12 + $0x10] sm:$0xff] %v1095_v4   ;;  %v643_v14 = vadd.f32 %v1365_v24, %v604_v0  ;;  %v630_v15 = vadd.f32 %v1365_v24, %v591_v6  ;;  %v607_v16 = vmul.f32 %v1226_v42, %v1360_v22  ;;  %v561_v17 = vpop.f32.mrb[15].mxu1  ;;  %vm659_vm5 = vcmp.gt.f32.partialorder %v627_v63, 0.0 }
 0x102   : > { %1171 = vst [vmem:[%s1398_s12 + $0x50] sm:$0xff] %v1135_v9   ;;  %v589_v18 = vmul.f32 %v1360_v22, %v481_v43  ;;  %v605_v19 = vmul.f32 %v1360_v22, %v545_v46  ;;  %v594_v20 = vmul.f32 %v1213_v60, %v1360_v22  ;;  %v748_v21 = vsel %vm677_vm4, %v645_v62, %v716_v10 }
 0x103   : > { %v698_v23 = vmul.f32 %v1371_v28, %v627_v63  ;;  %v714_v25 = vmul.f32 %v1371_v28, %v643_v14  ;;  %vm662_vm6 = vcmp.gt.f32.partialorder %v630_v15, 0.0  ;;  %v701_v26 = vmul.f32 %v1371_v28, %v630_v15 }
 0x104   : > { %v646_v27 = vadd.f32 %v1365_v24, %v607_v16  ;;  %v628_v29 = vadd.f32 %v1365_v24, %v589_v18  ;;  %v644_v30 = vadd.f32 %v1365_v24, %v605_v19  ;;  %vm675_vm7 = vcmp.gt.f32.partialorder %v643_v14, 0.0 }
 0x105   : > { %v633_v31 = vadd.f32 %v1365_v24, %v594_v20  ;;  %v610_v32 = vmul.f32 %v1229_v1, %v1360_v22  ;;  %v592_v33 = vmul.f32 %v1360_v22, %v494_v2  ;;  %v733_v34 = vsel %vm662_vm6, %v630_v15, %v701_v26 }
 0x106   : > { %vm678_vm8 = vcmp.gt.f32.partialorder %v646_v27, 0.0  ;;  %v717_v35 = vmul.f32 %v1371_v28, %v646_v27  ;;  %vm660_vm9 = vcmp.gt.f32.partialorder %v628_v29, 0.0  ;;  %v1110_v36 = vpack.c.bf16 %v733_v34, %v732_v13 }
 0x107   : > { %v699_v37 = vmul.f32 %v1371_v28, %v628_v29  ;;  %vm676_vm10 = vcmp.gt.f32.partialorder %v644_v30, 0.0  ;;  %v715_v38 = vmul.f32 %v1371_v28, %v644_v30  ;;  %v730_v39 = vsel %vm659_vm5, %v627_v63, %v698_v23 }
 0x108   : > { %v746_v40 = vsel %vm675_vm7, %v643_v14, %v714_v25  ;;  %v749_v41 = vsel %vm678_vm8, %v646_v27, %v717_v35  ;;  %v704_v42 = vmul.f32 %v1371_v28, %v633_v31  ;;  %1166 = vst [vmem:[%s1398_s12 + $0x28] sm:$0xff] %v1110_v36   ;;  %v649_v46 = vadd.f32 %v1365_v24, %v610_v32 }
 0x109   : > { %v1150_v43 = vpack.c.bf16 %v749_v41, %v748_v21  ;;  %v731_v44 = vsel %vm660_vm9, %v628_v29, %v699_v37  ;;  %v747_v45 = vsel %vm676_vm10, %v644_v30, %v715_v38  ;;  %vm665_vm11 = vcmp.gt.f32.partialorder %v633_v31, 0.0 }
 0x10a   : > { %v1105_v47 = vpack.c.bf16 %v731_v44, %v730_v39  ;;  %v1145_v48 = vpack.c.bf16 %v747_v45, %v746_v40  ;;  %v631_v49 = vadd.f32 %v1365_v24, %v592_v33  ;;  %v608_v50 = vmul.f32 %v1360_v22, %v558_v7 }
 0x10b   : > { %1174 = vst [vmem:[%s1398_s12 + $0x68] sm:$0xff] %v1150_v43   ;;  %v595_v51 = vmul.f32 %v1214_v8, %v1360_v22  ;;  %v611_v52 = vmul.f32 %v1230_v11, %v1360_v22  ;;  %v593_v53 = vmul.f32 %v1360_v22, %v497_v12  ;;  %v609_v54 = vmul.f32 %v1360_v22, %v561_v17 }
 0x10c   : > { %1165 = vst [vmem:[%s1398_s12 + $0x20] sm:$0xff] %v1105_v47   ;;  %1173 = vst [vmem:[%s1398_s12 + $0x60] sm:$0xff] %v1145_v48   ;;  %v736_v55 = vsel %vm665_vm11, %v633_v31, %v704_v42  ;;  %v720_v56 = vmul.f32 %v1371_v28, %v649_v46  ;;  %v647_v57 = vadd.f32 %v1365_v24, %v608_v50  ;;  %vm681_vm12 = vcmp.gt.f32.partialorder %v649_v46, 0.0 }
 0x10d   : > { %v634_v58 = vadd.f32 %v1365_v24, %v595_v51  ;;  %v650_v59 = vadd.f32 %v1365_v24, %v611_v52  ;;  %v632_v60 = vadd.f32 %v1365_v24, %v593_v53  ;;  %v648_v61 = vadd.f32 %v1365_v24, %v609_v54 }
 0x10e   : > { %vm663_vm13 = vcmp.gt.f32.partialorder %v631_v49, 0.0  ;;  %v702_v62 = vmul.f32 %v1371_v28, %v631_v49  ;;  %v718_v63 = vmul.f32 %v1371_v28, %v647_v57  ;;  %vm679_vm0 = vcmp.gt.f32.partialorder %v647_v57, 0.0 }
 0x10f   : > { %vm666_vm14 = vcmp.gt.f32.partialorder %v634_v58, 0.0  ;;  %v705_v22 = vmul.f32 %v1371_v28, %v634_v58  ;;  %vm682_vm15 = vcmp.gt.f32.partialorder %v650_v59, 0.0  ;;  %v721_v0 = vmul.f32 %v1371_v28, %v650_v59 }
 0x110   : > { %vm664_vm1 = vcmp.gt.f32.partialorder %v632_v60, 0.0  ;;  %v703_v1 = vmul.f32 %v1371_v28, %v632_v60  ;;  %vm680_vm2 = vcmp.gt.f32.partialorder %v648_v61, 0.0  ;;  %v752_v24 = vsel %vm681_vm12, %v649_v46, %v720_v56 }
 0x111   : > { %v737_v2 = vsel %vm666_vm14, %v634_v58, %v705_v22  ;;  %v753_v3 = vsel %vm682_vm15, %v650_v59, %v721_v0  ;;  %v719_v4 = vmul.f32 %v1371_v28, %v648_v61  ;;  %v734_v5 = vsel %vm663_vm13, %v631_v49, %v702_v62 }
 0x112   : > { %v1120_v6 = vpack.c.bf16 %v737_v2, %v736_v55  ;;  %v1160_v7 = vpack.c.bf16 %v753_v3, %v752_v24  ;;  %v735_v8 = vsel %vm664_vm1, %v632_v60, %v703_v1  ;;  %v750_v9 = vsel %vm679_vm0, %v647_v57, %v718_v63 }
 0x113   : > { %v1115_v10 = vpack.c.bf16 %v735_v8, %v734_v5  ;;  %v751_v11 = vsel %vm680_vm2, %v648_v61, %v719_v4 }
 0x114   : > { %1168 = vst [vmem:[%s1398_s12 + $0x38] sm:$0xff] %v1120_v6   ;;  %1176 = vst [vmem:[%s1398_s12 + $0x78] sm:$0xff] %v1160_v7   ;;  %v1155_v12 = vpack.c.bf16 %v751_v11, %v750_v9 }
 0x115   : > { %1167 = vst [vmem:[%s1398_s12 + $0x30] sm:$0xff] %v1115_v10  }
 0x116   : > { %1175 = vst [vmem:[%s1398_s12 + $0x70] sm:$0xff] %v1155_v12  }
 0x117 PF: > { %s15_s18 = sadd.s32 1, %s1268_s18  }
 0x118   : > { %p12_p4 = scmp.ge.s32.totalorder %s15_s18, 4  }
 0x11a   :  { %14 = sbr.rel (!%p12_p4) target bundleno = 1 (0x1), region = 70 }

// kernel: unet_forward.23
= control target key start
LH: loop header
LB: loop body
LE: loop exit
PB: predicated region body
PF: predicated region fallthrough
CT: control target
= control target key end

     0   :  { %s1340_s18 = smov 0   ;;  %s1545_s0 = inlined_call_operand.vmem [shape: bf16[512,72], index: 0, kind: input, shape index: {}]   ;;  %s1546_s1 = inlined_call_operand.vmem [shape: bf16[72,128], index: 1, kind: input, shape index: {}]   ;;  %s1547_s2 = inlined_call_operand.vmem [shape: f32[1,128], index: 2, kind: input, shape index: {}]   ;;  %s1548_s3 = inlined_call_operand.vmem [shape: f32[1,128], index: 3, kind: input, shape index: {}]   ;;  %s1549_s4 = inlined_call_operand.vmem [shape: f32[1,128], index: 4, kind: input, shape index: {}]   ;;  %s1550_s5 = inlined_call_operand.vmem [shape: bf16[512,128], index: 5, kind: output, shape index: {}]  }
   0x1 LB: > { %s988_s19 = sadd.s32 4294967295, %s1308_s18   ;;  %p992_p0 = scmp.ge.s32.totalorder %s1308_s18, 1  ;;  %s1308_s18 = sphi %s1340_s18, %s15_s18  }
   0x2   : > { %p188_p1 = scmp.lt.s32.totalorder %s1308_s18, 3 }
   0x4   : > { %p189_p2 = pnand %p992_p0, %p188_p1 }
   0x5   : > { %v1281_v0 = vld [vmem:[%s1546_s1] sm:$0xff] (!%p189_p2)   ;;  %v1282_v1 = vld [vmem:[%s1546_s1 + $0x8] sm:$0xff] (!%p189_p2)   ;;  %s993_s24 = sshll.u32 (!%p189_p2), %s988_s19, 5  ;;  %v1283_v2 = vld [vmem:[%s1546_s1 + $0x10] sm:$0xff] (!%p189_p2)   ;;  %vm377_vm0 = vcmask (!%p189_p2), 588800   ;;  %vm426_vm1 = vcmask (!%p189_p2), 1043456  }
   0x6   : > { %192 = sbr.rel (%p189_p2) target bundleno = 288 (0x120), region = 40  ;;  %1219 = vmatprep.subr.bf16.mxu0 (!%p189_p2), %v1281_v0  ;;  %1261 = vmatprep.subr.bf16.mxu1 (!%p189_p2), %v1281_v0  ;;  %p217_p3 = scmp.lt.s32.totalorder (!%p189_p2), %s993_s24, 63  ;;  %v1284_v3 = vld [vmem:[%s1546_s1 + $0x18] sm:$0xff] (!%p189_p2)   ;;  %v1285_v6 = vld [vmem:[%s1546_s1 + $0x20] ss:$0 sps:$4 sm:$0xff] (!%p189_p2)  }
   0x7   : > { %1220 = vmatpush3.bf16.msra.mxu0 (!%p189_p2), %v1281_v0  ;;  %1266 = vmatpush3.bf16.msra.mxu1 (!%p189_p2), %v1281_v0  ;;  %v428_v7 = vsel (!%p189_p2), %vm426_vm1, %v1285_v6, 0  ;;  %v1408_v22 = vld [vmem:[%s1547_s2] ss:$0 sm:$0xff] (!%p189_p2) }
   0x8   : > { %1221 = vmatprep.subr.bf16.mxu0 (!%p189_p2), %v1282_v1  ;;  %1262 = vmatprep.subr.bf16.mxu1 (!%p189_p2), %v1282_v1  ;;  %v1413_v24 = vld [vmem:[%s1548_s3] ss:$0 sm:$0xff] (!%p189_p2) }
   0x9   : > { %v1420_v30 = vld [vmem:[%s1549_s4] ss:$0 sm:$0xff] (!%p189_p2) }
   0xb   : > { %1222 = vmatpush3.bf16.msra.mxu0 (!%p189_p2), %v1282_v1  ;;  %1267 = vmatpush3.bf16.msra.mxu1 (!%p189_p2), %v1282_v1 }
   0xc   : > { %1223 = vmatprep.subr.bf16.mxu0 (!%p189_p2), %v1283_v2  ;;  %1263 = vmatprep.subr.bf16.mxu1 (!%p189_p2), %v1283_v2 }
   0xd   : > { %s1552_s24 = smov (!%p217_p3, %s993_s24), 63 }
   0xe   : > { %s994_s27 = sshll.u32 %s1552_s24, 2 }
   0xf   : > { %s1368_s7 = scalar_lea.vmem %s1545_s0, %s994_s27  ;;  %1224 = vmatpush3.bf16.msra.mxu0 %v1283_v2  ;;  %1268 = vmatpush3.bf16.msra.mxu1 %v1283_v2  ;;  %s1449_s19 = scalar_lea.vmem %s1550_s5, %s994_s27 }
  0x10   : > { %v1286_v4 = vld [vmem:[%s1368_s7] sm:$0xff]   ;;  %1225 = vmatprep.subr.bf16.mxu0 %v1284_v3  ;;  %1264 = vmatprep.subr.bf16.mxu1 %v1284_v3  ;;  %v1288_v8 = vld [vmem:[%s1368_s7 + $0x8] sm:$0xff]   ;;  %v1290_v10 = vld [vmem:[%s1368_s7 + $0x10] sm:$0xff]  }
  0x11   : > { %v1287_v5 = vld [vmem:[%s1368_s7 + $0x40] sm:$0xff]   ;;  %1229 = vmatprep.mubr.msk.bf16.mxu0 %vm377_vm0, %v1286_v4  ;;  %v1289_v9 = vld [vmem:[%s1368_s7 + $0x48] sm:$0xff]   ;;  %v1291_v11 = vld [vmem:[%s1368_s7 + $0x50] sm:$0xff]  }
  0x12   : > { %1245 = vmatprep.mubr.msk.bf16.mxu1 %vm377_vm0, %v1287_v5  ;;  %v1292_v12 = vld [vmem:[%s1368_s7 + $0x18] sm:$0xff]   ;;  %v1294_v14 = vld [vmem:[%s1368_s7 + $0x20] sm:$0xff]   ;;  %v1296_v16 = vld [vmem:[%s1368_s7 + $0x28] sm:$0xff]  }
  0x13   : > { %1226 = vmatpush3.bf16.msra.mxu0 %v1284_v3  ;;  %1269 = vmatpush3.bf16.msra.mxu1 %v1284_v3  ;;  %v1293_v13 = vld [vmem:[%s1368_s7 + $0x58] sm:$0xff]   ;;  %v1295_v15 = vld [vmem:[%s1368_s7 + $0x60] sm:$0xff]   ;;  %v1297_v17 = vld [vmem:[%s1368_s7 + $0x68] sm:$0xff]  }
  0x14   : > { %1271 = vmatprep.subr.msk.bf16.mxu0 %vm426_vm1, %v1285_v6  ;;  %1272 = vmatprep.subr.msk.bf16.mxu1 %vm426_vm1, %v1285_v6  ;;  %v1298_v18 = vld [vmem:[%s1368_s7 + $0x30] sm:$0xff]   ;;  %v1300_v20 = vld [vmem:[%s1368_s7 + $0x38] sm:$0xff]  }
  0x15   : > { %v1299_v19 = vld [vmem:[%s1368_s7 + $0x70] sm:$0xff]   ;;  %v1301_v21 = vld [vmem:[%s1368_s7 + $0x78] sm:$0xff]  }
  0x17   : > { %1228 = vmatpush3.bf16.msra.mxu0 %v428_v7  ;;  %1270 = vmatpush3.bf16.msra.mxu1 %v428_v7 }
  0x1a   : > { %1230 = vmatmul.mubr.msk.bf16.vlgmr.msra.gmra.mrb[0].mxu0 %vm377_vm0, %v1288_v8  ;;  %1246 = vmatmul.mubr.msk.bf16.vlgmr.msra.gmra.mrb[0].mxu1 %vm377_vm0, %v1289_v9 }
  0x1b   : > { %1233 = vmatprep.mubr.msk.bf16.mxu0 %vm377_vm0, %v1290_v10  ;;  %1249 = vmatprep.mubr.msk.bf16.mxu1 %vm377_vm0, %v1291_v11 }
  0x22   : > { %1234 = vmatmul.mubr.msk.bf16.gmra.mrb[4].mxu0 %vm377_vm0, %v1292_v12  ;;  %1250 = vmatmul.mubr.msk.bf16.gmra.mrb[4].mxu1 %vm377_vm0, %v1293_v13 }
  0x23   : > { %1237 = vmatprep.mubr.msk.bf16.mxu0 %vm377_vm0, %v1294_v14  ;;  %1253 = vmatprep.mubr.msk.bf16.mxu1 %vm377_vm0, %v1295_v15 }
  0x2a   : > { %1238 = vmatmul.mubr.msk.bf16.gmra.mrb[8].mxu0 %vm377_vm0, %v1296_v16  ;;  %1254 = vmatmul.mubr.msk.bf16.gmra.mrb[8].mxu1 %vm377_vm0, %v1297_v17 }
  0x2b   : > { %1241 = vmatprep.mubr.msk.bf16.mxu0 %vm377_vm0, %v1298_v18  ;;  %1257 = vmatprep.mubr.msk.bf16.mxu1 %vm377_vm0, %v1299_v19 }
  0x32   : > { %1242 = vmatmul.mubr.msk.bf16.gmra.mrb[12].mxu0 %vm377_vm0, %v1300_v20  ;;  %1258 = vmatmul.mubr.msk.bf16.gmra.mrb[12].mxu1 %vm377_vm0, %v1301_v21 }
  0xed   : > { %v1231_v23 = vpop.f32.mrb[0].mxu0  ;;  %v1247_v25 = vpop.f32.mrb[0].mxu1 }
  0xee   : > { %v600_v26 = vmul.f32 %v1231_v23, %v1408_v22  ;;  %v616_v27 = vmul.f32 %v1247_v25, %v1408_v22  ;;  %v464_v28 = vpop.f32.mrb[1].mxu0  ;;  %v528_v29 = vpop.f32.mrb[1].mxu1 }
  0xef   : > { %v598_v31 = vmul.f32 %v1408_v22, %v464_v28  ;;  %v614_v32 = vmul.f32 %v1408_v22, %v528_v29  ;;  %v1232_v33 = vpop.f32.mrb[2].mxu0  ;;  %v1248_v34 = vpop.f32.mrb[2].mxu1 }
  0xf0   : > { %v639_v35 = vadd.f32 %v1413_v24, %v600_v26  ;;  %v655_v36 = vadd.f32 %v1413_v24, %v616_v27  ;;  %v601_v37 = vmul.f32 %v1232_v33, %v1408_v22  ;;  %v617_v38 = vmul.f32 %v1248_v34, %v1408_v22  ;;  %v467_v39 = vpop.f32.mrb[3].mxu0  ;;  %v531_v40 = vpop.f32.mrb[3].mxu1 }
  0xf1   : > { %v637_v41 = vadd.f32 %v1413_v24, %v598_v31  ;;  %v653_v42 = vadd.f32 %v1413_v24, %v614_v32  ;;  %v599_v43 = vmul.f32 %v1408_v22, %v467_v39  ;;  %v615_v44 = vmul.f32 %v1408_v22, %v531_v40 }
  0xf2   : > { %vm671_vm2 = vcmp.gt.f32.partialorder %v639_v35, 0.0  ;;  %v710_v45 = vmul.f32 %v1420_v30, %v639_v35  ;;  %vm687_vm3 = vcmp.gt.f32.partialorder %v655_v36, 0.0  ;;  %v726_v46 = vmul.f32 %v1420_v30, %v655_v36 }
  0xf3   : > { %vm669_vm4 = vcmp.gt.f32.partialorder %v637_v41, 0.0  ;;  %v708_v47 = vmul.f32 %v1420_v30, %v637_v41  ;;  %vm685_vm5 = vcmp.gt.f32.partialorder %v653_v42, 0.0  ;;  %v724_v48 = vmul.f32 %v1420_v30, %v653_v42 }
  0xf4   : > { %v742_v49 = vsel %vm671_vm2, %v639_v35, %v710_v45  ;;  %v758_v50 = vsel %vm687_vm3, %v655_v36, %v726_v46  ;;  %v640_v51 = vadd.f32 %v1413_v24, %v601_v37  ;;  %v656_v52 = vadd.f32 %v1413_v24, %v617_v38 }
  0xf5   : > { %v740_v53 = vsel %vm669_vm4, %v637_v41, %v708_v47  ;;  %v756_v54 = vsel %vm685_vm5, %v653_v42, %v724_v48  ;;  %v638_v55 = vadd.f32 %v1413_v24, %v599_v43  ;;  %v654_v56 = vadd.f32 %v1413_v24, %v615_v44  ;;  %v1235_v57 = vpop.f32.mrb[4].mxu0  ;;  %v1251_v58 = vpop.f32.mrb[4].mxu1 }
  0xf6   : > { %vm672_vm6 = vcmp.gt.f32.partialorder %v640_v51, 0.0  ;;  %v711_v59 = vmul.f32 %v1420_v30, %v640_v51  ;;  %vm688_vm7 = vcmp.gt.f32.partialorder %v656_v52, 0.0  ;;  %v727_v60 = vmul.f32 %v1420_v30, %v656_v52  ;;  %v480_v61 = vpop.f32.mrb[5].mxu0  ;;  %v544_v62 = vpop.f32.mrb[5].mxu1 }
  0xf7   : > { %vm670_vm8 = vcmp.gt.f32.partialorder %v638_v55, 0.0  ;;  %v709_v63 = vmul.f32 %v1420_v30, %v638_v55  ;;  %vm686_vm9 = vcmp.gt.f32.partialorder %v654_v56, 0.0  ;;  %v725_v0 = vmul.f32 %v1420_v30, %v654_v56  ;;  %v1236_v1 = vpop.f32.mrb[6].mxu0  ;;  %v1252_v2 = vpop.f32.mrb[6].mxu1 }
  0xf8   : > { %v743_v3 = vsel %vm672_vm6, %v640_v51, %v711_v59  ;;  %v759_v4 = vsel %vm688_vm7, %v656_v52, %v727_v60  ;;  %v604_v5 = vmul.f32 %v1235_v57, %v1408_v22  ;;  %v620_v6 = vmul.f32 %v1251_v58, %v1408_v22  ;;  %v483_v7 = vpop.f32.mrb[7].mxu0  ;;  %v547_v8 = vpop.f32.mrb[7].mxu1 }
  0xf9   : > { %v1111_v9 = vpack.c.bf16 %v743_v3, %v742_v49  ;;  %v1151_v10 = vpack.c.bf16 %v759_v4, %v758_v50  ;;  %v741_v11 = vsel %vm670_vm8, %v638_v55, %v709_v63  ;;  %v757_v12 = vsel %vm686_vm9, %v654_v56, %v725_v0 }
  0xfa   : > { %v1106_v13 = vpack.c.bf16 %v741_v11, %v740_v53  ;;  %v1146_v14 = vpack.c.bf16 %v757_v12, %v756_v54  ;;  %v643_v15 = vadd.f32 %v1413_v24, %v604_v5  ;;  %v659_v16 = vadd.f32 %v1413_v24, %v620_v6 }
  0xfb   : > { %1183 = vst [vmem:[%s1449_s19 + $0x8] sm:$0xff] %v1111_v9   ;;  %1191 = vst [vmem:[%s1449_s19 + $0x48] sm:$0xff] %v1151_v10   ;;  %v602_v17 = vmul.f32 %v1408_v22, %v480_v61  ;;  %v618_v18 = vmul.f32 %v1408_v22, %v544_v62  ;;  %v605_v19 = vmul.f32 %v1236_v1, %v1408_v22 }
  0xfc   : > { %v621_v20 = vmul.f32 %v1252_v2, %v1408_v22  ;;  %1107 = vst [vmem:[%s1449_s19] sm:$0xff] %v1106_v13   ;;  %1190 = vst [vmem:[%s1449_s19 + $0x40] sm:$0xff] %v1146_v14   ;;  %vm675_vm10 = vcmp.gt.f32.partialorder %v643_v15, 0.0  ;;  %v714_v21 = vmul.f32 %v1420_v30, %v643_v15  ;;  %vm691_vm11 = vcmp.gt.f32.partialorder %v659_v16, 0.0 }
  0xfd   : > { %v730_v23 = vmul.f32 %v1420_v30, %v659_v16  ;;  %v641_v25 = vadd.f32 %v1413_v24, %v602_v17  ;;  %v657_v26 = vadd.f32 %v1413_v24, %v618_v18  ;;  %v644_v27 = vadd.f32 %v1413_v24, %v605_v19  ;;  %v1239_v29 = vpop.f32.mrb[8].mxu0  ;;  %v1255_v31 = vpop.f32.mrb[8].mxu1 }
  0xfe   : > { %v660_v28 = vadd.f32 %v1413_v24, %v621_v20  ;;  %v746_v32 = vsel %vm675_vm10, %v643_v15, %v714_v21  ;;  %v603_v34 = vmul.f32 %v1408_v22, %v483_v7  ;;  %v619_v35 = vmul.f32 %v1408_v22, %v547_v8  ;;  %v496_v36 = vpop.f32.mrb[9].mxu0  ;;  %v560_v37 = vpop.f32.mrb[9].mxu1 }
  0xff   : > { %v762_v33 = vsel %vm691_vm11, %v659_v16, %v730_v23  ;;  %vm673_vm12 = vcmp.gt.f32.partialorder %v641_v25, 0.0  ;;  %v712_v38 = vmul.f32 %v1420_v30, %v641_v25  ;;  %vm689_vm13 = vcmp.gt.f32.partialorder %v657_v26, 0.0  ;;  %v1240_v40 = vpop.f32.mrb[10].mxu0  ;;  %v1256_v41 = vpop.f32.mrb[10].mxu1 }
 0x100   : > { %v728_v39 = vmul.f32 %v1420_v30, %v657_v26  ;;  %vm676_vm14 = vcmp.gt.f32.partialorder %v644_v27, 0.0  ;;  %v715_v42 = vmul.f32 %v1420_v30, %v644_v27  ;;  %vm692_vm15 = vcmp.gt.f32.partialorder %v660_v28, 0.0  ;;  %v499_v44 = vpop.f32.mrb[11].mxu0  ;;  %v563_v45 = vpop.f32.mrb[11].mxu1 }
 0x101   : > { %v731_v43 = vmul.f32 %v1420_v30, %v660_v28  ;;  %v744_v46 = vsel %vm673_vm12, %v641_v25, %v712_v38  ;;  %v642_v48 = vadd.f32 %v1413_v24, %v603_v34  ;;  %v658_v49 = vadd.f32 %v1413_v24, %v619_v35 }
 0x102   : > { %v760_v47 = vsel %vm689_vm13, %v657_v26, %v728_v39  ;;  %v747_v50 = vsel %vm676_vm14, %v644_v27, %v715_v42  ;;  %v608_v52 = vmul.f32 %v1239_v29, %v1408_v22  ;;  %v624_v53 = vmul.f32 %v1255_v31, %v1408_v22 }
 0x103   : > { %v763_v51 = vsel %vm692_vm15, %v660_v28, %v731_v43  ;;  %v1121_v54 = vpack.c.bf16 %v747_v50, %v746_v32  ;;  %vm674_vm0 = vcmp.gt.f32.partialorder %v642_v48, 0.0  ;;  %v713_v56 = vmul.f32 %v1420_v30, %v642_v48 }
 0x104   : > { %v1161_v55 = vpack.c.bf16 %v763_v51, %v762_v33  ;;  %vm690_vm1 = vcmp.gt.f32.partialorder %v658_v49, 0.0  ;;  %v729_v57 = vmul.f32 %v1420_v30, %v658_v49  ;;  %v647_v58 = vadd.f32 %v1413_v24, %v608_v52 }
 0x105   : > { %v663_v59 = vadd.f32 %v1413_v24, %v624_v53  ;;  %1185 = vst [vmem:[%s1449_s19 + $0x18] sm:$0xff] %v1121_v54   ;;  %v745_v60 = vsel %vm674_vm0, %v642_v48, %v713_v56  ;;  %v606_v61 = vmul.f32 %v1408_v22, %v496_v36  ;;  %v622_v62 = vmul.f32 %v1408_v22, %v560_v37  ;;  %v1243_v0 = vpop.f32.mrb[12].mxu0  ;;  %v1259_v1 = vpop.f32.mrb[12].mxu1 }
 0x106   : > { %1193 = vst [vmem:[%s1449_s19 + $0x58] sm:$0xff] %v1161_v55   ;;  %v609_v63 = vmul.f32 %v1240_v40, %v1408_v22  ;;  %v1116_v2 = vpack.c.bf16 %v745_v60, %v744_v46  ;;  %v761_v3 = vsel %vm690_vm1, %v658_v49, %v729_v57  ;;  %vm679_vm2 = vcmp.gt.f32.partialorder %v647_v58, 0.0  ;;  %v512_v5 = vpop.f32.mrb[13].mxu0  ;;  %v576_v6 = vpop.f32.mrb[13].mxu1 }
 0x107   : > { %v718_v4 = vmul.f32 %v1420_v30, %v647_v58  ;;  %v1156_v7 = vpack.c.bf16 %v761_v3, %v760_v47  ;;  %vm695_vm3 = vcmp.gt.f32.partialorder %v663_v59, 0.0  ;;  %v734_v8 = vmul.f32 %v1420_v30, %v663_v59  ;;  %v1244_v10 = vpop.f32.mrb[14].mxu0  ;;  %v1260_v11 = vpop.f32.mrb[14].mxu1 }
 0x108   : > { %v645_v9 = vadd.f32 %v1413_v24, %v606_v61  ;;  %1184 = vst [vmem:[%s1449_s19 + $0x10] sm:$0xff] %v1116_v2   ;;  %v661_v12 = vadd.f32 %v1413_v24, %v622_v62  ;;  %v648_v13 = vadd.f32 %v1413_v24, %v609_v63  ;;  %v625_v14 = vmul.f32 %v1256_v41, %v1408_v22  ;;  %v515_v15 = vpop.f32.mrb[15].mxu0  ;;  %v579_v16 = vpop.f32.mrb[15].mxu1 }
 0x109   : > { %1192 = vst [vmem:[%s1449_s19 + $0x50] sm:$0xff] %v1156_v7   ;;  %v750_v17 = vsel %vm679_vm2, %v647_v58, %v718_v4  ;;  %v766_v18 = vsel %vm695_vm3, %v663_v59, %v734_v8  ;;  %v607_v19 = vmul.f32 %v1408_v22, %v499_v44  ;;  %v623_v26 = vmul.f32 %v1408_v22, %v563_v45 }
 0x10a   : > { %vm677_vm4 = vcmp.gt.f32.partialorder %v645_v9, 0.0  ;;  %v716_v20 = vmul.f32 %v1420_v30, %v645_v9  ;;  %vm680_vm5 = vcmp.gt.f32.partialorder %v648_v13, 0.0  ;;  %v719_v21 = vmul.f32 %v1420_v30, %v648_v13 }
 0x10b   : > { %vm693_vm6 = vcmp.gt.f32.partialorder %v661_v12, 0.0  ;;  %v664_v23 = vadd.f32 %v1413_v24, %v625_v14  ;;  %v646_v25 = vadd.f32 %v1413_v24, %v607_v19  ;;  %v732_v27 = vmul.f32 %v1420_v30, %v661_v12 }
 0x10c   : > { %v751_v28 = vsel %vm680_vm5, %v648_v13, %v719_v21  ;;  %v612_v29 = vmul.f32 %v1243_v0, %v1408_v22  ;;  %v628_v31 = vmul.f32 %v1259_v1, %v1408_v22  ;;  %v748_v34 = vsel %vm677_vm4, %v645_v9, %v716_v20 }
 0x10d   : > { %v1131_v32 = vpack.c.bf16 %v751_v28, %v750_v17  ;;  %vm696_vm7 = vcmp.gt.f32.partialorder %v664_v23, 0.0  ;;  %v735_v33 = vmul.f32 %v1420_v30, %v664_v23  ;;  %vm678_vm8 = vcmp.gt.f32.partialorder %v646_v25, 0.0 }
 0x10e   : > { %v717_v35 = vmul.f32 %v1420_v30, %v646_v25  ;;  %v662_v36 = vadd.f32 %v1413_v24, %v623_v26  ;;  %v651_v37 = vadd.f32 %v1413_v24, %v612_v29  ;;  %v667_v39 = vadd.f32 %v1413_v24, %v628_v31 }
 0x10f   : > { %1187 = vst [vmem:[%s1449_s19 + $0x28] sm:$0xff] %v1131_v32   ;;  %v767_v38 = vsel %vm696_vm7, %v664_v23, %v735_v33  ;;  %v610_v40 = vmul.f32 %v1408_v22, %v512_v5  ;;  %v613_v41 = vmul.f32 %v1244_v10, %v1408_v22  ;;  %v626_v46 = vmul.f32 %v1408_v22, %v576_v6 }
 0x110   : > { %v1171_v42 = vpack.c.bf16 %v767_v38, %v766_v18  ;;  %v749_v43 = vsel %vm678_vm8, %v646_v25, %v717_v35  ;;  %vm694_vm9 = vcmp.gt.f32.partialorder %v662_v36, 0.0  ;;  %v733_v44 = vmul.f32 %v1420_v30, %v662_v36 }
 0x111   : > { %v1126_v45 = vpack.c.bf16 %v749_v43, %v748_v34  ;;  %v764_v47 = vsel %vm693_vm6, %v661_v12, %v732_v27  ;;  %vm683_vm10 = vcmp.gt.f32.partialorder %v651_v37, 0.0  ;;  %v722_v49 = vmul.f32 %v1420_v30, %v651_v37 }
 0x112   : > { %1195 = vst [vmem:[%s1449_s19 + $0x68] sm:$0xff] %v1171_v42   ;;  %v765_v48 = vsel %vm694_vm9, %v662_v36, %v733_v44  ;;  %v738_v51 = vmul.f32 %v1420_v30, %v667_v39  ;;  %v652_v52 = vadd.f32 %v1413_v24, %v613_v41  ;;  %v629_v53 = vmul.f32 %v1260_v11, %v1408_v22 }
 0x113   : > { %1186 = vst [vmem:[%s1449_s19 + $0x20] sm:$0xff] %v1126_v45   ;;  %v1166_v50 = vpack.c.bf16 %v765_v48, %v764_v47  ;;  %vm699_vm11 = vcmp.gt.f32.partialorder %v667_v39, 0.0  ;;  %v649_v54 = vadd.f32 %v1413_v24, %v610_v40  ;;  %v665_v55 = vadd.f32 %v1413_v24, %v626_v46 }
 0x114   : > { %vm684_vm12 = vcmp.gt.f32.partialorder %v652_v52, 0.0  ;;  %v723_v56 = vmul.f32 %v1420_v30, %v652_v52  ;;  %v668_v57 = vadd.f32 %v1413_v24, %v629_v53  ;;  %v754_v58 = vsel %vm683_vm10, %v651_v37, %v722_v49 }
 0x115   : > { %1194 = vst [vmem:[%s1449_s19 + $0x60] sm:$0xff] %v1166_v50   ;;  %v611_v59 = vmul.f32 %v1408_v22, %v515_v15  ;;  %v627_v60 = vmul.f32 %v1408_v22, %v579_v16  ;;  %v770_v61 = vsel %vm699_vm11, %v667_v39, %v738_v51  ;;  %v720_v0 = vmul.f32 %v1420_v30, %v649_v54 }
 0x116   : > { %v755_v62 = vsel %vm684_vm12, %v652_v52, %v723_v56  ;;  %vm700_vm13 = vcmp.gt.f32.partialorder %v668_v57, 0.0  ;;  %v739_v63 = vmul.f32 %v1420_v30, %v668_v57  ;;  %vm681_vm14 = vcmp.gt.f32.partialorder %v649_v54, 0.0 }
 0x117   : > { %v1141_v1 = vpack.c.bf16 %v755_v62, %v754_v58  ;;  %v650_v2 = vadd.f32 %v1413_v24, %v611_v59  ;;  %v666_v3 = vadd.f32 %v1413_v24, %v627_v60  ;;  %vm697_vm15 = vcmp.gt.f32.partialorder %v665_v55, 0.0 }
 0x118   : > { %v736_v4 = vmul.f32 %v1420_v30, %v665_v55  ;;  %v771_v22 = vsel %vm700_vm13, %v668_v57, %v739_v63  ;;  %v752_v8 = vsel %vm681_vm14, %v649_v54, %v720_v0 }
 0x119   : > { %1189 = vst [vmem:[%s1449_s19 + $0x38] sm:$0xff] %v1141_v1   ;;  %v1181_v5 = vpack.c.bf16 %v771_v22, %v770_v61  ;;  %vm682_vm0 = vcmp.gt.f32.partialorder %v650_v2, 0.0  ;;  %v721_v6 = vmul.f32 %v1420_v30, %v650_v2  ;;  %vm698_vm1 = vcmp.gt.f32.partialorder %v666_v3, 0.0 }
 0x11a   : > { %v737_v7 = vmul.f32 %v1420_v30, %v666_v3  ;;  %v768_v10 = vsel %vm697_vm15, %v665_v55, %v736_v4 }
 0x11b   : > { %1197 = vst [vmem:[%s1449_s19 + $0x78] sm:$0xff] %v1181_v5   ;;  %v753_v9 = vsel %vm682_vm0, %v650_v2, %v721_v6 }
 0x11c   : > { %v1136_v24 = vpack.c.bf16 %v753_v9, %v752_v8  ;;  %v769_v11 = vsel %vm698_vm1, %v666_v3, %v737_v7 }
 0x11d   : > { %v1176_v12 = vpack.c.bf16 %v769_v11, %v768_v10 }
 0x11e   : > { %1188 = vst [vmem:[%s1449_s19 + $0x30] sm:$0xff] %v1136_v24  }
 0x11f   : > { %1196 = vst [vmem:[%s1449_s19 + $0x70] sm:$0xff] %v1176_v12  }
 0x120 PF: > { %s15_s18 = sadd.s32 1, %s1308_s18  }
 0x121   : > { %p12_p4 = scmp.ge.s32.totalorder %s15_s18, 4  }
 0x123   :  { %14 = sbr.rel (!%p12_p4) target bundleno = 1 (0x1), region = 70 }

// kernel: mul.25
= control target key start
LH: loop header
LB: loop body
LE: loop exit
PB: predicated region body
PF: predicated region fallthrough
CT: control target
= control target key end

     0   :  { %s20_s0 = inlined_call_operand.<no memory space> [shape: f32[], index: 0, kind: input, shape index: {}]   ;;  %s21_s1 = inlined_call_operand.vmem [shape: f32[16], index: 1, kind: output, shape index: {}]  }
   0x1   :  { %v2_v0 = vstv %s20_s0 }
   0x2   :  { %3 = vst [vmem:[%s21_s1] sm:$0x1] %v2_v0 }

// kernel: unet_forward.24
= control target key start
LH: loop header
LB: loop body
LE: loop exit
PB: predicated region body
PF: predicated region fallthrough
CT: control target
= control target key end

     0   :  { %s692_s18 = smov 0   ;;  %s746_s0 = inlined_call_operand.vmem [shape: bf16[128,72], index: 0, kind: input, shape index: {}]   ;;  %s747_s1 = inlined_call_operand.vmem [shape: bf16[72,128], index: 1, kind: input, shape index: {}]   ;;  %s748_s2 = inlined_call_operand.vmem [shape: f32[1,128], index: 2, kind: input, shape index: {}]   ;;  %s749_s3 = inlined_call_operand.vmem [shape: f32[1,128], index: 3, kind: input, shape index: {}]   ;;  %s750_s4 = inlined_call_operand.vmem [shape: f32[1,128], index: 4, kind: input, shape index: {}]   ;;  %s751_s5 = inlined_call_operand.vmem [shape: bf16[128,128], index: 5, kind: output, shape index: {}]  }
   0x1 LB: > { %s532_s19 = sadd.s32 4294967295, %s660_s18   ;;  %p536_p0 = scmp.ge.s32.totalorder %s660_s18, 1  ;;  %s660_s18 = sphi %s692_s18, %s15_s18  }
   0x2   : > { %p188_p1 = scmp.lt.s32.totalorder %s660_s18, 3 }
   0x4   : > { %p189_p2 = pnand %p536_p0, %p188_p1 }
   0x5   : > { %v645_v0 = vld [vmem:[%s747_s1] sm:$0xff] (!%p189_p2)   ;;  %v646_v1 = vld [vmem:[%s747_s1 + $0x8] sm:$0xff] (!%p189_p2)   ;;  %s537_s24 = sshll.u32 (!%p189_p2), %s532_s19, 3  ;;  %v647_v2 = vld [vmem:[%s747_s1 + $0x10] sm:$0xff] (!%p189_p2)   ;;  %vm293_vm0 = vcmask (!%p189_p2), 588800   ;;  %vm306_vm1 = vcmask (!%p189_p2), 1043456  }
   0x6   : > { %192 = sbr.rel (%p189_p2) target bundleno = 253 (0xfd), region = 40  ;;  %607 = vmatprep.subr.bf16.mxu0 (!%p189_p2), %v645_v0  ;;  %625 = vmatprep.subr.bf16.mxu1 (!%p189_p2), %v645_v0  ;;  %p217_p3 = scmp.lt.s32.totalorder (!%p189_p2), %s537_s24, 15  ;;  %v648_v3 = vld [vmem:[%s747_s1 + $0x18] sm:$0xff] (!%p189_p2)   ;;  %v649_v6 = vld [vmem:[%s747_s1 + $0x20] ss:$0 sps:$4 sm:$0xff] (!%p189_p2)  }
   0x7   : > { %608 = vmatpush3.bf16.msra.mxu0 (!%p189_p2), %v645_v0  ;;  %630 = vmatpush3.bf16.msra.mxu1 (!%p189_p2), %v645_v0  ;;  %v308_v7 = vsel (!%p189_p2), %vm306_vm1, %v649_v6, 0  ;;  %v554_v10 = vld [vmem:[%s748_s2] ss:$0 sm:$0xff] (!%p189_p2) }
   0x8   : > { %609 = vmatprep.subr.bf16.mxu0 (!%p189_p2), %v646_v1  ;;  %626 = vmatprep.subr.bf16.mxu1 (!%p189_p2), %v646_v1  ;;  %v555_v12 = vld [vmem:[%s749_s3] ss:$0 sm:$0xff] (!%p189_p2) }
   0x9   : > { %v556_v18 = vld [vmem:[%s750_s4] ss:$0 sm:$0xff] (!%p189_p2) }
   0xb   : > { %610 = vmatpush3.bf16.msra.mxu0 (!%p189_p2), %v646_v1  ;;  %631 = vmatpush3.bf16.msra.mxu1 (!%p189_p2), %v646_v1 }
   0xc   : > { %611 = vmatprep.subr.bf16.mxu0 (!%p189_p2), %v647_v2  ;;  %627 = vmatprep.subr.bf16.mxu1 (!%p189_p2), %v647_v2 }
   0xd   : > { %s753_s24 = smov (!%p217_p3, %s537_s24), 15 }
   0xe   : > { %s538_s27 = sshll.u32 %s753_s24, 2 }
   0xf   : > { %s220_s7 = scalar_lea.vmem %s746_s0, %s538_s27  ;;  %612 = vmatpush3.bf16.msra.mxu0 %v647_v2  ;;  %632 = vmatpush3.bf16.msra.mxu1 %v647_v2  ;;  %s226_s19 = scalar_lea.vmem %s751_s5, %s538_s27 }
  0x10   : > { %v650_v4 = vld [vmem:[%s220_s7] sm:$0xff]   ;;  %v651_v5 = vld [vmem:[%s220_s7 + $0x10] sm:$0xff]   ;;  %613 = vmatprep.subr.bf16.mxu0 %v648_v3  ;;  %628 = vmatprep.subr.bf16.mxu1 %v648_v3  ;;  %v652_v8 = vld [vmem:[%s220_s7 + $0x8] sm:$0xff]  }
  0x11   : > { %617 = vmatprep.mubr.msk.bf16.mxu0 %vm293_vm0, %v650_v4  ;;  %621 = vmatprep.mubr.msk.bf16.mxu1 %vm293_vm0, %v651_v5  ;;  %v653_v9 = vld [vmem:[%s220_s7 + $0x18] sm:$0xff]  }
  0x13   : > { %614 = vmatpush3.bf16.msra.mxu0 %v648_v3  ;;  %633 = vmatpush3.bf16.msra.mxu1 %v648_v3 }
  0x14   : > { %635 = vmatprep.subr.msk.bf16.mxu0 %vm306_vm1, %v649_v6  ;;  %636 = vmatprep.subr.msk.bf16.mxu1 %vm306_vm1, %v649_v6 }
  0x17   : > { %616 = vmatpush3.bf16.msra.mxu0 %v308_v7  ;;  %634 = vmatpush3.bf16.msra.mxu1 %v308_v7 }
  0x1a   : > { %618 = vmatmul.mubr.msk.bf16.vlgmr.msra.gmra.mrb[0].mxu0 %vm293_vm0, %v652_v8  ;;  %622 = vmatmul.mubr.msk.bf16.vlgmr.msra.gmra.mrb[0].mxu1 %vm293_vm0, %v653_v9 }
  0xed   : > { %v619_v11 = vpop.f32.mrb[0].mxu0  ;;  %v623_v13 = vpop.f32.mrb[0].mxu1 }
  0xee   : > { %v384_v14 = vmul.f32 %v619_v11, %v554_v10  ;;  %v388_v15 = vmul.f32 %v623_v13, %v554_v10  ;;  %v344_v16 = vpop.f32.mrb[1].mxu0  ;;  %v360_v17 = vpop.f32.mrb[1].mxu1 }
  0xef   : > { %v382_v19 = vmul.f32 %v554_v10, %v344_v16  ;;  %v386_v20 = vmul.f32 %v554_v10, %v360_v17  ;;  %v620_v21 = vpop.f32.mrb[2].mxu0  ;;  %v624_v22 = vpop.f32.mrb[2].mxu1 }
  0xf0   : > { %v399_v23 = vadd.f32 %v555_v12, %v384_v14  ;;  %v403_v24 = vadd.f32 %v555_v12, %v388_v15  ;;  %v385_v25 = vmul.f32 %v620_v21, %v554_v10  ;;  %v389_v26 = vmul.f32 %v624_v22, %v554_v10  ;;  %v347_v27 = vpop.f32.mrb[3].mxu0  ;;  %v363_v28 = vpop.f32.mrb[3].mxu1 }
  0xf1   : > { %v397_v29 = vadd.f32 %v555_v12, %v382_v19  ;;  %v401_v30 = vadd.f32 %v555_v12, %v386_v20  ;;  %v383_v31 = vmul.f32 %v554_v10, %v347_v27  ;;  %v387_v32 = vmul.f32 %v554_v10, %v363_v28 }
  0xf2   : > { %vm407_vm2 = vcmp.gt.f32.partialorder %v399_v23, 0.0  ;;  %v422_v33 = vmul.f32 %v556_v18, %v399_v23  ;;  %vm411_vm3 = vcmp.gt.f32.partialorder %v403_v24, 0.0  ;;  %v426_v34 = vmul.f32 %v556_v18, %v403_v24 }
  0xf3   : > { %vm405_vm4 = vcmp.gt.f32.partialorder %v397_v29, 0.0  ;;  %v420_v35 = vmul.f32 %v556_v18, %v397_v29  ;;  %vm409_vm5 = vcmp.gt.f32.partialorder %v401_v30, 0.0  ;;  %v424_v36 = vmul.f32 %v556_v18, %v401_v30 }
  0xf4   : > { %v400_v37 = vadd.f32 %v555_v12, %v385_v25  ;;  %v404_v38 = vadd.f32 %v555_v12, %v389_v26  ;;  %v430_v39 = vsel %vm407_vm2, %v399_v23, %v422_v33  ;;  %v434_v40 = vsel %vm411_vm3, %v403_v24, %v426_v34 }
  0xf5   : > { %v398_v41 = vadd.f32 %v555_v12, %v383_v31  ;;  %v402_v42 = vadd.f32 %v555_v12, %v387_v32  ;;  %v428_v47 = vsel %vm405_vm4, %v397_v29, %v420_v35  ;;  %v432_v48 = vsel %vm409_vm5, %v401_v30, %v424_v36 }
  0xf6   : > { %vm408_vm6 = vcmp.gt.f32.partialorder %v400_v37, 0.0  ;;  %v423_v43 = vmul.f32 %v556_v18, %v400_v37  ;;  %vm412_vm7 = vcmp.gt.f32.partialorder %v404_v38, 0.0  ;;  %v427_v44 = vmul.f32 %v556_v18, %v404_v38 }
  0xf7   : > { %vm406_vm8 = vcmp.gt.f32.partialorder %v398_v41, 0.0  ;;  %v421_v45 = vmul.f32 %v556_v18, %v398_v41  ;;  %vm410_vm9 = vcmp.gt.f32.partialorder %v402_v42, 0.0  ;;  %v425_v46 = vmul.f32 %v556_v18, %v402_v42 }
  0xf8   : > { %v431_v49 = vsel %vm408_vm6, %v400_v37, %v423_v43  ;;  %v435_v50 = vsel %vm412_vm7, %v404_v38, %v427_v44 }
  0xf9   : > { %v583_v51 = vpack.c.bf16 %v431_v49, %v430_v39  ;;  %v593_v52 = vpack.c.bf16 %v435_v50, %v434_v40  ;;  %v429_v53 = vsel %vm406_vm8, %v398_v41, %v421_v45  ;;  %v433_v54 = vsel %vm410_vm9, %v402_v42, %v425_v46 }
  0xfa   : > { %v578_v55 = vpack.c.bf16 %v429_v53, %v428_v47  ;;  %v588_v56 = vpack.c.bf16 %v433_v54, %v432_v48 }
  0xfb   : > { %595 = vst [vmem:[%s226_s19 + $0x8] sm:$0xff] %v583_v51   ;;  %597 = vst [vmem:[%s226_s19 + $0x18] sm:$0xff] %v593_v52  }
  0xfc   : > { %579 = vst [vmem:[%s226_s19] sm:$0xff] %v578_v55   ;;  %596 = vst [vmem:[%s226_s19 + $0x10] sm:$0xff] %v588_v56  }
  0xfd PF: > { %s15_s18 = sadd.s32 1, %s660_s18  }
  0xfe   : > { %p12_p4 = scmp.ge.s32.totalorder %s15_s18, 4  }
 0x100   :  { %14 = sbr.rel (!%p12_p4) target bundleno = 1 (0x1), region = 70 }

// kernel: unet_forward.25
= control target key start
LH: loop header
LB: loop body
LE: loop exit
PB: predicated region body
PF: predicated region fallthrough
CT: control target
= control target key end

     0   :  { %s746_s18 = smov 0   ;;  %s823_s0 = inlined_call_operand.vmem [shape: bf16[128,144], index: 0, kind: input, shape index: {}]   ;;  %s824_s1 = inlined_call_operand.vmem [shape: bf16[144,128], index: 1, kind: input, shape index: {}]   ;;  %s825_s2 = inlined_call_operand.vmem [shape: f32[1,128], index: 2, kind: input, shape index: {}]   ;;  %s826_s3 = inlined_call_operand.vmem [shape: f32[1,128], index: 3, kind: input, shape index: {}]   ;;  %s827_s4 = inlined_call_operand.vmem [shape: f32[1,128], index: 4, kind: input, shape index: {}]   ;;  %s828_s5 = inlined_call_operand.vmem [shape: bf16[128,128], index: 5, kind: output, shape index: {}]  }
   0x1 LB: > { %s583_s19 = sadd.s32 4294967295, %s713_s18   ;;  %p587_p0 = scmp.ge.s32.totalorder %s713_s18, 1  ;;  %s713_s18 = sphi %s746_s18, %s15_s18  }
   0x2   : > { %p189_p1 = scmp.lt.s32.totalorder %s713_s18, 3 }
   0x4   : > { %p190_p2 = pnand %p587_p0, %p189_p1 }
   0x5   : > { %v686_v0 = vld [vmem:[%s824_s1] sm:$0xff] (!%p190_p2)   ;;  %v715_v1 = vmov (!%p190_p2), 0   ;;  %s588_s22 = sshll.u32 (!%p190_p2), %s583_s19, 3  ;;  %v687_v2 = vld [vmem:[%s824_s1 + $0x8] sm:$0xff] (!%p190_p2)   ;;  %v688_v3 = vld [vmem:[%s824_s1 + $0x10] sm:$0xff] (!%p190_p2)   ;;  %vm348_vm0 = vcmask (!%p190_p2), 130048  }
   0x6   : > { %193 = sbr.rel (%p190_p2) target bundleno = 274 (0x112), region = 40  ;;  %361 = vmatprep.subr.bf16.mxu0 (!%p190_p2), %v715_v1  ;;  %659 = vmatprep.subr.bf16.mxu1 (!%p190_p2), %v715_v1  ;;  %p219_p3 = scmp.lt.s32.totalorder (!%p190_p2), %s588_s22, 15  ;;  %v689_v4 = vld [vmem:[%s824_s1 + $0x18] sm:$0xff] (!%p190_p2)   ;;  %v690_v7 = vld [vmem:[%s824_s1 + $0x20] sm:$0xff] (!%p190_p2)   ;;  %v691_v8 = vld [vmem:[%s824_s1 + $0x28] sm:$0xff] (!%p190_p2)  }
   0x7   : > { %362 = vmatpush1.bf16.msra.mxu0 (!%p190_p2), %v686_v0  ;;  %668 = vmatpush1.bf16.msra.mxu1 (!%p190_p2), %v686_v0  ;;  %v692_v9 = vld [vmem:[%s824_s1 + $0x30] sm:$0xff] (!%p190_p2)   ;;  %v693_v10 = vld [vmem:[%s824_s1 + $0x38] sm:$0xff] (!%p190_p2)   ;;  %v694_v11 = vld [vmem:[%s824_s1 + $0x40] sm:$0xff] (!%p190_p2)  }
   0x8   : > { %363 = vmatprep.subr.bf16.mxu0 (!%p190_p2), %v715_v1  ;;  %660 = vmatprep.subr.bf16.mxu1 (!%p190_p2), %v715_v1  ;;  %v614_v18 = vld [vmem:[%s825_s2] ss:$0 sm:$0xff] (!%p190_p2) }
   0x9   : > { %v615_v20 = vld [vmem:[%s826_s3] ss:$0 sm:$0xff] (!%p190_p2) }
   0xa   : > { %v616_v29 = vld [vmem:[%s827_s4] ss:$0 sm:$0xff] (!%p190_p2) }
   0xb   : > { %364 = vmatpush1.bf16.msra.mxu0 (!%p190_p2), %v687_v2  ;;  %669 = vmatpush1.bf16.msra.mxu1 (!%p190_p2), %v687_v2 }
   0xc   : > { %365 = vmatprep.subr.bf16.mxu0 (!%p190_p2), %v715_v1  ;;  %661 = vmatprep.subr.bf16.mxu1 (!%p190_p2), %v715_v1 }
   0xd   : > { %s830_s22 = smov (!%p219_p3, %s588_s22), 15 }
   0xe   : > { %s627_s27 = sshll.u32 %s830_s22, 3  ;;  %s592_s26 = sshll.u32 %s830_s22, 2 }
   0xf   : > { %s769_s30 = scalar_lea.vmem %s823_s0, %s627_s27  ;;  %366 = vmatpush1.bf16.msra.mxu0 %v688_v3  ;;  %670 = vmatpush1.bf16.msra.mxu1 %v688_v3  ;;  %s814_s29 = scalar_lea.vmem %s828_s5, %s592_s26 }
  0x10   : > { %v697_v5 = vld [vmem:[%s769_s30 + $0x4] ss:$8 sps:$4 sm:$0xff]   ;;  %367 = vmatprep.subr.bf16.mxu0 %v715_v1  ;;  %662 = vmatprep.subr.bf16.mxu1 %v715_v1  ;;  %v695_v12 = vld [vmem:[%s769_s30] ss:$8 sps:$4 sm:$0xff]   ;;  %v701_v14 = vld [vmem:[%s769_s30 + $0x14] ss:$8 sps:$4 sm:$0xff]  }
  0x11   : > { %v700_v6 = vld [vmem:[%s769_s30 + $0x24] ss:$8 sps:$4 sm:$0xff]   ;;  %610 = vmatprep.mubr.msk.bf16.mxu0 %vm348_vm0, %v697_v5  ;;  %v698_v13 = vld [vmem:[%s769_s30 + $0x20] ss:$8 sps:$4 sm:$0xff]   ;;  %v703_v15 = vld [vmem:[%s769_s30 + $0x34] ss:$8 sps:$4 sm:$0xff]  }
  0x12   : > { %612 = vmatprep.mubr.msk.bf16.mxu1 %vm348_vm0, %v700_v6  ;;  %v705_v16 = vld [vmem:[%s769_s30 + $0x10] ss:$8 sps:$4 sm:$0xff]  }
  0x13   : > { %368 = vmatpush1.bf16.msra.mxu0 %v689_v4  ;;  %671 = vmatpush1.bf16.msra.mxu1 %v689_v4  ;;  %v706_v17 = vld [vmem:[%s769_s30 + $0x30] ss:$8 sps:$4 sm:$0xff]  }
  0x14   : > { %369 = vmatprep.subr.bf16.mxu0 %v715_v1  ;;  %663 = vmatprep.subr.bf16.mxu1 %v715_v1 }
  0x17   : > { %370 = vmatpush1.bf16.msra.mxu0 %v690_v7  ;;  %672 = vmatpush1.bf16.msra.mxu1 %v690_v7 }
  0x18   : > { %371 = vmatprep.subr.bf16.mxu0 %v715_v1  ;;  %664 = vmatprep.subr.bf16.mxu1 %v715_v1 }
  0x1b   : > { %372 = vmatpush1.bf16.msra.mxu0 %v691_v8  ;;  %673 = vmatpush1.bf16.msra.mxu1 %v691_v8 }
  0x1c   : > { %373 = vmatprep.subr.bf16.mxu0 %v715_v1  ;;  %665 = vmatprep.subr.bf16.mxu1 %v715_v1 }
  0x1f   : > { %374 = vmatpush1.bf16.msra.mxu0 %v692_v9  ;;  %674 = vmatpush1.bf16.msra.mxu1 %v692_v9 }
  0x20   : > { %375 = vmatprep.subr.bf16.mxu0 %v715_v1  ;;  %666 = vmatprep.subr.bf16.mxu1 %v715_v1 }
  0x23   : > { %376 = vmatpush1.bf16.msra.mxu0 %v693_v10  ;;  %675 = vmatpush1.bf16.msra.mxu1 %v693_v10 }
  0x24   : > { %377 = vmatprep.subr.bf16.mxu0 %v715_v1  ;;  %667 = vmatprep.subr.bf16.mxu1 %v715_v1 }
  0x27   : > { %378 = vmatpush1.bf16.msra.mxu0 %v694_v11  ;;  %676 = vmatpush1.bf16.msra.mxu1 %v694_v11 }
  0x2a   : > { %394 = vmatmul.mubr.bf16.vlgmr.msra.gmra.mrb[0].mxu0 %v695_v12  ;;  %410 = vmatmul.mubr.bf16.vlgmr.msra.gmra.mrb[0].mxu1 %v698_v13 }
  0x2b   : > { %611 = vmatprep.mubr.msk.bf16.mxu0 %vm348_vm0, %v701_v14  ;;  %613 = vmatprep.mubr.msk.bf16.mxu1 %vm348_vm0, %v703_v15 }
  0x32   : > { %402 = vmatmul.mubr.bf16.gmra.mrb[4].mxu0 %v705_v16  ;;  %418 = vmatmul.mubr.bf16.gmra.mrb[4].mxu1 %v706_v17 }
  0xfd   : > { %v395_v19 = vpop.f32.mrb[0].mxu0  ;;  %v411_v21 = vpop.f32.mrb[0].mxu1 }
  0xfe   : > { %v433_v22 = vmul.f32 %v614_v18, %v395_v19  ;;  %v437_v23 = vmul.f32 %v614_v18, %v411_v21  ;;  %v397_v24 = vpop.f32.mrb[1].mxu0  ;;  %v413_v25 = vpop.f32.mrb[1].mxu1 }
  0xff   : > { %v398_v26 = vpop.f32.mrb[2].mxu0  ;;  %v414_v27 = vpop.f32.mrb[2].mxu1 }
 0x100   : > { %v448_v28 = vadd.f32 %v615_v20, %v433_v22  ;;  %v452_v30 = vadd.f32 %v615_v20, %v437_v23  ;;  %v434_v31 = vmul.f32 %v614_v18, %v398_v26  ;;  %v438_v32 = vmul.f32 %v614_v18, %v414_v27  ;;  %v400_v33 = vpop.f32.mrb[3].mxu0  ;;  %v416_v34 = vpop.f32.mrb[3].mxu1 }
 0x102   : > { %v471_v35 = vmul.f32 %v616_v29, %v448_v28  ;;  %v475_v36 = vmul.f32 %v616_v29, %v452_v30  ;;  %v449_v37 = vadd.f32 %v615_v20, %v434_v31  ;;  %v453_v38 = vadd.f32 %v615_v20, %v438_v32 }
 0x103   : > { %vm456_vm1 = vcmp.gt.f32.partialorder %v448_v28, 0.0  ;;  %vm460_vm2 = vcmp.gt.f32.partialorder %v452_v30, 0.0 }
 0x104   : > { %vm457_vm3 = vcmp.gt.f32.partialorder %v449_v37, 0.0  ;;  %v472_v39 = vmul.f32 %v616_v29, %v449_v37  ;;  %vm461_vm4 = vcmp.gt.f32.partialorder %v453_v38, 0.0  ;;  %v476_v40 = vmul.f32 %v616_v29, %v453_v38 }
 0x105   : > { %v403_v41 = vpop.f32.mrb[4].mxu0  ;;  %v419_v42 = vpop.f32.mrb[4].mxu1  ;;  %v479_v47 = vsel %vm456_vm1, %v448_v28, %v471_v35  ;;  %v483_v48 = vsel %vm460_vm2, %v452_v30, %v475_v36 }
 0x106   : > { %v435_v43 = vmul.f32 %v614_v18, %v403_v41  ;;  %v439_v44 = vmul.f32 %v614_v18, %v419_v42  ;;  %v405_v45 = vpop.f32.mrb[5].mxu0  ;;  %v421_v46 = vpop.f32.mrb[5].mxu1  ;;  %v480_v49 = vsel %vm457_vm3, %v449_v37, %v472_v39  ;;  %v484_v50 = vsel %vm461_vm4, %v453_v38, %v476_v40 }
 0x107   : > { %v406_v51 = vpop.f32.mrb[6].mxu0  ;;  %v422_v52 = vpop.f32.mrb[6].mxu1  ;;  %v639_v53 = vpack.c.bf16 %v480_v49, %v479_v47  ;;  %v649_v54 = vpack.c.bf16 %v484_v50, %v483_v48 }
 0x108   : > { %v450_v55 = vadd.f32 %v615_v20, %v435_v43  ;;  %v454_v56 = vadd.f32 %v615_v20, %v439_v44  ;;  %v408_v57 = vpop.f32.mrb[7].mxu0  ;;  %v424_v58 = vpop.f32.mrb[7].mxu1  ;;  %v436_v59 = vmul.f32 %v614_v18, %v406_v51  ;;  %v440_v60 = vmul.f32 %v614_v18, %v422_v52 }
 0x109   : > { %640 = vst [vmem:[%s814_s29] sm:$0xff] %v639_v53   ;;  %657 = vst [vmem:[%s814_s29 + $0x10] sm:$0xff] %v649_v54  }
 0x10a   : > { %v473_v61 = vmul.f32 %v616_v29, %v450_v55  ;;  %v477_v62 = vmul.f32 %v616_v29, %v454_v56  ;;  %v451_v63 = vadd.f32 %v615_v20, %v436_v59  ;;  %v455_v0 = vadd.f32 %v615_v20, %v440_v60 }
 0x10b   : > { %vm458_vm5 = vcmp.gt.f32.partialorder %v450_v55, 0.0  ;;  %vm462_vm6 = vcmp.gt.f32.partialorder %v454_v56, 0.0 }
 0x10c   : > { %vm459_vm7 = vcmp.gt.f32.partialorder %v451_v63, 0.0  ;;  %v474_v1 = vmul.f32 %v616_v29, %v451_v63  ;;  %vm463_vm8 = vcmp.gt.f32.partialorder %v455_v0, 0.0  ;;  %v478_v2 = vmul.f32 %v616_v29, %v455_v0 }
 0x10d   : > { %v481_v3 = vsel %vm458_vm5, %v450_v55, %v473_v61  ;;  %v485_v4 = vsel %vm462_vm6, %v454_v56, %v477_v62 }
 0x10e   : > { %v482_v5 = vsel %vm459_vm7, %v451_v63, %v474_v1  ;;  %v486_v6 = vsel %vm463_vm8, %v455_v0, %v478_v2 }
 0x10f   : > { %v644_v7 = vpack.c.bf16 %v482_v5, %v481_v3  ;;  %v654_v8 = vpack.c.bf16 %v486_v6, %v485_v4 }
 0x111   : > { %656 = vst [vmem:[%s814_s29 + $0x8] sm:$0xff] %v644_v7   ;;  %658 = vst [vmem:[%s814_s29 + $0x18] sm:$0xff] %v654_v8  }
 0x112 PF: > { %s15_s18 = sadd.s32 1, %s713_s18  }
 0x113   : > { %p12_p4 = scmp.ge.s32.totalorder %s15_s18, 4  }
 0x115   :  { %14 = sbr.rel (!%p12_p4) target bundleno = 1 (0x1), region = 70 }

// kernel: mul.27
= control target key start
LH: loop header
LB: loop body
LE: loop exit
PB: predicated region body
PF: predicated region fallthrough
CT: control target
= control target key end

     0   :  { %s20_s0 = inlined_call_operand.<no memory space> [shape: f32[], index: 0, kind: input, shape index: {}]   ;;  %s21_s1 = inlined_call_operand.vmem [shape: f32[32], index: 1, kind: output, shape index: {}]  }
   0x1   :  { %v2_v0 = vstv %s20_s0 }
   0x2   :  { %3 = vst [vmem:[%s21_s1] sm:$0x1] %v2_v0 }

// kernel: unet_forward.26
= control target key start
LH: loop header
LB: loop body
LE: loop exit
PB: predicated region body
PF: predicated region fallthrough
CT: control target
= control target key end

     0   :  { %s554_s18 = smov 0   ;;  %s611_s0 = inlined_call_operand.vmem [shape: bf16[32,144], index: 0, kind: input, shape index: {}]   ;;  %s612_s1 = inlined_call_operand.vmem [shape: bf16[144,128], index: 1, kind: input, shape index: {}]   ;;  %s613_s2 = inlined_call_operand.vmem [shape: f32[1,128], index: 2, kind: input, shape index: {}]   ;;  %s614_s3 = inlined_call_operand.vmem [shape: f32[1,128], index: 3, kind: input, shape index: {}]   ;;  %s615_s4 = inlined_call_operand.vmem [shape: f32[1,128], index: 4, kind: input, shape index: {}]   ;;  %s616_s5 = inlined_call_operand.vmem [shape: bf16[32,128], index: 5, kind: output, shape index: {}]  }
   0x1 LB: > { %s457_s19 = sadd.s32 4294967295, %s521_s18   ;;  %p461_p0 = scmp.ge.s32.totalorder %s521_s18, 1  ;;  %s521_s18 = sphi %s554_s18, %s15_s18  }
   0x2   : > { %p189_p1 = scmp.lt.s32.totalorder %s521_s18, 3 }
   0x4   : > { %p190_p2 = pnand %p461_p0, %p189_p1 }
   0x5   : > { %v503_v0 = vld [vmem:[%s612_s1] sm:$0xff] (!%p190_p2)   ;;  %v523_v1 = vmov (!%p190_p2), 0   ;;  %s462_s22 = sshll.u32 (!%p190_p2), %s457_s19, 1  ;;  %v504_v2 = vld [vmem:[%s612_s1 + $0x8] sm:$0xff] (!%p190_p2)   ;;  %v505_v3 = vld [vmem:[%s612_s1 + $0x10] sm:$0xff] (!%p190_p2)   ;;  %vm315_vm0 = vcmask (!%p190_p2), 130048  }
   0x6   : > { %193 = sbr.rel (%p190_p2) target bundleno = 266 (0x10a), region = 40  ;;  %319 = vmatprep.subr.bf16.mxu0 (!%p190_p2), %v523_v1  ;;  %p219_p3 = scmp.lt.s32.totalorder (!%p190_p2), %s462_s22, 3  ;;  %v506_v4 = vld [vmem:[%s612_s1 + $0x18] sm:$0xff] (!%p190_p2)   ;;  %v507_v6 = vld [vmem:[%s612_s1 + $0x20] sm:$0xff] (!%p190_p2)   ;;  %v508_v7 = vld [vmem:[%s612_s1 + $0x28] sm:$0xff] (!%p190_p2)  }
   0x7   : > { %320 = vmatpush1.bf16.msra.mxu0 (!%p190_p2), %v503_v0  ;;  %v509_v8 = vld [vmem:[%s612_s1 + $0x30] sm:$0xff] (!%p190_p2)   ;;  %v510_v9 = vld [vmem:[%s612_s1 + $0x38] sm:$0xff] (!%p190_p2)   ;;  %v511_v10 = vld [vmem:[%s612_s1 + $0x40] sm:$0xff] (!%p190_p2)  }
   0x8   : > { %321 = vmatprep.subr.bf16.mxu0 (!%p190_p2), %v523_v1  ;;  %v479_v12 = vld [vmem:[%s613_s2] ss:$0 sm:$0xff] (!%p190_p2) }
   0x9   : > { %v480_v14 = vld [vmem:[%s614_s3] ss:$0 sm:$0xff] (!%p190_p2) }
   0xa   : > { %v481_v17 = vld [vmem:[%s615_s4] ss:$0 sm:$0xff] (!%p190_p2) }
   0xb   : > { %322 = vmatpush1.bf16.msra.mxu0 (!%p190_p2), %v504_v2 }
   0xc   : > { %323 = vmatprep.subr.bf16.mxu0 (!%p190_p2), %v523_v1 }
   0xd   : > { %s618_s22 = smov (!%p219_p3, %s462_s22), 3 }
   0xe   : > { %s486_s27 = sshll.u32 %s618_s22, 3  ;;  %s466_s26 = sshll.u32 %s618_s22, 2 }
   0xf   : > { %s223_s30 = scalar_lea.vmem %s611_s0, %s486_s27  ;;  %324 = vmatpush1.bf16.msra.mxu0 %v505_v3  ;;  %s229_s29 = scalar_lea.vmem %s616_s5, %s466_s26 }
  0x10   : > { %v514_v5 = vld [vmem:[%s223_s30 + $0x4] ss:$8 sps:$4 sm:$0xff]   ;;  %325 = vmatprep.subr.bf16.mxu0 %v523_v1  ;;  %v512_v11 = vld [vmem:[%s223_s30] ss:$8 sps:$4 sm:$0xff]  }
  0x11   : > { %478 = vmatprep.mubr.msk.bf16.mxu0 %vm315_vm0, %v514_v5 }
  0x13   : > { %326 = vmatpush1.bf16.msra.mxu0 %v506_v4 }
  0x14   : > { %327 = vmatprep.subr.bf16.mxu0 %v523_v1 }
  0x17   : > { %328 = vmatpush1.bf16.msra.mxu0 %v507_v6 }
  0x18   : > { %329 = vmatprep.subr.bf16.mxu0 %v523_v1 }
  0x1b   : > { %330 = vmatpush1.bf16.msra.mxu0 %v508_v7 }
  0x1c   : > { %331 = vmatprep.subr.bf16.mxu0 %v523_v1 }
  0x1f   : > { %332 = vmatpush1.bf16.msra.mxu0 %v509_v8 }
  0x20   : > { %333 = vmatprep.subr.bf16.mxu0 %v523_v1 }
  0x23   : > { %334 = vmatpush1.bf16.msra.mxu0 %v510_v9 }
  0x24   : > { %335 = vmatprep.subr.bf16.mxu0 %v523_v1 }
  0x27   : > { %336 = vmatpush1.bf16.msra.mxu0 %v511_v10 }
  0x2a   : > { %352 = vmatmul.mubr.bf16.vlgmr.msra.gmra.mrb[0].mxu0 %v512_v11 }
  0xfd   : > { %v353_v13 = vpop.f32.mrb[0].mxu0 }
  0xfe   : > { %v367_v15 = vmul.f32 %v479_v12, %v353_v13  ;;  %v355_v16 = vpop.f32.mrb[1].mxu0 }
  0xff   : > { %v356_v18 = vpop.f32.mrb[2].mxu0 }
 0x100   : > { %v376_v19 = vadd.f32 %v480_v14, %v367_v15  ;;  %v368_v20 = vmul.f32 %v479_v12, %v356_v18  ;;  %v358_v21 = vpop.f32.mrb[3].mxu0 }
 0x102   : > { %v387_v22 = vmul.f32 %v481_v17, %v376_v19  ;;  %v377_v23 = vadd.f32 %v480_v14, %v368_v20  ;;  %vm378_vm1 = vcmp.gt.f32.partialorder %v376_v19, 0.0 }
 0x104   : > { %vm379_vm2 = vcmp.gt.f32.partialorder %v377_v23, 0.0  ;;  %v388_v24 = vmul.f32 %v481_v17, %v377_v23  ;;  %v389_v25 = vsel %vm378_vm1, %v376_v19, %v387_v22 }
 0x106   : > { %v390_v26 = vsel %vm379_vm2, %v377_v23, %v388_v24 }
 0x107   : > { %v492_v27 = vpack.c.bf16 %v390_v26, %v389_v25 }
 0x109   : > { %493 = vst [vmem:[%s229_s29] sm:$0xff] %v492_v27  }
 0x10a PF: > { %s15_s18 = sadd.s32 1, %s521_s18  }
 0x10b   : > { %p12_p4 = scmp.ge.s32.totalorder %s15_s18, 4  }
 0x10d   :  { %14 = sbr.rel (!%p12_p4) target bundleno = 1 (0x1), region = 70 }

// kernel: mul.29
= control target key start
LH: loop header
LB: loop body
LE: loop exit
PB: predicated region body
PF: predicated region fallthrough
CT: control target
= control target key end

     0   :  { %s20_s0 = inlined_call_operand.<no memory space> [shape: f32[], index: 0, kind: input, shape index: {}]   ;;  %s21_s1 = inlined_call_operand.vmem [shape: f32[64], index: 1, kind: output, shape index: {}]  }
   0x1   :  { %v2_v0 = vstv %s20_s0 }
   0x2   :  { %3 = vst [vmem:[%s21_s1] sm:$0x1] %v2_v0 }

// kernel: unet_forward.27
= control target key start
LH: loop header
LB: loop body
LE: loop exit
PB: predicated region body
PF: predicated region fallthrough
CT: control target
= control target key end

     0   :  { %s729_s18 = smov 0   ;;  %s813_s0 = inlined_call_operand.vmem [shape: bf16[32,288], index: 0, kind: input, shape index: {}]   ;;  %s814_s1 = inlined_call_operand.vmem [shape: bf16[288,128], index: 1, kind: input, shape index: {}]   ;;  %s815_s2 = inlined_call_operand.vmem [shape: f32[1,128], index: 2, kind: input, shape index: {}]   ;;  %s816_s3 = inlined_call_operand.vmem [shape: f32[1,128], index: 3, kind: input, shape index: {}]   ;;  %s817_s4 = inlined_call_operand.vmem [shape: f32[1,128], index: 4, kind: input, shape index: {}]   ;;  %s818_s5 = inlined_call_operand.vmem [shape: bf16[32,128], index: 5, kind: output, shape index: {}]  }
   0x1 LB: > { %s578_s19 = sadd.s32 4294967295, %s695_s18   ;;  %p582_p0 = scmp.ge.s32.totalorder %s695_s18, 1  ;;  %s695_s18 = sphi %s729_s18, %s15_s18  }
   0x2   : > { %p189_p1 = scmp.lt.s32.totalorder %s695_s18, 3 }
   0x4   : > { %p190_p2 = pnand %p582_p0, %p189_p1 }
   0x5   : > { %v667_v0 = vld [vmem:[%s814_s1 + $0x40] sm:$0xff] (!%p190_p2)   ;;  %v697_v2 = vmov (!%p190_p2), 0.0   ;;  %s583_s24 = sshll.u32 (!%p190_p2), %s578_s19, 1  ;;  %v669_v3 = vld [vmem:[%s814_s1 + $0x48] sm:$0xff] (!%p190_p2)   ;;  %v671_v5 = vld [vmem:[%s814_s1 + $0x50] sm:$0xff] (!%p190_p2)   ;;  %vm698_vm0 = vmmov (!%p190_p2), 0  }
   0x6   : > { %193 = sbr.rel (%p190_p2) target bundleno = 267 (0x10b), region = 40  ;;  %v668_v1 = vld [vmem:[%s814_s1] sm:$0xff] (!%p190_p2)   ;;  %648 = vmatprep.subr.bf16.mxu1 (!%p190_p2), %v697_v2  ;;  %623 = vmatprep.subr.bf16.mxu0 (!%p190_p2), %v667_v0  ;;  %v670_v4 = vld [vmem:[%s814_s1 + $0x8] sm:$0xff] (!%p190_p2)   ;;  %p219_p3 = scmp.lt.s32.totalorder (!%p190_p2), %s583_s24, 3  ;;  %v672_v6 = vld [vmem:[%s814_s1 + $0x10] sm:$0xff] (!%p190_p2)   ;;  %vm395_vm1 = vcmask (!%p190_p2), 261120  }
   0x7   : > { %624 = vmatpush3.bf16.msra.mxu0 (!%p190_p2), %v668_v1  ;;  %652 = vmatprep.mubr.msk.bf16.mxu1 (!%p190_p2), %vm698_vm0, %v697_v2  ;;  %v673_v7 = vld [vmem:[%s814_s1 + $0x58] sm:$0xff] (!%p190_p2)   ;;  %v675_v9 = vld [vmem:[%s814_s1 + $0x60] sm:$0xff] (!%p190_p2)   ;;  %v677_v12 = vld [vmem:[%s814_s1 + $0x68] sm:$0xff] (!%p190_p2)  }
   0x8   : > { %625 = vmatprep.subr.bf16.mxu0 (!%p190_p2), %v669_v3  ;;  %v674_v8 = vld [vmem:[%s814_s1 + $0x18] sm:$0xff] (!%p190_p2)   ;;  %v681_v10 = vld [vmem:[%s814_s1 + $0x80] sm:$0xff] (!%p190_p2)   ;;  %v684_v13 = vld [vmem:[%s814_s1 + $0x88] sm:$0xff] (!%p190_p2)  }
   0x9   : > { %v676_v11 = vld [vmem:[%s814_s1 + $0x20] sm:$0xff] (!%p190_p2)   ;;  %649 = vmatpush3.bf16.msra.mxu1 (!%p190_p2), %v681_v10  ;;  %v678_v14 = vld [vmem:[%s814_s1 + $0x28] sm:$0xff] (!%p190_p2)   ;;  %v679_v16 = vld [vmem:[%s814_s1 + $0x70] sm:$0xff] (!%p190_p2)  }
   0xa   : > { %650 = vmatprep.subr.bf16.mxu1 (!%p190_p2), %v697_v2  ;;  %v680_v18 = vld [vmem:[%s814_s1 + $0x30] sm:$0xff] (!%p190_p2)   ;;  %v682_v19 = vld [vmem:[%s814_s1 + $0x78] sm:$0xff] (!%p190_p2)   ;;  %v609_v30 = vld [vmem:[%s815_s2] ss:$0 sm:$0xff] (!%p190_p2) }
   0xb   : > { %626 = vmatpush3.bf16.msra.mxu0 (!%p190_p2), %v670_v4  ;;  %v683_v20 = vld [vmem:[%s814_s1 + $0x38] sm:$0xff] (!%p190_p2)   ;;  %v610_v34 = vld [vmem:[%s816_s3] ss:$0 sm:$0xff] (!%p190_p2) }
   0xc   : > { %627 = vmatprep.subr.bf16.mxu0 (!%p190_p2), %v671_v5  ;;  %v611_v37 = vld [vmem:[%s817_s4] ss:$0 sm:$0xff] (!%p190_p2) }
   0xd   : > { %s820_s24 = smov (!%p219_p3, %s583_s24), 3  ;;  %651 = vmatpush3.bf16.msra.mxu1 %v684_v13 }
   0xe   : > { %s656_s14 = smul.u32 12, %s820_s24  ;;  %s586_s20 = sshll.u32 %s820_s24, 2 }
   0xf   : > { %628 = vmatpush3.bf16.msra.mxu0 %v672_v6  ;;  %s229_s23 = scalar_lea.vmem %s818_s5, %s586_s20 }
  0x10   : > { %629 = vmatprep.subr.bf16.mxu0 %v673_v7  ;;  %s223_s25 = scalar_lea.vmem %s813_s0, %s656_s14 }
  0x11   : > { %v687_v15 = vld [vmem:[%s223_s25 + $0x4] ss:$12 sps:$4 sm:$0xff]   ;;  %v688_v17 = vld [vmem:[%s223_s25 + $0x8] ss:$12 sps:$4 sm:$0xff]   ;;  %v685_v21 = vld [vmem:[%s223_s25] ss:$12 sps:$4 sm:$0xff]  }
  0x12   : > { %431 = vmatprep.mubr.bf16.mxu0 %v687_v15  ;;  %653 = vmatmul.mubr.msk.bf16.vlgmr.msra.gmra.mrb[0].mxu1 %vm395_vm1, %v688_v17 }
  0x13   : > { %630 = vmatpush3.bf16.msra.mxu0 %v674_v8 }
  0x14   : > { %631 = vmatprep.subr.bf16.mxu0 %v675_v9 }
  0x17   : > { %632 = vmatpush3.bf16.msra.mxu0 %v676_v11 }
  0x18   : > { %633 = vmatprep.subr.bf16.mxu0 %v677_v12 }
  0x1b   : > { %634 = vmatpush3.bf16.msra.mxu0 %v678_v14 }
  0x1c   : > { %635 = vmatprep.subr.bf16.mxu0 %v679_v16 }
  0x1f   : > { %636 = vmatpush3.bf16.msra.mxu0 %v680_v18 }
  0x20   : > { %637 = vmatprep.subr.bf16.mxu0 %v682_v19 }
  0x23   : > { %638 = vmatpush3.bf16.msra.mxu0 %v683_v20 }
  0x26   : > { %432 = vmatmul.mubr.bf16.vlgmr.msra.gmra.mrb[0].mxu0 %v685_v21 }
  0xe5   : > { %v474_v22 = vpop.f32.mrb[0].mxu1 }
  0xe6   : > { %v654_v23 = vpop.f32.mrb[1].mxu1 }
  0xe7   : > { %v477_v24 = vpop.f32.mrb[2].mxu1 }
  0xe8   : > { %v655_v25 = vpop.f32.mrb[3].mxu1 }
  0xf9   : > { %v639_v26 = vpop.f32.mrb[0].mxu0 }
  0xfa   : > { %v640_v27 = vpop.f32.mrb[1].mxu0 }
  0xfb   : > { %v641_v28 = vadd.f32 %v640_v27, %v639_v26  ;;  %v642_v29 = vpop.f32.mrb[2].mxu0 }
  0xfc   : > { %v643_v31 = vpop.f32.mrb[3].mxu0 }
  0xfd   : > { %v475_v32 = vadd.f32 %v641_v28, %v474_v22  ;;  %v644_v33 = vadd.f32 %v643_v31, %v642_v29 }
  0xff   : > { %v488_v35 = vmul.f32 %v609_v30, %v475_v32  ;;  %v478_v36 = vadd.f32 %v644_v33, %v477_v24 }
 0x101   : > { %v497_v38 = vadd.f32 %v610_v34, %v488_v35  ;;  %v489_v39 = vmul.f32 %v609_v30, %v478_v36 }
 0x103   : > { %v508_v40 = vmul.f32 %v611_v37, %v497_v38  ;;  %v498_v41 = vadd.f32 %v610_v34, %v489_v39  ;;  %vm499_vm2 = vcmp.gt.f32.partialorder %v497_v38, 0.0 }
 0x105   : > { %vm500_vm3 = vcmp.gt.f32.partialorder %v498_v41, 0.0  ;;  %v509_v42 = vmul.f32 %v611_v37, %v498_v41  ;;  %v510_v43 = vsel %vm499_vm2, %v497_v38, %v508_v40 }
 0x107   : > { %v511_v44 = vsel %vm500_vm3, %v498_v41, %v509_v42 }
 0x108   : > { %v621_v45 = vpack.c.bf16 %v511_v44, %v510_v43 }
 0x10a   : > { %622 = vst [vmem:[%s229_s23] sm:$0xff] %v621_v45  }
 0x10b PF: > { %s15_s18 = sadd.s32 1, %s695_s18  }
 0x10c   : > { %p12_p4 = scmp.ge.s32.totalorder %s15_s18, 4  }
 0x10e   :  { %14 = sbr.rel (!%p12_p4) target bundleno = 1 (0x1), region = 70 }

// kernel: mul.22
= control target key start
LH: loop header
LB: loop body
LE: loop exit
PB: predicated region body
PF: predicated region fallthrough
CT: control target
= control target key end

     0   :  { %s20_s0 = inlined_call_operand.<no memory space> [shape: f32[], index: 0, kind: input, shape index: {}]   ;;  %s21_s1 = inlined_call_operand.vmem [shape: f32[64], index: 1, kind: output, shape index: {}]  }
   0x1   :  { %v2_v0 = vstv %s20_s0 }
   0x2   :  { %3 = vst [vmem:[%s21_s1] sm:$0x1] %v2_v0 }

// kernel: unet_forward.28
= control target key start
LH: loop header
LB: loop body
LE: loop exit
PB: predicated region body
PF: predicated region fallthrough
CT: control target
= control target key end

     0   :  { %v374_v1 = vmov 0.0   ;;  %vm375_vm0 = vmmov 0   ;;  %vm177_vm1 = vcmask 261120   ;;  %s478_s1 = inlined_call_operand.vmem [shape: bf16[288,128], index: 1, kind: input, shape index: {}]   ;;  %s479_s0 = inlined_call_operand.vmem [shape: bf16[8,288], index: 0, kind: input, shape index: {}]   ;;  %s480_s2 = inlined_call_operand.vmem [shape: f32[1,128], index: 2, kind: input, shape index: {}]   ;;  %s481_s3 = inlined_call_operand.vmem [shape: f32[1,128], index: 3, kind: input, shape index: {}]   ;;  %s482_s4 = inlined_call_operand.vmem [shape: f32[1,128], index: 4, kind: input, shape index: {}]   ;;  %s483_s5 = inlined_call_operand.vmem [shape: bf16[8,128], index: 5, kind: output, shape index: {}]  }
   0x1   :  { %v353_v0 = vld [vmem:[%s478_s1 + $0x40] sm:$0xff]   ;;  %343 = vmatprep.subr.bf16.mxu1 %v374_v1  ;;  %347 = vmatprep.mubr.msk.bf16.mxu1 %vm375_vm0, %v374_v1  ;;  %v355_v3 = vld [vmem:[%s478_s1 + $0x48] sm:$0xff]   ;;  %v357_v5 = vld [vmem:[%s478_s1 + $0x50] sm:$0xff]  }
   0x2   :  { %v354_v2 = vld [vmem:[%s478_s1] sm:$0xff]   ;;  %318 = vmatprep.subr.bf16.mxu0 %v353_v0  ;;  %v356_v4 = vld [vmem:[%s478_s1 + $0x8] sm:$0xff]   ;;  %v358_v6 = vld [vmem:[%s478_s1 + $0x10] sm:$0xff]  }
   0x3   :  { %319 = vmatpush3.bf16.msra.mxu0 %v354_v2  ;;  %v359_v7 = vld [vmem:[%s478_s1 + $0x58] sm:$0xff]   ;;  %v361_v9 = vld [vmem:[%s478_s1 + $0x60] sm:$0xff]   ;;  %v363_v12 = vld [vmem:[%s478_s1 + $0x68] sm:$0xff]  }
   0x4   :  { %320 = vmatprep.subr.bf16.mxu0 %v355_v3  ;;  %v360_v8 = vld [vmem:[%s478_s1 + $0x18] sm:$0xff]   ;;  %v367_v10 = vld [vmem:[%s478_s1 + $0x80] sm:$0xff]   ;;  %v370_v13 = vld [vmem:[%s478_s1 + $0x88] sm:$0xff]  }
   0x5   :  { %v362_v11 = vld [vmem:[%s478_s1 + $0x20] sm:$0xff]   ;;  %344 = vmatpush3.bf16.msra.mxu1 %v367_v10  ;;  %v364_v15 = vld [vmem:[%s478_s1 + $0x28] sm:$0xff]   ;;  %v365_v18 = vld [vmem:[%s478_s1 + $0x70] sm:$0xff]  }
   0x6   :  { %345 = vmatprep.subr.bf16.mxu1 %v374_v1  ;;  %v21_v14 = vld [vmem:[%s479_s0] sm:$0xff]  ;;  %v373_v17 = vld [vmem:[%s479_s0 + $0x8] ss:$0 sps:$4 sm:$0xff]   ;;  %v366_v19 = vld [vmem:[%s478_s1 + $0x30] sm:$0xff]  }
   0x7   :  { %321 = vmatpush3.bf16.msra.mxu0 %v356_v4  ;;  %v294_v16 = vcombine.high %v21_v14, %v21_v14  ;;  %v368_v20 = vld [vmem:[%s478_s1 + $0x78] sm:$0xff]   ;;  %v293_v22 = vcombine.low %v21_v14, %v21_v14  ;;  %v315_v31 = vld [vmem:[%s480_s2] ss:$0 sm:$0xff] }
   0x8   :  { %322 = vmatprep.subr.bf16.mxu0 %v357_v5  ;;  %v369_v21 = vld [vmem:[%s478_s1 + $0x38] sm:$0xff]   ;;  %v316_v34 = vld [vmem:[%s481_s3] ss:$0 sm:$0xff] }
   0x9   :  { %346 = vmatpush3.bf16.msra.mxu1 %v370_v13  ;;  %213 = vmatprep.mubr.bf16.mxu0 %v294_v16  ;;  %v317_v36 = vld [vmem:[%s482_s4] ss:$0 sm:$0xff] }
   0xb   :  { %323 = vmatpush3.bf16.msra.mxu0 %v358_v6 }
   0xc   :  { %324 = vmatprep.subr.bf16.mxu0 %v359_v7  ;;  %348 = vmatmul.mubr.msk.bf16.vlgmr.msra.gmra.mrb[0].mxu1 %vm177_vm1, %v373_v17 }
   0xf   :  { %325 = vmatpush3.bf16.msra.mxu0 %v360_v8 }
  0x10   :  { %326 = vmatprep.subr.bf16.mxu0 %v361_v9 }
  0x13   :  { %327 = vmatpush3.bf16.msra.mxu0 %v362_v11 }
  0x14   :  { %328 = vmatprep.subr.bf16.mxu0 %v363_v12 }
  0x17   :  { %329 = vmatpush3.bf16.msra.mxu0 %v364_v15 }
  0x18   :  { %330 = vmatprep.subr.bf16.mxu0 %v365_v18 }
  0x1b   :  { %331 = vmatpush3.bf16.msra.mxu0 %v366_v19 }
  0x1c   :  { %332 = vmatprep.subr.bf16.mxu0 %v368_v20 }
  0x1f   :  { %333 = vmatpush3.bf16.msra.mxu0 %v369_v21 }
  0x22   :  { %214 = vmatmul.mubr.bf16.vlgmr.msra.gmra.mrb[0].mxu0 %v293_v22 }
  0xdf   :  { %v255_v23 = vpop.f32.mrb[0].mxu1 }
  0xe0   :  { %v349_v24 = vpop.f32.mrb[1].mxu1 }
  0xe1   :  { %v258_v25 = vpop.f32.mrb[2].mxu1 }
  0xe2   :  { %v350_v26 = vpop.f32.mrb[3].mxu1 }
  0xf5   :  { %v334_v27 = vpop.f32.mrb[0].mxu0 }
  0xf6   :  { %v335_v28 = vpop.f32.mrb[1].mxu0 }
  0xf7   :  { %v336_v29 = vadd.f32 %v335_v28, %v334_v27  ;;  %v337_v30 = vpop.f32.mrb[2].mxu0 }
  0xf8   :  { %v338_v32 = vpop.f32.mrb[3].mxu0 }
  0xf9   :  { %v256_v33 = vadd.f32 %v336_v29, %v255_v23 }
  0xfb   :  { %v268_v35 = vmul.f32 %v315_v31, %v256_v33 }
  0xfd   :  { %v276_v37 = vadd.f32 %v316_v34, %v268_v35 }
  0xff   :  { %vm277_vm2 = vcmp.gt.f32.partialorder %v276_v37, 0.0  ;;  %v285_v38 = vmul.f32 %v317_v36, %v276_v37 }
 0x101   :  { %v286_v39 = vsel %vm277_vm2, %v276_v37, %v285_v38 }
 0x102   :  { %v287_v40 = vpack.c.bf16 %v286_v39, %v286_v39 }
 0x104   :  { %288 = vst [vmem:[%s483_s5] sm:$0xf] %v287_v40 }

// kernel: unet_forward.29
= control target key start
LH: loop header
LB: loop body
LE: loop exit
PB: predicated region body
PF: predicated region fallthrough
CT: control target
= control target key end

     0   :  { %v634_v36 = vmov 0.0   ;;  %vm635_vm0 = vmmov 0   ;;  %vm329_vm1 = vcmask 523264   ;;  %s795_s1 = inlined_call_operand.vmem [shape: bf16[576,128], index: 1, kind: input, shape index: {}]   ;;  %s796_s0 = inlined_call_operand.vmem [shape: bf16[8,576], index: 0, kind: input, shape index: {}]   ;;  %s797_s2 = inlined_call_operand.vmem [shape: f32[1,128], index: 2, kind: input, shape index: {}]   ;;  %s798_s3 = inlined_call_operand.vmem [shape: f32[1,128], index: 3, kind: input, shape index: {}]   ;;  %s799_s4 = inlined_call_operand.vmem [shape: f32[1,128], index: 4, kind: input, shape index: {}]   ;;  %s800_s5 = inlined_call_operand.vmem [shape: bf16[8,128], index: 5, kind: output, shape index: {}]  }
   0x1   :  { %v593_v0 = vld [vmem:[%s795_s1 + $0x40] sm:$0xff]   ;;  %v597_v4 = vld [vmem:[%s795_s1 + $0x48] sm:$0xff]   ;;  %v601_v8 = vld [vmem:[%s795_s1 + $0x50] sm:$0xff]  }
   0x2   :  { %v594_v1 = vld [vmem:[%s795_s1 + $0xc0] sm:$0xff]   ;;  %530 = vmatprep.subr.bf16.mxu0 %v593_v0  ;;  %v598_v5 = vld [vmem:[%s795_s1 + $0xc8] sm:$0xff]   ;;  %v602_v9 = vld [vmem:[%s795_s1 + $0xd0] sm:$0xff]  }
   0x3   :  { %v595_v2 = vld [vmem:[%s795_s1] sm:$0xff]   ;;  %552 = vmatprep.subr.bf16.mxu1 %v594_v1  ;;  %v599_v6 = vld [vmem:[%s795_s1 + $0x8] sm:$0xff]   ;;  %v603_v10 = vld [vmem:[%s795_s1 + $0x10] sm:$0xff]  }
   0x4   :  { %v596_v3 = vld [vmem:[%s795_s1 + $0x80] sm:$0xff]   ;;  %531 = vmatpush3.bf16.msra.mxu0 %v595_v2  ;;  %v600_v7 = vld [vmem:[%s795_s1 + $0x88] sm:$0xff]   ;;  %v604_v11 = vld [vmem:[%s795_s1 + $0x90] sm:$0xff]  }
   0x5   :  { %553 = vmatpush3.bf16.msra.mxu1 %v596_v3  ;;  %532 = vmatprep.subr.bf16.mxu0 %v597_v4  ;;  %v605_v12 = vld [vmem:[%s795_s1 + $0x58] sm:$0xff]   ;;  %v609_v16 = vld [vmem:[%s795_s1 + $0x60] sm:$0xff]   ;;  %v613_v20 = vld [vmem:[%s795_s1 + $0x68] sm:$0xff]  }
   0x6   :  { %554 = vmatprep.subr.bf16.mxu1 %v598_v5  ;;  %v606_v13 = vld [vmem:[%s795_s1 + $0xd8] sm:$0xff]   ;;  %v610_v17 = vld [vmem:[%s795_s1 + $0xe0] sm:$0xff]   ;;  %v614_v21 = vld [vmem:[%s795_s1 + $0xe8] sm:$0xff]  }
   0x7   :  { %v607_v14 = vld [vmem:[%s795_s1 + $0x18] sm:$0xff]   ;;  %v611_v18 = vld [vmem:[%s795_s1 + $0x20] sm:$0xff]   ;;  %v615_v22 = vld [vmem:[%s795_s1 + $0x28] sm:$0xff]  }
   0x8   :  { %533 = vmatpush3.bf16.msra.mxu0 %v599_v6  ;;  %v608_v15 = vld [vmem:[%s795_s1 + $0x98] sm:$0xff]   ;;  %v612_v19 = vld [vmem:[%s795_s1 + $0xa0] sm:$0xff]   ;;  %v616_v23 = vld [vmem:[%s795_s1 + $0xa8] sm:$0xff]  }
   0x9   :  { %555 = vmatpush3.bf16.msra.mxu1 %v600_v7  ;;  %534 = vmatprep.subr.bf16.mxu0 %v601_v8  ;;  %v617_v24 = vld [vmem:[%s795_s1 + $0x70] sm:$0xff]   ;;  %v621_v28 = vld [vmem:[%s795_s1 + $0x78] sm:$0xff]   ;;  %v21_v32 = vld [vmem:[%s796_s0] sm:$0xff] }
   0xa   :  { %556 = vmatprep.subr.bf16.mxu1 %v602_v9  ;;  %v618_v25 = vld [vmem:[%s795_s1 + $0xf0] sm:$0xff]   ;;  %v622_v29 = vld [vmem:[%s795_s1 + $0xf8] sm:$0xff]   ;;  %v485_v33 = vcombine.low %v21_v32, %v21_v32  ;;  %v486_v34 = vcombine.high %v21_v32, %v21_v32  ;;  %v22_v35 = vld [vmem:[%s796_s0 + $0x8] sm:$0xff] }
   0xb   :  { %v619_v26 = vld [vmem:[%s795_s1 + $0x30] sm:$0xff]   ;;  %v623_v30 = vld [vmem:[%s795_s1 + $0x38] sm:$0xff]   ;;  %v487_v37 = vcombine.low %v22_v35, %v22_v35  ;;  %v488_v38 = vcombine.high %v22_v35, %v22_v35  ;;  %v630_v39 = vld [vmem:[%s795_s1 + $0x100] sm:$0xff]  }
   0xc   :  { %535 = vmatpush3.bf16.msra.mxu0 %v603_v10  ;;  %v620_v27 = vld [vmem:[%s795_s1 + $0xb0] sm:$0xff]   ;;  %v624_v31 = vld [vmem:[%s795_s1 + $0xb8] sm:$0xff]   ;;  %365 = vmatprep.mubr.bf16.mxu0 %v486_v34  ;;  %v631_v40 = vld [vmem:[%s795_s1 + $0x108] sm:$0xff]  }
   0xd   :  { %557 = vmatpush3.bf16.msra.mxu1 %v604_v11  ;;  %536 = vmatprep.subr.bf16.mxu0 %v605_v12  ;;  %v632_v41 = vld [vmem:[%s795_s1 + $0x110] sm:$0xff]   ;;  %v633_v42 = vld [vmem:[%s795_s1 + $0x118] sm:$0xff]   ;;  %v527_v56 = vld [vmem:[%s797_s2] ss:$0 sm:$0xff] }
   0xe   :  { %558 = vmatprep.subr.bf16.mxu1 %v606_v13  ;;  %405 = vmatprep.mubr.bf16.mxu1 %v488_v38  ;;  %v627_v43 = vld [vmem:[%s796_s0 + $0x10] ss:$0 sps:$4 sm:$0xff]   ;;  %v528_v59 = vld [vmem:[%s798_s3] ss:$0 sm:$0xff] }
   0xf   :  { %v529_v63 = vld [vmem:[%s799_s4] ss:$0 sm:$0xff] }
  0x10   :  { %537 = vmatpush3.bf16.msra.mxu0 %v607_v14 }
  0x11   :  { %559 = vmatpush3.bf16.msra.mxu1 %v608_v15  ;;  %538 = vmatprep.subr.bf16.mxu0 %v609_v16 }
  0x12   :  { %560 = vmatprep.subr.bf16.mxu1 %v610_v17 }
  0x14   :  { %539 = vmatpush3.bf16.msra.mxu0 %v611_v18 }
  0x15   :  { %561 = vmatpush3.bf16.msra.mxu1 %v612_v19  ;;  %540 = vmatprep.subr.bf16.mxu0 %v613_v20 }
  0x16   :  { %562 = vmatprep.subr.bf16.mxu1 %v614_v21 }
  0x18   :  { %541 = vmatpush3.bf16.msra.mxu0 %v615_v22 }
  0x19   :  { %563 = vmatpush3.bf16.msra.mxu1 %v616_v23  ;;  %542 = vmatprep.subr.bf16.mxu0 %v617_v24 }
  0x1a   :  { %564 = vmatprep.subr.bf16.mxu1 %v618_v25 }
  0x1c   :  { %543 = vmatpush3.bf16.msra.mxu0 %v619_v26 }
  0x1d   :  { %565 = vmatpush3.bf16.msra.mxu1 %v620_v27  ;;  %544 = vmatprep.subr.bf16.mxu0 %v621_v28 }
  0x1e   :  { %566 = vmatprep.subr.bf16.mxu1 %v622_v29 }
  0x20   :  { %545 = vmatpush3.bf16.msra.mxu0 %v623_v30 }
  0x21   :  { %567 = vmatpush3.bf16.msra.mxu1 %v624_v31  ;;  %579 = vmatprep.subr.bf16.mxu0 %v634_v36 }
  0x23   :  { %366 = vmatmul.mubr.bf16.vlgmr.msra.gmra.mrb[0].mxu0 %v485_v33 }
  0x24   :  { %406 = vmatmul.mubr.bf16.vlgmr.msra.gmra.mrb[0].mxu1 %v487_v37  ;;  %580 = vmatpush3.bf16.msra.mxu0 %v630_v39 }
  0x25   :  { %581 = vmatprep.subr.bf16.mxu0 %v634_v36  ;;  %587 = vmatprep.mubr.msk.bf16.mxu0 %vm635_vm0, %v634_v36 }
  0x28   :  { %582 = vmatpush3.bf16.msra.mxu0 %v631_v40 }
  0x29   :  { %583 = vmatprep.subr.bf16.mxu0 %v634_v36 }
  0x2c   :  { %584 = vmatpush3.bf16.msra.mxu0 %v632_v41 }
  0x2d   :  { %585 = vmatprep.subr.bf16.mxu0 %v634_v36 }
  0x30   :  { %586 = vmatpush3.bf16.msra.mxu0 %v633_v42 }
  0x33   :  { %588 = vmatmul.mubr.msk.bf16.vlgmr.msra.gmra.mrb[4].mxu0 %vm329_vm1, %v627_v43 }
  0xf6   :  { %v546_v44 = vpop.f32.mrb[0].mxu0 }
  0xf7   :  { %v568_v45 = vpop.f32.mrb[0].mxu1  ;;  %v547_v46 = vpop.f32.mrb[1].mxu0 }
  0xf8   :  { %v548_v47 = vadd.f32 %v547_v46, %v546_v44  ;;  %v569_v48 = vpop.f32.mrb[1].mxu1  ;;  %v549_v49 = vpop.f32.mrb[2].mxu0 }
  0xf9   :  { %v570_v50 = vadd.f32 %v569_v48, %v568_v45  ;;  %v550_v51 = vpop.f32.mrb[3].mxu0  ;;  %v571_v52 = vpop.f32.mrb[2].mxu1 }
  0xfa   :  { %v572_v53 = vpop.f32.mrb[3].mxu1 }
  0xfb   :  { %v408_v54 = vadd.f32 %v570_v50, %v548_v47 }
 0x106   :  { %v447_v55 = vpop.f32.mrb[4].mxu0 }
 0x107   :  { %v448_v57 = vadd.f32 %v447_v55, %v408_v54  ;;  %v589_v58 = vpop.f32.mrb[5].mxu0 }
 0x108   :  { %v450_v60 = vpop.f32.mrb[6].mxu0 }
 0x109   :  { %v460_v61 = vmul.f32 %v527_v56, %v448_v57  ;;  %v590_v62 = vpop.f32.mrb[7].mxu0 }
 0x10b   :  { %v468_v0 = vadd.f32 %v528_v59, %v460_v61 }
 0x10d   :  { %vm469_vm2 = vcmp.gt.f32.partialorder %v468_v0, 0.0  ;;  %v477_v1 = vmul.f32 %v529_v63, %v468_v0 }
 0x10f   :  { %v478_v2 = vsel %vm469_vm2, %v468_v0, %v477_v1 }
 0x110   :  { %v479_v3 = vpack.c.bf16 %v478_v2, %v478_v2 }
 0x112   :  { %480 = vst [vmem:[%s800_s5] sm:$0xf] %v479_v3 }

// kernel: unet_forward.30
= control target key start
LH: loop header
LB: loop body
LE: loop exit
PB: predicated region body
PF: predicated region fallthrough
CT: control target
= control target key end

     0   :  { %v640_v36 = vmov 0.0   ;;  %vm641_vm0 = vmmov 0   ;;  %vm332_vm1 = vcmask 523264   ;;  %s809_s1 = inlined_call_operand.vmem [shape: bf16[576,128], index: 1, kind: input, shape index: {}]   ;;  %s810_s0 = inlined_call_operand.vmem [shape: bf16[8,576], index: 0, kind: input, shape index: {}]   ;;  %s811_s2 = inlined_call_operand.vmem [shape: f32[1,128], index: 2, kind: input, shape index: {}]   ;;  %s812_s5 = inlined_call_operand.vmem [shape: bf16[8,128], index: 5, kind: input, shape index: {}]   ;;  %s813_s3 = inlined_call_operand.vmem [shape: f32[1,128], index: 3, kind: input, shape index: {}]   ;;  %s814_s4 = inlined_call_operand.vmem [shape: f32[1,128], index: 4, kind: input, shape index: {}]   ;;  %s815_s6 = inlined_call_operand.vmem [shape: bf16[8,128], index: 6, kind: output, shape index: {}]  }
   0x1   :  { %v599_v0 = vld [vmem:[%s809_s1 + $0x40] sm:$0xff]   ;;  %v603_v4 = vld [vmem:[%s809_s1 + $0x48] sm:$0xff]   ;;  %v607_v8 = vld [vmem:[%s809_s1 + $0x50] sm:$0xff]  }
   0x2   :  { %v600_v1 = vld [vmem:[%s809_s1 + $0xc0] sm:$0xff]   ;;  %536 = vmatprep.subr.bf16.mxu0 %v599_v0  ;;  %v604_v5 = vld [vmem:[%s809_s1 + $0xc8] sm:$0xff]   ;;  %v608_v9 = vld [vmem:[%s809_s1 + $0xd0] sm:$0xff]  }
   0x3   :  { %v601_v2 = vld [vmem:[%s809_s1] sm:$0xff]   ;;  %558 = vmatprep.subr.bf16.mxu1 %v600_v1  ;;  %v605_v6 = vld [vmem:[%s809_s1 + $0x8] sm:$0xff]   ;;  %v609_v10 = vld [vmem:[%s809_s1 + $0x10] sm:$0xff]  }
   0x4   :  { %v602_v3 = vld [vmem:[%s809_s1 + $0x80] sm:$0xff]   ;;  %537 = vmatpush3.bf16.msra.mxu0 %v601_v2  ;;  %v606_v7 = vld [vmem:[%s809_s1 + $0x88] sm:$0xff]   ;;  %v610_v11 = vld [vmem:[%s809_s1 + $0x90] sm:$0xff]  }
   0x5   :  { %559 = vmatpush3.bf16.msra.mxu1 %v602_v3  ;;  %538 = vmatprep.subr.bf16.mxu0 %v603_v4  ;;  %v611_v12 = vld [vmem:[%s809_s1 + $0x58] sm:$0xff]   ;;  %v615_v16 = vld [vmem:[%s809_s1 + $0x60] sm:$0xff]   ;;  %v619_v20 = vld [vmem:[%s809_s1 + $0x68] sm:$0xff]  }
   0x6   :  { %560 = vmatprep.subr.bf16.mxu1 %v604_v5  ;;  %v612_v13 = vld [vmem:[%s809_s1 + $0xd8] sm:$0xff]   ;;  %v616_v17 = vld [vmem:[%s809_s1 + $0xe0] sm:$0xff]   ;;  %v620_v21 = vld [vmem:[%s809_s1 + $0xe8] sm:$0xff]  }
   0x7   :  { %v613_v14 = vld [vmem:[%s809_s1 + $0x18] sm:$0xff]   ;;  %v617_v18 = vld [vmem:[%s809_s1 + $0x20] sm:$0xff]   ;;  %v621_v22 = vld [vmem:[%s809_s1 + $0x28] sm:$0xff]  }
   0x8   :  { %539 = vmatpush3.bf16.msra.mxu0 %v605_v6  ;;  %v614_v15 = vld [vmem:[%s809_s1 + $0x98] sm:$0xff]   ;;  %v618_v19 = vld [vmem:[%s809_s1 + $0xa0] sm:$0xff]   ;;  %v622_v23 = vld [vmem:[%s809_s1 + $0xa8] sm:$0xff]  }
   0x9   :  { %561 = vmatpush3.bf16.msra.mxu1 %v606_v7  ;;  %540 = vmatprep.subr.bf16.mxu0 %v607_v8  ;;  %v623_v24 = vld [vmem:[%s809_s1 + $0x70] sm:$0xff]   ;;  %v627_v28 = vld [vmem:[%s809_s1 + $0x78] sm:$0xff]   ;;  %v24_v32 = vld [vmem:[%s810_s0] sm:$0xff] }
   0xa   :  { %562 = vmatprep.subr.bf16.mxu1 %v608_v9  ;;  %v624_v25 = vld [vmem:[%s809_s1 + $0xf0] sm:$0xff]   ;;  %v628_v29 = vld [vmem:[%s809_s1 + $0xf8] sm:$0xff]   ;;  %v491_v33 = vcombine.low %v24_v32, %v24_v32  ;;  %v492_v34 = vcombine.high %v24_v32, %v24_v32  ;;  %v25_v35 = vld [vmem:[%s810_s0 + $0x8] sm:$0xff] }
   0xb   :  { %v625_v26 = vld [vmem:[%s809_s1 + $0x30] sm:$0xff]   ;;  %v629_v30 = vld [vmem:[%s809_s1 + $0x38] sm:$0xff]   ;;  %v493_v37 = vcombine.low %v25_v35, %v25_v35  ;;  %v494_v38 = vcombine.high %v25_v35, %v25_v35  ;;  %v636_v39 = vld [vmem:[%s809_s1 + $0x100] sm:$0xff]  }
   0xc   :  { %541 = vmatpush3.bf16.msra.mxu0 %v609_v10  ;;  %v626_v27 = vld [vmem:[%s809_s1 + $0xb0] sm:$0xff]   ;;  %v630_v31 = vld [vmem:[%s809_s1 + $0xb8] sm:$0xff]   ;;  %368 = vmatprep.mubr.bf16.mxu0 %v492_v34  ;;  %v637_v40 = vld [vmem:[%s809_s1 + $0x108] sm:$0xff]  }
   0xd   :  { %563 = vmatpush3.bf16.msra.mxu1 %v610_v11  ;;  %542 = vmatprep.subr.bf16.mxu0 %v611_v12  ;;  %v638_v41 = vld [vmem:[%s809_s1 + $0x110] sm:$0xff]   ;;  %v639_v42 = vld [vmem:[%s809_s1 + $0x118] sm:$0xff]   ;;  %v533_v56 = vld [vmem:[%s811_s2] ss:$0 sm:$0xff] }
   0xe   :  { %564 = vmatprep.subr.bf16.mxu1 %v612_v13  ;;  %408 = vmatprep.mubr.bf16.mxu1 %v494_v38  ;;  %v633_v43 = vld [vmem:[%s810_s0 + $0x10] ss:$0 sps:$4 sm:$0xff]   ;;  %v472_v57 = vld [vmem:[%s812_s5] sm:$0xf] }
   0xf   :  { %v534_v60 = vld [vmem:[%s813_s3] ss:$0 sm:$0xff]  ;;  %v473_v63 = vunpack.c.l.bf16 %v472_v57 }
  0x10   :  { %543 = vmatpush3.bf16.msra.mxu0 %v613_v14  ;;  %v535_v2 = vld [vmem:[%s814_s4] ss:$0 sm:$0xff] }
  0x11   :  { %565 = vmatpush3.bf16.msra.mxu1 %v614_v15  ;;  %544 = vmatprep.subr.bf16.mxu0 %v615_v16 }
  0x12   :  { %566 = vmatprep.subr.bf16.mxu1 %v616_v17 }
  0x14   :  { %545 = vmatpush3.bf16.msra.mxu0 %v617_v18 }
  0x15   :  { %567 = vmatpush3.bf16.msra.mxu1 %v618_v19  ;;  %546 = vmatprep.subr.bf16.mxu0 %v619_v20 }
  0x16   :  { %568 = vmatprep.subr.bf16.mxu1 %v620_v21 }
  0x18   :  { %547 = vmatpush3.bf16.msra.mxu0 %v621_v22 }
  0x19   :  { %569 = vmatpush3.bf16.msra.mxu1 %v622_v23  ;;  %548 = vmatprep.subr.bf16.mxu0 %v623_v24 }
  0x1a   :  { %570 = vmatprep.subr.bf16.mxu1 %v624_v25 }
  0x1c   :  { %549 = vmatpush3.bf16.msra.mxu0 %v625_v26 }
  0x1d   :  { %571 = vmatpush3.bf16.msra.mxu1 %v626_v27  ;;  %550 = vmatprep.subr.bf16.mxu0 %v627_v28 }
  0x1e   :  { %572 = vmatprep.subr.bf16.mxu1 %v628_v29 }
  0x20   :  { %551 = vmatpush3.bf16.msra.mxu0 %v629_v30 }
  0x21   :  { %573 = vmatpush3.bf16.msra.mxu1 %v630_v31  ;;  %585 = vmatprep.subr.bf16.mxu0 %v640_v36 }
  0x23   :  { %369 = vmatmul.mubr.bf16.vlgmr.msra.gmra.mrb[0].mxu0 %v491_v33 }
  0x24   :  { %409 = vmatmul.mubr.bf16.vlgmr.msra.gmra.mrb[0].mxu1 %v493_v37  ;;  %586 = vmatpush3.bf16.msra.mxu0 %v636_v39 }
  0x25   :  { %587 = vmatprep.subr.bf16.mxu0 %v640_v36  ;;  %593 = vmatprep.mubr.msk.bf16.mxu0 %vm641_vm0, %v640_v36 }
  0x28   :  { %588 = vmatpush3.bf16.msra.mxu0 %v637_v40 }
  0x29   :  { %589 = vmatprep.subr.bf16.mxu0 %v640_v36 }
  0x2c   :  { %590 = vmatpush3.bf16.msra.mxu0 %v638_v41 }
  0x2d   :  { %591 = vmatprep.subr.bf16.mxu0 %v640_v36 }
  0x30   :  { %592 = vmatpush3.bf16.msra.mxu0 %v639_v42 }
  0x33   :  { %594 = vmatmul.mubr.msk.bf16.vlgmr.msra.gmra.mrb[4].mxu0 %vm332_vm1, %v633_v43 }
  0xf6   :  { %v552_v44 = vpop.f32.mrb[0].mxu0 }
  0xf7   :  { %v574_v45 = vpop.f32.mrb[0].mxu1  ;;  %v553_v46 = vpop.f32.mrb[1].mxu0 }
  0xf8   :  { %v554_v47 = vadd.f32 %v553_v46, %v552_v44  ;;  %v575_v48 = vpop.f32.mrb[1].mxu1  ;;  %v555_v49 = vpop.f32.mrb[2].mxu0 }
  0xf9   :  { %v576_v50 = vadd.f32 %v575_v48, %v574_v45  ;;  %v556_v51 = vpop.f32.mrb[3].mxu0  ;;  %v577_v52 = vpop.f32.mrb[2].mxu1 }
  0xfa   :  { %v578_v53 = vpop.f32.mrb[3].mxu1 }
  0xfb   :  { %v411_v54 = vadd.f32 %v576_v50, %v554_v47 }
 0x106   :  { %v450_v55 = vpop.f32.mrb[4].mxu0 }
 0x107   :  { %v451_v58 = vadd.f32 %v450_v55, %v411_v54  ;;  %v595_v59 = vpop.f32.mrb[5].mxu0 }
 0x108   :  { %v453_v61 = vpop.f32.mrb[6].mxu0 }
 0x109   :  { %v463_v62 = vmul.f32 %v533_v56, %v451_v58  ;;  %v596_v0 = vpop.f32.mrb[7].mxu0 }
 0x10b   :  { %v471_v1 = vadd.f32 %v534_v60, %v463_v62 }
 0x10d   :  { %v474_v3 = vadd.f32 %v473_v63, %v471_v1 }
 0x10f   :  { %vm475_vm2 = vcmp.gt.f32.partialorder %v474_v3, 0.0  ;;  %v483_v4 = vmul.f32 %v535_v2, %v474_v3 }
 0x111   :  { %v484_v5 = vsel %vm475_vm2, %v474_v3, %v483_v4 }
 0x112   :  { %v485_v6 = vpack.c.bf16 %v484_v5, %v484_v5 }
 0x114   :  { %486 = vst [vmem:[%s815_s6] sm:$0xf] %v485_v6 }

// kernel: unet_forward.32
= control target key start
LH: loop header
LB: loop body
LE: loop exit
PB: predicated region body
PF: predicated region fallthrough
CT: control target
= control target key end

     0   :  { %s995_s18 = smov 0   ;;  %s1135_s0 = inlined_call_operand.vmem [shape: bf16[32,576], index: 0, kind: input, shape index: {}]   ;;  %s1136_s1 = inlined_call_operand.vmem [shape: bf16[576,128], index: 1, kind: input, shape index: {}]   ;;  %s1137_s2 = inlined_call_operand.vmem [shape: f32[1,128], index: 2, kind: input, shape index: {}]   ;;  %s1138_s3 = inlined_call_operand.vmem [shape: f32[1,128], index: 3, kind: input, shape index: {}]   ;;  %s1139_s4 = inlined_call_operand.vmem [shape: f32[1,128], index: 4, kind: input, shape index: {}]   ;;  %s1140_s5 = inlined_call_operand.vmem [shape: bf16[32,128], index: 5, kind: output, shape index: {}]  }
   0x1 LB: > { %s775_s19 = sadd.s32 4294967295, %s961_s18   ;;  %p779_p0 = scmp.ge.s32.totalorder %s961_s18, 1  ;;  %s961_s18 = sphi %s995_s18, %s15_s18  }
   0x2   : > { %p189_p1 = scmp.lt.s32.totalorder %s961_s18, 3 }
   0x4   : > { %p190_p2 = pnand %p779_p0, %p189_p1 }
   0x5   : > { %v912_v0 = vld [vmem:[%s1136_s1 + $0x40] sm:$0xff] (!%p190_p2)   ;;  %v916_v4 = vld [vmem:[%s1136_s1 + $0x48] sm:$0xff] (!%p190_p2)   ;;  %v920_v8 = vld [vmem:[%s1136_s1 + $0x50] sm:$0xff] (!%p190_p2)   ;;  %s780_s27 = sshll.u32 (!%p190_p2), %s775_s19, 1  ;;  %v963_v34 = vmov (!%p190_p2), 0.0   ;;  %vm964_vm0 = vmmov (!%p190_p2), 0  }
   0x6   : > { %193 = sbr.rel (%p190_p2) target bundleno = 281 (0x119), region = 40  ;;  %v913_v1 = vld [vmem:[%s1136_s1 + $0xc0] sm:$0xff] (!%p190_p2)   ;;  %840 = vmatprep.subr.bf16.mxu0 (!%p190_p2), %v912_v0  ;;  %v917_v5 = vld [vmem:[%s1136_s1 + $0xc8] sm:$0xff] (!%p190_p2)   ;;  %v921_v9 = vld [vmem:[%s1136_s1 + $0xd0] sm:$0xff] (!%p190_p2)   ;;  %p219_p3 = scmp.lt.s32.totalorder (!%p190_p2), %s780_s27, 3  ;;  %vm551_vm1 = vcmask (!%p190_p2), 523264  }
   0x7   : > { %v914_v2 = vld [vmem:[%s1136_s1] sm:$0xff] (!%p190_p2)   ;;  %862 = vmatprep.subr.bf16.mxu1 (!%p190_p2), %v913_v1  ;;  %v918_v6 = vld [vmem:[%s1136_s1 + $0x8] sm:$0xff] (!%p190_p2)   ;;  %v922_v10 = vld [vmem:[%s1136_s1 + $0x10] sm:$0xff] (!%p190_p2)  }
   0x8   : > { %v915_v3 = vld [vmem:[%s1136_s1 + $0x80] sm:$0xff] (!%p190_p2)   ;;  %841 = vmatpush3.bf16.msra.mxu0 (!%p190_p2), %v914_v2  ;;  %v919_v7 = vld [vmem:[%s1136_s1 + $0x88] sm:$0xff] (!%p190_p2)   ;;  %v923_v11 = vld [vmem:[%s1136_s1 + $0x90] sm:$0xff] (!%p190_p2)  }
   0x9   : > { %863 = vmatpush3.bf16.msra.mxu1 (!%p190_p2), %v915_v3  ;;  %842 = vmatprep.subr.bf16.mxu0 (!%p190_p2), %v916_v4  ;;  %v924_v12 = vld [vmem:[%s1136_s1 + $0x58] sm:$0xff] (!%p190_p2)   ;;  %v928_v16 = vld [vmem:[%s1136_s1 + $0x60] sm:$0xff] (!%p190_p2)   ;;  %v932_v20 = vld [vmem:[%s1136_s1 + $0x68] sm:$0xff] (!%p190_p2)  }
   0xa   : > { %864 = vmatprep.subr.bf16.mxu1 (!%p190_p2), %v917_v5  ;;  %v925_v13 = vld [vmem:[%s1136_s1 + $0xd8] sm:$0xff] (!%p190_p2)   ;;  %v929_v17 = vld [vmem:[%s1136_s1 + $0xe0] sm:$0xff] (!%p190_p2)   ;;  %v933_v21 = vld [vmem:[%s1136_s1 + $0xe8] sm:$0xff] (!%p190_p2)  }
   0xb   : > { %v926_v14 = vld [vmem:[%s1136_s1 + $0x18] sm:$0xff] (!%p190_p2)   ;;  %v930_v18 = vld [vmem:[%s1136_s1 + $0x20] sm:$0xff] (!%p190_p2)   ;;  %v934_v22 = vld [vmem:[%s1136_s1 + $0x28] sm:$0xff] (!%p190_p2)  }
   0xc   : > { %843 = vmatpush3.bf16.msra.mxu0 (!%p190_p2), %v918_v6  ;;  %v927_v15 = vld [vmem:[%s1136_s1 + $0x98] sm:$0xff] (!%p190_p2)   ;;  %v931_v19 = vld [vmem:[%s1136_s1 + $0xa0] sm:$0xff] (!%p190_p2)   ;;  %v935_v23 = vld [vmem:[%s1136_s1 + $0xa8] sm:$0xff] (!%p190_p2)  }
   0xd   : > { %865 = vmatpush3.bf16.msra.mxu1 %v919_v7  ;;  %844 = vmatprep.subr.bf16.mxu0 %v920_v8  ;;  %s1142_s27 = smov (!%p219_p3, %s780_s27), 3  ;;  %v936_v24 = vld [vmem:[%s1136_s1 + $0x70] sm:$0xff]   ;;  %v940_v28 = vld [vmem:[%s1136_s1 + $0x78] sm:$0xff]   ;;  %v950_v37 = vld [vmem:[%s1136_s1 + $0x100] sm:$0xff]  }
   0xe   : > { %866 = vmatprep.subr.bf16.mxu1 %v921_v9  ;;  %v937_v25 = vld [vmem:[%s1136_s1 + $0xf0] sm:$0xff]   ;;  %s901_s26 = smul.u32 20, %s1142_s27  ;;  %v941_v29 = vld [vmem:[%s1136_s1 + $0xf8] sm:$0xff]   ;;  %v951_v38 = vld [vmem:[%s1136_s1 + $0x108] sm:$0xff]   ;;  %s783_s9 = sshll.u32 %s1142_s27, 2 }
   0xf   : > { %v938_v26 = vld [vmem:[%s1136_s1 + $0x30] sm:$0xff]   ;;  %v942_v30 = vld [vmem:[%s1136_s1 + $0x38] sm:$0xff]   ;;  %v826_v57 = vld [vmem:[%s1137_s2] ss:$0 sm:$0xff]  ;;  %s229_s11 = scalar_lea.vmem %s1140_s5, %s783_s9 }
  0x10   : > { %845 = vmatpush3.bf16.msra.mxu0 %v922_v10  ;;  %v939_v27 = vld [vmem:[%s1136_s1 + $0xb0] sm:$0xff]   ;;  %s223_s12 = scalar_lea.vmem %s1135_s0, %s901_s26  ;;  %v943_v31 = vld [vmem:[%s1136_s1 + $0xb8] sm:$0xff]   ;;  %v827_v60 = vld [vmem:[%s1138_s3] ss:$0 sm:$0xff] }
  0x11   : > { %867 = vmatpush3.bf16.msra.mxu1 %v923_v11  ;;  %846 = vmatprep.subr.bf16.mxu0 %v924_v12  ;;  %v944_v32 = vld [vmem:[%s223_s12] ss:$20 sps:$4 sm:$0xff]   ;;  %v946_v33 = vld [vmem:[%s223_s12 + $0x4] ss:$20 sps:$4 sm:$0xff]   ;;  %v947_v35 = vld [vmem:[%s223_s12 + $0x8] ss:$20 sps:$4 sm:$0xff]  }
  0x12   : > { %868 = vmatprep.subr.bf16.mxu1 %v925_v13  ;;  %v949_v36 = vld [vmem:[%s223_s12 + $0xc] ss:$20 sps:$4 sm:$0xff]   ;;  %587 = vmatprep.mubr.bf16.mxu0 %v946_v33  ;;  %v952_v39 = vld [vmem:[%s1136_s1 + $0x110] sm:$0xff]   ;;  %v953_v40 = vld [vmem:[%s1136_s1 + $0x118] sm:$0xff]  }
  0x13   : > { %628 = vmatprep.mubr.bf16.mxu1 %v949_v36  ;;  %v954_v41 = vld [vmem:[%s223_s12 + $0x10] ss:$20 sps:$4 sm:$0xff]   ;;  %v828_v1 = vld [vmem:[%s1139_s4] ss:$0 sm:$0xff] }
  0x14   : > { %847 = vmatpush3.bf16.msra.mxu0 %v926_v14 }
  0x15   : > { %869 = vmatpush3.bf16.msra.mxu1 %v927_v15  ;;  %848 = vmatprep.subr.bf16.mxu0 %v928_v16 }
  0x16   : > { %870 = vmatprep.subr.bf16.mxu1 %v929_v17 }
  0x18   : > { %849 = vmatpush3.bf16.msra.mxu0 %v930_v18 }
  0x19   : > { %871 = vmatpush3.bf16.msra.mxu1 %v931_v19  ;;  %850 = vmatprep.subr.bf16.mxu0 %v932_v20 }
  0x1a   : > { %872 = vmatprep.subr.bf16.mxu1 %v933_v21 }
  0x1c   : > { %851 = vmatpush3.bf16.msra.mxu0 %v934_v22 }
  0x1d   : > { %873 = vmatpush3.bf16.msra.mxu1 %v935_v23  ;;  %852 = vmatprep.subr.bf16.mxu0 %v936_v24 }
  0x1e   : > { %874 = vmatprep.subr.bf16.mxu1 %v937_v25 }
  0x20   : > { %853 = vmatpush3.bf16.msra.mxu0 %v938_v26 }
  0x21   : > { %875 = vmatpush3.bf16.msra.mxu1 %v939_v27  ;;  %854 = vmatprep.subr.bf16.mxu0 %v940_v28 }
  0x22   : > { %876 = vmatprep.subr.bf16.mxu1 %v941_v29 }
  0x24   : > { %855 = vmatpush3.bf16.msra.mxu0 %v942_v30 }
  0x25   : > { %877 = vmatpush3.bf16.msra.mxu1 %v943_v31  ;;  %889 = vmatprep.subr.bf16.mxu0 %v963_v34 }
  0x27   : > { %588 = vmatmul.mubr.bf16.vlgmr.msra.gmra.mrb[0].mxu0 %v944_v32 }
  0x28   : > { %629 = vmatmul.mubr.bf16.vlgmr.msra.gmra.mrb[0].mxu1 %v947_v35  ;;  %890 = vmatpush3.bf16.msra.mxu0 %v950_v37 }
  0x29   : > { %891 = vmatprep.subr.bf16.mxu0 %v963_v34  ;;  %897 = vmatprep.mubr.msk.bf16.mxu0 %vm964_vm0, %v963_v34 }
  0x2c   : > { %892 = vmatpush3.bf16.msra.mxu0 %v951_v38 }
  0x2d   : > { %893 = vmatprep.subr.bf16.mxu0 %v963_v34 }
  0x30   : > { %894 = vmatpush3.bf16.msra.mxu0 %v952_v39 }
  0x31   : > { %895 = vmatprep.subr.bf16.mxu0 %v963_v34 }
  0x34   : > { %896 = vmatpush3.bf16.msra.mxu0 %v953_v40 }
  0x37   : > { %898 = vmatmul.mubr.msk.bf16.vlgmr.msra.gmra.mrb[4].mxu0 %vm551_vm1, %v954_v41 }
  0xfa   : > { %v856_v42 = vpop.f32.mrb[0].mxu0 }
  0xfb   : > { %v878_v43 = vpop.f32.mrb[0].mxu1  ;;  %v857_v44 = vpop.f32.mrb[1].mxu0 }
  0xfc   : > { %v858_v45 = vadd.f32 %v857_v44, %v856_v42  ;;  %v879_v46 = vpop.f32.mrb[1].mxu1  ;;  %v859_v47 = vpop.f32.mrb[2].mxu0 }
  0xfd   : > { %v880_v48 = vadd.f32 %v879_v46, %v878_v43  ;;  %v881_v49 = vpop.f32.mrb[2].mxu1  ;;  %v860_v50 = vpop.f32.mrb[3].mxu0 }
  0xfe   : > { %v861_v51 = vadd.f32 %v860_v50, %v859_v47  ;;  %v882_v52 = vpop.f32.mrb[3].mxu1 }
  0xff   : > { %v883_v53 = vadd.f32 %v882_v52, %v881_v49  ;;  %v631_v54 = vadd.f32 %v880_v48, %v858_v45 }
 0x101   : > { %v634_v55 = vadd.f32 %v883_v53, %v861_v51 }
 0x10a   : > { %v671_v56 = vpop.f32.mrb[4].mxu0 }
 0x10b   : > { %v672_v58 = vadd.f32 %v671_v56, %v631_v54  ;;  %v899_v59 = vpop.f32.mrb[5].mxu0 }
 0x10c   : > { %v674_v61 = vpop.f32.mrb[6].mxu0 }
 0x10d   : > { %v685_v62 = vmul.f32 %v826_v57, %v672_v58  ;;  %v675_v63 = vadd.f32 %v674_v61, %v634_v55  ;;  %v900_v0 = vpop.f32.mrb[7].mxu0 }
 0x10f   : > { %v694_v2 = vadd.f32 %v827_v60, %v685_v62  ;;  %v686_v3 = vmul.f32 %v826_v57, %v675_v63 }
 0x111   : > { %v705_v4 = vmul.f32 %v828_v1, %v694_v2  ;;  %v695_v5 = vadd.f32 %v827_v60, %v686_v3  ;;  %vm696_vm2 = vcmp.gt.f32.partialorder %v694_v2, 0.0 }
 0x113   : > { %vm697_vm3 = vcmp.gt.f32.partialorder %v695_v5, 0.0  ;;  %v706_v6 = vmul.f32 %v828_v1, %v695_v5  ;;  %v707_v7 = vsel %vm696_vm2, %v694_v2, %v705_v4 }
 0x115   : > { %v708_v8 = vsel %vm697_vm3, %v695_v5, %v706_v6 }
 0x116   : > { %v838_v9 = vpack.c.bf16 %v708_v8, %v707_v7 }
 0x118   : > { %839 = vst [vmem:[%s229_s11] sm:$0xff] %v838_v9  }
 0x119 PF: > { %s15_s18 = sadd.s32 1, %s961_s18  }
 0x11a   : > { %p12_p4 = scmp.ge.s32.totalorder %s15_s18, 4  }
 0x11c   :  { %14 = sbr.rel (!%p12_p4) target bundleno = 1 (0x1), region = 70 }

// kernel: unet_forward.34
= control target key start
LH: loop header
LB: loop body
LE: loop exit
PB: predicated region body
PF: predicated region fallthrough
CT: control target
= control target key end

     0   :  { %s1435_s24 = smov 0   ;;  %s1653_s0 = inlined_call_operand.vmem [shape: bf16[32,576], index: 0, kind: input, shape index: {}]   ;;  %s1654_s1 = inlined_call_operand.vmem [shape: bf16[32,288], index: 1, kind: input, shape index: {}]   ;;  %s1655_s2 = inlined_call_operand.vmem [shape: bf16[576,128], index: 2, kind: input, shape index: {}]   ;;  %s1656_s3 = inlined_call_operand.vmem [shape: bf16[288,128], index: 3, kind: input, shape index: {}]   ;;  %s1657_s4 = inlined_call_operand.vmem [shape: f32[1,128], index: 4, kind: input, shape index: {}]   ;;  %s1658_s5 = inlined_call_operand.vmem [shape: f32[1,128], index: 5, kind: input, shape index: {}]   ;;  %s1659_s6 = inlined_call_operand.vmem [shape: f32[1,128], index: 6, kind: input, shape index: {}]   ;;  %s1660_s7 = inlined_call_operand.vmem [shape: bf16[32,128], index: 7, kind: output, shape index: {}]  }
   0x1 LB: > { %s1115_s25 = sadd.s32 4294967295, %s1391_s24   ;;  %p1119_p0 = scmp.ge.s32.totalorder %s1391_s24, 1  ;;  %s1391_s24 = sphi %s1435_s24, %s17_s24  }
   0x2   : > { %p251_p1 = scmp.lt.s32.totalorder %s1391_s24, 3 }
   0x4   : > { %p252_p2 = pnand %p1119_p0, %p251_p1 }
   0x5   : > { %v1320_v0 = vld [vmem:[%s1656_s3 + $0x40] sm:$0xff] (!%p252_p2)   ;;  %v1393_v1 = vmov (!%p252_p2), 0.0   ;;  %vm1394_vm0 = vmmov (!%p252_p2), 0   ;;  %s1120_s9 = sshll.u32 (!%p252_p2), %s1115_s25, 1  ;;  %v1323_v4 = vld [vmem:[%s1656_s3 + $0x48] sm:$0xff] (!%p252_p2)   ;;  %v1327_v8 = vld [vmem:[%s1656_s3 + $0x50] sm:$0xff] (!%p252_p2)  }
   0x6   : > { %255 = sbr.rel (%p252_p2) target bundleno = 302 (0x12e), region = 48  ;;  %1278 = vmatprep.subr.bf16.mxu1 (!%p252_p2), %v1393_v1  ;;  %v1321_v2 = vld [vmem:[%s1656_s3 + $0x80] sm:$0xff] (!%p252_p2)   ;;  %1204 = vmatprep.subr.bf16.mxu0 (!%p252_p2), %v1320_v0  ;;  %p291_p3 = scmp.lt.s32.totalorder (!%p252_p2), %s1120_s9, 3  ;;  %v1324_v5 = vld [vmem:[%s1656_s3 + $0x88] sm:$0xff] (!%p252_p2)   ;;  %vm552_vm1 = vcmask (!%p252_p2), 261120   ;;  %v1330_v10 = vld [vmem:[%s1656_s3 + $0x10] sm:$0xff] (!%p252_p2)  }
   0x7   : > { %v1322_v3 = vld [vmem:[%s1656_s3] sm:$0xff] (!%p252_p2)   ;;  %1282 = vmatprep.mubr.msk.bf16.mxu1 (!%p252_p2), %vm1394_vm0, %v1393_v1  ;;  %1279 = vmatpush3.bf16.msra.mxu1 (!%p252_p2), %v1321_v2  ;;  %v1325_v6 = vld [vmem:[%s1656_s3 + $0x8] sm:$0xff] (!%p252_p2)   ;;  %v1332_v13 = vld [vmem:[%s1656_s3 + $0x58] sm:$0xff] (!%p252_p2)   ;;  %vm879_vm2 = vcmask (!%p252_p2), 523264  }
   0x8   : > { %1205 = vmatpush3.bf16.msra.mxu0 (!%p252_p2), %v1322_v3  ;;  %1280 = vmatprep.subr.bf16.mxu1 (!%p252_p2), %v1393_v1  ;;  %v1326_v7 = vld [vmem:[%s1655_s2 + $0x40] sm:$0xff] (!%p252_p2)   ;;  %v1331_v12 = vld [vmem:[%s1655_s2 + $0x48] sm:$0xff] (!%p252_p2)   ;;  %v1334_v15 = vld [vmem:[%s1656_s3 + $0x18] sm:$0xff] (!%p252_p2)  }
   0x9   : > { %1206 = vmatprep.subr.bf16.mxu0 (!%p252_p2), %v1323_v4  ;;  %v1329_v9 = vld [vmem:[%s1655_s2] sm:$0xff] (!%p252_p2)   ;;  %v1333_v14 = vld [vmem:[%s1655_s2 + $0x8] sm:$0xff] (!%p252_p2)   ;;  %v1335_v16 = vld [vmem:[%s1655_s2 + $0x50] sm:$0xff] (!%p252_p2)  }
   0xa   : > { %v1336_v17 = vld [vmem:[%s1656_s3 + $0x60] sm:$0xff] (!%p252_p2)   ;;  %v1337_v18 = vld [vmem:[%s1655_s2 + $0x10] sm:$0xff] (!%p252_p2)   ;;  %v1339_v20 = vld [vmem:[%s1655_s2 + $0x58] sm:$0xff] (!%p252_p2)  }
   0xb   : > { %1281 = vmatpush3.bf16.msra.mxu1 (!%p252_p2), %v1324_v5  ;;  %v1338_v19 = vld [vmem:[%s1656_s3 + $0x20] sm:$0xff] (!%p252_p2)   ;;  %v1340_v21 = vld [vmem:[%s1656_s3 + $0x68] sm:$0xff] (!%p252_p2)   ;;  %v1341_v22 = vld [vmem:[%s1655_s2 + $0x18] sm:$0xff] (!%p252_p2)  }
   0xc   : > { %1207 = vmatpush3.bf16.msra.mxu0 (!%p252_p2), %v1325_v6  ;;  %1229 = vmatprep.subr.bf16.mxu1 (!%p252_p2), %v1326_v7  ;;  %v1342_v23 = vld [vmem:[%s1656_s3 + $0x28] sm:$0xff] (!%p252_p2)   ;;  %v1343_v24 = vld [vmem:[%s1655_s2 + $0x60] sm:$0xff] (!%p252_p2)   ;;  %v1344_v25 = vld [vmem:[%s1656_s3 + $0x70] sm:$0xff] (!%p252_p2)  }
   0xd   : > { %s1662_s9 = smov (!%p291_p3, %s1120_s9), 3  ;;  %1208 = vmatprep.subr.bf16.mxu0 %v1327_v8  ;;  %v1345_v26 = vld [vmem:[%s1655_s2 + $0x20] sm:$0xff]   ;;  %v1346_v27 = vld [vmem:[%s1656_s3 + $0x30] sm:$0xff]   ;;  %v1347_v28 = vld [vmem:[%s1655_s2 + $0x68] sm:$0xff]  }
   0xe   : > { %s1309_s20 = smul.u32 12, %s1662_s9  ;;  %v1348_v29 = vld [vmem:[%s1656_s3 + $0x78] sm:$0xff]   ;;  %v1349_v30 = vld [vmem:[%s1655_s2 + $0x28] sm:$0xff]   ;;  %v1354_v34 = vld [vmem:[%s1655_s2 + $0x70] sm:$0xff]   ;;  %s1125_s23 = sshll.u32 %s1662_s9, 2 }
   0xf   : > { %v1350_v31 = vld [vmem:[%s1656_s3 + $0x38] sm:$0xff]   ;;  %v1355_v35 = vld [vmem:[%s1655_s2 + $0x30] sm:$0xff]   ;;  %s1308_s11 = smul.u32 20, %s1662_s9  ;;  %v1356_v36 = vld [vmem:[%s1655_s2 + $0xc0] sm:$0xff]   ;;  %s308_s28 = scalar_lea.vmem %s1660_s7, %s1125_s23 }
  0x10   : > { %s1480_s26 = scalar_lea.vmem %s1654_s1, %s1309_s20  ;;  %1209 = vmatpush3.bf16.msra.mxu0 %v1330_v10  ;;  %v1357_v37 = vld [vmem:[%s1655_s2 + $0x80] sm:$0xff]   ;;  %v1358_v38 = vld [vmem:[%s1655_s2 + $0x78] sm:$0xff]   ;;  %v1360_v40 = vld [vmem:[%s1655_s2 + $0xc8] sm:$0xff]  }
  0x11   : > { %v1328_v11 = vld [vmem:[%s1480_s26 + $0x8] ss:$12 sps:$4 sm:$0xff]   ;;  %1210 = vmatprep.subr.bf16.mxu0 %v1332_v13  ;;  %v1351_v32 = vld [vmem:[%s1480_s26] ss:$12 sps:$4 sm:$0xff]   ;;  %v1353_v33 = vld [vmem:[%s1480_s26 + $0x4] ss:$12 sps:$4 sm:$0xff]   ;;  %s1570_s21 = scalar_lea.vmem %s1653_s0, %s1308_s11 }
  0x12   : > { %1283 = vmatmul.mubr.msk.bf16.vlgmr.msra.gmra.mrb[0].mxu1 %vm552_vm1, %v1328_v11  ;;  %588 = vmatprep.mubr.bf16.mxu0 %v1353_v33  ;;  %v1359_v39 = vld [vmem:[%s1655_s2 + $0x38] sm:$0xff]   ;;  %v1361_v41 = vld [vmem:[%s1655_s2 + $0x88] sm:$0xff]   ;;  %v1362_v42 = vld [vmem:[%s1570_s21] ss:$20 sps:$4 sm:$0xff]  }
  0x13   : > { %1230 = vmatpush3.bf16.msra.mxu1 %v1329_v9  ;;  %v1364_v43 = vld [vmem:[%s1570_s21 + $0x4] ss:$20 sps:$4 sm:$0xff]   ;;  %v1365_v44 = vld [vmem:[%s1655_s2 + $0xd0] sm:$0xff]   ;;  %v1369_v48 = vld [vmem:[%s1655_s2 + $0x108] sm:$0xff]  }
  0x14   : > { %1231 = vmatprep.subr.bf16.mxu1 %v1331_v12  ;;  %1211 = vmatpush3.bf16.msra.mxu0 %v1334_v15  ;;  %v1366_v45 = vld [vmem:[%s1655_s2 + $0x100] sm:$0xff]   ;;  %v1367_v46 = vld [vmem:[%s1655_s2 + $0x90] sm:$0xff]   ;;  %v1368_v47 = vld [vmem:[%s1655_s2 + $0xd8] sm:$0xff]  }
  0x15   : > { %1212 = vmatprep.subr.bf16.mxu0 %v1336_v17  ;;  %915 = vmatprep.mubr.bf16.mxu1 %v1364_v43  ;;  %v1370_v49 = vld [vmem:[%s1655_s2 + $0x98] sm:$0xff]   ;;  %v1371_v50 = vld [vmem:[%s1655_s2 + $0xe0] sm:$0xff]   ;;  %v1372_v51 = vld [vmem:[%s1655_s2 + $0x110] sm:$0xff]  }
  0x16   : > { %v1373_v52 = vld [vmem:[%s1655_s2 + $0xa0] sm:$0xff]   ;;  %v1374_v53 = vld [vmem:[%s1655_s2 + $0xe8] sm:$0xff]   ;;  %v1375_v54 = vld [vmem:[%s1655_s2 + $0x118] sm:$0xff]  }
  0x17   : > { %1232 = vmatpush3.bf16.msra.mxu1 %v1333_v14  ;;  %v1376_v55 = vld [vmem:[%s1655_s2 + $0xa8] sm:$0xff]   ;;  %v1378_v56 = vld [vmem:[%s1655_s2 + $0xf0] sm:$0xff]   ;;  %v1380_v59 = vld [vmem:[%s1655_s2 + $0xf8] sm:$0xff]  }
  0x18   : > { %1233 = vmatprep.subr.bf16.mxu1 %v1335_v16  ;;  %1213 = vmatpush3.bf16.msra.mxu0 %v1338_v19  ;;  %v1377_v57 = vld [vmem:[%s1570_s21 + $0x10] ss:$20 sps:$4 sm:$0xff]   ;;  %v1384_v60 = vld [vmem:[%s1570_s21 + $0xc] ss:$20 sps:$4 sm:$0xff]   ;;  %v1381_v61 = vld [vmem:[%s1655_s2 + $0xb8] sm:$0xff]  }
  0x19   : > { %1214 = vmatprep.subr.bf16.mxu0 %v1340_v21  ;;  %v1379_v58 = vld [vmem:[%s1655_s2 + $0xb0] sm:$0xff]   ;;  %v1382_v62 = vld [vmem:[%s1570_s21 + $0x8] ss:$20 sps:$4 sm:$0xff]  }
  0x1b   : > { %1234 = vmatpush3.bf16.msra.mxu1 %v1337_v18 }
  0x1c   : > { %1235 = vmatprep.subr.bf16.mxu1 %v1339_v20  ;;  %1215 = vmatpush3.bf16.msra.mxu0 %v1342_v23 }
  0x1d   : > { %1216 = vmatprep.subr.bf16.mxu0 %v1344_v25 }
  0x1f   : > { %1236 = vmatpush3.bf16.msra.mxu1 %v1341_v22 }
  0x20   : > { %1237 = vmatprep.subr.bf16.mxu1 %v1343_v24  ;;  %1217 = vmatpush3.bf16.msra.mxu0 %v1346_v27  ;;  %v1190_v24 = vld [vmem:[%s1657_s4] ss:$0 sm:$0xff] }
  0x21   : > { %1218 = vmatprep.subr.bf16.mxu0 %v1348_v29  ;;  %v1191_v27 = vld [vmem:[%s1658_s5] ss:$0 sm:$0xff] }
  0x23   : > { %1238 = vmatpush3.bf16.msra.mxu1 %v1345_v26 }
  0x24   : > { %1239 = vmatprep.subr.bf16.mxu1 %v1347_v28  ;;  %1219 = vmatpush3.bf16.msra.mxu0 %v1350_v31 }
  0x25   : > { %1251 = vmatprep.subr.bf16.mxu0 %v1356_v36 }
  0x27   : > { %1240 = vmatpush3.bf16.msra.mxu1 %v1349_v30  ;;  %589 = vmatmul.mubr.bf16.vlgmr.msra.gmra.mrb[0].mxu0 %v1351_v32  ;;  %v1192_v30 = vld [vmem:[%s1659_s6] ss:$0 sm:$0xff] }
  0x28   : > { %1241 = vmatprep.subr.bf16.mxu1 %v1354_v34  ;;  %1252 = vmatpush3.bf16.msra.mxu0 %v1357_v37 }
  0x29   : > { %1253 = vmatprep.subr.bf16.mxu0 %v1360_v40  ;;  %956 = vmatprep.mubr.bf16.mxu0 %v1384_v60 }
  0x2b   : > { %1242 = vmatpush3.bf16.msra.mxu1 %v1355_v35 }
  0x2c   : > { %1243 = vmatprep.subr.bf16.mxu1 %v1358_v38  ;;  %1254 = vmatpush3.bf16.msra.mxu0 %v1361_v41 }
  0x2d   : > { %1255 = vmatprep.subr.bf16.mxu0 %v1365_v44 }
  0x2f   : > { %1244 = vmatpush3.bf16.msra.mxu1 %v1359_v39 }
  0x30   : > { %1286 = vmatprep.subr.bf16.mxu1 %v1393_v1  ;;  %1256 = vmatpush3.bf16.msra.mxu0 %v1367_v46 }
  0x31   : > { %1257 = vmatprep.subr.bf16.mxu0 %v1368_v47 }
  0x32   : > { %916 = vmatmul.mubr.bf16.vlgmr.msra.gmra.mrb[4].mxu1 %v1362_v42 }
  0x33   : > { %1287 = vmatpush3.bf16.msra.mxu1 %v1366_v45  ;;  %1294 = vmatprep.mubr.msk.bf16.mxu1 %vm1394_vm0, %v1393_v1 }
  0x34   : > { %1288 = vmatprep.subr.bf16.mxu1 %v1393_v1  ;;  %1258 = vmatpush3.bf16.msra.mxu0 %v1370_v49 }
  0x35   : > { %1259 = vmatprep.subr.bf16.mxu0 %v1371_v50 }
  0x37   : > { %1289 = vmatpush3.bf16.msra.mxu1 %v1369_v48 }
  0x38   : > { %1290 = vmatprep.subr.bf16.mxu1 %v1393_v1  ;;  %1260 = vmatpush3.bf16.msra.mxu0 %v1373_v52 }
  0x39   : > { %1261 = vmatprep.subr.bf16.mxu0 %v1374_v53 }
  0x3b   : > { %1291 = vmatpush3.bf16.msra.mxu1 %v1372_v51 }
  0x3c   : > { %1292 = vmatprep.subr.bf16.mxu1 %v1393_v1  ;;  %1262 = vmatpush3.bf16.msra.mxu0 %v1376_v55 }
  0x3d   : > { %1263 = vmatprep.subr.bf16.mxu0 %v1378_v56 }
  0x3f   : > { %1293 = vmatpush3.bf16.msra.mxu1 %v1375_v54 }
  0x40   : > { %1264 = vmatpush3.bf16.msra.mxu0 %v1379_v58 }
  0x41   : > { %1265 = vmatprep.subr.bf16.mxu0 %v1380_v59 }
  0x42   : > { %1295 = vmatmul.mubr.msk.bf16.vlgmr.msra.gmra.mrb[0].mxu1 %vm879_vm2, %v1377_v57 }
  0x44   : > { %1266 = vmatpush3.bf16.msra.mxu0 %v1381_v61 }
  0x47   : > { %957 = vmatmul.mubr.bf16.vlgmr.msra.gmra.mrb[4].mxu0 %v1382_v62 }
  0xfa   : > { %v1220_v63 = vpop.f32.mrb[0].mxu0 }
  0xfb   : > { %v1221_v0 = vpop.f32.mrb[1].mxu0 }
  0xfc   : > { %v1222_v1 = vadd.f32 %v1221_v0, %v1220_v63  ;;  %v1223_v2 = vpop.f32.mrb[2].mxu0 }
  0xfd   : > { %v1224_v3 = vpop.f32.mrb[3].mxu0 }
  0xfe   : > { %v1225_v4 = vadd.f32 %v1224_v3, %v1223_v2 }
 0x105   : > { %v1245_v5 = vpop.f32.mrb[4].mxu1 }
 0x106   : > { %v1246_v6 = vpop.f32.mrb[5].mxu1 }
 0x107   : > { %v1247_v7 = vadd.f32 %v1246_v6, %v1245_v5  ;;  %v1248_v8 = vpop.f32.mrb[6].mxu1 }
 0x108   : > { %v1249_v9 = vpop.f32.mrb[7].mxu1 }
 0x109   : > { %v1298_v10 = vadd.f32 %v1247_v7, %v1222_v1  ;;  %v1250_v11 = vadd.f32 %v1249_v9, %v1248_v8 }
 0x10b   : > { %v1301_v12 = vadd.f32 %v1250_v11, %v1225_v4 }
 0x115   : > { %v999_v13 = vpop.f32.mrb[0].mxu1 }
 0x116   : > { %v1296_v14 = vpop.f32.mrb[1].mxu1 }
 0x117   : > { %v1002_v15 = vpop.f32.mrb[2].mxu1 }
 0x118   : > { %v1297_v16 = vpop.f32.mrb[3].mxu1 }
 0x11a   : > { %v1267_v17 = vpop.f32.mrb[4].mxu0 }
 0x11b   : > { %v1268_v18 = vpop.f32.mrb[5].mxu0 }
 0x11c   : > { %v1269_v19 = vadd.f32 %v1268_v18, %v1267_v17  ;;  %v1270_v20 = vpop.f32.mrb[6].mxu0 }
 0x11d   : > { %v1271_v21 = vpop.f32.mrb[7].mxu0 }
 0x11e   : > { %v1299_v22 = vadd.f32 %v1298_v10, %v1269_v19  ;;  %v1272_v23 = vadd.f32 %v1271_v21, %v1270_v20 }
 0x120   : > { %v1300_v25 = vadd.f32 %v1299_v22, %v999_v13  ;;  %v1302_v26 = vadd.f32 %v1301_v12, %v1272_v23 }
 0x122   : > { %v1013_v28 = vmul.f32 %v1300_v25, %v1190_v24  ;;  %v1303_v29 = vadd.f32 %v1302_v26, %v1002_v15 }
 0x124   : > { %v1022_v31 = vadd.f32 %v1191_v27, %v1013_v28  ;;  %v1014_v32 = vmul.f32 %v1303_v29, %v1190_v24 }
 0x126   : > { %v1033_v33 = vmul.f32 %v1192_v30, %v1022_v31  ;;  %v1023_v34 = vadd.f32 %v1191_v27, %v1014_v32  ;;  %vm1024_vm3 = vcmp.gt.f32.partialorder %v1022_v31, 0.0 }
 0x128   : > { %vm1025_vm4 = vcmp.gt.f32.partialorder %v1023_v34, 0.0  ;;  %v1034_v35 = vmul.f32 %v1192_v30, %v1023_v34  ;;  %v1035_v36 = vsel %vm1024_vm3, %v1022_v31, %v1033_v33 }
 0x12a   : > { %v1036_v37 = vsel %vm1025_vm4, %v1023_v34, %v1034_v35 }
 0x12b   : > { %v1202_v38 = vpack.c.bf16 %v1036_v37, %v1035_v36 }
 0x12d   : > { %1203 = vst [vmem:[%s308_s28] sm:$0xff] %v1202_v38  }
 0x12e PF: > { %s17_s24 = sadd.s32 1, %s1391_s24  }
 0x12f   : > { %p14_p4 = scmp.ge.s32.totalorder %s17_s24, 4  }
 0x131   :  { %16 = sbr.rel (!%p14_p4) target bundleno = 1 (0x1), region = 81 }

// kernel: unet_forward.36
= control target key start
LH: loop header
LB: loop body
LE: loop exit
PB: predicated region body
PF: predicated region fallthrough
CT: control target
= control target key end

     0   :  { %s994_s18 = smov 0   ;;  %s1124_s0 = inlined_call_operand.vmem [shape: bf16[128,288], index: 0, kind: input, shape index: {}]   ;;  %s1125_s1 = inlined_call_operand.vmem [shape: bf16[288,128], index: 1, kind: input, shape index: {}]   ;;  %s1126_s2 = inlined_call_operand.vmem [shape: f32[1,128], index: 2, kind: input, shape index: {}]   ;;  %s1127_s3 = inlined_call_operand.vmem [shape: f32[1,128], index: 3, kind: input, shape index: {}]   ;;  %s1128_s4 = inlined_call_operand.vmem [shape: f32[1,128], index: 4, kind: input, shape index: {}]   ;;  %s1129_s5 = inlined_call_operand.vmem [shape: bf16[128,128], index: 5, kind: output, shape index: {}]  }
   0x1 LB: > { %s752_s19 = sadd.s32 4294967295, %s962_s18   ;;  %p756_p0 = scmp.ge.s32.totalorder %s962_s18, 1  ;;  %s962_s18 = sphi %s994_s18, %s15_s18  }
   0x2   : > { %p189_p1 = scmp.lt.s32.totalorder %s962_s18, 3 }
   0x4   : > { %p190_p2 = pnand %p756_p0, %p189_p1 }
   0x5   : > { %v922_v0 = vld [vmem:[%s1125_s1 + $0x40] sm:$0xff] (!%p190_p2)   ;;  %s757_s22 = sshll.u32 (!%p190_p2), %s752_s19, 3  ;;  %v924_v2 = vld [vmem:[%s1125_s1 + $0x48] sm:$0xff] (!%p190_p2)   ;;  %v926_v4 = vld [vmem:[%s1125_s1 + $0x50] sm:$0xff] (!%p190_p2)   ;;  %vm452_vm0 = vcmask (!%p190_p2), 261120  }
   0x6   : > { %193 = sbr.rel (%p190_p2) target bundleno = 284 (0x11c), region = 40  ;;  %v923_v1 = vld [vmem:[%s1125_s1] sm:$0xff] (!%p190_p2)   ;;  %839 = vmatprep.subr.bf16.mxu0 (!%p190_p2), %v922_v0  ;;  %897 = vmatprep.subr.bf16.mxu1 (!%p190_p2), %v922_v0  ;;  %p219_p3 = scmp.lt.s32.totalorder (!%p190_p2), %s757_s22, 15  ;;  %v925_v3 = vld [vmem:[%s1125_s1 + $0x8] sm:$0xff] (!%p190_p2)   ;;  %v927_v5 = vld [vmem:[%s1125_s1 + $0x10] sm:$0xff] (!%p190_p2)  }
   0x7   : > { %840 = vmatpush3.bf16.msra.mxu0 (!%p190_p2), %v923_v1  ;;  %905 = vmatpush3.bf16.msra.mxu1 (!%p190_p2), %v923_v1  ;;  %v928_v6 = vld [vmem:[%s1125_s1 + $0x58] sm:$0xff] (!%p190_p2)   ;;  %v930_v8 = vld [vmem:[%s1125_s1 + $0x60] sm:$0xff] (!%p190_p2)   ;;  %v932_v10 = vld [vmem:[%s1125_s1 + $0x68] sm:$0xff] (!%p190_p2)  }
   0x8   : > { %841 = vmatprep.subr.bf16.mxu0 (!%p190_p2), %v924_v2  ;;  %898 = vmatprep.subr.bf16.mxu1 (!%p190_p2), %v924_v2  ;;  %v929_v7 = vld [vmem:[%s1125_s1 + $0x18] sm:$0xff] (!%p190_p2)   ;;  %v931_v9 = vld [vmem:[%s1125_s1 + $0x20] sm:$0xff] (!%p190_p2)   ;;  %v933_v13 = vld [vmem:[%s1125_s1 + $0x28] sm:$0xff] (!%p190_p2)  }
   0x9   : > { %v934_v14 = vld [vmem:[%s1125_s1 + $0x70] sm:$0xff] (!%p190_p2)   ;;  %v936_v16 = vld [vmem:[%s1125_s1 + $0x78] sm:$0xff] (!%p190_p2)   ;;  %v944_v18 = vld [vmem:[%s1125_s1 + $0x80] sm:$0xff] (!%p190_p2)  }
   0xa   : > { %v935_v15 = vld [vmem:[%s1125_s1 + $0x30] sm:$0xff] (!%p190_p2)   ;;  %v937_v17 = vld [vmem:[%s1125_s1 + $0x38] sm:$0xff] (!%p190_p2)   ;;  %v945_v22 = vld [vmem:[%s1125_s1 + $0x88] sm:$0xff] (!%p190_p2)  }
   0xb   : > { %842 = vmatpush3.bf16.msra.mxu0 (!%p190_p2), %v925_v3  ;;  %906 = vmatpush3.bf16.msra.mxu1 (!%p190_p2), %v925_v3  ;;  %v1083_v45 = vld [vmem:[%s1126_s2] ss:$0 sm:$0xff] (!%p190_p2) }
   0xc   : > { %843 = vmatprep.subr.bf16.mxu0 (!%p190_p2), %v926_v4  ;;  %899 = vmatprep.subr.bf16.mxu1 (!%p190_p2), %v926_v4  ;;  %v1088_v51 = vld [vmem:[%s1127_s3] ss:$0 sm:$0xff] (!%p190_p2) }
   0xd   : > { %s1131_s22 = smov (!%p219_p3, %s757_s22), 15  ;;  %v797_v58 = vld [vmem:[%s1128_s4] ss:$0 sm:$0xff] }
   0xe   : > { %s913_s10 = smul.u32 12, %s1131_s22  ;;  %s760_s20 = sshll.u32 %s1131_s22, 2 }
   0xf   : > { %844 = vmatpush3.bf16.msra.mxu0 %v927_v5  ;;  %907 = vmatpush3.bf16.msra.mxu1 %v927_v5  ;;  %s1107_s22 = scalar_lea.vmem %s1129_s5, %s760_s20 }
  0x10   : > { %845 = vmatprep.subr.bf16.mxu0 %v928_v6  ;;  %900 = vmatprep.subr.bf16.mxu1 %v928_v6  ;;  %s1035_s17 = scalar_lea.vmem %s1124_s0, %s913_s10 }
  0x11   : > { %v940_v11 = vld [vmem:[%s1035_s17 + $0x4] ss:$12 sps:$4 sm:$0xff]   ;;  %v943_v12 = vld [vmem:[%s1035_s17 + $0x4c] ss:$12 sps:$4 sm:$0xff]   ;;  %v941_v20 = vld [vmem:[%s1035_s17 + $0x48] ss:$12 sps:$4 sm:$0xff]  }
  0x12   : > { %497 = vmatprep.mubr.bf16.mxu0 %v940_v11  ;;  %521 = vmatprep.mubr.bf16.mxu1 %v943_v12  ;;  %v938_v19 = vld [vmem:[%s1035_s17] ss:$12 sps:$4 sm:$0xff]   ;;  %v946_v21 = vld [vmem:[%s1035_s17 + $0x1c] ss:$12 sps:$4 sm:$0xff]   ;;  %v949_v24 = vld [vmem:[%s1035_s17 + $0x18] ss:$12 sps:$4 sm:$0xff]  }
  0x13   : > { %846 = vmatpush3.bf16.msra.mxu0 %v929_v7  ;;  %908 = vmatpush3.bf16.msra.mxu1 %v929_v7  ;;  %v948_v23 = vld [vmem:[%s1035_s17 + $0x8] ss:$12 sps:$4 sm:$0xff]   ;;  %v950_v25 = vld [vmem:[%s1035_s17 + $0x20] ss:$12 sps:$4 sm:$0xff]   ;;  %v953_v27 = vld [vmem:[%s1035_s17 + $0x38] ss:$12 sps:$4 sm:$0xff]  }
  0x14   : > { %847 = vmatprep.subr.bf16.mxu0 %v930_v8  ;;  %901 = vmatprep.subr.bf16.mxu1 %v930_v8  ;;  %v951_v26 = vld [vmem:[%s1035_s17 + $0x34] ss:$12 sps:$4 sm:$0xff]   ;;  %v954_v28 = vld [vmem:[%s1035_s17 + $0x30] ss:$12 sps:$4 sm:$0xff]  }
  0x15   : > { %v955_v29 = vld [vmem:[%s1035_s17 + $0x50] ss:$12 sps:$4 sm:$0xff]  }
  0x17   : > { %848 = vmatpush3.bf16.msra.mxu0 %v931_v9  ;;  %909 = vmatpush3.bf16.msra.mxu1 %v931_v9 }
  0x18   : > { %849 = vmatprep.subr.bf16.mxu0 %v932_v10  ;;  %902 = vmatprep.subr.bf16.mxu1 %v932_v10 }
  0x1b   : > { %850 = vmatpush3.bf16.msra.mxu0 %v933_v13  ;;  %910 = vmatpush3.bf16.msra.mxu1 %v933_v13 }
  0x1c   : > { %851 = vmatprep.subr.bf16.mxu0 %v934_v14  ;;  %903 = vmatprep.subr.bf16.mxu1 %v934_v14 }
  0x1f   : > { %852 = vmatpush3.bf16.msra.mxu0 %v935_v15  ;;  %911 = vmatpush3.bf16.msra.mxu1 %v935_v15 }
  0x20   : > { %853 = vmatprep.subr.bf16.mxu0 %v936_v16  ;;  %904 = vmatprep.subr.bf16.mxu1 %v936_v16 }
  0x23   : > { %854 = vmatpush3.bf16.msra.mxu0 %v937_v17  ;;  %912 = vmatpush3.bf16.msra.mxu1 %v937_v17 }
  0x24   : > { %885 = vmatprep.subr.bf16.mxu1 %v944_v18 }
  0x26   : > { %498 = vmatmul.mubr.bf16.vlgmr.msra.gmra.mrb[0].mxu0 %v938_v19  ;;  %522 = vmatmul.mubr.bf16.vlgmr.msra.gmra.mrb[0].mxu1 %v941_v20 }
  0x27   : > { %886 = vmatpush3.bf16.msra.mxu1 %v944_v18  ;;  %505 = vmatprep.mubr.bf16.mxu0 %v946_v21 }
  0x28   : > { %887 = vmatprep.subr.bf16.mxu1 %v945_v22  ;;  %889 = vmatprep.mubr.msk.bf16.mxu1 %vm452_vm0, %v948_v23 }
  0x2b   : > { %888 = vmatpush3.bf16.msra.mxu1 %v945_v22 }
  0x2e   : > { %506 = vmatmul.mubr.bf16.gmra.mrb[4].mxu0 %v949_v24  ;;  %890 = vmatmul.mubr.msk.bf16.vlgmr.msra.gmra.mrb[4].mxu1 %vm452_vm0, %v950_v25 }
  0x2f   : > { %513 = vmatprep.mubr.bf16.mxu0 %v951_v26  ;;  %893 = vmatprep.mubr.msk.bf16.mxu1 %vm452_vm0, %v953_v27 }
  0x36   : > { %514 = vmatmul.mubr.bf16.gmra.mrb[8].mxu0 %v954_v28  ;;  %894 = vmatmul.mubr.msk.bf16.gmra.mrb[8].mxu1 %vm452_vm0, %v955_v29 }
  0xf9   : > { %v855_v30 = vpop.f32.mrb[0].mxu0  ;;  %v873_v31 = vpop.f32.mrb[0].mxu1 }
  0xfa   : > { %v856_v32 = vpop.f32.mrb[1].mxu0  ;;  %v874_v33 = vpop.f32.mrb[1].mxu1 }
  0xfb   : > { %v857_v34 = vadd.f32 %v856_v32, %v855_v30  ;;  %v875_v35 = vadd.f32 %v874_v33, %v873_v31  ;;  %v858_v36 = vpop.f32.mrb[2].mxu0  ;;  %v876_v37 = vpop.f32.mrb[2].mxu1 }
  0xfc   : > { %v859_v38 = vpop.f32.mrb[3].mxu0  ;;  %v877_v39 = vpop.f32.mrb[3].mxu1 }
  0xfd   : > { %v860_v40 = vadd.f32 %v859_v38, %v858_v36  ;;  %v878_v41 = vadd.f32 %v877_v39, %v876_v37 }
 0x101   : > { %v861_v42 = vpop.f32.mrb[4].mxu0  ;;  %v891_v43 = vpop.f32.mrb[4].mxu1 }
 0x102   : > { %v862_v44 = vpop.f32.mrb[5].mxu0  ;;  %v564_v46 = vpop.f32.mrb[5].mxu1 }
 0x103   : > { %v863_v47 = vadd.f32 %v862_v44, %v861_v42  ;;  %v565_v48 = vadd.f32 %v857_v34, %v564_v46  ;;  %v864_v49 = vpop.f32.mrb[6].mxu0  ;;  %v892_v50 = vpop.f32.mrb[6].mxu1 }
 0x104   : > { %v865_v52 = vpop.f32.mrb[7].mxu0  ;;  %v567_v53 = vpop.f32.mrb[7].mxu1 }
 0x105   : > { %v573_v54 = vadd.f32 %v891_v43, %v863_v47  ;;  %v602_v55 = vmul.f32 %v1083_v45, %v565_v48  ;;  %v866_v56 = vadd.f32 %v865_v52, %v864_v49  ;;  %v568_v57 = vadd.f32 %v860_v40, %v567_v53 }
 0x107   : > { %v604_v59 = vmul.f32 %v1083_v45, %v573_v54  ;;  %v617_v60 = vadd.f32 %v1088_v51, %v602_v55  ;;  %v576_v61 = vadd.f32 %v892_v50, %v866_v56  ;;  %v603_v62 = vmul.f32 %v1083_v45, %v568_v57 }
 0x109   : > { %v619_v63 = vadd.f32 %v1088_v51, %v604_v59  ;;  %v640_v0 = vmul.f32 %v797_v58, %v617_v60  ;;  %v605_v1 = vmul.f32 %v1083_v45, %v576_v61  ;;  %v867_v2 = vpop.f32.mrb[8].mxu0  ;;  %v895_v3 = vpop.f32.mrb[8].mxu1  ;;  %vm625_vm1 = vcmp.gt.f32.partialorder %v617_v60, 0.0 }
 0x10a   : > { %v618_v4 = vadd.f32 %v1088_v51, %v603_v62  ;;  %v589_v5 = vadd.f32 %v895_v3, %v875_v35  ;;  %v868_v6 = vpop.f32.mrb[9].mxu0  ;;  %v580_v7 = vpop.f32.mrb[9].mxu1 }
 0x10b   : > { %vm627_vm2 = vcmp.gt.f32.partialorder %v619_v63, 0.0  ;;  %v642_v8 = vmul.f32 %v797_v58, %v619_v63  ;;  %v620_v9 = vadd.f32 %v1088_v51, %v605_v1  ;;  %v870_v10 = vpop.f32.mrb[10].mxu0  ;;  %v896_v11 = vpop.f32.mrb[10].mxu1  ;;  %v869_v14 = vadd.f32 %v868_v6, %v867_v2 }
 0x10c   : > { %vm626_vm3 = vcmp.gt.f32.partialorder %v618_v4, 0.0  ;;  %v641_v12 = vmul.f32 %v797_v58, %v618_v4  ;;  %v608_v13 = vmul.f32 %v1083_v45, %v589_v5  ;;  %v871_v15 = vpop.f32.mrb[11].mxu0  ;;  %v583_v16 = vpop.f32.mrb[11].mxu1  ;;  %v648_v17 = vsel %vm625_vm1, %v617_v60, %v640_v0 }
 0x10d   : > { %vm628_vm4 = vcmp.gt.f32.partialorder %v620_v9, 0.0  ;;  %v643_v18 = vmul.f32 %v797_v58, %v620_v9  ;;  %v592_v19 = vadd.f32 %v896_v11, %v878_v41  ;;  %v581_v22 = vadd.f32 %v869_v14, %v580_v7 }
 0x10e   : > { %v649_v20 = vsel %vm626_vm3, %v618_v4, %v641_v12  ;;  %v623_v21 = vadd.f32 %v1088_v51, %v608_v13  ;;  %v872_v23 = vadd.f32 %v871_v15, %v870_v10  ;;  %v650_v24 = vsel %vm627_vm2, %v619_v63, %v642_v8 }
 0x10f   : > { %v651_v25 = vsel %vm628_vm4, %v620_v9, %v643_v18  ;;  %v819_v26 = vpack.c.bf16 %v649_v20, %v648_v17  ;;  %v609_v27 = vmul.f32 %v1083_v45, %v592_v19  ;;  %v606_v29 = vmul.f32 %v1083_v45, %v581_v22 }
 0x110   : > { %v824_v28 = vpack.c.bf16 %v651_v25, %v650_v24  ;;  %v646_v30 = vmul.f32 %v797_v58, %v623_v21  ;;  %v584_v32 = vadd.f32 %v872_v23, %v583_v16  ;;  %vm631_vm5 = vcmp.gt.f32.partialorder %v623_v21, 0.0 }
 0x111   : > { %820 = vst [vmem:[%s1107_s22] sm:$0xff] %v819_v26   ;;  %v624_v31 = vadd.f32 %v1088_v51, %v609_v27  ;;  %v621_v33 = vadd.f32 %v1088_v51, %v606_v29 }
 0x112   : > { %836 = vst [vmem:[%s1107_s22 + $0x8] sm:$0xff] %v824_v28   ;;  %v607_v35 = vmul.f32 %v1083_v45, %v584_v32  ;;  %v654_v36 = vsel %vm631_vm5, %v623_v21, %v646_v30 }
 0x113   : > { %vm632_vm6 = vcmp.gt.f32.partialorder %v624_v31, 0.0  ;;  %v647_v34 = vmul.f32 %v797_v58, %v624_v31  ;;  %v644_v37 = vmul.f32 %v797_v58, %v621_v33  ;;  %vm629_vm7 = vcmp.gt.f32.partialorder %v621_v33, 0.0 }
 0x114   : > { %v622_v39 = vadd.f32 %v1088_v51, %v607_v35 }
 0x115   : > { %v655_v38 = vsel %vm632_vm6, %v624_v31, %v647_v34  ;;  %v652_v42 = vsel %vm629_vm7, %v621_v33, %v644_v37 }
 0x116   : > { %v834_v40 = vpack.c.bf16 %v655_v38, %v654_v36  ;;  %vm630_vm8 = vcmp.gt.f32.partialorder %v622_v39, 0.0  ;;  %v645_v41 = vmul.f32 %v797_v58, %v622_v39 }
 0x118   : > { %838 = vst [vmem:[%s1107_s22 + $0x18] sm:$0xff] %v834_v40   ;;  %v653_v43 = vsel %vm630_vm8, %v622_v39, %v645_v41 }
 0x119   : > { %v829_v44 = vpack.c.bf16 %v653_v43, %v652_v42 }
 0x11b   : > { %837 = vst [vmem:[%s1107_s22 + $0x10] sm:$0xff] %v829_v44  }
 0x11c PF: > { %s15_s18 = sadd.s32 1, %s962_s18  }
 0x11d   : > { %p12_p4 = scmp.ge.s32.totalorder %s15_s18, 4  }
 0x11f   :  { %14 = sbr.rel (!%p12_p4) target bundleno = 1 (0x1), region = 70 }

// kernel: unet_forward.38
= control target key start
LH: loop header
LB: loop body
LE: loop exit
PB: predicated region body
PF: predicated region fallthrough
CT: control target
= control target key end

     0   :  { %s1325_s24 = smov 0   ;;  %s1480_s0 = inlined_call_operand.vmem [shape: bf16[128,288], index: 0, kind: input, shape index: {}]   ;;  %s1481_s1 = inlined_call_operand.vmem [shape: bf16[128,144], index: 1, kind: input, shape index: {}]   ;;  %s1482_s2 = inlined_call_operand.vmem [shape: bf16[288,128], index: 2, kind: input, shape index: {}]   ;;  %s1483_s3 = inlined_call_operand.vmem [shape: bf16[144,128], index: 3, kind: input, shape index: {}]   ;;  %s1484_s4 = inlined_call_operand.vmem [shape: f32[1,128], index: 4, kind: input, shape index: {}]   ;;  %s1485_s5 = inlined_call_operand.vmem [shape: f32[1,128], index: 5, kind: input, shape index: {}]   ;;  %s1486_s6 = inlined_call_operand.vmem [shape: f32[1,128], index: 6, kind: input, shape index: {}]   ;;  %s1487_s7 = inlined_call_operand.vmem [shape: bf16[128,128], index: 7, kind: output, shape index: {}]  }
   0x1 LB: > { %s1037_s25 = sadd.s32 4294967295, %s1282_s24   ;;  %p1041_p0 = scmp.ge.s32.totalorder %s1282_s24, 1  ;;  %s1282_s24 = sphi %s1325_s24, %s17_s24  }
   0x2   : > { %p251_p1 = scmp.lt.s32.totalorder %s1282_s24, 3 }
   0x4   : > { %p252_p2 = pnand %p1041_p0, %p251_p1 }
   0x5   : > { %v1221_v0 = vld [vmem:[%s1483_s3] sm:$0xff] (!%p252_p2)   ;;  %v1284_v1 = vmov (!%p252_p2), 0   ;;  %v1224_v4 = vld [vmem:[%s1483_s3 + $0x8] sm:$0xff] (!%p252_p2)   ;;  %v1227_v7 = vld [vmem:[%s1483_s3 + $0x10] sm:$0xff] (!%p252_p2)   ;;  %s1042_s19 = sshll.u32 (!%p252_p2), %s1037_s25, 3  ;;  %vm479_vm0 = vcmask (!%p252_p2), 130048  }
   0x6   : > { %255 = sbr.rel (%p252_p2) target bundleno = 303 (0x12f), region = 48  ;;  %492 = vmatprep.subr.bf16.mxu0 (!%p252_p2), %v1284_v1  ;;  %v1222_v2 = vld [vmem:[%s1482_s2 + $0x40] sm:$0xff] (!%p252_p2)   ;;  %v1225_v5 = vld [vmem:[%s1482_s2 + $0x48] sm:$0xff] (!%p252_p2)   ;;  %v1228_v8 = vld [vmem:[%s1482_s2 + $0x50] sm:$0xff] (!%p252_p2)   ;;  %p291_p3 = scmp.lt.s32.totalorder (!%p252_p2), %s1042_s19, 15  ;;  %vm725_vm1 = vcmask (!%p252_p2), 261120  }
   0x7   : > { %493 = vmatpush1.bf16.msra.mxu0 (!%p252_p2), %v1221_v0  ;;  %v1223_v3 = vld [vmem:[%s1482_s2] sm:$0xff] (!%p252_p2)   ;;  %1149 = vmatprep.subr.bf16.mxu1 (!%p252_p2), %v1222_v2  ;;  %v1226_v6 = vld [vmem:[%s1482_s2 + $0x8] sm:$0xff] (!%p252_p2)   ;;  %v1229_v9 = vld [vmem:[%s1482_s2 + $0x10] sm:$0xff] (!%p252_p2)  }
   0x8   : > { %494 = vmatprep.subr.bf16.mxu0 (!%p252_p2), %v1284_v1  ;;  %1150 = vmatpush3.bf16.msra.mxu1 (!%p252_p2), %v1223_v3  ;;  %v1230_v10 = vld [vmem:[%s1483_s3 + $0x18] sm:$0xff] (!%p252_p2)   ;;  %v1234_v13 = vld [vmem:[%s1482_s2 + $0x60] sm:$0xff] (!%p252_p2)   ;;  %v1237_v16 = vld [vmem:[%s1482_s2 + $0x68] sm:$0xff] (!%p252_p2)  }
   0x9   : > { %1151 = vmatprep.subr.bf16.mxu1 (!%p252_p2), %v1225_v5  ;;  %v1231_v11 = vld [vmem:[%s1482_s2 + $0x58] sm:$0xff] (!%p252_p2)   ;;  %v1233_v14 = vld [vmem:[%s1483_s3 + $0x20] sm:$0xff] (!%p252_p2)   ;;  %v1236_v17 = vld [vmem:[%s1483_s3 + $0x28] sm:$0xff] (!%p252_p2)  }
   0xa   : > { %v1232_v12 = vld [vmem:[%s1482_s2 + $0x18] sm:$0xff] (!%p252_p2)   ;;  %v1235_v15 = vld [vmem:[%s1482_s2 + $0x20] sm:$0xff] (!%p252_p2)   ;;  %v1238_v18 = vld [vmem:[%s1482_s2 + $0x28] sm:$0xff] (!%p252_p2)  }
   0xb   : > { %495 = vmatpush1.bf16.msra.mxu0 (!%p252_p2), %v1224_v4  ;;  %v1240_v19 = vld [vmem:[%s1482_s2 + $0x70] sm:$0xff] (!%p252_p2)   ;;  %v1243_v22 = vld [vmem:[%s1482_s2 + $0x78] sm:$0xff] (!%p252_p2)   ;;  %v1252_v27 = vld [vmem:[%s1482_s2 + $0x80] sm:$0xff] (!%p252_p2)  }
   0xc   : > { %496 = vmatprep.subr.bf16.mxu0 (!%p252_p2), %v1284_v1  ;;  %1152 = vmatpush3.bf16.msra.mxu1 (!%p252_p2), %v1226_v6  ;;  %v1239_v20 = vld [vmem:[%s1483_s3 + $0x30] sm:$0xff] (!%p252_p2)   ;;  %v1242_v24 = vld [vmem:[%s1483_s3 + $0x38] sm:$0xff] (!%p252_p2)   ;;  %v1248_v28 = vld [vmem:[%s1483_s3 + $0x40] sm:$0xff] (!%p252_p2)  }
   0xd   : > { %1153 = vmatprep.subr.bf16.mxu1 %v1228_v8  ;;  %s1489_s19 = smov (!%p291_p3, %s1042_s19), 15  ;;  %v1241_v21 = vld [vmem:[%s1482_s2 + $0x30] sm:$0xff]   ;;  %v1244_v26 = vld [vmem:[%s1482_s2 + $0x38] sm:$0xff]   ;;  %v1265_v33 = vld [vmem:[%s1482_s2 + $0x88] sm:$0xff]  }
   0xe   : > { %s1211_s16 = smul.u32 12, %s1489_s19  ;;  %s1117_s22 = sshll.u32 %s1489_s19, 3 }
   0xf   : > { %497 = vmatpush1.bf16.msra.mxu0 %v1227_v7  ;;  %s1418_s12 = scalar_lea.vmem %s1481_s1, %s1117_s22  ;;  %s1048_s8 = sshll.u32 %s1489_s19, 2 }
  0x10   : > { %498 = vmatprep.subr.bf16.mxu0 %v1284_v1  ;;  %1154 = vmatpush3.bf16.msra.mxu1 %v1229_v9  ;;  %s1406_s28 = scalar_lea.vmem %s1480_s0, %s1211_s16  ;;  %v1251_v25 = vld [vmem:[%s1418_s12 + $0x4] ss:$8 sps:$4 sm:$0xff]   ;;  %v1249_v31 = vld [vmem:[%s1418_s12] ss:$8 sps:$4 sm:$0xff]   ;;  %v1256_v32 = vld [vmem:[%s1418_s12 + $0x14] ss:$8 sps:$4 sm:$0xff]   ;;  %s308_s11 = scalar_lea.vmem %s1487_s7, %s1048_s8 }
  0x11   : > { %1155 = vmatprep.subr.bf16.mxu1 %v1231_v11  ;;  %v1247_v23 = vld [vmem:[%s1406_s28 + $0x4] ss:$12 sps:$4 sm:$0xff]   ;;  %1066 = vmatprep.mubr.msk.bf16.mxu0 %vm479_vm0, %v1251_v25  ;;  %v1245_v29 = vld [vmem:[%s1406_s28] ss:$12 sps:$4 sm:$0xff]   ;;  %v1253_v30 = vld [vmem:[%s1406_s28 + $0x1c] ss:$12 sps:$4 sm:$0xff]  }
  0x12   : > { %770 = vmatprep.mubr.bf16.mxu1 %v1247_v23  ;;  %v1255_v34 = vld [vmem:[%s1406_s28 + $0x18] ss:$12 sps:$4 sm:$0xff]   ;;  %v1259_v35 = vld [vmem:[%s1406_s28 + $0x34] ss:$12 sps:$4 sm:$0xff]   ;;  %v1261_v38 = vld [vmem:[%s1406_s28 + $0x30] ss:$12 sps:$4 sm:$0xff]  }
  0x13   : > { %499 = vmatpush1.bf16.msra.mxu0 %v1230_v10  ;;  %v1258_v36 = vld [vmem:[%s1418_s12 + $0x10] ss:$8 sps:$4 sm:$0xff]   ;;  %v1262_v37 = vld [vmem:[%s1418_s12 + $0x24] ss:$8 sps:$4 sm:$0xff]   ;;  %v1264_v40 = vld [vmem:[%s1418_s12 + $0x20] ss:$8 sps:$4 sm:$0xff]  }
  0x14   : > { %500 = vmatprep.subr.bf16.mxu0 %v1284_v1  ;;  %1156 = vmatpush3.bf16.msra.mxu1 %v1232_v12  ;;  %v1266_v39 = vld [vmem:[%s1406_s28 + $0x4c] ss:$12 sps:$4 sm:$0xff]   ;;  %v1269_v41 = vld [vmem:[%s1418_s12 + $0x34] ss:$8 sps:$4 sm:$0xff]  }
  0x15   : > { %1157 = vmatprep.subr.bf16.mxu1 %v1234_v13  ;;  %v1268_v42 = vld [vmem:[%s1406_s28 + $0x48] ss:$12 sps:$4 sm:$0xff]   ;;  %v1272_v43 = vld [vmem:[%s1406_s28 + $0x38] ss:$12 sps:$4 sm:$0xff]   ;;  %v1273_v46 = vld [vmem:[%s1406_s28 + $0x50] ss:$12 sps:$4 sm:$0xff]  }
  0x16   : > { %v1271_v44 = vld [vmem:[%s1418_s12 + $0x30] ss:$8 sps:$4 sm:$0xff]   ;;  %v1274_v45 = vld [vmem:[%s1406_s28 + $0x8] ss:$12 sps:$4 sm:$0xff]   ;;  %v1275_v47 = vld [vmem:[%s1406_s28 + $0x20] ss:$12 sps:$4 sm:$0xff]  }
  0x17   : > { %501 = vmatpush1.bf16.msra.mxu0 %v1233_v14 }
  0x18   : > { %502 = vmatprep.subr.bf16.mxu0 %v1284_v1  ;;  %1158 = vmatpush3.bf16.msra.mxu1 %v1235_v15 }
  0x19   : > { %1159 = vmatprep.subr.bf16.mxu1 %v1237_v16 }
  0x1b   : > { %503 = vmatpush1.bf16.msra.mxu0 %v1236_v17 }
  0x1c   : > { %504 = vmatprep.subr.bf16.mxu0 %v1284_v1  ;;  %1160 = vmatpush3.bf16.msra.mxu1 %v1238_v18 }
  0x1d   : > { %1161 = vmatprep.subr.bf16.mxu1 %v1240_v19 }
  0x1f   : > { %505 = vmatpush1.bf16.msra.mxu0 %v1239_v20 }
  0x20   : > { %506 = vmatprep.subr.bf16.mxu0 %v1284_v1  ;;  %1162 = vmatpush3.bf16.msra.mxu1 %v1241_v21 }
  0x21   : > { %1163 = vmatprep.subr.bf16.mxu1 %v1243_v22 }
  0x23   : > { %507 = vmatpush1.bf16.msra.mxu0 %v1242_v24 }
  0x24   : > { %508 = vmatprep.subr.bf16.mxu0 %v1284_v1  ;;  %1164 = vmatpush3.bf16.msra.mxu1 %v1244_v26 }
  0x25   : > { %1207 = vmatprep.subr.bf16.mxu1 %v1252_v27 }
  0x27   : > { %509 = vmatpush1.bf16.msra.mxu0 %v1248_v28  ;;  %771 = vmatmul.mubr.bf16.vlgmr.msra.gmra.mrb[0].mxu1 %v1245_v29 }
  0x28   : > { %1195 = vmatprep.subr.bf16.mxu0 %v1252_v27  ;;  %1209 = vmatpush3.bf16.msra.mxu1 %v1252_v27 }
  0x29   : > { %778 = vmatprep.mubr.bf16.mxu1 %v1253_v30  ;;  %1208 = vmatprep.subr.bf16.mxu1 %v1265_v33 }
  0x2a   : > { %525 = vmatmul.mubr.bf16.vlgmr.msra.gmra.mrb[0].mxu0 %v1249_v31 }
  0x2b   : > { %1196 = vmatpush3.bf16.msra.mxu0 %v1252_v27  ;;  %1067 = vmatprep.mubr.msk.bf16.mxu0 %vm479_vm0, %v1256_v32 }
  0x2c   : > { %1197 = vmatprep.subr.bf16.mxu0 %v1265_v33  ;;  %1210 = vmatpush3.bf16.msra.mxu1 %v1265_v33 }
  0x2f   : > { %1198 = vmatpush3.bf16.msra.mxu0 %v1265_v33  ;;  %779 = vmatmul.mubr.bf16.gmra.mrb[4].mxu1 %v1255_v34  ;;  %v1104_v33 = vld [vmem:[%s1484_s4] ss:$0 sm:$0xff] }
  0x30   : > { %786 = vmatprep.mubr.bf16.mxu1 %v1259_v35 }
  0x32   : > { %533 = vmatmul.mubr.bf16.gmra.mrb[4].mxu0 %v1258_v36  ;;  %v1105_v36 = vld [vmem:[%s1485_s5] ss:$0 sm:$0xff] }
  0x33   : > { %1068 = vmatprep.mubr.msk.bf16.mxu0 %vm479_vm0, %v1262_v37 }
  0x37   : > { %787 = vmatmul.mubr.bf16.gmra.mrb[8].mxu1 %v1261_v38 }
  0x38   : > { %794 = vmatprep.mubr.bf16.mxu1 %v1266_v39 }
  0x3a   : > { %541 = vmatmul.mubr.bf16.gmra.mrb[8].mxu0 %v1264_v40 }
  0x3b   : > { %1069 = vmatprep.mubr.msk.bf16.mxu0 %vm479_vm0, %v1269_v41 }
  0x3f   : > { %795 = vmatmul.mubr.bf16.gmra.mrb[12].mxu1 %v1268_v42 }
  0x40   : > { %1203 = vmatprep.mubr.msk.bf16.mxu1 %vm725_vm1, %v1272_v43 }
  0x42   : > { %549 = vmatmul.mubr.bf16.gmra.mrb[12].mxu0 %v1271_v44 }
  0x43   : > { %1199 = vmatprep.mubr.msk.bf16.mxu0 %vm725_vm1, %v1274_v45  ;;  %v1106_v45 = vld [vmem:[%s1486_s6] ss:$0 sm:$0xff] }
  0x47   : > { %1204 = vmatmul.mubr.msk.bf16.vlgmr.msra.gmra.mrb[16].mxu1 %vm725_vm1, %v1273_v46 }
  0x4a   : > { %1200 = vmatmul.mubr.msk.bf16.vlgmr.msra.gmra.mrb[16].mxu0 %vm725_vm1, %v1275_v47 }
  0xfa   : > { %v1165_v48 = vpop.f32.mrb[0].mxu1 }
  0xfb   : > { %v1166_v49 = vpop.f32.mrb[1].mxu1 }
  0xfc   : > { %v1167_v50 = vadd.f32 %v1166_v49, %v1165_v48  ;;  %v1168_v51 = vpop.f32.mrb[2].mxu1 }
  0xfd   : > { %v526_v52 = vpop.f32.mrb[0].mxu0  ;;  %v1169_v53 = vpop.f32.mrb[3].mxu1 }
  0xfe   : > { %v528_v54 = vpop.f32.mrb[1].mxu0  ;;  %v773_v55 = vadd.f32 %v1167_v50, %v526_v52  ;;  %v1170_v56 = vadd.f32 %v1169_v53, %v1168_v51 }
  0xff   : > { %v529_v57 = vpop.f32.mrb[2].mxu0 }
 0x100   : > { %v531_v58 = vpop.f32.mrb[3].mxu0  ;;  %v1461_v59 = vadd.f32 %v1170_v56, %v529_v57 }
 0x102   : > { %v1171_v60 = vpop.f32.mrb[4].mxu1 }
 0x103   : > { %v1172_v61 = vpop.f32.mrb[5].mxu1 }
 0x104   : > { %v1173_v62 = vadd.f32 %v1172_v61, %v1171_v60  ;;  %v1174_v63 = vpop.f32.mrb[6].mxu1 }
 0x105   : > { %v534_v0 = vpop.f32.mrb[4].mxu0  ;;  %v1175_v1 = vpop.f32.mrb[7].mxu1 }
 0x106   : > { %v536_v2 = vpop.f32.mrb[5].mxu0  ;;  %v781_v3 = vadd.f32 %v1173_v62, %v534_v0  ;;  %v1176_v4 = vadd.f32 %v1175_v1, %v1174_v63 }
 0x107   : > { %v537_v5 = vpop.f32.mrb[6].mxu0 }
 0x108   : > { %v539_v6 = vpop.f32.mrb[7].mxu0  ;;  %v784_v7 = vadd.f32 %v1176_v4, %v537_v5 }
 0x10a   : > { %v1177_v8 = vpop.f32.mrb[8].mxu1 }
 0x10b   : > { %v1178_v9 = vpop.f32.mrb[9].mxu1 }
 0x10c   : > { %v1179_v10 = vadd.f32 %v1178_v9, %v1177_v8  ;;  %v1180_v11 = vpop.f32.mrb[10].mxu1 }
 0x10d   : > { %v542_v12 = vpop.f32.mrb[8].mxu0  ;;  %v1181_v13 = vpop.f32.mrb[11].mxu1 }
 0x10e   : > { %v544_v14 = vpop.f32.mrb[9].mxu0  ;;  %v789_v15 = vadd.f32 %v1179_v10, %v542_v12  ;;  %v1182_v16 = vadd.f32 %v1181_v13, %v1180_v11 }
 0x10f   : > { %v545_v17 = vpop.f32.mrb[10].mxu0 }
 0x110   : > { %v547_v18 = vpop.f32.mrb[11].mxu0  ;;  %v792_v19 = vadd.f32 %v1182_v16, %v545_v17 }
 0x112   : > { %v1183_v20 = vpop.f32.mrb[12].mxu1 }
 0x113   : > { %v1184_v21 = vpop.f32.mrb[13].mxu1 }
 0x114   : > { %v1185_v22 = vadd.f32 %v1184_v21, %v1183_v20  ;;  %v1186_v23 = vpop.f32.mrb[14].mxu1 }
 0x115   : > { %v550_v24 = vpop.f32.mrb[12].mxu0  ;;  %v1187_v25 = vpop.f32.mrb[15].mxu1 }
 0x116   : > { %v552_v26 = vpop.f32.mrb[13].mxu0  ;;  %v797_v27 = vadd.f32 %v1185_v22, %v550_v24  ;;  %v1188_v28 = vadd.f32 %v1187_v25, %v1186_v23 }
 0x117   : > { %v553_v29 = vpop.f32.mrb[14].mxu0 }
 0x118   : > { %v555_v30 = vpop.f32.mrb[15].mxu0  ;;  %v800_v31 = vadd.f32 %v1188_v28, %v553_v29 }
 0x11a   : > { %v1205_v32 = vpop.f32.mrb[16].mxu1 }
 0x11b   : > { %v862_v34 = vadd.f32 %v1205_v32, %v797_v27  ;;  %v853_v35 = vpop.f32.mrb[17].mxu1 }
 0x11c   : > { %v854_v37 = vadd.f32 %v853_v35, %v789_v15  ;;  %v1206_v38 = vpop.f32.mrb[18].mxu1 }
 0x11d   : > { %v1201_v39 = vpop.f32.mrb[16].mxu0  ;;  %v881_v40 = vmul.f32 %v1104_v33, %v862_v34  ;;  %v865_v41 = vadd.f32 %v1206_v38, %v800_v31  ;;  %v856_v43 = vpop.f32.mrb[19].mxu1 }
 0x11e   : > { %v846_v42 = vadd.f32 %v1201_v39, %v781_v3  ;;  %v837_v44 = vpop.f32.mrb[17].mxu0  ;;  %v879_v46 = vmul.f32 %v1104_v33, %v854_v37  ;;  %v857_v47 = vadd.f32 %v856_v43, %v792_v19 }
 0x11f   : > { %v838_v48 = vadd.f32 %v837_v44, %v773_v55  ;;  %v1202_v49 = vpop.f32.mrb[18].mxu0  ;;  %v896_v50 = vadd.f32 %v1105_v36, %v881_v40  ;;  %v882_v51 = vmul.f32 %v1104_v33, %v865_v41 }
 0x120   : > { %v877_v52 = vmul.f32 %v1104_v33, %v846_v42  ;;  %v849_v53 = vadd.f32 %v1202_v49, %v784_v7  ;;  %v840_v54 = vpop.f32.mrb[19].mxu0  ;;  %v894_v56 = vadd.f32 %v1105_v36, %v879_v46  ;;  %v880_v57 = vmul.f32 %v1104_v33, %v857_v47 }
 0x121   : > { %v875_v58 = vmul.f32 %v1104_v33, %v838_v48  ;;  %v841_v60 = vadd.f32 %v840_v54, %v1461_v59  ;;  %v919_v61 = vmul.f32 %v1106_v45, %v896_v50  ;;  %v897_v62 = vadd.f32 %v1105_v36, %v882_v51 }
 0x122   : > { %vm904_vm2 = vcmp.gt.f32.partialorder %v896_v50, 0.0  ;;  %v917_v63 = vmul.f32 %v1106_v45, %v894_v56  ;;  %v895_v0 = vadd.f32 %v1105_v36, %v880_v57  ;;  %vm902_vm3 = vcmp.gt.f32.partialorder %v894_v56, 0.0 }
 0x123   : > { %vm905_vm4 = vcmp.gt.f32.partialorder %v897_v62, 0.0  ;;  %v920_v55 = vmul.f32 %v1106_v45, %v897_v62  ;;  %v892_v1 = vadd.f32 %v1105_v36, %v877_v52  ;;  %v890_v3 = vadd.f32 %v1105_v36, %v875_v58 }
 0x124   : > { %vm903_vm5 = vcmp.gt.f32.partialorder %v895_v0, 0.0  ;;  %v918_v2 = vmul.f32 %v1106_v45, %v895_v0  ;;  %v927_v4 = vsel %vm904_vm2, %v896_v50, %v919_v61  ;;  %v878_v59 = vmul.f32 %v1104_v33, %v849_v53 }
 0x125   : > { %v928_v5 = vsel %vm905_vm4, %v897_v62, %v920_v55  ;;  %v925_v6 = vsel %vm902_vm3, %v894_v56, %v917_v63  ;;  %v876_v9 = vmul.f32 %v1104_v33, %v841_v60  ;;  %v915_v10 = vmul.f32 %v1106_v45, %v892_v1 }
 0x126   : > { %v1144_v7 = vpack.c.bf16 %v928_v5, %v927_v4  ;;  %v926_v8 = vsel %vm903_vm5, %v895_v0, %v918_v2  ;;  %v893_v12 = vadd.f32 %v1105_v36, %v878_v59  ;;  %vm900_vm6 = vcmp.gt.f32.partialorder %v892_v1, 0.0 }
 0x127   : > { %v1139_v11 = vpack.c.bf16 %v926_v8, %v925_v6  ;;  %v913_v13 = vmul.f32 %v1106_v45, %v890_v3  ;;  %v891_v14 = vadd.f32 %v1105_v36, %v876_v9  ;;  %vm898_vm7 = vcmp.gt.f32.partialorder %v890_v3, 0.0 }
 0x128   : > { %1148 = vst [vmem:[%s308_s11 + $0x18] sm:$0xff] %v1144_v7   ;;  %vm901_vm8 = vcmp.gt.f32.partialorder %v893_v12, 0.0  ;;  %v916_v15 = vmul.f32 %v1106_v45, %v893_v12  ;;  %v923_v17 = vsel %vm900_vm6, %v892_v1, %v915_v10 }
 0x129   : > { %1147 = vst [vmem:[%s308_s11 + $0x10] sm:$0xff] %v1139_v11   ;;  %vm899_vm9 = vcmp.gt.f32.partialorder %v891_v14, 0.0  ;;  %v914_v16 = vmul.f32 %v1106_v45, %v891_v14  ;;  %v921_v19 = vsel %vm898_vm7, %v890_v3, %v913_v13 }
 0x12a   : > { %v924_v18 = vsel %vm901_vm8, %v893_v12, %v916_v15 }
 0x12b   : > { %v1134_v20 = vpack.c.bf16 %v924_v18, %v923_v17  ;;  %v922_v21 = vsel %vm899_vm9, %v891_v14, %v914_v16 }
 0x12c   : > { %v1129_v22 = vpack.c.bf16 %v922_v21, %v921_v19 }
 0x12d   : > { %1146 = vst [vmem:[%s308_s11 + $0x8] sm:$0xff] %v1134_v20  }
 0x12e   : > { %1130 = vst [vmem:[%s308_s11] sm:$0xff] %v1129_v22  }
 0x12f PF: > { %s17_s24 = sadd.s32 1, %s1282_s24  }
 0x130   : > { %p14_p4 = scmp.ge.s32.totalorder %s17_s24, 4  }
 0x132   :  { %16 = sbr.rel (!%p14_p4) target bundleno = 1 (0x1), region = 81 }

// kernel: unet_forward.40
= control target key start
LH: loop header
LB: loop body
LE: loop exit
PB: predicated region body
PF: predicated region fallthrough
CT: control target
= control target key end

     0   :  { %s1442_s18 = smov 0   ;;  %s1669_s0 = inlined_call_operand.vmem [shape: bf16[512,144], index: 0, kind: input, shape index: {}]   ;;  %s1670_s1 = inlined_call_operand.vmem [shape: bf16[144,128], index: 1, kind: input, shape index: {}]   ;;  %s1671_s2 = inlined_call_operand.vmem [shape: f32[1,128], index: 2, kind: input, shape index: {}]   ;;  %s1672_s3 = inlined_call_operand.vmem [shape: f32[1,128], index: 3, kind: input, shape index: {}]   ;;  %s1673_s4 = inlined_call_operand.vmem [shape: f32[1,128], index: 4, kind: input, shape index: {}]   ;;  %s1674_s5 = inlined_call_operand.vmem [shape: bf16[512,128], index: 5, kind: output, shape index: {}]  }
   0x1 LB: > { %s1087_s19 = sadd.s32 4294967295, %s1409_s18   ;;  %p1091_p0 = scmp.ge.s32.totalorder %s1409_s18, 1  ;;  %s1409_s18 = sphi %s1442_s18, %s15_s18  }
   0x2   : > { %p189_p1 = scmp.lt.s32.totalorder %s1409_s18, 3 }
   0x4   : > { %p190_p2 = pnand %p1091_p0, %p189_p1 }
   0x5   : > { %v1346_v0 = vld [vmem:[%s1670_s1] sm:$0xff] (!%p190_p2)   ;;  %v1411_v1 = vmov (!%p190_p2), 0   ;;  %s1092_s22 = sshll.u32 (!%p190_p2), %s1087_s19, 5  ;;  %v1347_v2 = vld [vmem:[%s1670_s1 + $0x8] sm:$0xff] (!%p190_p2)   ;;  %v1348_v3 = vld [vmem:[%s1670_s1 + $0x10] sm:$0xff] (!%p190_p2)   ;;  %vm480_vm0 = vcmask (!%p190_p2), 130048  }
   0x6   : > { %193 = sbr.rel (%p190_p2) target bundleno = 322 (0x142), region = 40  ;;  %529 = vmatprep.subr.bf16.mxu0 (!%p190_p2), %v1411_v1  ;;  %1319 = vmatprep.subr.bf16.mxu1 (!%p190_p2), %v1411_v1  ;;  %p219_p3 = scmp.lt.s32.totalorder (!%p190_p2), %s1092_s22, 63  ;;  %v1349_v4 = vld [vmem:[%s1670_s1 + $0x18] sm:$0xff] (!%p190_p2)   ;;  %v1350_v7 = vld [vmem:[%s1670_s1 + $0x20] sm:$0xff] (!%p190_p2)   ;;  %v1351_v8 = vld [vmem:[%s1670_s1 + $0x28] sm:$0xff] (!%p190_p2)  }
   0x7   : > { %530 = vmatpush1.bf16.msra.mxu0 (!%p190_p2), %v1346_v0  ;;  %1328 = vmatpush1.bf16.msra.mxu1 (!%p190_p2), %v1346_v0  ;;  %v1352_v9 = vld [vmem:[%s1670_s1 + $0x30] sm:$0xff] (!%p190_p2)   ;;  %v1353_v10 = vld [vmem:[%s1670_s1 + $0x38] sm:$0xff] (!%p190_p2)   ;;  %v1354_v11 = vld [vmem:[%s1670_s1 + $0x40] sm:$0xff] (!%p190_p2)  }
   0x8   : > { %531 = vmatprep.subr.bf16.mxu0 (!%p190_p2), %v1411_v1  ;;  %1320 = vmatprep.subr.bf16.mxu1 (!%p190_p2), %v1411_v1  ;;  %v1536_v42 = vld [vmem:[%s1671_s2] ss:$0 sm:$0xff] (!%p190_p2) }
   0x9   : > { %v1541_v44 = vld [vmem:[%s1672_s3] ss:$0 sm:$0xff] (!%p190_p2) }
   0xa   : > { %v1549_v53 = vld [vmem:[%s1673_s4] ss:$0 sm:$0xff] (!%p190_p2) }
   0xb   : > { %532 = vmatpush1.bf16.msra.mxu0 (!%p190_p2), %v1347_v2  ;;  %1329 = vmatpush1.bf16.msra.mxu1 (!%p190_p2), %v1347_v2 }
   0xc   : > { %533 = vmatprep.subr.bf16.mxu0 (!%p190_p2), %v1411_v1  ;;  %1321 = vmatprep.subr.bf16.mxu1 (!%p190_p2), %v1411_v1 }
   0xd   : > { %s1676_s22 = smov (!%p219_p3, %s1092_s22), 63 }
   0xe   : > { %s1191_s27 = sshll.u32 %s1676_s22, 3  ;;  %s1096_s26 = sshll.u32 %s1676_s22, 2 }
   0xf   : > { %s1465_s30 = scalar_lea.vmem %s1669_s0, %s1191_s27  ;;  %534 = vmatpush1.bf16.msra.mxu0 %v1348_v3  ;;  %1330 = vmatpush1.bf16.msra.mxu1 %v1348_v3  ;;  %s1566_s22 = scalar_lea.vmem %s1674_s5, %s1096_s26 }
  0x10   : > { %v1357_v5 = vld [vmem:[%s1465_s30 + $0x4] ss:$8 sps:$4 sm:$0xff]   ;;  %535 = vmatprep.subr.bf16.mxu0 %v1411_v1  ;;  %1322 = vmatprep.subr.bf16.mxu1 %v1411_v1  ;;  %v1355_v12 = vld [vmem:[%s1465_s30] ss:$8 sps:$4 sm:$0xff]   ;;  %v1361_v14 = vld [vmem:[%s1465_s30 + $0x14] ss:$8 sps:$4 sm:$0xff]  }
  0x11   : > { %v1360_v6 = vld [vmem:[%s1465_s30 + $0x84] ss:$8 sps:$4 sm:$0xff]   ;;  %1138 = vmatprep.mubr.msk.bf16.mxu0 %vm480_vm0, %v1357_v5  ;;  %v1358_v13 = vld [vmem:[%s1465_s30 + $0x80] ss:$8 sps:$4 sm:$0xff]   ;;  %v1363_v15 = vld [vmem:[%s1465_s30 + $0x94] ss:$8 sps:$4 sm:$0xff]  }
  0x12   : > { %1146 = vmatprep.mubr.msk.bf16.mxu1 %vm480_vm0, %v1360_v6  ;;  %v1365_v16 = vld [vmem:[%s1465_s30 + $0x10] ss:$8 sps:$4 sm:$0xff]   ;;  %v1367_v18 = vld [vmem:[%s1465_s30 + $0x24] ss:$8 sps:$4 sm:$0xff]   ;;  %v1371_v20 = vld [vmem:[%s1465_s30 + $0x20] ss:$8 sps:$4 sm:$0xff]  }
  0x13   : > { %536 = vmatpush1.bf16.msra.mxu0 %v1349_v4  ;;  %1331 = vmatpush1.bf16.msra.mxu1 %v1349_v4  ;;  %v1366_v17 = vld [vmem:[%s1465_s30 + $0x90] ss:$8 sps:$4 sm:$0xff]   ;;  %v1369_v19 = vld [vmem:[%s1465_s30 + $0xa4] ss:$8 sps:$4 sm:$0xff]   ;;  %v1372_v21 = vld [vmem:[%s1465_s30 + $0xa0] ss:$8 sps:$4 sm:$0xff]  }
  0x14   : > { %537 = vmatprep.subr.bf16.mxu0 %v1411_v1  ;;  %1323 = vmatprep.subr.bf16.mxu1 %v1411_v1  ;;  %v1373_v22 = vld [vmem:[%s1465_s30 + $0x34] ss:$8 sps:$4 sm:$0xff]   ;;  %v1377_v24 = vld [vmem:[%s1465_s30 + $0x30] ss:$8 sps:$4 sm:$0xff]   ;;  %v1379_v26 = vld [vmem:[%s1465_s30 + $0x44] ss:$8 sps:$4 sm:$0xff]  }
  0x15   : > { %v1375_v23 = vld [vmem:[%s1465_s30 + $0xb4] ss:$8 sps:$4 sm:$0xff]   ;;  %v1378_v25 = vld [vmem:[%s1465_s30 + $0xb0] ss:$8 sps:$4 sm:$0xff]   ;;  %v1381_v27 = vld [vmem:[%s1465_s30 + $0xc4] ss:$8 sps:$4 sm:$0xff]  }
  0x16   : > { %v1383_v28 = vld [vmem:[%s1465_s30 + $0x40] ss:$8 sps:$4 sm:$0xff]   ;;  %v1385_v30 = vld [vmem:[%s1465_s30 + $0x54] ss:$8 sps:$4 sm:$0xff]   ;;  %v1389_v32 = vld [vmem:[%s1465_s30 + $0x50] ss:$8 sps:$4 sm:$0xff]  }
  0x17   : > { %538 = vmatpush1.bf16.msra.mxu0 %v1350_v7  ;;  %1332 = vmatpush1.bf16.msra.mxu1 %v1350_v7  ;;  %v1384_v29 = vld [vmem:[%s1465_s30 + $0xc0] ss:$8 sps:$4 sm:$0xff]   ;;  %v1387_v31 = vld [vmem:[%s1465_s30 + $0xd4] ss:$8 sps:$4 sm:$0xff]   ;;  %v1390_v33 = vld [vmem:[%s1465_s30 + $0xd0] ss:$8 sps:$4 sm:$0xff]  }
  0x18   : > { %539 = vmatprep.subr.bf16.mxu0 %v1411_v1  ;;  %1324 = vmatprep.subr.bf16.mxu1 %v1411_v1  ;;  %v1391_v34 = vld [vmem:[%s1465_s30 + $0x64] ss:$8 sps:$4 sm:$0xff]   ;;  %v1395_v36 = vld [vmem:[%s1465_s30 + $0x60] ss:$8 sps:$4 sm:$0xff]   ;;  %v1397_v38 = vld [vmem:[%s1465_s30 + $0x74] ss:$8 sps:$4 sm:$0xff]  }
  0x19   : > { %v1393_v35 = vld [vmem:[%s1465_s30 + $0xe4] ss:$8 sps:$4 sm:$0xff]   ;;  %v1396_v37 = vld [vmem:[%s1465_s30 + $0xe0] ss:$8 sps:$4 sm:$0xff]   ;;  %v1399_v39 = vld [vmem:[%s1465_s30 + $0xf4] ss:$8 sps:$4 sm:$0xff]  }
  0x1a   : > { %v1401_v40 = vld [vmem:[%s1465_s30 + $0x70] ss:$8 sps:$4 sm:$0xff]  }
  0x1b   : > { %540 = vmatpush1.bf16.msra.mxu0 %v1351_v8  ;;  %1333 = vmatpush1.bf16.msra.mxu1 %v1351_v8  ;;  %v1402_v41 = vld [vmem:[%s1465_s30 + $0xf0] ss:$8 sps:$4 sm:$0xff]  }
  0x1c   : > { %541 = vmatprep.subr.bf16.mxu0 %v1411_v1  ;;  %1325 = vmatprep.subr.bf16.mxu1 %v1411_v1 }
  0x1f   : > { %542 = vmatpush1.bf16.msra.mxu0 %v1352_v9  ;;  %1334 = vmatpush1.bf16.msra.mxu1 %v1352_v9 }
  0x20   : > { %543 = vmatprep.subr.bf16.mxu0 %v1411_v1  ;;  %1326 = vmatprep.subr.bf16.mxu1 %v1411_v1 }
  0x23   : > { %544 = vmatpush1.bf16.msra.mxu0 %v1353_v10  ;;  %1335 = vmatpush1.bf16.msra.mxu1 %v1353_v10 }
  0x24   : > { %545 = vmatprep.subr.bf16.mxu0 %v1411_v1  ;;  %1327 = vmatprep.subr.bf16.mxu1 %v1411_v1 }
  0x27   : > { %546 = vmatpush1.bf16.msra.mxu0 %v1354_v11  ;;  %1336 = vmatpush1.bf16.msra.mxu1 %v1354_v11 }
  0x2a   : > { %562 = vmatmul.mubr.bf16.vlgmr.msra.gmra.mrb[0].mxu0 %v1355_v12  ;;  %626 = vmatmul.mubr.bf16.vlgmr.msra.gmra.mrb[0].mxu1 %v1358_v13 }
  0x2b   : > { %1139 = vmatprep.mubr.msk.bf16.mxu0 %vm480_vm0, %v1361_v14  ;;  %1147 = vmatprep.mubr.msk.bf16.mxu1 %vm480_vm0, %v1363_v15 }
  0x32   : > { %570 = vmatmul.mubr.bf16.gmra.mrb[4].mxu0 %v1365_v16  ;;  %634 = vmatmul.mubr.bf16.gmra.mrb[4].mxu1 %v1366_v17 }
  0x33   : > { %1140 = vmatprep.mubr.msk.bf16.mxu0 %vm480_vm0, %v1367_v18  ;;  %1148 = vmatprep.mubr.msk.bf16.mxu1 %vm480_vm0, %v1369_v19 }
  0x3a   : > { %578 = vmatmul.mubr.bf16.gmra.mrb[8].mxu0 %v1371_v20  ;;  %642 = vmatmul.mubr.bf16.gmra.mrb[8].mxu1 %v1372_v21 }
  0x3b   : > { %1141 = vmatprep.mubr.msk.bf16.mxu0 %vm480_vm0, %v1373_v22  ;;  %1149 = vmatprep.mubr.msk.bf16.mxu1 %vm480_vm0, %v1375_v23 }
  0x42   : > { %586 = vmatmul.mubr.bf16.gmra.mrb[12].mxu0 %v1377_v24  ;;  %650 = vmatmul.mubr.bf16.gmra.mrb[12].mxu1 %v1378_v25 }
  0x43   : > { %1142 = vmatprep.mubr.msk.bf16.mxu0 %vm480_vm0, %v1379_v26  ;;  %1150 = vmatprep.mubr.msk.bf16.mxu1 %vm480_vm0, %v1381_v27 }
  0x4a   : > { %594 = vmatmul.mubr.bf16.gmra.mrb[16].mxu0 %v1383_v28  ;;  %658 = vmatmul.mubr.bf16.gmra.mrb[16].mxu1 %v1384_v29 }
  0x4b   : > { %1143 = vmatprep.mubr.msk.bf16.mxu0 %vm480_vm0, %v1385_v30  ;;  %1151 = vmatprep.mubr.msk.bf16.mxu1 %vm480_vm0, %v1387_v31 }
  0x52   : > { %602 = vmatmul.mubr.bf16.gmra.mrb[20].mxu0 %v1389_v32  ;;  %666 = vmatmul.mubr.bf16.gmra.mrb[20].mxu1 %v1390_v33 }
  0x53   : > { %1144 = vmatprep.mubr.msk.bf16.mxu0 %vm480_vm0, %v1391_v34  ;;  %1152 = vmatprep.mubr.msk.bf16.mxu1 %vm480_vm0, %v1393_v35 }
  0x5a   : > { %610 = vmatmul.mubr.bf16.gmra.mrb[24].mxu0 %v1395_v36  ;;  %674 = vmatmul.mubr.bf16.gmra.mrb[24].mxu1 %v1396_v37 }
  0x5b   : > { %1145 = vmatprep.mubr.msk.bf16.mxu0 %vm480_vm0, %v1397_v38  ;;  %1153 = vmatprep.mubr.msk.bf16.mxu1 %vm480_vm0, %v1399_v39 }
  0x62   : > { %618 = vmatmul.mubr.bf16.gmra.mrb[28].mxu0 %v1401_v40  ;;  %682 = vmatmul.mubr.bf16.gmra.mrb[28].mxu1 %v1402_v41 }
  0xfd   : > { %v563_v43 = vpop.f32.mrb[0].mxu0  ;;  %v627_v45 = vpop.f32.mrb[0].mxu1 }
  0xfe   : > { %v697_v46 = vmul.f32 %v1536_v42, %v563_v43  ;;  %v713_v47 = vmul.f32 %v1536_v42, %v627_v45  ;;  %v565_v48 = vpop.f32.mrb[1].mxu0  ;;  %v629_v49 = vpop.f32.mrb[1].mxu1 }
  0xff   : > { %v566_v50 = vpop.f32.mrb[2].mxu0  ;;  %v630_v51 = vpop.f32.mrb[2].mxu1 }
 0x100   : > { %v736_v52 = vadd.f32 %v1541_v44, %v697_v46  ;;  %v752_v54 = vadd.f32 %v1541_v44, %v713_v47  ;;  %v698_v55 = vmul.f32 %v1536_v42, %v566_v50  ;;  %v714_v56 = vmul.f32 %v1536_v42, %v630_v51  ;;  %v568_v57 = vpop.f32.mrb[3].mxu0  ;;  %v632_v58 = vpop.f32.mrb[3].mxu1 }
 0x102   : > { %v807_v59 = vmul.f32 %v1549_v53, %v736_v52  ;;  %v823_v60 = vmul.f32 %v1549_v53, %v752_v54  ;;  %v737_v61 = vadd.f32 %v1541_v44, %v698_v55  ;;  %v753_v62 = vadd.f32 %v1541_v44, %v714_v56 }
 0x103   : > { %vm768_vm1 = vcmp.gt.f32.partialorder %v736_v52, 0.0  ;;  %vm784_vm2 = vcmp.gt.f32.partialorder %v752_v54, 0.0 }
 0x104   : > { %vm769_vm3 = vcmp.gt.f32.partialorder %v737_v61, 0.0  ;;  %v808_v63 = vmul.f32 %v1549_v53, %v737_v61  ;;  %vm785_vm4 = vcmp.gt.f32.partialorder %v753_v62, 0.0  ;;  %v824_v0 = vmul.f32 %v1549_v53, %v753_v62 }
 0x105   : > { %v571_v1 = vpop.f32.mrb[4].mxu0  ;;  %v635_v2 = vpop.f32.mrb[4].mxu1  ;;  %v839_v7 = vsel %vm768_vm1, %v736_v52, %v807_v59  ;;  %v855_v8 = vsel %vm784_vm2, %v752_v54, %v823_v60 }
 0x106   : > { %v699_v3 = vmul.f32 %v1536_v42, %v571_v1  ;;  %v715_v4 = vmul.f32 %v1536_v42, %v635_v2  ;;  %v573_v5 = vpop.f32.mrb[5].mxu0  ;;  %v637_v6 = vpop.f32.mrb[5].mxu1  ;;  %v840_v9 = vsel %vm769_vm3, %v737_v61, %v808_v63  ;;  %v856_v10 = vsel %vm785_vm4, %v753_v62, %v824_v0 }
 0x107   : > { %v574_v11 = vpop.f32.mrb[6].mxu0  ;;  %v638_v12 = vpop.f32.mrb[6].mxu1  ;;  %v1227_v13 = vpack.c.bf16 %v840_v9, %v839_v7  ;;  %v1267_v14 = vpack.c.bf16 %v856_v10, %v855_v8 }
 0x108   : > { %v738_v15 = vadd.f32 %v1541_v44, %v699_v3  ;;  %v754_v16 = vadd.f32 %v1541_v44, %v715_v4  ;;  %v576_v17 = vpop.f32.mrb[7].mxu0  ;;  %v640_v18 = vpop.f32.mrb[7].mxu1  ;;  %v700_v19 = vmul.f32 %v1536_v42, %v574_v11  ;;  %v716_v20 = vmul.f32 %v1536_v42, %v638_v12 }
 0x109   : > { %1228 = vst [vmem:[%s1566_s22] sm:$0xff] %v1227_v13   ;;  %1311 = vst [vmem:[%s1566_s22 + $0x40] sm:$0xff] %v1267_v14  }
 0x10a   : > { %v809_v21 = vmul.f32 %v1549_v53, %v738_v15  ;;  %v825_v22 = vmul.f32 %v1549_v53, %v754_v16  ;;  %v739_v23 = vadd.f32 %v1541_v44, %v700_v19  ;;  %v755_v24 = vadd.f32 %v1541_v44, %v716_v20 }
 0x10b   : > { %vm770_vm5 = vcmp.gt.f32.partialorder %v738_v15, 0.0  ;;  %vm786_vm6 = vcmp.gt.f32.partialorder %v754_v16, 0.0 }
 0x10c   : > { %vm771_vm7 = vcmp.gt.f32.partialorder %v739_v23, 0.0  ;;  %v810_v25 = vmul.f32 %v1549_v53, %v739_v23  ;;  %vm787_vm8 = vcmp.gt.f32.partialorder %v755_v24, 0.0  ;;  %v826_v26 = vmul.f32 %v1549_v53, %v755_v24 }
 0x10d   : > { %v579_v27 = vpop.f32.mrb[8].mxu0  ;;  %v643_v28 = vpop.f32.mrb[8].mxu1  ;;  %v841_v33 = vsel %vm770_vm5, %v738_v15, %v809_v21  ;;  %v857_v34 = vsel %vm786_vm6, %v754_v16, %v825_v22 }
 0x10e   : > { %v701_v29 = vmul.f32 %v1536_v42, %v579_v27  ;;  %v717_v30 = vmul.f32 %v1536_v42, %v643_v28  ;;  %v581_v31 = vpop.f32.mrb[9].mxu0  ;;  %v645_v32 = vpop.f32.mrb[9].mxu1  ;;  %v842_v35 = vsel %vm771_vm7, %v739_v23, %v810_v25  ;;  %v858_v36 = vsel %vm787_vm8, %v755_v24, %v826_v26 }
 0x10f   : > { %v582_v37 = vpop.f32.mrb[10].mxu0  ;;  %v646_v38 = vpop.f32.mrb[10].mxu1  ;;  %v1232_v39 = vpack.c.bf16 %v842_v35, %v841_v33  ;;  %v1272_v40 = vpack.c.bf16 %v858_v36, %v857_v34 }
 0x110   : > { %v740_v41 = vadd.f32 %v1541_v44, %v701_v29  ;;  %v756_v43 = vadd.f32 %v1541_v44, %v717_v30  ;;  %v584_v45 = vpop.f32.mrb[11].mxu0  ;;  %v648_v46 = vpop.f32.mrb[11].mxu1  ;;  %v702_v47 = vmul.f32 %v1536_v42, %v582_v37  ;;  %v718_v48 = vmul.f32 %v1536_v42, %v646_v38 }
 0x111   : > { %1304 = vst [vmem:[%s1566_s22 + $0x8] sm:$0xff] %v1232_v39   ;;  %1312 = vst [vmem:[%s1566_s22 + $0x48] sm:$0xff] %v1272_v40  }
 0x112   : > { %v811_v49 = vmul.f32 %v1549_v53, %v740_v41  ;;  %v827_v50 = vmul.f32 %v1549_v53, %v756_v43  ;;  %v741_v51 = vadd.f32 %v1541_v44, %v702_v47  ;;  %v757_v52 = vadd.f32 %v1541_v44, %v718_v48 }
 0x113   : > { %vm772_vm9 = vcmp.gt.f32.partialorder %v740_v41, 0.0  ;;  %vm788_vm10 = vcmp.gt.f32.partialorder %v756_v43, 0.0 }
 0x114   : > { %vm773_vm11 = vcmp.gt.f32.partialorder %v741_v51, 0.0  ;;  %v812_v54 = vmul.f32 %v1549_v53, %v741_v51  ;;  %vm789_vm12 = vcmp.gt.f32.partialorder %v757_v52, 0.0  ;;  %v828_v55 = vmul.f32 %v1549_v53, %v757_v52 }
 0x115   : > { %v587_v56 = vpop.f32.mrb[12].mxu0  ;;  %v651_v57 = vpop.f32.mrb[12].mxu1  ;;  %v843_v62 = vsel %vm772_vm9, %v740_v41, %v811_v49  ;;  %v859_v63 = vsel %vm788_vm10, %v756_v43, %v827_v50 }
 0x116   : > { %v703_v58 = vmul.f32 %v1536_v42, %v587_v56  ;;  %v719_v59 = vmul.f32 %v1536_v42, %v651_v57  ;;  %v589_v60 = vpop.f32.mrb[13].mxu0  ;;  %v653_v61 = vpop.f32.mrb[13].mxu1  ;;  %v844_v0 = vsel %vm773_vm11, %v741_v51, %v812_v54  ;;  %v860_v1 = vsel %vm789_vm12, %v757_v52, %v828_v55 }
 0x117   : > { %v590_v2 = vpop.f32.mrb[14].mxu0  ;;  %v654_v3 = vpop.f32.mrb[14].mxu1  ;;  %v1237_v4 = vpack.c.bf16 %v844_v0, %v843_v62  ;;  %v1277_v5 = vpack.c.bf16 %v860_v1, %v859_v63 }
 0x118   : > { %v742_v6 = vadd.f32 %v1541_v44, %v703_v58  ;;  %v758_v7 = vadd.f32 %v1541_v44, %v719_v59  ;;  %v592_v8 = vpop.f32.mrb[15].mxu0  ;;  %v656_v9 = vpop.f32.mrb[15].mxu1  ;;  %v704_v10 = vmul.f32 %v1536_v42, %v590_v2  ;;  %v720_v11 = vmul.f32 %v1536_v42, %v654_v3 }
 0x119   : > { %1305 = vst [vmem:[%s1566_s22 + $0x10] sm:$0xff] %v1237_v4   ;;  %1313 = vst [vmem:[%s1566_s22 + $0x50] sm:$0xff] %v1277_v5  }
 0x11a   : > { %v813_v12 = vmul.f32 %v1549_v53, %v742_v6  ;;  %v829_v13 = vmul.f32 %v1549_v53, %v758_v7  ;;  %v743_v14 = vadd.f32 %v1541_v44, %v704_v10  ;;  %v759_v15 = vadd.f32 %v1541_v44, %v720_v11 }
 0x11b   : > { %vm774_vm13 = vcmp.gt.f32.partialorder %v742_v6, 0.0  ;;  %vm790_vm14 = vcmp.gt.f32.partialorder %v758_v7, 0.0 }
 0x11c   : > { %vm775_vm15 = vcmp.gt.f32.partialorder %v743_v14, 0.0  ;;  %v814_v16 = vmul.f32 %v1549_v53, %v743_v14  ;;  %vm791_vm0 = vcmp.gt.f32.partialorder %v759_v15, 0.0  ;;  %v830_v17 = vmul.f32 %v1549_v53, %v759_v15 }
 0x11d   : > { %v595_v18 = vpop.f32.mrb[16].mxu0  ;;  %v659_v19 = vpop.f32.mrb[16].mxu1  ;;  %v845_v24 = vsel %vm774_vm13, %v742_v6, %v813_v12  ;;  %v861_v25 = vsel %vm790_vm14, %v758_v7, %v829_v13 }
 0x11e   : > { %v705_v20 = vmul.f32 %v1536_v42, %v595_v18  ;;  %v721_v21 = vmul.f32 %v1536_v42, %v659_v19  ;;  %v597_v22 = vpop.f32.mrb[17].mxu0  ;;  %v661_v23 = vpop.f32.mrb[17].mxu1  ;;  %v846_v26 = vsel %vm775_vm15, %v743_v14, %v814_v16  ;;  %v862_v27 = vsel %vm791_vm0, %v759_v15, %v830_v17 }
 0x11f   : > { %v598_v28 = vpop.f32.mrb[18].mxu0  ;;  %v662_v29 = vpop.f32.mrb[18].mxu1  ;;  %v1242_v30 = vpack.c.bf16 %v846_v26, %v845_v24  ;;  %v1282_v31 = vpack.c.bf16 %v862_v27, %v861_v25 }
 0x120   : > { %v744_v32 = vadd.f32 %v1541_v44, %v705_v20  ;;  %v760_v33 = vadd.f32 %v1541_v44, %v721_v21  ;;  %v600_v34 = vpop.f32.mrb[19].mxu0  ;;  %v664_v35 = vpop.f32.mrb[19].mxu1  ;;  %v706_v36 = vmul.f32 %v1536_v42, %v598_v28  ;;  %v722_v37 = vmul.f32 %v1536_v42, %v662_v29 }
 0x121   : > { %1306 = vst [vmem:[%s1566_s22 + $0x18] sm:$0xff] %v1242_v30   ;;  %1314 = vst [vmem:[%s1566_s22 + $0x58] sm:$0xff] %v1282_v31  }
 0x122   : > { %v815_v38 = vmul.f32 %v1549_v53, %v744_v32  ;;  %v831_v39 = vmul.f32 %v1549_v53, %v760_v33  ;;  %v745_v40 = vadd.f32 %v1541_v44, %v706_v36  ;;  %v761_v41 = vadd.f32 %v1541_v44, %v722_v37 }
 0x123   : > { %vm776_vm1 = vcmp.gt.f32.partialorder %v744_v32, 0.0  ;;  %vm792_vm2 = vcmp.gt.f32.partialorder %v760_v33, 0.0 }
 0x124   : > { %vm777_vm3 = vcmp.gt.f32.partialorder %v745_v40, 0.0  ;;  %v816_v43 = vmul.f32 %v1549_v53, %v745_v40  ;;  %vm793_vm4 = vcmp.gt.f32.partialorder %v761_v41, 0.0  ;;  %v832_v45 = vmul.f32 %v1549_v53, %v761_v41 }
 0x125   : > { %v603_v46 = vpop.f32.mrb[20].mxu0  ;;  %v667_v47 = vpop.f32.mrb[20].mxu1  ;;  %v847_v52 = vsel %vm776_vm1, %v744_v32, %v815_v38  ;;  %v863_v54 = vsel %vm792_vm2, %v760_v33, %v831_v39 }
 0x126   : > { %v707_v48 = vmul.f32 %v1536_v42, %v603_v46  ;;  %v723_v49 = vmul.f32 %v1536_v42, %v667_v47  ;;  %v605_v50 = vpop.f32.mrb[21].mxu0  ;;  %v669_v51 = vpop.f32.mrb[21].mxu1  ;;  %v848_v55 = vsel %vm777_vm3, %v745_v40, %v816_v43  ;;  %v864_v56 = vsel %vm793_vm4, %v761_v41, %v832_v45 }
 0x127   : > { %v606_v57 = vpop.f32.mrb[22].mxu0  ;;  %v670_v58 = vpop.f32.mrb[22].mxu1  ;;  %v1247_v59 = vpack.c.bf16 %v848_v55, %v847_v52  ;;  %v1287_v60 = vpack.c.bf16 %v864_v56, %v863_v54 }
 0x128   : > { %v746_v61 = vadd.f32 %v1541_v44, %v707_v48  ;;  %v762_v62 = vadd.f32 %v1541_v44, %v723_v49  ;;  %v608_v63 = vpop.f32.mrb[23].mxu0  ;;  %v672_v0 = vpop.f32.mrb[23].mxu1  ;;  %v708_v1 = vmul.f32 %v1536_v42, %v606_v57  ;;  %v724_v2 = vmul.f32 %v1536_v42, %v670_v58 }
 0x129   : > { %1307 = vst [vmem:[%s1566_s22 + $0x20] sm:$0xff] %v1247_v59   ;;  %1315 = vst [vmem:[%s1566_s22 + $0x60] sm:$0xff] %v1287_v60  }
 0x12a   : > { %v817_v3 = vmul.f32 %v1549_v53, %v746_v61  ;;  %v833_v4 = vmul.f32 %v1549_v53, %v762_v62  ;;  %v747_v5 = vadd.f32 %v1541_v44, %v708_v1  ;;  %v763_v6 = vadd.f32 %v1541_v44, %v724_v2 }
 0x12b   : > { %vm778_vm5 = vcmp.gt.f32.partialorder %v746_v61, 0.0  ;;  %vm794_vm6 = vcmp.gt.f32.partialorder %v762_v62, 0.0 }
 0x12c   : > { %vm779_vm7 = vcmp.gt.f32.partialorder %v747_v5, 0.0  ;;  %v818_v7 = vmul.f32 %v1549_v53, %v747_v5  ;;  %vm795_vm8 = vcmp.gt.f32.partialorder %v763_v6, 0.0  ;;  %v834_v8 = vmul.f32 %v1549_v53, %v763_v6 }
 0x12d   : > { %v611_v9 = vpop.f32.mrb[24].mxu0  ;;  %v675_v10 = vpop.f32.mrb[24].mxu1  ;;  %v849_v15 = vsel %vm778_vm5, %v746_v61, %v817_v3  ;;  %v865_v16 = vsel %vm794_vm6, %v762_v62, %v833_v4 }
 0x12e   : > { %v709_v11 = vmul.f32 %v1536_v42, %v611_v9  ;;  %v725_v12 = vmul.f32 %v1536_v42, %v675_v10  ;;  %v613_v13 = vpop.f32.mrb[25].mxu0  ;;  %v677_v14 = vpop.f32.mrb[25].mxu1  ;;  %v850_v17 = vsel %vm779_vm7, %v747_v5, %v818_v7  ;;  %v866_v18 = vsel %vm795_vm8, %v763_v6, %v834_v8 }
 0x12f   : > { %v614_v19 = vpop.f32.mrb[26].mxu0  ;;  %v678_v20 = vpop.f32.mrb[26].mxu1  ;;  %v1252_v21 = vpack.c.bf16 %v850_v17, %v849_v15  ;;  %v1292_v22 = vpack.c.bf16 %v866_v18, %v865_v16 }
 0x130   : > { %v748_v23 = vadd.f32 %v1541_v44, %v709_v11  ;;  %v764_v24 = vadd.f32 %v1541_v44, %v725_v12  ;;  %v616_v25 = vpop.f32.mrb[27].mxu0  ;;  %v680_v26 = vpop.f32.mrb[27].mxu1  ;;  %v710_v27 = vmul.f32 %v1536_v42, %v614_v19  ;;  %v726_v28 = vmul.f32 %v1536_v42, %v678_v20 }
 0x131   : > { %1308 = vst [vmem:[%s1566_s22 + $0x28] sm:$0xff] %v1252_v21   ;;  %1316 = vst [vmem:[%s1566_s22 + $0x68] sm:$0xff] %v1292_v22  }
 0x132   : > { %v819_v29 = vmul.f32 %v1549_v53, %v748_v23  ;;  %v835_v30 = vmul.f32 %v1549_v53, %v764_v24  ;;  %v749_v31 = vadd.f32 %v1541_v44, %v710_v27  ;;  %v765_v32 = vadd.f32 %v1541_v44, %v726_v28 }
 0x133   : > { %vm780_vm9 = vcmp.gt.f32.partialorder %v748_v23, 0.0  ;;  %vm796_vm10 = vcmp.gt.f32.partialorder %v764_v24, 0.0 }
 0x134   : > { %vm781_vm11 = vcmp.gt.f32.partialorder %v749_v31, 0.0  ;;  %v820_v33 = vmul.f32 %v1549_v53, %v749_v31  ;;  %vm797_vm12 = vcmp.gt.f32.partialorder %v765_v32, 0.0  ;;  %v836_v34 = vmul.f32 %v1549_v53, %v765_v32 }
 0x135   : > { %v619_v35 = vpop.f32.mrb[28].mxu0  ;;  %v683_v36 = vpop.f32.mrb[28].mxu1  ;;  %v851_v41 = vsel %vm780_vm9, %v748_v23, %v819_v29  ;;  %v867_v43 = vsel %vm796_vm10, %v764_v24, %v835_v30 }
 0x136   : > { %v711_v37 = vmul.f32 %v1536_v42, %v619_v35  ;;  %v727_v38 = vmul.f32 %v1536_v42, %v683_v36  ;;  %v621_v39 = vpop.f32.mrb[29].mxu0  ;;  %v685_v40 = vpop.f32.mrb[29].mxu1  ;;  %v852_v45 = vsel %vm781_vm11, %v749_v31, %v820_v33  ;;  %v868_v46 = vsel %vm797_vm12, %v765_v32, %v836_v34 }
 0x137   : > { %v622_v47 = vpop.f32.mrb[30].mxu0  ;;  %v686_v48 = vpop.f32.mrb[30].mxu1  ;;  %v1257_v49 = vpack.c.bf16 %v852_v45, %v851_v41  ;;  %v1297_v50 = vpack.c.bf16 %v868_v46, %v867_v43 }
 0x138   : > { %v750_v51 = vadd.f32 %v1541_v44, %v711_v37  ;;  %v766_v52 = vadd.f32 %v1541_v44, %v727_v38  ;;  %v624_v54 = vpop.f32.mrb[31].mxu0  ;;  %v688_v55 = vpop.f32.mrb[31].mxu1  ;;  %v712_v56 = vmul.f32 %v1536_v42, %v622_v47  ;;  %v728_v57 = vmul.f32 %v1536_v42, %v686_v48 }
 0x139   : > { %1309 = vst [vmem:[%s1566_s22 + $0x30] sm:$0xff] %v1257_v49   ;;  %1317 = vst [vmem:[%s1566_s22 + $0x70] sm:$0xff] %v1297_v50  }
 0x13a   : > { %v821_v58 = vmul.f32 %v1549_v53, %v750_v51  ;;  %v837_v59 = vmul.f32 %v1549_v53, %v766_v52  ;;  %v751_v60 = vadd.f32 %v1541_v44, %v712_v56  ;;  %v767_v61 = vadd.f32 %v1541_v44, %v728_v57 }
 0x13b   : > { %vm782_vm13 = vcmp.gt.f32.partialorder %v750_v51, 0.0  ;;  %vm798_vm14 = vcmp.gt.f32.partialorder %v766_v52, 0.0 }
 0x13c   : > { %vm783_vm15 = vcmp.gt.f32.partialorder %v751_v60, 0.0  ;;  %v822_v62 = vmul.f32 %v1549_v53, %v751_v60  ;;  %vm799_vm0 = vcmp.gt.f32.partialorder %v767_v61, 0.0  ;;  %v838_v42 = vmul.f32 %v1549_v53, %v767_v61 }
 0x13d   : > { %v853_v63 = vsel %vm782_vm13, %v750_v51, %v821_v58  ;;  %v869_v0 = vsel %vm798_vm14, %v766_v52, %v837_v59 }
 0x13e   : > { %v854_v1 = vsel %vm783_vm15, %v751_v60, %v822_v62  ;;  %v870_v2 = vsel %vm799_vm0, %v767_v61, %v838_v42 }
 0x13f   : > { %v1262_v3 = vpack.c.bf16 %v854_v1, %v853_v63  ;;  %v1302_v4 = vpack.c.bf16 %v870_v2, %v869_v0 }
 0x141   : > { %1310 = vst [vmem:[%s1566_s22 + $0x38] sm:$0xff] %v1262_v3   ;;  %1318 = vst [vmem:[%s1566_s22 + $0x78] sm:$0xff] %v1302_v4  }
 0x142 PF: > { %s15_s18 = sadd.s32 1, %s1409_s18  }
 0x143   : > { %p12_p4 = scmp.ge.s32.totalorder %s15_s18, 4  }
 0x145   :  { %14 = sbr.rel (!%p12_p4) target bundleno = 1 (0x1), region = 70 }

// kernel: unet_forward.42
= control target key start
LH: loop header
LB: loop body
LE: loop exit
PB: predicated region body
PF: predicated region fallthrough
CT: control target
= control target key end

     0   :  { %s2026_s24 = smov 0   ;;  %s2388_s0 = inlined_call_operand.vmem [shape: bf16[512,144], index: 0, kind: input, shape index: {}]   ;;  %s2389_s1 = inlined_call_operand.vmem [shape: bf16[512,72], index: 1, kind: input, shape index: {}]   ;;  %s2390_s2 = inlined_call_operand.vmem [shape: bf16[144,128], index: 2, kind: input, shape index: {}]   ;;  %s2391_s3 = inlined_call_operand.vmem [shape: bf16[72,128], index: 3, kind: input, shape index: {}]   ;;  %s2392_s4 = inlined_call_operand.vmem [shape: f32[1,128], index: 4, kind: input, shape index: {}]   ;;  %s2393_s5 = inlined_call_operand.vmem [shape: f32[1,128], index: 5, kind: input, shape index: {}]   ;;  %s2394_s6 = inlined_call_operand.vmem [shape: f32[1,128], index: 6, kind: input, shape index: {}]   ;;  %s2395_s7 = inlined_call_operand.vmem [shape: bf16[512,128], index: 7, kind: output, shape index: {}]  }
   0x1 LB: > { %s1537_s25 = sadd.s32 4294967295, %s1983_s24   ;;  %p1541_p0 = scmp.ge.s32.totalorder %s1983_s24, 1  ;;  %s1983_s24 = sphi %s2026_s24, %s17_s24  }
   0x2   : > { %p250_p1 = scmp.lt.s32.totalorder %s1983_s24, 3 }
   0x4   : > { %p251_p2 = pnand %p1541_p0, %p250_p1 }
   0x5   : > { %v1899_v0 = vld [vmem:[%s2391_s3] sm:$0xff] (!%p251_p2)   ;;  %v1985_v1 = vmov (!%p251_p2), 0   ;;  %v1901_v3 = vld [vmem:[%s2391_s3 + $0x8] sm:$0xff] (!%p251_p2)   ;;  %s1542_s9 = sshll.u32 (!%p251_p2), %s1537_s25, 5  ;;  %v1903_v5 = vld [vmem:[%s2391_s3 + $0x10] sm:$0xff] (!%p251_p2)   ;;  %vm506_vm0 = vcmask (!%p251_p2), 588800  }
   0x6   : > { %254 = sbr.rel (%p251_p2) target bundleno = 348 (0x15c), region = 48  ;;  %1871 = vmatprep.subr.bf16.mxu1 (!%p251_p2), %v1985_v1  ;;  %v1900_v2 = vld [vmem:[%s2390_s2] sm:$0xff] (!%p251_p2)   ;;  %1829 = vmatprep.subr.bf16.mxu0 (!%p251_p2), %v1899_v0  ;;  %v1902_v4 = vld [vmem:[%s2390_s2 + $0x8] sm:$0xff] (!%p251_p2)   ;;  %p289_p3 = scmp.lt.s32.totalorder (!%p251_p2), %s1542_s9, 63  ;;  %v1904_v6 = vld [vmem:[%s2390_s2 + $0x10] sm:$0xff] (!%p251_p2)   ;;  %vm555_vm1 = vcmask (!%p251_p2), 1043456  }
   0x7   : > { %1880 = vmatpush1.bf16.msra.mxu1 (!%p251_p2), %v1900_v2  ;;  %1830 = vmatpush3.bf16.msra.mxu0 (!%p251_p2), %v1899_v0  ;;  %v1905_v7 = vld [vmem:[%s2391_s3 + $0x18] sm:$0xff] (!%p251_p2)   ;;  %v1907_v10 = vld [vmem:[%s2391_s3 + $0x20] ss:$0 sps:$4 sm:$0xff] (!%p251_p2)   ;;  %vm918_vm2 = vcmask (!%p251_p2), 130048   ;;  %v1911_v15 = vld [vmem:[%s2390_s2 + $0x28] sm:$0xff] (!%p251_p2)  }
   0x8   : > { %1872 = vmatprep.subr.bf16.mxu1 (!%p251_p2), %v1985_v1  ;;  %1831 = vmatprep.subr.bf16.mxu0 (!%p251_p2), %v1901_v3  ;;  %v1906_v8 = vld [vmem:[%s2390_s2 + $0x18] sm:$0xff] (!%p251_p2)   ;;  %v1908_v11 = vld [vmem:[%s2390_s2 + $0x20] sm:$0xff] (!%p251_p2)   ;;  %v557_v12 = vsel (!%p251_p2), %vm555_vm1, %v1907_v10, 0  ;;  %v1912_v17 = vld [vmem:[%s2390_s2 + $0x30] sm:$0xff] (!%p251_p2)  }
   0x9   : > { %v1915_v19 = vld [vmem:[%s2390_s2 + $0x38] sm:$0xff] (!%p251_p2)   ;;  %v1916_v21 = vld [vmem:[%s2390_s2 + $0x40] sm:$0xff] (!%p251_p2)  }
   0xb   : > { %1881 = vmatpush1.bf16.msra.mxu1 (!%p251_p2), %v1902_v4  ;;  %1832 = vmatpush3.bf16.msra.mxu0 (!%p251_p2), %v1901_v3 }
   0xc   : > { %1873 = vmatprep.subr.bf16.mxu1 (!%p251_p2), %v1985_v1  ;;  %1833 = vmatprep.subr.bf16.mxu0 (!%p251_p2), %v1903_v5 }
   0xd   : > { %s2397_s9 = smov (!%p289_p3, %s1542_s9), 63 }
   0xe   : > { %s1546_s16 = sshll.u32 %s2397_s9, 2  ;;  %s1680_s27 = sshll.u32 %s2397_s9, 3 }
   0xf   : > { %s2066_s21 = scalar_lea.vmem %s2389_s1, %s1546_s16  ;;  %1882 = vmatpush1.bf16.msra.mxu1 %v1904_v6  ;;  %1834 = vmatpush3.bf16.msra.mxu0 %v1903_v5  ;;  %s2084_s10 = scalar_lea.vmem %s2388_s0, %s1680_s27 }
  0x10   : > { %v1909_v9 = vld [vmem:[%s2066_s21] sm:$0xff]   ;;  %1874 = vmatprep.subr.bf16.mxu1 %v1985_v1  ;;  %1835 = vmatprep.subr.bf16.mxu0 %v1905_v7  ;;  %v1910_v13 = vld [vmem:[%s2066_s21 + $0x8] sm:$0xff]   ;;  %v1919_v14 = vld [vmem:[%s2084_s10 + $0x54] ss:$8 sps:$4 sm:$0xff]   ;;  %s2236_s29 = scalar_lea.vmem %s2395_s7, %s1546_s16 }
  0x11   : > { %1839 = vmatprep.mubr.msk.bf16.mxu0 %vm506_vm0, %v1909_v9  ;;  %v1913_v16 = vld [vmem:[%s2066_s21 + $0x10] sm:$0xff]   ;;  %1632 = vmatprep.mubr.msk.bf16.mxu1 %vm918_vm2, %v1919_v14  ;;  %v1914_v18 = vld [vmem:[%s2066_s21 + $0x18] sm:$0xff]   ;;  %v1920_v20 = vld [vmem:[%s2066_s21 + $0x20] sm:$0xff]  }
  0x12   : > { %v1917_v22 = vld [vmem:[%s2084_s10 + $0x50] ss:$8 sps:$4 sm:$0xff]   ;;  %v1921_v23 = vld [vmem:[%s2066_s21 + $0x28] sm:$0xff]   ;;  %v1927_v28 = vld [vmem:[%s2084_s10 + $0x74] ss:$8 sps:$4 sm:$0xff]  }
  0x13   : > { %1883 = vmatpush1.bf16.msra.mxu1 %v1906_v8  ;;  %1836 = vmatpush3.bf16.msra.mxu0 %v1905_v7  ;;  %v1922_v24 = vld [vmem:[%s2084_s10 + $0x64] ss:$8 sps:$4 sm:$0xff]   ;;  %v1924_v25 = vld [vmem:[%s2066_s21 + $0x30] sm:$0xff]   ;;  %v1925_v26 = vld [vmem:[%s2084_s10 + $0x60] ss:$8 sps:$4 sm:$0xff]  }
  0x14   : > { %1875 = vmatprep.subr.bf16.mxu1 %v1985_v1  ;;  %1889 = vmatprep.subr.msk.bf16.mxu0 %vm555_vm1, %v1907_v10  ;;  %v1926_v27 = vld [vmem:[%s2066_s21 + $0x38] sm:$0xff]   ;;  %v1929_v29 = vld [vmem:[%s2066_s21 + $0x40] sm:$0xff]   ;;  %v1931_v31 = vld [vmem:[%s2066_s21 + $0x48] sm:$0xff]  }
  0x15   : > { %v1930_v30 = vld [vmem:[%s2084_s10 + $0x70] ss:$8 sps:$4 sm:$0xff]   ;;  %v1932_v32 = vld [vmem:[%s2084_s10 + $0x84] ss:$8 sps:$4 sm:$0xff]   ;;  %v1935_v34 = vld [vmem:[%s2084_s10 + $0x80] ss:$8 sps:$4 sm:$0xff]  }
  0x16   : > { %v1934_v33 = vld [vmem:[%s2066_s21 + $0x50] sm:$0xff]   ;;  %v1936_v35 = vld [vmem:[%s2066_s21 + $0x58] sm:$0xff]   ;;  %v1939_v37 = vld [vmem:[%s2066_s21 + $0x60] sm:$0xff]  }
  0x17   : > { %1884 = vmatpush1.bf16.msra.mxu1 %v1908_v11  ;;  %1838 = vmatpush3.bf16.msra.mxu0 %v557_v12  ;;  %v1937_v36 = vld [vmem:[%s2084_s10 + $0x94] ss:$8 sps:$4 sm:$0xff]   ;;  %v1940_v38 = vld [vmem:[%s2084_s10 + $0x90] ss:$8 sps:$4 sm:$0xff]   ;;  %v1941_v39 = vld [vmem:[%s2066_s21 + $0x68] sm:$0xff]  }
  0x18   : > { %1876 = vmatprep.subr.bf16.mxu1 %v1985_v1  ;;  %967 = vmatprep.subr.bf16.mxu0 %v1985_v1  ;;  %v1942_v40 = vld [vmem:[%s2084_s10 + $0xa4] ss:$8 sps:$4 sm:$0xff]   ;;  %v1944_v41 = vld [vmem:[%s2066_s21 + $0x70] sm:$0xff]   ;;  %v1945_v42 = vld [vmem:[%s2084_s10 + $0xa0] ss:$8 sps:$4 sm:$0xff]  }
  0x19   : > { %v1946_v43 = vld [vmem:[%s2066_s21 + $0x78] sm:$0xff]   ;;  %v1951_v45 = vld [vmem:[%s2084_s10 + $0x4] ss:$8 sps:$4 sm:$0xff]   ;;  %v1949_v46 = vld [vmem:[%s2084_s10] ss:$8 sps:$4 sm:$0xff]  }
  0x1a   : > { %1840 = vmatmul.mubr.msk.bf16.vlgmr.msra.gmra.mrb[0].mxu0 %vm506_vm0, %v1910_v13  ;;  %v1947_v44 = vld [vmem:[%s2084_s10 + $0xb4] ss:$8 sps:$4 sm:$0xff]   ;;  %v1952_v47 = vld [vmem:[%s2084_s10 + $0xb0] ss:$8 sps:$4 sm:$0xff]   ;;  %v1953_v48 = vld [vmem:[%s2084_s10 + $0xc4] ss:$8 sps:$4 sm:$0xff]  }
  0x1b   : > { %1885 = vmatpush1.bf16.msra.mxu1 %v1911_v15  ;;  %968 = vmatpush1.bf16.msra.mxu0 %v1900_v2  ;;  %v1955_v49 = vld [vmem:[%s2084_s10 + $0x14] ss:$8 sps:$4 sm:$0xff]   ;;  %v1957_v50 = vld [vmem:[%s2084_s10 + $0xc0] ss:$8 sps:$4 sm:$0xff]   ;;  %v1958_v51 = vld [vmem:[%s2084_s10 + $0x10] ss:$8 sps:$4 sm:$0xff]  }
  0x1c   : > { %1877 = vmatprep.subr.bf16.mxu1 %v1985_v1  ;;  %1843 = vmatprep.mubr.msk.bf16.mxu0 %vm506_vm0, %v1913_v16  ;;  %v1959_v52 = vld [vmem:[%s2084_s10 + $0xd4] ss:$8 sps:$4 sm:$0xff]   ;;  %v1961_v53 = vld [vmem:[%s2084_s10 + $0x24] ss:$8 sps:$4 sm:$0xff]   ;;  %v1963_v54 = vld [vmem:[%s2084_s10 + $0xd0] ss:$8 sps:$4 sm:$0xff]  }
  0x1d   : > { %969 = vmatprep.subr.bf16.mxu0 %v1985_v1  ;;  %v1964_v55 = vld [vmem:[%s2084_s10 + $0x20] ss:$8 sps:$4 sm:$0xff]   ;;  %v1965_v56 = vld [vmem:[%s2084_s10 + $0xe4] ss:$8 sps:$4 sm:$0xff]   ;;  %v1967_v57 = vld [vmem:[%s2084_s10 + $0x34] ss:$8 sps:$4 sm:$0xff]  }
  0x1e   : > { %v1969_v58 = vld [vmem:[%s2084_s10 + $0xe0] ss:$8 sps:$4 sm:$0xff]   ;;  %v1970_v59 = vld [vmem:[%s2084_s10 + $0x30] ss:$8 sps:$4 sm:$0xff]   ;;  %v1971_v60 = vld [vmem:[%s2084_s10 + $0xf4] ss:$8 sps:$4 sm:$0xff]  }
  0x1f   : > { %1886 = vmatpush1.bf16.msra.mxu1 %v1912_v17  ;;  %970 = vmatpush1.bf16.msra.mxu0 %v1902_v4  ;;  %v1973_v61 = vld [vmem:[%s2084_s10 + $0x44] ss:$8 sps:$4 sm:$0xff]   ;;  %v1975_v62 = vld [vmem:[%s2084_s10 + $0xf0] ss:$8 sps:$4 sm:$0xff]   ;;  %v1976_v63 = vld [vmem:[%s2084_s10 + $0x40] ss:$8 sps:$4 sm:$0xff]  }
  0x20   : > { %1878 = vmatprep.subr.bf16.mxu1 %v1985_v1  ;;  %971 = vmatprep.subr.bf16.mxu0 %v1985_v1  ;;  %v2209_v10 = vld [vmem:[%s2392_s4] ss:$0 sm:$0xff] }
  0x21   : > { %v2216_v14 = vld [vmem:[%s2393_s5] ss:$0 sm:$0xff] }
  0x22   : > { %1844 = vmatmul.mubr.msk.bf16.gmra.mrb[4].mxu0 %vm506_vm0, %v1914_v18 }
  0x23   : > { %1887 = vmatpush1.bf16.msra.mxu1 %v1915_v19  ;;  %1847 = vmatprep.mubr.msk.bf16.mxu0 %vm506_vm0, %v1920_v20 }
  0x24   : > { %1879 = vmatprep.subr.bf16.mxu1 %v1985_v1  ;;  %972 = vmatpush1.bf16.msra.mxu0 %v1904_v6 }
  0x25   : > { %973 = vmatprep.subr.bf16.mxu0 %v1985_v1 }
  0x27   : > { %1888 = vmatpush1.bf16.msra.mxu1 %v1916_v21 }
  0x28   : > { %974 = vmatpush1.bf16.msra.mxu0 %v1906_v8 }
  0x29   : > { %975 = vmatprep.subr.bf16.mxu0 %v1985_v1 }
  0x2a   : > { %1040 = vmatmul.mubr.bf16.vlgmr.msra.gmra.mrb[0].mxu1 %v1917_v22  ;;  %1848 = vmatmul.mubr.msk.bf16.gmra.mrb[8].mxu0 %vm506_vm0, %v1921_v23 }
  0x2b   : > { %1633 = vmatprep.mubr.msk.bf16.mxu1 %vm918_vm2, %v1922_v24  ;;  %1851 = vmatprep.mubr.msk.bf16.mxu0 %vm506_vm0, %v1924_v25 }
  0x2c   : > { %976 = vmatpush1.bf16.msra.mxu0 %v1908_v11 }
  0x2d   : > { %977 = vmatprep.subr.bf16.mxu0 %v1985_v1 }
  0x30   : > { %978 = vmatpush1.bf16.msra.mxu0 %v1911_v15 }
  0x31   : > { %979 = vmatprep.subr.bf16.mxu0 %v1985_v1 }
  0x32   : > { %1048 = vmatmul.mubr.bf16.gmra.mrb[4].mxu1 %v1925_v26  ;;  %1852 = vmatmul.mubr.msk.bf16.gmra.mrb[12].mxu0 %vm506_vm0, %v1926_v27 }
  0x33   : > { %1634 = vmatprep.mubr.msk.bf16.mxu1 %vm918_vm2, %v1927_v28  ;;  %1855 = vmatprep.mubr.msk.bf16.mxu0 %vm506_vm0, %v1929_v29 }
  0x34   : > { %980 = vmatpush1.bf16.msra.mxu0 %v1912_v17 }
  0x35   : > { %981 = vmatprep.subr.bf16.mxu0 %v1985_v1 }
  0x38   : > { %982 = vmatpush1.bf16.msra.mxu0 %v1915_v19 }
  0x39   : > { %983 = vmatprep.subr.bf16.mxu0 %v1985_v1 }
  0x3a   : > { %1056 = vmatmul.mubr.bf16.gmra.mrb[8].mxu1 %v1930_v30  ;;  %1856 = vmatmul.mubr.msk.bf16.gmra.mrb[16].mxu0 %vm506_vm0, %v1931_v31 }
  0x3b   : > { %1635 = vmatprep.mubr.msk.bf16.mxu1 %vm918_vm2, %v1932_v32  ;;  %1859 = vmatprep.mubr.msk.bf16.mxu0 %vm506_vm0, %v1934_v33 }
  0x3c   : > { %984 = vmatpush1.bf16.msra.mxu0 %v1916_v21  ;;  %v2224_v21 = vld [vmem:[%s2394_s6] ss:$0 sm:$0xff] }
  0x42   : > { %1064 = vmatmul.mubr.bf16.gmra.mrb[12].mxu1 %v1935_v34  ;;  %1860 = vmatmul.mubr.msk.bf16.gmra.mrb[20].mxu0 %vm506_vm0, %v1936_v35 }
  0x43   : > { %1636 = vmatprep.mubr.msk.bf16.mxu1 %vm918_vm2, %v1937_v36  ;;  %1863 = vmatprep.mubr.msk.bf16.mxu0 %vm506_vm0, %v1939_v37 }
  0x4a   : > { %1072 = vmatmul.mubr.bf16.gmra.mrb[16].mxu1 %v1940_v38  ;;  %1864 = vmatmul.mubr.msk.bf16.gmra.mrb[24].mxu0 %vm506_vm0, %v1941_v39 }
  0x4b   : > { %1637 = vmatprep.mubr.msk.bf16.mxu1 %vm918_vm2, %v1942_v40  ;;  %1867 = vmatprep.mubr.msk.bf16.mxu0 %vm506_vm0, %v1944_v41 }
  0x52   : > { %1080 = vmatmul.mubr.bf16.gmra.mrb[20].mxu1 %v1945_v42  ;;  %1868 = vmatmul.mubr.msk.bf16.gmra.mrb[28].mxu0 %vm506_vm0, %v1946_v43 }
  0x53   : > { %1638 = vmatprep.mubr.msk.bf16.mxu1 %vm918_vm2, %v1947_v44  ;;  %1627 = vmatprep.mubr.msk.bf16.mxu0 %vm918_vm2, %v1951_v45 }
  0x5a   : > { %1088 = vmatmul.mubr.bf16.gmra.mrb[24].mxu1 %v1952_v47  ;;  %1000 = vmatmul.mubr.bf16.vlgmr.msra.gmra.mrb[32].mxu0 %v1949_v46 }
  0x5b   : > { %1639 = vmatprep.mubr.msk.bf16.mxu1 %vm918_vm2, %v1953_v48  ;;  %1628 = vmatprep.mubr.msk.bf16.mxu0 %vm918_vm2, %v1955_v49 }
  0x62   : > { %1096 = vmatmul.mubr.bf16.gmra.mrb[28].mxu1 %v1957_v50  ;;  %1008 = vmatmul.mubr.bf16.gmra.mrb[36].mxu0 %v1958_v51 }
  0x63   : > { %1640 = vmatprep.mubr.msk.bf16.mxu1 %vm918_vm2, %v1959_v52  ;;  %1629 = vmatprep.mubr.msk.bf16.mxu0 %vm918_vm2, %v1961_v53 }
  0x6a   : > { %1104 = vmatmul.mubr.bf16.gmra.mrb[32].mxu1 %v1963_v54  ;;  %1016 = vmatmul.mubr.bf16.gmra.mrb[40].mxu0 %v1964_v55 }
  0x6b   : > { %1641 = vmatprep.mubr.msk.bf16.mxu1 %vm918_vm2, %v1965_v56  ;;  %1630 = vmatprep.mubr.msk.bf16.mxu0 %vm918_vm2, %v1967_v57 }
  0x72   : > { %1112 = vmatmul.mubr.bf16.gmra.mrb[36].mxu1 %v1969_v58  ;;  %1024 = vmatmul.mubr.bf16.gmra.mrb[44].mxu0 %v1970_v59 }
  0x73   : > { %1642 = vmatprep.mubr.msk.bf16.mxu1 %vm918_vm2, %v1971_v60  ;;  %1631 = vmatprep.mubr.msk.bf16.mxu0 %vm918_vm2, %v1973_v61 }
  0x7a   : > { %1120 = vmatmul.mubr.bf16.gmra.mrb[40].mxu1 %v1975_v62  ;;  %1032 = vmatmul.mubr.bf16.gmra.mrb[48].mxu0 %v1976_v63 }
  0xed   : > { %v2190_v0 = vpop.f32.mrb[0].mxu0 }
  0xee   : > { %v2192_v1 = vpop.f32.mrb[1].mxu0 }
  0xef   : > { %v2194_v2 = vpop.f32.mrb[2].mxu0 }
  0xf0   : > { %v2196_v3 = vpop.f32.mrb[3].mxu0 }
  0xf5   : > { %v2198_v4 = vpop.f32.mrb[4].mxu0 }
  0xf6   : > { %v2200_v5 = vpop.f32.mrb[5].mxu0 }
  0xf7   : > { %v2202_v6 = vpop.f32.mrb[6].mxu0 }
  0xf8   : > { %v2204_v7 = vpop.f32.mrb[7].mxu0 }
  0xfd   : > { %v1041_v8 = vpop.f32.mrb[0].mxu1  ;;  %v1849_v9 = vpop.f32.mrb[8].mxu0 }
  0xfe   : > { %v1042_v11 = vadd.f32 %v1849_v9, %v1041_v8  ;;  %v1043_v12 = vpop.f32.mrb[1].mxu1  ;;  %v2211_v13 = vpop.f32.mrb[9].mxu0 }
  0xff   : > { %v1044_v15 = vpop.f32.mrb[2].mxu1  ;;  %v1850_v16 = vpop.f32.mrb[10].mxu0 }
 0x100   : > { %v1145_v17 = vmul.f32 %v2209_v10, %v1042_v11  ;;  %v1045_v18 = vadd.f32 %v1850_v16, %v1044_v15  ;;  %v1046_v19 = vpop.f32.mrb[3].mxu1  ;;  %v2219_v20 = vpop.f32.mrb[11].mxu0 }
 0x102   : > { %v1184_v22 = vadd.f32 %v2216_v14, %v1145_v17  ;;  %v1146_v23 = vmul.f32 %v2209_v10, %v1045_v18 }
 0x104   : > { %v1255_v24 = vmul.f32 %v2224_v21, %v1184_v22  ;;  %v1185_v25 = vadd.f32 %v2216_v14, %v1146_v23  ;;  %vm1216_vm3 = vcmp.gt.f32.partialorder %v1184_v22, 0.0 }
 0x105   : > { %v1049_v26 = vpop.f32.mrb[4].mxu1  ;;  %v1853_v27 = vpop.f32.mrb[12].mxu0 }
 0x106   : > { %vm1217_vm4 = vcmp.gt.f32.partialorder %v1185_v25, 0.0  ;;  %v1256_v28 = vmul.f32 %v2224_v21, %v1185_v25  ;;  %v1051_v29 = vpop.f32.mrb[5].mxu1  ;;  %v641_v30 = vpop.f32.mrb[13].mxu0  ;;  %v1287_v34 = vsel %vm1216_vm3, %v1184_v22, %v1255_v24 }
 0x107   : > { %v1050_v31 = vadd.f32 %v1049_v26, %v641_v30  ;;  %v1052_v32 = vpop.f32.mrb[6].mxu1  ;;  %v1854_v33 = vpop.f32.mrb[14].mxu0 }
 0x108   : > { %v1288_v35 = vsel %vm1217_vm4, %v1185_v25, %v1256_v28  ;;  %v1054_v36 = vpop.f32.mrb[7].mxu1  ;;  %v644_v37 = vpop.f32.mrb[15].mxu0 }
 0x109   : > { %v1741_v38 = vpack.c.bf16 %v1288_v35, %v1287_v34  ;;  %v1147_v39 = vmul.f32 %v2209_v10, %v1050_v31  ;;  %v1053_v40 = vadd.f32 %v1052_v32, %v644_v37 }
 0x10b   : > { %1797 = vst [vmem:[%s2236_s29 + $0x28] sm:$0xff] %v1741_v38   ;;  %v1186_v41 = vadd.f32 %v2216_v14, %v1147_v39  ;;  %v1148_v42 = vmul.f32 %v2209_v10, %v1053_v40 }
 0x10d   : > { %v1257_v43 = vmul.f32 %v2224_v21, %v1186_v41  ;;  %v1187_v44 = vadd.f32 %v2216_v14, %v1148_v42  ;;  %v1057_v45 = vpop.f32.mrb[8].mxu1  ;;  %v1857_v46 = vpop.f32.mrb[16].mxu0  ;;  %vm1218_vm5 = vcmp.gt.f32.partialorder %v1186_v41, 0.0 }
 0x10e   : > { %v1058_v47 = vadd.f32 %v1853_v27, %v1057_v45  ;;  %v1059_v48 = vpop.f32.mrb[9].mxu1  ;;  %v657_v49 = vpop.f32.mrb[17].mxu0 }
 0x10f   : > { %vm1219_vm6 = vcmp.gt.f32.partialorder %v1187_v44, 0.0  ;;  %v1258_v50 = vmul.f32 %v2224_v21, %v1187_v44  ;;  %v1060_v51 = vpop.f32.mrb[10].mxu1  ;;  %v1858_v52 = vpop.f32.mrb[18].mxu0  ;;  %v1289_v57 = vsel %vm1218_vm5, %v1186_v41, %v1257_v43 }
 0x110   : > { %v1149_v53 = vmul.f32 %v2209_v10, %v1058_v47  ;;  %v1061_v54 = vadd.f32 %v1854_v33, %v1060_v51  ;;  %v1062_v55 = vpop.f32.mrb[11].mxu1  ;;  %v660_v56 = vpop.f32.mrb[19].mxu0 }
 0x111   : > { %v1290_v58 = vsel %vm1219_vm6, %v1187_v44, %v1258_v50 }
 0x112   : > { %v1746_v59 = vpack.c.bf16 %v1290_v58, %v1289_v57  ;;  %v1188_v60 = vadd.f32 %v2216_v14, %v1149_v53  ;;  %v1150_v61 = vmul.f32 %v2209_v10, %v1061_v54 }
 0x114   : > { %1798 = vst [vmem:[%s2236_s29 + $0x30] sm:$0xff] %v1746_v59   ;;  %v1259_v62 = vmul.f32 %v2224_v21, %v1188_v60  ;;  %v1189_v63 = vadd.f32 %v2216_v14, %v1150_v61  ;;  %vm1220_vm7 = vcmp.gt.f32.partialorder %v1188_v60, 0.0 }
 0x115   : > { %v1065_v8 = vpop.f32.mrb[12].mxu1  ;;  %v2251_v9 = vpop.f32.mrb[20].mxu0 }
 0x116   : > { %vm1221_vm8 = vcmp.gt.f32.partialorder %v1189_v63, 0.0  ;;  %v1260_v11 = vmul.f32 %v2224_v21, %v1189_v63  ;;  %v1066_v12 = vadd.f32 %v1065_v8, %v657_v49  ;;  %v1067_v15 = vpop.f32.mrb[13].mxu1  ;;  %v673_v16 = vpop.f32.mrb[21].mxu0  ;;  %v1291_v19 = vsel %vm1220_vm7, %v1188_v60, %v1259_v62 }
 0x117   : > { %v1068_v17 = vpop.f32.mrb[14].mxu1  ;;  %v2254_v18 = vpop.f32.mrb[22].mxu0 }
 0x118   : > { %v1292_v22 = vsel %vm1221_vm8, %v1189_v63, %v1260_v11  ;;  %v1151_v23 = vmul.f32 %v2209_v10, %v1066_v12  ;;  %v1069_v24 = vadd.f32 %v1068_v17, %v660_v56  ;;  %v1070_v25 = vpop.f32.mrb[15].mxu1  ;;  %v676_v26 = vpop.f32.mrb[23].mxu0 }
 0x119   : > { %v1751_v27 = vpack.c.bf16 %v1292_v22, %v1291_v19 }
 0x11a   : > { %v1190_v28 = vadd.f32 %v2216_v14, %v1151_v23  ;;  %v1152_v29 = vmul.f32 %v2209_v10, %v1069_v24 }
 0x11b   : > { %1799 = vst [vmem:[%s2236_s29 + $0x38] sm:$0xff] %v1751_v27  }
 0x11c   : > { %v1261_v30 = vmul.f32 %v2224_v21, %v1190_v28  ;;  %v1191_v31 = vadd.f32 %v2216_v14, %v1152_v29  ;;  %vm1222_vm9 = vcmp.gt.f32.partialorder %v1190_v28, 0.0 }
 0x11d   : > { %v1073_v32 = vpop.f32.mrb[16].mxu1  ;;  %v2262_v33 = vpop.f32.mrb[24].mxu0 }
 0x11e   : > { %vm1223_vm10 = vcmp.gt.f32.partialorder %v1191_v31, 0.0  ;;  %v1262_v34 = vmul.f32 %v2224_v21, %v1191_v31  ;;  %v1074_v35 = vadd.f32 %v1857_v46, %v1073_v32  ;;  %v1075_v36 = vpop.f32.mrb[17].mxu1  ;;  %v2265_v37 = vpop.f32.mrb[25].mxu0  ;;  %v1293_v40 = vsel %vm1222_vm9, %v1190_v28, %v1261_v30 }
 0x11f   : > { %v1076_v38 = vpop.f32.mrb[18].mxu1  ;;  %v2267_v39 = vpop.f32.mrb[26].mxu0 }
 0x120   : > { %v1294_v41 = vsel %vm1223_vm10, %v1191_v31, %v1262_v34  ;;  %v1153_v42 = vmul.f32 %v2209_v10, %v1074_v35  ;;  %v1077_v43 = vadd.f32 %v1858_v52, %v1076_v38  ;;  %v1078_v44 = vpop.f32.mrb[19].mxu1  ;;  %v2270_v45 = vpop.f32.mrb[27].mxu0 }
 0x121   : > { %v1756_v47 = vpack.c.bf16 %v1294_v41, %v1293_v40 }
 0x122   : > { %v1192_v48 = vadd.f32 %v2216_v14, %v1153_v42  ;;  %v1154_v49 = vmul.f32 %v2209_v10, %v1077_v43 }
 0x123   : > { %1800 = vst [vmem:[%s2236_s29 + $0x40] sm:$0xff] %v1756_v47  }
 0x124   : > { %v1263_v46 = vmul.f32 %v2224_v21, %v1192_v48  ;;  %v1193_v50 = vadd.f32 %v2216_v14, %v1154_v49  ;;  %vm1224_vm11 = vcmp.gt.f32.partialorder %v1192_v48, 0.0 }
 0x125   : > { %v1081_v51 = vpop.f32.mrb[20].mxu1  ;;  %v2277_v53 = vpop.f32.mrb[28].mxu0 }
 0x126   : > { %vm1225_vm12 = vcmp.gt.f32.partialorder %v1193_v50, 0.0  ;;  %v1264_v52 = vmul.f32 %v2224_v21, %v1193_v50  ;;  %v1082_v54 = vadd.f32 %v1081_v51, %v673_v16  ;;  %v1083_v55 = vpop.f32.mrb[21].mxu1  ;;  %v2280_v56 = vpop.f32.mrb[29].mxu0  ;;  %v1295_v59 = vsel %vm1224_vm11, %v1192_v48, %v1263_v46 }
 0x127   : > { %v1084_v57 = vpop.f32.mrb[22].mxu1  ;;  %v2282_v58 = vpop.f32.mrb[30].mxu0 }
 0x128   : > { %v1296_v60 = vsel %vm1225_vm12, %v1193_v50, %v1264_v52  ;;  %v1155_v61 = vmul.f32 %v2209_v10, %v1082_v54  ;;  %v1085_v62 = vadd.f32 %v1084_v57, %v676_v26  ;;  %v1086_v63 = vpop.f32.mrb[23].mxu1  ;;  %v2285_v8 = vpop.f32.mrb[31].mxu0 }
 0x129   : > { %v1761_v11 = vpack.c.bf16 %v1296_v60, %v1295_v59 }
 0x12a   : > { %v1194_v12 = vadd.f32 %v2216_v14, %v1155_v61  ;;  %v1156_v15 = vmul.f32 %v2209_v10, %v1085_v62 }
 0x12b   : > { %1801 = vst [vmem:[%s2236_s29 + $0x48] sm:$0xff] %v1761_v11  }
 0x12c   : > { %vm1226_vm13 = vcmp.gt.f32.partialorder %v1194_v12, 0.0  ;;  %v1265_v16 = vmul.f32 %v2224_v21, %v1194_v12  ;;  %v1195_v17 = vadd.f32 %v2216_v14, %v1156_v15 }
 0x12d   : > { %v1089_v19 = vpop.f32.mrb[24].mxu1  ;;  %v1001_v22 = vpop.f32.mrb[32].mxu0 }
 0x12e   : > { %vm1227_vm14 = vcmp.gt.f32.partialorder %v1195_v17, 0.0  ;;  %v1266_v23 = vmul.f32 %v2224_v21, %v1195_v17  ;;  %v1090_v24 = vadd.f32 %v2251_v9, %v1089_v19  ;;  %v1091_v25 = vpop.f32.mrb[25].mxu1  ;;  %v1003_v26 = vpop.f32.mrb[33].mxu0  ;;  %v1297_v27 = vsel %vm1226_vm13, %v1194_v12, %v1265_v16 }
 0x12f   : > { %v1002_v28 = vadd.f32 %v1001_v22, %v2192_v1  ;;  %v1092_v29 = vpop.f32.mrb[26].mxu1  ;;  %v1004_v30 = vpop.f32.mrb[34].mxu0 }
 0x130   : > { %v1298_v31 = vsel %vm1227_vm14, %v1195_v17, %v1266_v23  ;;  %v1157_v32 = vmul.f32 %v2209_v10, %v1090_v24  ;;  %v1093_v34 = vadd.f32 %v2254_v18, %v1092_v29  ;;  %v1005_v35 = vadd.f32 %v1004_v30, %v2196_v3  ;;  %v1094_v36 = vpop.f32.mrb[27].mxu1  ;;  %v1006_v38 = vpop.f32.mrb[35].mxu0 }
 0x131   : > { %v1766_v40 = vpack.c.bf16 %v1298_v31, %v1297_v27  ;;  %v1135_v9 = vmul.f32 %v2209_v10, %v1002_v28 }
 0x132   : > { %v1196_v41 = vadd.f32 %v2216_v14, %v1157_v32  ;;  %v1158_v42 = vmul.f32 %v2209_v10, %v1093_v34  ;;  %v1136_v1 = vmul.f32 %v2209_v10, %v1005_v35 }
 0x133   : > { %1802 = vst [vmem:[%s2236_s29 + $0x50] sm:$0xff] %v1766_v40   ;;  %v1174_v43 = vadd.f32 %v2216_v14, %v1135_v9 }
 0x134   : > { %vm1228_vm15 = vcmp.gt.f32.partialorder %v1196_v41, 0.0  ;;  %v1267_v44 = vmul.f32 %v2224_v21, %v1196_v41  ;;  %v1197_v18 = vadd.f32 %v2216_v14, %v1158_v42  ;;  %v1175_v3 = vadd.f32 %v2216_v14, %v1136_v1 }
 0x135   : > { %vm1206_vm0 = vcmp.gt.f32.partialorder %v1174_v43, 0.0  ;;  %v1245_v47 = vmul.f32 %v2224_v21, %v1174_v43  ;;  %v1097_v48 = vpop.f32.mrb[28].mxu1  ;;  %v1009_v49 = vpop.f32.mrb[36].mxu0 }
 0x136   : > { %vm1229_vm1 = vcmp.gt.f32.partialorder %v1197_v18, 0.0  ;;  %v1268_v46 = vmul.f32 %v2224_v21, %v1197_v18  ;;  %vm1207_vm2 = vcmp.gt.f32.partialorder %v1175_v3, 0.0  ;;  %v1099_v50 = vpop.f32.mrb[29].mxu1  ;;  %v1011_v51 = vpop.f32.mrb[37].mxu0  ;;  %v1299_v52 = vsel %vm1228_vm15, %v1196_v41, %v1267_v44 }
 0x137   : > { %v1246_v54 = vmul.f32 %v2224_v21, %v1175_v3  ;;  %v1098_v55 = vadd.f32 %v1097_v48, %v2265_v37  ;;  %v1010_v57 = vadd.f32 %v2190_v0, %v1009_v49  ;;  %v1100_v59 = vpop.f32.mrb[30].mxu1  ;;  %v1012_v60 = vpop.f32.mrb[38].mxu0  ;;  %v1277_v61 = vsel %vm1206_vm0, %v1174_v43, %v1245_v47 }
 0x138   : > { %v1300_v62 = vsel %vm1229_vm1, %v1197_v18, %v1268_v46  ;;  %v1101_v63 = vadd.f32 %v1100_v59, %v2270_v45  ;;  %v1013_v11 = vadd.f32 %v2194_v2, %v1012_v60  ;;  %v1102_v12 = vpop.f32.mrb[31].mxu1  ;;  %v1014_v15 = vpop.f32.mrb[39].mxu0 }
 0x139   : > { %v1771_v16 = vpack.c.bf16 %v1300_v62, %v1299_v52  ;;  %v1278_v17 = vsel %vm1207_vm2, %v1175_v3, %v1246_v54  ;;  %v1159_v19 = vmul.f32 %v2209_v10, %v1098_v55  ;;  %v1137_v37 = vmul.f32 %v2209_v10, %v1010_v57 }
 0x13a   : > { %v1716_v0 = vpack.c.bf16 %v1278_v17, %v1277_v61  ;;  %v1160_v22 = vmul.f32 %v2209_v10, %v1101_v63  ;;  %v1138_v23 = vmul.f32 %v2209_v10, %v1013_v11 }
 0x13b   : > { %1803 = vst [vmem:[%s2236_s29 + $0x58] sm:$0xff] %v1771_v16   ;;  %v1198_v24 = vadd.f32 %v2216_v14, %v1159_v19  ;;  %v1176_v45 = vadd.f32 %v2216_v14, %v1137_v37 }
 0x13c   : > { %1717 = vst [vmem:[%s2236_s29] sm:$0xff] %v1716_v0   ;;  %v1199_v2 = vadd.f32 %v2216_v14, %v1160_v22  ;;  %v1177_v25 = vadd.f32 %v2216_v14, %v1138_v23 }
 0x13d   : > { %vm1230_vm3 = vcmp.gt.f32.partialorder %v1198_v24, 0.0  ;;  %v1269_v26 = vmul.f32 %v2224_v21, %v1198_v24  ;;  %vm1208_vm4 = vcmp.gt.f32.partialorder %v1176_v45, 0.0  ;;  %v1247_v27 = vmul.f32 %v2224_v21, %v1176_v45  ;;  %v1105_v28 = vpop.f32.mrb[32].mxu1  ;;  %v1017_v29 = vpop.f32.mrb[40].mxu0 }
 0x13e   : > { %vm1231_vm5 = vcmp.gt.f32.partialorder %v1199_v2, 0.0  ;;  %v1270_v30 = vmul.f32 %v2224_v21, %v1199_v2  ;;  %vm1209_vm6 = vcmp.gt.f32.partialorder %v1177_v25, 0.0  ;;  %v1248_v31 = vmul.f32 %v2224_v21, %v1177_v25  ;;  %v1107_v32 = vpop.f32.mrb[33].mxu1  ;;  %v1019_v34 = vpop.f32.mrb[41].mxu0 }
 0x13f   : > { %v1301_v35 = vsel %vm1230_vm3, %v1198_v24, %v1269_v26  ;;  %v1279_v36 = vsel %vm1208_vm4, %v1176_v45, %v1247_v27  ;;  %v1106_v38 = vadd.f32 %v2262_v33, %v1105_v28  ;;  %v1018_v40 = vadd.f32 %v1017_v29, %v2200_v5  ;;  %v1108_v9 = vpop.f32.mrb[34].mxu1  ;;  %v1020_v41 = vpop.f32.mrb[42].mxu0 }
 0x140   : > { %v1302_v42 = vsel %vm1231_vm5, %v1199_v2, %v1270_v30  ;;  %v1280_v1 = vsel %vm1209_vm6, %v1177_v25, %v1248_v31  ;;  %v1109_v43 = vadd.f32 %v2267_v39, %v1108_v9  ;;  %v1021_v44 = vadd.f32 %v1020_v41, %v2204_v7  ;;  %v1110_v18 = vpop.f32.mrb[35].mxu1  ;;  %v1022_v3 = vpop.f32.mrb[43].mxu0 }
 0x141   : > { %v1776_v47 = vpack.c.bf16 %v1302_v42, %v1301_v35  ;;  %v1721_v48 = vpack.c.bf16 %v1280_v1, %v1279_v36  ;;  %v1161_v49 = vmul.f32 %v2209_v10, %v1106_v38  ;;  %v1139_v33 = vmul.f32 %v2209_v10, %v1018_v40 }
 0x142   : > { %v1162_v46 = vmul.f32 %v2209_v10, %v1109_v43  ;;  %v1140_v5 = vmul.f32 %v2209_v10, %v1021_v44 }
 0x143   : > { %1804 = vst [vmem:[%s2236_s29 + $0x60] sm:$0xff] %v1776_v47   ;;  %1793 = vst [vmem:[%s2236_s29 + $0x8] sm:$0xff] %v1721_v48   ;;  %v1200_v50 = vadd.f32 %v2216_v14, %v1161_v49  ;;  %v1178_v39 = vadd.f32 %v2216_v14, %v1139_v33 }
 0x144   : > { %v1201_v7 = vadd.f32 %v2216_v14, %v1162_v46  ;;  %v1179_v51 = vadd.f32 %v2216_v14, %v1140_v5 }
 0x145   : > { %vm1232_vm7 = vcmp.gt.f32.partialorder %v1200_v50, 0.0  ;;  %v1271_v52 = vmul.f32 %v2224_v21, %v1200_v50  ;;  %vm1210_vm8 = vcmp.gt.f32.partialorder %v1178_v39, 0.0  ;;  %v1249_v54 = vmul.f32 %v2224_v21, %v1178_v39  ;;  %v1113_v55 = vpop.f32.mrb[36].mxu1  ;;  %v1025_v57 = vpop.f32.mrb[44].mxu0 }
 0x146   : > { %vm1233_vm9 = vcmp.gt.f32.partialorder %v1201_v7, 0.0  ;;  %v1272_v59 = vmul.f32 %v2224_v21, %v1201_v7  ;;  %vm1211_vm10 = vcmp.gt.f32.partialorder %v1179_v51, 0.0  ;;  %v1250_v60 = vmul.f32 %v2224_v21, %v1179_v51  ;;  %v1115_v61 = vpop.f32.mrb[37].mxu1  ;;  %v1027_v62 = vpop.f32.mrb[45].mxu0 }
 0x147   : > { %v1303_v63 = vsel %vm1232_vm7, %v1200_v50, %v1271_v52  ;;  %v1281_v11 = vsel %vm1210_vm8, %v1178_v39, %v1249_v54  ;;  %v1114_v12 = vadd.f32 %v1113_v55, %v2280_v56  ;;  %v1026_v15 = vadd.f32 %v2198_v4, %v1025_v57  ;;  %v1116_v16 = vpop.f32.mrb[38].mxu1  ;;  %v1028_v17 = vpop.f32.mrb[46].mxu0 }
 0x148   : > { %v1304_v19 = vsel %vm1233_vm9, %v1201_v7, %v1272_v59  ;;  %v1282_v37 = vsel %vm1211_vm10, %v1179_v51, %v1250_v60  ;;  %v1117_v0 = vadd.f32 %v1116_v16, %v2285_v8  ;;  %v1029_v22 = vadd.f32 %v2202_v6, %v1028_v17  ;;  %v1118_v23 = vpop.f32.mrb[39].mxu1  ;;  %v1030_v24 = vpop.f32.mrb[47].mxu0 }
 0x149   : > { %v1781_v45 = vpack.c.bf16 %v1304_v19, %v1303_v63  ;;  %v1726_v2 = vpack.c.bf16 %v1282_v37, %v1281_v11  ;;  %v1163_v25 = vmul.f32 %v2209_v10, %v1114_v12  ;;  %v1141_v56 = vmul.f32 %v2209_v10, %v1026_v15 }
 0x14a   : > { %v1164_v26 = vmul.f32 %v2209_v10, %v1117_v0  ;;  %v1142_v4 = vmul.f32 %v2209_v10, %v1029_v22 }
 0x14b   : > { %1805 = vst [vmem:[%s2236_s29 + $0x68] sm:$0xff] %v1781_v45   ;;  %1794 = vst [vmem:[%s2236_s29 + $0x10] sm:$0xff] %v1726_v2   ;;  %v1202_v27 = vadd.f32 %v2216_v14, %v1163_v25  ;;  %v1180_v8 = vadd.f32 %v2216_v14, %v1141_v56 }
 0x14c   : > { %v1203_v6 = vadd.f32 %v2216_v14, %v1164_v26  ;;  %v1181_v28 = vadd.f32 %v2216_v14, %v1142_v4 }
 0x14d   : > { %vm1234_vm11 = vcmp.gt.f32.partialorder %v1202_v27, 0.0  ;;  %v1273_v29 = vmul.f32 %v2224_v21, %v1202_v27  ;;  %vm1212_vm12 = vcmp.gt.f32.partialorder %v1180_v8, 0.0  ;;  %v1251_v30 = vmul.f32 %v2224_v21, %v1180_v8  ;;  %v1121_v31 = vpop.f32.mrb[40].mxu1  ;;  %v1033_v32 = vpop.f32.mrb[48].mxu0 }
 0x14e   : > { %vm1235_vm13 = vcmp.gt.f32.partialorder %v1203_v6, 0.0  ;;  %v1274_v34 = vmul.f32 %v2224_v21, %v1203_v6  ;;  %vm1213_vm14 = vcmp.gt.f32.partialorder %v1181_v28, 0.0  ;;  %v1252_v35 = vmul.f32 %v2224_v21, %v1181_v28  ;;  %v1123_v36 = vpop.f32.mrb[41].mxu1  ;;  %v1035_v38 = vpop.f32.mrb[49].mxu0 }
 0x14f   : > { %v1305_v40 = vsel %vm1234_vm11, %v1202_v27, %v1273_v29  ;;  %v1283_v9 = vsel %vm1212_vm12, %v1180_v8, %v1251_v30  ;;  %v1122_v41 = vadd.f32 %v2277_v53, %v1121_v31  ;;  %v1034_v42 = vadd.f32 %v1033_v32, %v2211_v13  ;;  %v1124_v1 = vpop.f32.mrb[42].mxu1  ;;  %v1036_v43 = vpop.f32.mrb[50].mxu0 }
 0x150   : > { %v1306_v44 = vsel %vm1235_vm13, %v1203_v6, %v1274_v34  ;;  %v1284_v18 = vsel %vm1213_vm14, %v1181_v28, %v1252_v35  ;;  %v1125_v3 = vadd.f32 %v2282_v58, %v1124_v1  ;;  %v1037_v47 = vadd.f32 %v1036_v43, %v2219_v20  ;;  %v1126_v48 = vpop.f32.mrb[43].mxu1  ;;  %v1038_v49 = vpop.f32.mrb[51].mxu0 }
 0x151   : > { %v1786_v33 = vpack.c.bf16 %v1306_v44, %v1305_v40  ;;  %v1731_v46 = vpack.c.bf16 %v1284_v18, %v1283_v9  ;;  %v1165_v5 = vmul.f32 %v2209_v10, %v1122_v41  ;;  %v1143_v53 = vmul.f32 %v2209_v10, %v1034_v42 }
 0x152   : > { %v1166_v50 = vmul.f32 %v2209_v10, %v1125_v3  ;;  %v1144_v13 = vmul.f32 %v2209_v10, %v1037_v47 }
 0x153   : > { %1806 = vst [vmem:[%s2236_s29 + $0x70] sm:$0xff] %v1786_v33   ;;  %1795 = vst [vmem:[%s2236_s29 + $0x18] sm:$0xff] %v1731_v46   ;;  %v1204_v39 = vadd.f32 %v2216_v14, %v1165_v5  ;;  %v1182_v58 = vadd.f32 %v2216_v14, %v1143_v53 }
 0x154   : > { %v1205_v20 = vadd.f32 %v2216_v14, %v1166_v50  ;;  %v1183_v7 = vadd.f32 %v2216_v14, %v1144_v13 }
 0x155   : > { %vm1236_vm15 = vcmp.gt.f32.partialorder %v1204_v39, 0.0  ;;  %v1275_v51 = vmul.f32 %v2224_v21, %v1204_v39  ;;  %vm1214_vm0 = vcmp.gt.f32.partialorder %v1182_v58, 0.0  ;;  %v1253_v52 = vmul.f32 %v2224_v21, %v1182_v58 }
 0x156   : > { %vm1237_vm1 = vcmp.gt.f32.partialorder %v1205_v20, 0.0  ;;  %v1276_v10 = vmul.f32 %v2224_v21, %v1205_v20  ;;  %vm1215_vm2 = vcmp.gt.f32.partialorder %v1183_v7, 0.0  ;;  %v1254_v54 = vmul.f32 %v2224_v21, %v1183_v7 }
 0x157   : > { %v1307_v55 = vsel %vm1236_vm15, %v1204_v39, %v1275_v51  ;;  %v1285_v57 = vsel %vm1214_vm0, %v1182_v58, %v1253_v52 }
 0x158   : > { %v1308_v59 = vsel %vm1237_vm1, %v1205_v20, %v1276_v10  ;;  %v1286_v60 = vsel %vm1215_vm2, %v1183_v7, %v1254_v54 }
 0x159   : > { %v1791_v61 = vpack.c.bf16 %v1308_v59, %v1307_v55  ;;  %v1736_v62 = vpack.c.bf16 %v1286_v60, %v1285_v57 }
 0x15b   : > { %1807 = vst [vmem:[%s2236_s29 + $0x78] sm:$0xff] %v1791_v61   ;;  %1796 = vst [vmem:[%s2236_s29 + $0x20] sm:$0xff] %v1736_v62  }
 0x15c PF: > { %s17_s24 = sadd.s32 1, %s1983_s24  }
 0x15d   : > { %p14_p4 = scmp.ge.s32.totalorder %s17_s24, 4  }
 0x15f   :  { %16 = sbr.rel (!%p14_p4) target bundleno = 1 (0x1), region = 81 }

// kernel: unet_forward.43
= control target key start
LH: loop header
LB: loop body
LE: loop exit
PB: predicated region body
PF: predicated region fallthrough
CT: control target
= control target key end

     0   :  { %s1443_s24 = smov 0   ;;  %s1719_s0 = inlined_call_operand.vmem [shape: bf16[512,72], index: 0, kind: input, shape index: {}]   ;;  %s1720_s1 = inlined_call_operand.vmem [shape: bf16[72,128], index: 1, kind: input, shape index: {}]   ;;  %s1721_s2 = inlined_call_operand.vmem [shape: f32[1,128], index: 2, kind: input, shape index: {}]   ;;  %s1722_s3 = inlined_call_operand.vmem [shape: f32[1,128], index: 3, kind: input, shape index: {}]   ;;  %s1723_s4 = inlined_call_operand.vmem [shape: f32[1,128], index: 4, kind: input, shape index: {}]   ;;  %s1724_s5 = inlined_call_operand.vmem [shape: bf16[128,128], index: 5, kind: input, shape index: {}]   ;;  %s1725_s6 = inlined_call_operand.vmem [shape: f32[1,128], index: 6, kind: input, shape index: {}]   ;;  %s1726_s7 = inlined_call_operand.vmem [shape: f32[512,128], index: 7, kind: output, shape index: {}]  }
   0x1 LB: > { %s1162_s25 = sadd.s32 4294967295, %s1401_s24   ;;  %p1166_p0 = scmp.ge.s32.totalorder %s1401_s24, 1  ;;  %s1401_s24 = sphi %s1443_s24, %s17_s24  }
   0x2   : > { %p238_p1 = scmp.lt.s32.totalorder %s1401_s24, 3 }
   0x4   : > { %p239_p2 = pnand %p1166_p0, %p238_p1 }
   0x5   : > { %v1366_v0 = vld [vmem:[%s1720_s1] sm:$0xff] (!%p239_p2)   ;;  %v1367_v1 = vld [vmem:[%s1720_s1 + $0x8] sm:$0xff] (!%p239_p2)   ;;  %s1167_s30 = sshll.u32 (!%p239_p2), %s1162_s25, 5  ;;  %v1368_v2 = vld [vmem:[%s1720_s1 + $0x10] sm:$0xff] (!%p239_p2)   ;;  %vm431_vm0 = vcmask (!%p239_p2), 588800   ;;  %vm480_vm1 = vcmask (!%p239_p2), 1043456  }
   0x6   : > { %242 = sbr.rel (%p239_p2) target bundleno = 525 (0x20d), region = 48  ;;  %1267 = vmatprep.subr.bf16.mxu0 (!%p239_p2), %v1366_v0  ;;  %p271_p3 = scmp.lt.s32.totalorder (!%p239_p2), %s1167_s30, 63  ;;  %v1387_v3 = vld [vmem:[%s1724_s5] sm:$0xff] (!%p239_p2)   ;;  %v1369_v4 = vld [vmem:[%s1720_s1 + $0x18] sm:$0xff] (!%p239_p2)   ;;  %v1388_v5 = vld [vmem:[%s1724_s5 + $0x8] sm:$0xff] (!%p239_p2)  }
   0x7   : > { %1268 = vmatpush3.bf16.msra.mxu0 (!%p239_p2), %v1366_v0  ;;  %1309 = vmatprep.subr.bf16.mxu1 (!%p239_p2), %v1387_v3  ;;  %v1389_v6 = vld [vmem:[%s1724_s5 + $0x10] sm:$0xff] (!%p239_p2)   ;;  %v1370_v8 = vld [vmem:[%s1720_s1 + $0x20] ss:$0 sps:$4 sm:$0xff] (!%p239_p2)   ;;  %v1390_v13 = vld [vmem:[%s1724_s5 + $0x18] sm:$0xff] (!%p239_p2)  }
   0x8   : > { %1269 = vmatprep.subr.bf16.mxu0 (!%p239_p2), %v1367_v1  ;;  %1310 = vmatpush3.bf16.msra.mxu1 (!%p239_p2), %v1387_v3  ;;  %v482_v9 = vsel (!%p239_p2), %vm480_vm1, %v1370_v8, 0  ;;  %v1391_v14 = vld [vmem:[%s1724_s5 + $0x20] sm:$0xff] (!%p239_p2)   ;;  %v1392_v27 = vld [vmem:[%s1724_s5 + $0x28] sm:$0xff] (!%p239_p2)   ;;  %v1393_v28 = vld [vmem:[%s1724_s5 + $0x30] sm:$0xff] (!%p239_p2)  }
   0x9   : > { %1311 = vmatprep.subr.bf16.mxu1 (!%p239_p2), %v1388_v5  ;;  %v1394_v29 = vld [vmem:[%s1724_s5 + $0x38] sm:$0xff] (!%p239_p2)   ;;  %v1533_v30 = vld [vmem:[%s1721_s2] ss:$0 sm:$0xff] (!%p239_p2) }
   0xa   : > { %v1538_v32 = vld [vmem:[%s1722_s3] ss:$0 sm:$0xff] (!%p239_p2) }
   0xb   : > { %1270 = vmatpush3.bf16.msra.mxu0 (!%p239_p2), %v1367_v1  ;;  %v1544_v35 = vld [vmem:[%s1723_s4] ss:$0 sm:$0xff] (!%p239_p2) }
   0xc   : > { %1271 = vmatprep.subr.bf16.mxu0 (!%p239_p2), %v1368_v2  ;;  %1312 = vmatpush3.bf16.msra.mxu1 (!%p239_p2), %v1388_v5 }
   0xd   : > { %s1728_s30 = smov (!%p271_p3, %s1167_s30), 63  ;;  %1313 = vmatprep.subr.bf16.mxu1 %v1389_v6 }
   0xe   : > { %s1168_s14 = sshll.u32 %s1728_s30, 2  ;;  %s1170_s19 = sshll.u32 %s1728_s30, 3 }
   0xf   : > { %s1478_s21 = scalar_lea.vmem %s1719_s0, %s1168_s14  ;;  %1272 = vmatpush3.bf16.msra.mxu0 %v1368_v2  ;;  %s1650_s25 = scalar_lea.vmem %s1726_s7, %s1170_s19 }
  0x10   : > { %v1371_v7 = vld [vmem:[%s1478_s21] sm:$0xff]   ;;  %1273 = vmatprep.subr.bf16.mxu0 %v1369_v4  ;;  %1314 = vmatpush3.bf16.msra.mxu1 %v1389_v6  ;;  %v1372_v10 = vld [vmem:[%s1478_s21 + $0x8] sm:$0xff]   ;;  %v1373_v11 = vld [vmem:[%s1478_s21 + $0x10] sm:$0xff]  }
  0x11   : > { %1277 = vmatprep.mubr.msk.bf16.mxu0 %vm431_vm0, %v1371_v7  ;;  %v1374_v12 = vld [vmem:[%s1478_s21 + $0x18] sm:$0xff]   ;;  %1315 = vmatprep.subr.bf16.mxu1 %v1390_v13  ;;  %v1375_v15 = vld [vmem:[%s1478_s21 + $0x20] sm:$0xff]   ;;  %v1376_v16 = vld [vmem:[%s1478_s21 + $0x28] sm:$0xff]  }
  0x12   : > { %v1377_v17 = vld [vmem:[%s1478_s21 + $0x30] sm:$0xff]   ;;  %v1378_v18 = vld [vmem:[%s1478_s21 + $0x38] sm:$0xff]   ;;  %v1379_v19 = vld [vmem:[%s1478_s21 + $0x40] sm:$0xff]  }
  0x13   : > { %1274 = vmatpush3.bf16.msra.mxu0 %v1369_v4  ;;  %v1380_v20 = vld [vmem:[%s1478_s21 + $0x48] sm:$0xff]   ;;  %v1381_v21 = vld [vmem:[%s1478_s21 + $0x50] sm:$0xff]   ;;  %v1382_v22 = vld [vmem:[%s1478_s21 + $0x58] sm:$0xff]  }
  0x14   : > { %1357 = vmatprep.subr.msk.bf16.mxu0 %vm480_vm1, %v1370_v8  ;;  %1316 = vmatpush3.bf16.msra.mxu1 %v1390_v13  ;;  %v1383_v23 = vld [vmem:[%s1478_s21 + $0x60] sm:$0xff]   ;;  %v1384_v24 = vld [vmem:[%s1478_s21 + $0x68] sm:$0xff]   ;;  %v1385_v25 = vld [vmem:[%s1478_s21 + $0x70] sm:$0xff]  }
  0x15   : > { %1317 = vmatprep.subr.bf16.mxu1 %v1391_v14  ;;  %v1386_v26 = vld [vmem:[%s1478_s21 + $0x78] sm:$0xff]  }
  0x17   : > { %1276 = vmatpush3.bf16.msra.mxu0 %v482_v9 }
  0x18   : > { %1318 = vmatpush3.bf16.msra.mxu1 %v1391_v14 }
  0x19   : > { %1319 = vmatprep.subr.bf16.mxu1 %v1392_v27 }
  0x1a   : > { %1278 = vmatmul.mubr.msk.bf16.vlgmr.msra.gmra.mrb[0].mxu0 %vm431_vm0, %v1372_v10 }
  0x1b   : > { %1281 = vmatprep.mubr.msk.bf16.mxu0 %vm431_vm0, %v1373_v11 }
  0x1c   : > { %1320 = vmatpush3.bf16.msra.mxu1 %v1392_v27 }
  0x1d   : > { %1321 = vmatprep.subr.bf16.mxu1 %v1393_v28 }
  0x20   : > { %1322 = vmatpush3.bf16.msra.mxu1 %v1393_v28 }
  0x21   : > { %1323 = vmatprep.subr.bf16.mxu1 %v1394_v29 }
  0x22   : > { %1282 = vmatmul.mubr.msk.bf16.gmra.mrb[4].mxu0 %vm431_vm0, %v1374_v12 }
  0x23   : > { %1285 = vmatprep.mubr.msk.bf16.mxu0 %vm431_vm0, %v1375_v15 }
  0x24   : > { %1324 = vmatpush3.bf16.msra.mxu1 %v1394_v29 }
  0x2a   : > { %1286 = vmatmul.mubr.msk.bf16.gmra.mrb[8].mxu0 %vm431_vm0, %v1376_v16 }
  0x2b   : > { %1289 = vmatprep.mubr.msk.bf16.mxu0 %vm431_vm0, %v1377_v17 }
  0x32   : > { %1290 = vmatmul.mubr.msk.bf16.gmra.mrb[12].mxu0 %vm431_vm0, %v1378_v18 }
  0x33   : > { %1293 = vmatprep.mubr.msk.bf16.mxu0 %vm431_vm0, %v1379_v19 }
  0x3a   : > { %1294 = vmatmul.mubr.msk.bf16.gmra.mrb[16].mxu0 %vm431_vm0, %v1380_v20 }
  0x3b   : > { %1297 = vmatprep.mubr.msk.bf16.mxu0 %vm431_vm0, %v1381_v21 }
  0x42   : > { %1298 = vmatmul.mubr.msk.bf16.gmra.mrb[20].mxu0 %vm431_vm0, %v1382_v22 }
  0x43   : > { %1301 = vmatprep.mubr.msk.bf16.mxu0 %vm431_vm0, %v1383_v23 }
  0x4a   : > { %1302 = vmatmul.mubr.msk.bf16.gmra.mrb[24].mxu0 %vm431_vm0, %v1384_v24 }
  0x4b   : > { %1305 = vmatprep.mubr.msk.bf16.mxu0 %vm431_vm0, %v1385_v25 }
  0x52   : > { %1306 = vmatmul.mubr.msk.bf16.gmra.mrb[28].mxu0 %vm431_vm0, %v1386_v26 }
  0xed   : > { %v1279_v31 = vpop.f32.mrb[0].mxu0 }
  0xee   : > { %v654_v33 = vmul.f32 %v1279_v31, %v1533_v30  ;;  %v518_v34 = vpop.f32.mrb[1].mxu0 }
  0xef   : > { %v652_v36 = vmul.f32 %v1533_v30, %v518_v34  ;;  %v1280_v37 = vpop.f32.mrb[2].mxu0 }
  0xf0   : > { %v693_v38 = vadd.f32 %v1538_v32, %v654_v33  ;;  %v655_v39 = vmul.f32 %v1280_v37, %v1533_v30  ;;  %v521_v40 = vpop.f32.mrb[3].mxu0 }
  0xf1   : > { %v691_v41 = vadd.f32 %v1538_v32, %v652_v36  ;;  %v653_v42 = vmul.f32 %v1533_v30, %v521_v40 }
  0xf2   : > { %v764_v43 = vmul.f32 %v1544_v35, %v693_v38  ;;  %v694_v44 = vadd.f32 %v1538_v32, %v655_v39  ;;  %vm725_vm2 = vcmp.gt.f32.partialorder %v693_v38, 0.0 }
  0xf3   : > { %v692_v45 = vadd.f32 %v1538_v32, %v653_v42  ;;  %v762_v46 = vmul.f32 %v1544_v35, %v691_v41  ;;  %vm723_vm4 = vcmp.gt.f32.partialorder %v691_v41, 0.0 }
  0xf4   : > { %vm726_vm3 = vcmp.gt.f32.partialorder %v694_v44, 0.0  ;;  %v765_v47 = vmul.f32 %v1544_v35, %v694_v44  ;;  %v796_v52 = vsel %vm725_vm2, %v693_v38, %v764_v43 }
  0xf5   : > { %v1283_v48 = vpop.f32.mrb[4].mxu0  ;;  %vm724_vm5 = vcmp.gt.f32.partialorder %v692_v45, 0.0  ;;  %v763_v49 = vmul.f32 %v1544_v35, %v692_v45  ;;  %v794_v56 = vsel %vm723_vm4, %v691_v41, %v762_v46 }
  0xf6   : > { %v658_v50 = vmul.f32 %v1283_v48, %v1533_v30  ;;  %v534_v51 = vpop.f32.mrb[5].mxu0  ;;  %v797_v53 = vsel %vm726_vm3, %v694_v44, %v765_v47 }
  0xf7   : > { %v656_v54 = vmul.f32 %v1533_v30, %v534_v51  ;;  %v1284_v55 = vpop.f32.mrb[6].mxu0  ;;  %v795_v57 = vsel %vm724_vm5, %v692_v45, %v763_v49  ;;  %v827_v58 = vpack.c.bf16 %v797_v53, %v796_v52 }
  0xf8   : > { %v697_v59 = vadd.f32 %v1538_v32, %v658_v50  ;;  %v659_v60 = vmul.f32 %v1284_v55, %v1533_v30  ;;  %v537_v61 = vpop.f32.mrb[7].mxu0  ;;  %v826_v62 = vpack.c.bf16 %v795_v57, %v794_v56 }
  0xf9   : > { %v695_v63 = vadd.f32 %v1538_v32, %v656_v54  ;;  %v657_v0 = vmul.f32 %v1533_v30, %v537_v61 }
  0xfa   : > { %v768_v1 = vmul.f32 %v1544_v35, %v697_v59  ;;  %v698_v2 = vadd.f32 %v1538_v32, %v659_v60  ;;  %1325 = vmatprep.mubr.bf16.mxu1 %v826_v62  ;;  %vm729_vm6 = vcmp.gt.f32.partialorder %v697_v59, 0.0 }
  0xfb   : > { %v766_v3 = vmul.f32 %v1544_v35, %v695_v63  ;;  %v696_v4 = vadd.f32 %v1538_v32, %v657_v0  ;;  %1326 = vmatmul.mubr.bf16.vlgmr.msra.gmra.mrb[0].mxu1 %v827_v58  ;;  %vm727_vm7 = vcmp.gt.f32.partialorder %v695_v63, 0.0 }
  0xfc   : > { %vm730_vm8 = vcmp.gt.f32.partialorder %v698_v2, 0.0  ;;  %v769_v5 = vmul.f32 %v1544_v35, %v698_v2  ;;  %v800_v10 = vsel %vm729_vm6, %v697_v59, %v768_v1 }
  0xfd   : > { %vm728_vm9 = vcmp.gt.f32.partialorder %v696_v4, 0.0  ;;  %v767_v6 = vmul.f32 %v1544_v35, %v696_v4  ;;  %v1287_v7 = vpop.f32.mrb[8].mxu0  ;;  %v798_v14 = vsel %vm727_vm7, %v695_v63, %v766_v3 }
  0xfe   : > { %v662_v8 = vmul.f32 %v1287_v7, %v1533_v30  ;;  %v550_v9 = vpop.f32.mrb[9].mxu0  ;;  %v801_v11 = vsel %vm730_vm8, %v698_v2, %v769_v5 }
  0xff   : > { %v660_v12 = vmul.f32 %v1533_v30, %v550_v9  ;;  %v1288_v13 = vpop.f32.mrb[10].mxu0  ;;  %v799_v15 = vsel %vm728_vm9, %v696_v4, %v767_v6  ;;  %v829_v16 = vpack.c.bf16 %v801_v11, %v800_v10 }
 0x100   : > { %v701_v17 = vadd.f32 %v1538_v32, %v662_v8  ;;  %v663_v18 = vmul.f32 %v1288_v13, %v1533_v30  ;;  %v553_v19 = vpop.f32.mrb[11].mxu0  ;;  %v828_v20 = vpack.c.bf16 %v799_v15, %v798_v14 }
 0x101   : > { %v699_v21 = vadd.f32 %v1538_v32, %v660_v12  ;;  %v661_v22 = vmul.f32 %v1533_v30, %v553_v19 }
 0x102   : > { %v772_v23 = vmul.f32 %v1544_v35, %v701_v17  ;;  %v702_v24 = vadd.f32 %v1538_v32, %v663_v18  ;;  %1329 = vmatprep.mubr.bf16.mxu1 %v828_v20  ;;  %vm733_vm10 = vcmp.gt.f32.partialorder %v701_v17, 0.0 }
 0x103   : > { %v770_v25 = vmul.f32 %v1544_v35, %v699_v21  ;;  %v700_v26 = vadd.f32 %v1538_v32, %v661_v22  ;;  %1330 = vmatmul.mubr.bf16.gmra.mrb[4].mxu1 %v829_v16  ;;  %vm731_vm11 = vcmp.gt.f32.partialorder %v699_v21, 0.0 }
 0x104   : > { %vm734_vm12 = vcmp.gt.f32.partialorder %v702_v24, 0.0  ;;  %v773_v27 = vmul.f32 %v1544_v35, %v702_v24  ;;  %v804_v34 = vsel %vm733_vm10, %v701_v17, %v772_v23 }
 0x105   : > { %vm732_vm13 = vcmp.gt.f32.partialorder %v700_v26, 0.0  ;;  %v771_v28 = vmul.f32 %v1544_v35, %v700_v26  ;;  %v1291_v29 = vpop.f32.mrb[12].mxu0  ;;  %v802_v39 = vsel %vm731_vm11, %v699_v21, %v770_v25 }
 0x106   : > { %v666_v31 = vmul.f32 %v1291_v29, %v1533_v30  ;;  %v566_v33 = vpop.f32.mrb[13].mxu0  ;;  %v805_v36 = vsel %vm734_vm12, %v702_v24, %v773_v27 }
 0x107   : > { %v664_v37 = vmul.f32 %v1533_v30, %v566_v33  ;;  %v1292_v38 = vpop.f32.mrb[14].mxu0  ;;  %v803_v40 = vsel %vm732_vm13, %v700_v26, %v771_v28  ;;  %v831_v41 = vpack.c.bf16 %v805_v36, %v804_v34 }
 0x108   : > { %v705_v42 = vadd.f32 %v1538_v32, %v666_v31  ;;  %v667_v43 = vmul.f32 %v1292_v38, %v1533_v30  ;;  %v569_v44 = vpop.f32.mrb[15].mxu0  ;;  %v830_v45 = vpack.c.bf16 %v803_v40, %v802_v39 }
 0x109   : > { %v703_v46 = vadd.f32 %v1538_v32, %v664_v37  ;;  %v665_v47 = vmul.f32 %v1533_v30, %v569_v44 }
 0x10a   : > { %v776_v48 = vmul.f32 %v1544_v35, %v705_v42  ;;  %v706_v49 = vadd.f32 %v1538_v32, %v667_v43  ;;  %1333 = vmatprep.mubr.bf16.mxu1 %v830_v45  ;;  %vm737_vm14 = vcmp.gt.f32.partialorder %v705_v42, 0.0 }
 0x10b   : > { %v774_v50 = vmul.f32 %v1544_v35, %v703_v46  ;;  %v704_v51 = vadd.f32 %v1538_v32, %v665_v47  ;;  %1334 = vmatmul.mubr.bf16.gmra.mrb[8].mxu1 %v831_v41  ;;  %vm735_vm15 = vcmp.gt.f32.partialorder %v703_v46, 0.0 }
 0x10c   : > { %vm738_vm0 = vcmp.gt.f32.partialorder %v706_v49, 0.0  ;;  %v777_v52 = vmul.f32 %v1544_v35, %v706_v49  ;;  %v808_v57 = vsel %vm737_vm14, %v705_v42, %v776_v48 }
 0x10d   : > { %vm736_vm1 = vcmp.gt.f32.partialorder %v704_v51, 0.0  ;;  %v775_v53 = vmul.f32 %v1544_v35, %v704_v51  ;;  %v1295_v54 = vpop.f32.mrb[16].mxu0  ;;  %v806_v61 = vsel %vm735_vm15, %v703_v46, %v774_v50 }
 0x10e   : > { %v670_v55 = vmul.f32 %v1295_v54, %v1533_v30  ;;  %v582_v56 = vpop.f32.mrb[17].mxu0  ;;  %v809_v58 = vsel %vm738_vm0, %v706_v49, %v777_v52 }
 0x10f   : > { %v668_v59 = vmul.f32 %v1533_v30, %v582_v56  ;;  %v1296_v60 = vpop.f32.mrb[18].mxu0  ;;  %v807_v62 = vsel %vm736_vm1, %v704_v51, %v775_v53  ;;  %v833_v63 = vpack.c.bf16 %v809_v58, %v808_v57 }
 0x110   : > { %v709_v0 = vadd.f32 %v1538_v32, %v670_v55  ;;  %v671_v1 = vmul.f32 %v1296_v60, %v1533_v30  ;;  %v585_v2 = vpop.f32.mrb[19].mxu0  ;;  %v832_v3 = vpack.c.bf16 %v807_v62, %v806_v61 }
 0x111   : > { %v707_v4 = vadd.f32 %v1538_v32, %v668_v59  ;;  %v669_v5 = vmul.f32 %v1533_v30, %v585_v2 }
 0x112   : > { %v780_v6 = vmul.f32 %v1544_v35, %v709_v0  ;;  %v710_v7 = vadd.f32 %v1538_v32, %v671_v1  ;;  %1337 = vmatprep.mubr.bf16.mxu1 %v832_v3  ;;  %vm741_vm2 = vcmp.gt.f32.partialorder %v709_v0, 0.0 }
 0x113   : > { %v778_v8 = vmul.f32 %v1544_v35, %v707_v4  ;;  %v708_v9 = vadd.f32 %v1538_v32, %v669_v5  ;;  %1338 = vmatmul.mubr.bf16.gmra.mrb[12].mxu1 %v833_v63  ;;  %vm739_vm3 = vcmp.gt.f32.partialorder %v707_v4, 0.0 }
 0x114   : > { %vm742_vm4 = vcmp.gt.f32.partialorder %v710_v7, 0.0  ;;  %v781_v10 = vmul.f32 %v1544_v35, %v710_v7  ;;  %v812_v15 = vsel %vm741_vm2, %v709_v0, %v780_v6 }
 0x115   : > { %vm740_vm5 = vcmp.gt.f32.partialorder %v708_v9, 0.0  ;;  %v779_v11 = vmul.f32 %v1544_v35, %v708_v9  ;;  %v1299_v12 = vpop.f32.mrb[20].mxu0  ;;  %v810_v19 = vsel %vm739_vm3, %v707_v4, %v778_v8 }
 0x116   : > { %v674_v13 = vmul.f32 %v1299_v12, %v1533_v30  ;;  %v598_v14 = vpop.f32.mrb[21].mxu0  ;;  %v813_v16 = vsel %vm742_vm4, %v710_v7, %v781_v10 }
 0x117   : > { %v672_v17 = vmul.f32 %v1533_v30, %v598_v14  ;;  %v1300_v18 = vpop.f32.mrb[22].mxu0  ;;  %v811_v20 = vsel %vm740_vm5, %v708_v9, %v779_v11  ;;  %v835_v21 = vpack.c.bf16 %v813_v16, %v812_v15 }
 0x118   : > { %v713_v22 = vadd.f32 %v1538_v32, %v674_v13  ;;  %v675_v23 = vmul.f32 %v1300_v18, %v1533_v30  ;;  %v601_v24 = vpop.f32.mrb[23].mxu0  ;;  %v834_v25 = vpack.c.bf16 %v811_v20, %v810_v19 }
 0x119   : > { %v711_v26 = vadd.f32 %v1538_v32, %v672_v17  ;;  %v673_v27 = vmul.f32 %v1533_v30, %v601_v24 }
 0x11a   : > { %v784_v28 = vmul.f32 %v1544_v35, %v713_v22  ;;  %v714_v29 = vadd.f32 %v1538_v32, %v675_v23  ;;  %1341 = vmatprep.mubr.bf16.mxu1 %v834_v25  ;;  %vm745_vm6 = vcmp.gt.f32.partialorder %v713_v22, 0.0 }
 0x11b   : > { %v782_v31 = vmul.f32 %v1544_v35, %v711_v26  ;;  %v712_v33 = vadd.f32 %v1538_v32, %v673_v27  ;;  %1342 = vmatmul.mubr.bf16.gmra.mrb[16].mxu1 %v835_v21  ;;  %vm743_vm7 = vcmp.gt.f32.partialorder %v711_v26, 0.0 }
 0x11c   : > { %vm746_vm8 = vcmp.gt.f32.partialorder %v714_v29, 0.0  ;;  %v785_v34 = vmul.f32 %v1544_v35, %v714_v29  ;;  %v816_v40 = vsel %vm745_vm6, %v713_v22, %v784_v28 }
 0x11d   : > { %vm744_vm9 = vcmp.gt.f32.partialorder %v712_v33, 0.0  ;;  %v783_v36 = vmul.f32 %v1544_v35, %v712_v33  ;;  %v1303_v37 = vpop.f32.mrb[24].mxu0  ;;  %v814_v44 = vsel %vm743_vm7, %v711_v26, %v782_v31 }
 0x11e   : > { %v678_v38 = vmul.f32 %v1303_v37, %v1533_v30  ;;  %v614_v39 = vpop.f32.mrb[25].mxu0  ;;  %v817_v41 = vsel %vm746_vm8, %v714_v29, %v785_v34 }
 0x11f   : > { %v676_v42 = vmul.f32 %v1533_v30, %v614_v39  ;;  %v1304_v43 = vpop.f32.mrb[26].mxu0  ;;  %v815_v45 = vsel %vm744_vm9, %v712_v33, %v783_v36  ;;  %v837_v46 = vpack.c.bf16 %v817_v41, %v816_v40 }
 0x120   : > { %v717_v47 = vadd.f32 %v1538_v32, %v678_v38  ;;  %v679_v48 = vmul.f32 %v1304_v43, %v1533_v30  ;;  %v617_v49 = vpop.f32.mrb[27].mxu0  ;;  %v836_v50 = vpack.c.bf16 %v815_v45, %v814_v44 }
 0x121   : > { %v715_v51 = vadd.f32 %v1538_v32, %v676_v42  ;;  %v677_v52 = vmul.f32 %v1533_v30, %v617_v49 }
 0x122   : > { %v788_v53 = vmul.f32 %v1544_v35, %v717_v47  ;;  %v718_v54 = vadd.f32 %v1538_v32, %v679_v48  ;;  %1345 = vmatprep.mubr.bf16.mxu1 %v836_v50  ;;  %vm749_vm10 = vcmp.gt.f32.partialorder %v717_v47, 0.0 }
 0x123   : > { %v786_v55 = vmul.f32 %v1544_v35, %v715_v51  ;;  %v716_v56 = vadd.f32 %v1538_v32, %v677_v52  ;;  %1346 = vmatmul.mubr.bf16.gmra.mrb[20].mxu1 %v837_v46  ;;  %vm747_vm11 = vcmp.gt.f32.partialorder %v715_v51, 0.0 }
 0x124   : > { %vm750_vm12 = vcmp.gt.f32.partialorder %v718_v54, 0.0  ;;  %v789_v57 = vmul.f32 %v1544_v35, %v718_v54  ;;  %v820_v62 = vsel %vm749_vm10, %v717_v47, %v788_v53 }
 0x125   : > { %vm748_vm13 = vcmp.gt.f32.partialorder %v716_v56, 0.0  ;;  %v787_v58 = vmul.f32 %v1544_v35, %v716_v56  ;;  %v1307_v59 = vpop.f32.mrb[28].mxu0  ;;  %v818_v2 = vsel %vm747_vm11, %v715_v51, %v786_v55 }
 0x126   : > { %v682_v60 = vmul.f32 %v1307_v59, %v1533_v30  ;;  %v630_v61 = vpop.f32.mrb[29].mxu0  ;;  %v821_v63 = vsel %vm750_vm12, %v718_v54, %v789_v57 }
 0x127   : > { %v680_v0 = vmul.f32 %v1533_v30, %v630_v61  ;;  %v1308_v1 = vpop.f32.mrb[30].mxu0  ;;  %v819_v3 = vsel %vm748_vm13, %v716_v56, %v787_v58  ;;  %v839_v4 = vpack.c.bf16 %v821_v63, %v820_v62 }
 0x128   : > { %v721_v5 = vadd.f32 %v1538_v32, %v682_v60  ;;  %v683_v6 = vmul.f32 %v1308_v1, %v1533_v30  ;;  %v633_v7 = vpop.f32.mrb[31].mxu0  ;;  %v838_v8 = vpack.c.bf16 %v819_v3, %v818_v2 }
 0x129   : > { %v719_v9 = vadd.f32 %v1538_v32, %v680_v0  ;;  %v681_v10 = vmul.f32 %v1533_v30, %v633_v7 }
 0x12a   : > { %v792_v11 = vmul.f32 %v1544_v35, %v721_v5  ;;  %v722_v12 = vadd.f32 %v1538_v32, %v683_v6  ;;  %1349 = vmatprep.mubr.bf16.mxu1 %v838_v8  ;;  %vm753_vm14 = vcmp.gt.f32.partialorder %v721_v5, 0.0 }
 0x12b   : > { %v790_v13 = vmul.f32 %v1544_v35, %v719_v9  ;;  %v720_v14 = vadd.f32 %v1538_v32, %v681_v10  ;;  %1350 = vmatmul.mubr.bf16.gmra.mrb[24].mxu1 %v839_v4  ;;  %vm751_vm15 = vcmp.gt.f32.partialorder %v719_v9, 0.0  ;;  %v1645_v32 = vld [vmem:[%s1725_s6] ss:$0 sm:$0xff] }
 0x12c   : > { %vm754_vm0 = vcmp.gt.f32.partialorder %v722_v12, 0.0  ;;  %v793_v15 = vmul.f32 %v1544_v35, %v722_v12  ;;  %v824_v30 = vsel %vm753_vm14, %v721_v5, %v792_v11 }
 0x12d   : > { %vm752_vm1 = vcmp.gt.f32.partialorder %v720_v14, 0.0  ;;  %v791_v16 = vmul.f32 %v1544_v35, %v720_v14  ;;  %v822_v18 = vsel %vm751_vm15, %v719_v9, %v790_v13 }
 0x12e   : > { %v825_v17 = vsel %vm754_vm0, %v722_v12, %v793_v15 }
 0x12f   : > { %v823_v19 = vsel %vm752_vm1, %v720_v14, %v791_v16  ;;  %v841_v20 = vpack.c.bf16 %v825_v17, %v824_v30 }
 0x130   : > { %v840_v21 = vpack.c.bf16 %v823_v19, %v822_v18 }
 0x132   : > { %1353 = vmatprep.mubr.bf16.mxu1 %v840_v21 }
 0x133   : > { %1354 = vmatmul.mubr.bf16.gmra.mrb[28].mxu1 %v841_v20 }
 0x1ce   : > { %v1327_v35 = vpop.f32.mrb[0].mxu1 }
 0x1cf   : > { %v956_v22 = vadd.f32 %v1327_v35, %v1645_v32  ;;  %v947_v23 = vpop.f32.mrb[1].mxu1 }
 0x1d0   : > { %v948_v24 = vadd.f32 %v1645_v32, %v947_v23  ;;  %v1328_v25 = vpop.f32.mrb[2].mxu1 }
 0x1d1   : > { %1076 = vst [vmem:[%s1650_s25 + $0x10] sm:$0xff] %v956_v22  ;;  %v959_v26 = vadd.f32 %v1328_v25, %v1645_v32  ;;  %v950_v27 = vpop.f32.mrb[3].mxu1 }
 0x1d2   : > { %1074 = vst [vmem:[%s1650_s25] sm:$0xff] %v948_v24  ;;  %v951_v28 = vadd.f32 %v1645_v32, %v950_v27 }
 0x1d3   : > { %1077 = vst [vmem:[%s1650_s25 + $0x18] sm:$0xff] %v959_v26 }
 0x1d4   : > { %1075 = vst [vmem:[%s1650_s25 + $0x8] sm:$0xff] %v951_v28 }
 0x1d6   : > { %v1331_v29 = vpop.f32.mrb[4].mxu1 }
 0x1d7   : > { %v972_v31 = vadd.f32 %v1331_v29, %v1645_v32  ;;  %v963_v33 = vpop.f32.mrb[5].mxu1 }
 0x1d8   : > { %v964_v34 = vadd.f32 %v1645_v32, %v963_v33  ;;  %v1332_v36 = vpop.f32.mrb[6].mxu1 }
 0x1d9   : > { %1080 = vst [vmem:[%s1650_s25 + $0x30] sm:$0xff] %v972_v31  ;;  %v975_v37 = vadd.f32 %v1332_v36, %v1645_v32  ;;  %v966_v38 = vpop.f32.mrb[7].mxu1 }
 0x1da   : > { %1078 = vst [vmem:[%s1650_s25 + $0x20] sm:$0xff] %v964_v34  ;;  %v967_v39 = vadd.f32 %v1645_v32, %v966_v38 }
 0x1db   : > { %1081 = vst [vmem:[%s1650_s25 + $0x38] sm:$0xff] %v975_v37 }
 0x1dc   : > { %1079 = vst [vmem:[%s1650_s25 + $0x28] sm:$0xff] %v967_v39 }
 0x1de   : > { %v1335_v40 = vpop.f32.mrb[8].mxu1 }
 0x1df   : > { %v988_v41 = vadd.f32 %v1335_v40, %v1645_v32  ;;  %v979_v42 = vpop.f32.mrb[9].mxu1 }
 0x1e0   : > { %v980_v43 = vadd.f32 %v1645_v32, %v979_v42  ;;  %v1336_v44 = vpop.f32.mrb[10].mxu1 }
 0x1e1   : > { %1084 = vst [vmem:[%s1650_s25 + $0x50] sm:$0xff] %v988_v41  ;;  %v991_v45 = vadd.f32 %v1336_v44, %v1645_v32  ;;  %v982_v46 = vpop.f32.mrb[11].mxu1 }
 0x1e2   : > { %1082 = vst [vmem:[%s1650_s25 + $0x40] sm:$0xff] %v980_v43  ;;  %v983_v47 = vadd.f32 %v1645_v32, %v982_v46 }
 0x1e3   : > { %1085 = vst [vmem:[%s1650_s25 + $0x58] sm:$0xff] %v991_v45 }
 0x1e4   : > { %1083 = vst [vmem:[%s1650_s25 + $0x48] sm:$0xff] %v983_v47 }
 0x1e6   : > { %v1339_v48 = vpop.f32.mrb[12].mxu1 }
 0x1e7   : > { %v1004_v49 = vadd.f32 %v1339_v48, %v1645_v32  ;;  %v995_v50 = vpop.f32.mrb[13].mxu1 }
 0x1e8   : > { %v996_v51 = vadd.f32 %v1645_v32, %v995_v50  ;;  %v1340_v52 = vpop.f32.mrb[14].mxu1 }
 0x1e9   : > { %1088 = vst [vmem:[%s1650_s25 + $0x70] sm:$0xff] %v1004_v49  ;;  %v1007_v53 = vadd.f32 %v1340_v52, %v1645_v32  ;;  %v998_v54 = vpop.f32.mrb[15].mxu1 }
 0x1ea   : > { %1086 = vst [vmem:[%s1650_s25 + $0x60] sm:$0xff] %v996_v51  ;;  %v999_v55 = vadd.f32 %v1645_v32, %v998_v54 }
 0x1eb   : > { %1089 = vst [vmem:[%s1650_s25 + $0x78] sm:$0xff] %v1007_v53 }
 0x1ec   : > { %1087 = vst [vmem:[%s1650_s25 + $0x68] sm:$0xff] %v999_v55 }
 0x1ee   : > { %v1343_v56 = vpop.f32.mrb[16].mxu1 }
 0x1ef   : > { %v1020_v57 = vadd.f32 %v1343_v56, %v1645_v32  ;;  %v1011_v58 = vpop.f32.mrb[17].mxu1 }
 0x1f0   : > { %v1012_v59 = vadd.f32 %v1645_v32, %v1011_v58  ;;  %v1344_v60 = vpop.f32.mrb[18].mxu1 }
 0x1f1   : > { %1092 = vst [vmem:[%s1650_s25 + $0x90] sm:$0xff] %v1020_v57  ;;  %v1023_v61 = vadd.f32 %v1344_v60, %v1645_v32  ;;  %v1014_v62 = vpop.f32.mrb[19].mxu1 }
 0x1f2   : > { %1090 = vst [vmem:[%s1650_s25 + $0x80] sm:$0xff] %v1012_v59  ;;  %v1015_v63 = vadd.f32 %v1645_v32, %v1014_v62 }
 0x1f3   : > { %1093 = vst [vmem:[%s1650_s25 + $0x98] sm:$0xff] %v1023_v61 }
 0x1f4   : > { %1091 = vst [vmem:[%s1650_s25 + $0x88] sm:$0xff] %v1015_v63 }
 0x1f6   : > { %v1347_v0 = vpop.f32.mrb[20].mxu1 }
 0x1f7   : > { %v1036_v1 = vadd.f32 %v1347_v0, %v1645_v32  ;;  %v1027_v2 = vpop.f32.mrb[21].mxu1 }
 0x1f8   : > { %v1028_v3 = vadd.f32 %v1645_v32, %v1027_v2  ;;  %v1348_v4 = vpop.f32.mrb[22].mxu1 }
 0x1f9   : > { %1096 = vst [vmem:[%s1650_s25 + $0xb0] sm:$0xff] %v1036_v1  ;;  %v1039_v5 = vadd.f32 %v1348_v4, %v1645_v32  ;;  %v1030_v6 = vpop.f32.mrb[23].mxu1 }
 0x1fa   : > { %1094 = vst [vmem:[%s1650_s25 + $0xa0] sm:$0xff] %v1028_v3  ;;  %v1031_v7 = vadd.f32 %v1645_v32, %v1030_v6 }
 0x1fb   : > { %1097 = vst [vmem:[%s1650_s25 + $0xb8] sm:$0xff] %v1039_v5 }
 0x1fc   : > { %1095 = vst [vmem:[%s1650_s25 + $0xa8] sm:$0xff] %v1031_v7 }
 0x1fe   : > { %v1351_v8 = vpop.f32.mrb[24].mxu1 }
 0x1ff   : > { %v1052_v9 = vadd.f32 %v1351_v8, %v1645_v32  ;;  %v1043_v10 = vpop.f32.mrb[25].mxu1 }
 0x200   : > { %v1044_v11 = vadd.f32 %v1645_v32, %v1043_v10  ;;  %v1352_v12 = vpop.f32.mrb[26].mxu1 }
 0x201   : > { %1100 = vst [vmem:[%s1650_s25 + $0xd0] sm:$0xff] %v1052_v9  ;;  %v1055_v13 = vadd.f32 %v1352_v12, %v1645_v32  ;;  %v1046_v14 = vpop.f32.mrb[27].mxu1 }
 0x202   : > { %1098 = vst [vmem:[%s1650_s25 + $0xc0] sm:$0xff] %v1044_v11  ;;  %v1047_v15 = vadd.f32 %v1645_v32, %v1046_v14 }
 0x203   : > { %1101 = vst [vmem:[%s1650_s25 + $0xd8] sm:$0xff] %v1055_v13 }
 0x204   : > { %1099 = vst [vmem:[%s1650_s25 + $0xc8] sm:$0xff] %v1047_v15 }
 0x206   : > { %v1355_v16 = vpop.f32.mrb[28].mxu1 }
 0x207   : > { %v1068_v30 = vadd.f32 %v1355_v16, %v1645_v32  ;;  %v1059_v17 = vpop.f32.mrb[29].mxu1 }
 0x208   : > { %v1060_v18 = vadd.f32 %v1645_v32, %v1059_v17  ;;  %v1356_v19 = vpop.f32.mrb[30].mxu1 }
 0x209   : > { %1104 = vst [vmem:[%s1650_s25 + $0xf0] sm:$0xff] %v1068_v30  ;;  %v1071_v20 = vadd.f32 %v1356_v19, %v1645_v32  ;;  %v1062_v21 = vpop.f32.mrb[31].mxu1 }
 0x20a   : > { %1102 = vst [vmem:[%s1650_s25 + $0xe0] sm:$0xff] %v1060_v18  ;;  %v1063_v35 = vadd.f32 %v1645_v32, %v1062_v21 }
 0x20b   : > { %1105 = vst [vmem:[%s1650_s25 + $0xf8] sm:$0xff] %v1071_v20 }
 0x20c   : > { %1103 = vst [vmem:[%s1650_s25 + $0xe8] sm:$0xff] %v1063_v35 }
 0x20d PF: > { %s17_s24 = sadd.s32 1, %s1401_s24  }
 0x20e   : > { %p14_p4 = scmp.ge.s32.totalorder %s17_s24, 4  }
 0x210   :  { %16 = sbr.rel (!%p14_p4) target bundleno = 1 (0x1), region = 78 }

</bundles_post_ra>
